<compile_context>
chip_gen: v7x
topology: tpu7x:2x2x1
jax: 0.10.0
libtpu: 0.0.40
codegen_flags: <defaults>
</compile_context>

<pallas_src>
import functools

import numpy as np
import jax
import jax.numpy as jnp
from jax.experimental import pallas as pl
from jax.experimental.pallas import tpu as pltpu

NUM_CLASSES = 4
# resnet34 layer config: (num_blocks, out_channels, first_stride)
LAYER_CFG = [(3, 64, 1), (4, 128, 2), (6, 256, 2), (3, 512, 2)]

_VMEM_LIMIT = 32 * 1024 * 1024


# ----------------------------- Pallas kernels -----------------------------

def _gemm_k1_kernel(a_ref, b_ref, bias_ref, o_ref, *, relu):
    """Single-K-step GEMM: out = act(A @ B + bias); no accumulator scratch."""
    out = jnp.dot(a_ref[...], b_ref[...], preferred_element_type=jnp.float32)
    out = out + bias_ref[...].astype(jnp.float32)
    if relu:
        out = jnp.maximum(out, 0.0)
    o_ref[...] = out.astype(o_ref.dtype)


def _gemm_k1_res_kernel(a_ref, b_ref, bias_ref, r_ref, o_ref, *, relu):
    """Single-K-step GEMM with fused residual: out = act(A @ B + bias + residual)."""
    out = jnp.dot(a_ref[...], b_ref[...], preferred_element_type=jnp.float32)
    out = out + bias_ref[...].astype(jnp.float32) + r_ref[...].astype(jnp.float32)
    if relu:
        out = jnp.maximum(out, 0.0)
    o_ref[...] = out.astype(o_ref.dtype)


def _gemm_kernel(a_ref, b_ref, bias_ref, o_ref, acc_ref, *, relu):
    """Multi-K-step GEMM: f32 accumulation across the K grid axis."""
    @pl.when(pl.program_id(2) == 0)
    def _():
        acc_ref[...] = jnp.zeros_like(acc_ref)

    acc_ref[...] += jnp.dot(a_ref[...], b_ref[...],
                            preferred_element_type=jnp.float32)

    @pl.when(pl.program_id(2) == pl.num_programs(2) - 1)
    def _():
        out = acc_ref[...] + bias_ref[...].astype(jnp.float32)
        if relu:
            out = jnp.maximum(out, 0.0)
        o_ref[...] = out.astype(o_ref.dtype)


def _gemm_res_kernel(a_ref, b_ref, bias_ref, r_ref, o_ref, acc_ref, *, relu):
    """Multi-K-step GEMM with fused residual add in the epilogue."""
    @pl.when(pl.program_id(2) == 0)
    def _():
        acc_ref[...] = jnp.zeros_like(acc_ref)

    acc_ref[...] += jnp.dot(a_ref[...], b_ref[...],
                            preferred_element_type=jnp.float32)

    @pl.when(pl.program_id(2) == pl.num_programs(2) - 1)
    def _():
        out = (acc_ref[...] + bias_ref[...].astype(jnp.float32)
               + r_ref[...].astype(jnp.float32))
        if relu:
            out = jnp.maximum(out, 0.0)
        o_ref[...] = out.astype(o_ref.dtype)


def _max_reduce_kernel(x_ref, o_ref):
    # x_ref: (taps, tm, C) -> elementwise max over taps.
    acc = x_ref[0]
    for i in range(1, x_ref.shape[0]):
        acc = jnp.maximum(acc, x_ref[i])
    o_ref[...] = acc


def _upsample_kernel(x_ref, uy_ref, ux_ref, o_ref):
    """Separable bilinear ConvTranspose2d on one (H,W) plane: U_y @ X @ U_x."""
    x = x_ref[0].astype(jnp.float32)                                     # (H, W)
    tmp = jnp.dot(uy_ref[...], x, preferred_element_type=jnp.float32)    # (Ho, W)
    out = jnp.dot(tmp, ux_ref[...], preferred_element_type=jnp.float32)  # (Ho, Wo)
    o_ref[0] = out.astype(o_ref.dtype)


def _upsample_res_kernel(x_ref, uy_ref, ux_ref, r_ref, o_ref):
    """Separable bilinear upsample with the skip-add fused into the epilogue."""
    x = x_ref[0].astype(jnp.float32)
    tmp = jnp.dot(uy_ref[...], x, preferred_element_type=jnp.float32)
    out = jnp.dot(tmp, ux_ref[...], preferred_element_type=jnp.float32)
    o_ref[0] = (out + r_ref[0].astype(jnp.float32)).astype(o_ref.dtype)


# ----------------------------- tiled GEMM wrapper -----------------------------

def _pick_tiles(m, k, n):
    """Each of the last-two block dims is a multiple of the native tile or the full dim."""
    if m % 512 == 0:
        tm = 512
    elif m % 256 == 0:
        tm = 256
    elif m % 128 == 0:
        tm = 128
    else:
        tm = m                     # small M -> full-dim block (exempt from (8,128) rule)
    # tn capped at 256 so Cout=512 GEMMs keep >=2 parallel grid steps (v7x megacore).
    if n % 256 == 0:
        tn = 256
    elif n % 128 == 0:
        tn = 128
    else:
        tn = n                     # small channel counts -> full-dim block
    if k <= 2048:
        tk = k                     # single K step; weight block stays resident over M
    else:
        tk = next((c for c in (512, 384, 256, 128) if k % c == 0), k)
    return tm, tn, tk


def gemm(a, b, bias, *, relu=False, residual=None, out_dtype=jnp.float32,
         bias_along_m=False):
    """act((M,K) @ (K,N) + bias [+ residual]) as a tiled, pipelined Pallas GEMM.

    bf16 MXU operands, f32 epilogue.  No K/M padding: tk/tm/tn are chosen as divisors
    or full dims.  bias_along_m=True broadcasts the bias along N (used by the
    transposed, lane-dense FCN-head GEMMs where rows are classes).
    """
    m, k = a.shape
    kb, n = b.shape
    assert k == kb, (k, kb)
    a = a.astype(jnp.bfloat16)
    b = b.astype(jnp.bfloat16)

    tm, tn, tk = _pick_tiles(m, k, n)
    grid = (m // tm, n // tn, k // tk)
    k_steps = grid[2]

    if bias_along_m:
        bias2 = bias.astype(jnp.float32).reshape(m, 1)
        bias_spec = pl.BlockSpec((tm, 1), lambda i, j, kk: (i, 0))
    else:
        bias2 = bias.astype(jnp.float32).reshape(1, n)
        bias_spec = pl.BlockSpec((1, tn), lambda i, j, kk: (0, j))

    in_specs = [
        pl.BlockSpec((tm, tk), lambda i, j, kk: (i, kk)),
        pl.BlockSpec((tk, tn), lambda i, j, kk: (kk, j)),
        bias_spec,
    ]
    operands = [a, b, bias2]

    if residual is not None:
        assert residual.shape == (m, n), (residual.shape, (m, n))
        in_specs.append(pl.BlockSpec((tm, tn), lambda i, j, kk: (i, j)))
        operands.append(residual)
        kernel = functools.partial(
            _gemm_k1_res_kernel if k_steps == 1 else _gemm_res_kernel, relu=relu)
    else:
        kernel = functools.partial(
            _gemm_k1_kernel if k_steps == 1 else _gemm_kernel, relu=relu)

    scratch = [] if k_steps == 1 else [pltpu.VMEM((tm, tn), jnp.float32)]

    return pl.pallas_call(
        kernel,
        out_shape=jax.ShapeDtypeStruct((m, n), out_dtype),
        grid=grid,
        in_specs=in_specs,
        out_specs=pl.BlockSpec((tm, tn), lambda i, j, kk: (i, j)),
        scratch_shapes=scratch,
        compiler_params=pltpu.CompilerParams(
            dimension_semantics=("parallel", "parallel", "arbitrary"),
            vmem_limit_bytes=_VMEM_LIMIT),
    )(*operands)


# ----------------------------- conv / pool wrappers -----------------------------

def conv2d(x, w_mat, bias, *, ksize, stride, pad, relu=False, residual=None,
           out_dtype=jnp.bfloat16):
    """x: (N,H,W,Cin) bf16; w_mat: GEMM-ready (k*k*Cin, Cout) bf16 (BN folded)."""
    n, h, w, cin = x.shape
    cout = w_mat.shape[1]
    ho = (h + 2 * pad - ksize) // stride + 1
    wo = (w + 2 * pad - ksize) // stride + 1
    if ksize == 1:
        xs = x[:, ::stride, ::stride, :] if stride > 1 else x
        a = xs.reshape(n * ho * wo, cin)
    else:
        # TODO(synk): im2col materialized by XLA (k*k read amplification) -- see header.
        xp = jnp.pad(x, ((0, 0), (pad, pad), (pad, pad), (0, 0))) if pad > 0 else x
        cols = [xp[:, ky:ky + stride * ho:stride, kx:kx + stride * wo:stride, :]
                for ky in range(ksize) for kx in range(ksize)]
        patches = jnp.stack(cols, axis=3)               # (N, Ho, Wo, k*k, Cin) bf16
        a = patches.reshape(n * ho * wo, ksize * ksize * cin)
    r = residual.reshape(n * ho * wo, cout) if residual is not None else None
    out = gemm(a, w_mat, bias, relu=relu, residual=r, out_dtype=out_dtype)
    return out.reshape(n, ho, wo, cout)


def head_conv_t(x, w_t, bias):
    """FCN-head 1x1 conv as a lane-dense transposed GEMM.

    x: (N,H,W,Cin); w_t: (ncls, Cin) bf16.  Computes W^T @ X^T so the spatial dim
    (N*H*W) lands on lanes; result is channels-major (ncls, N, H, W) planes, ready
    for the per-plane separable upsample (no extra transpose)."""
    n, h, w, cin = x.shape
    xt = jnp.transpose(x.reshape(n * h * w, cin)).astype(jnp.bfloat16)   # (Cin, N*H*W)
    out_t = gemm(w_t, xt, bias, bias_along_m=True, out_dtype=jnp.float32)
    return out_t.reshape(-1, n, h, w)                                    # (ncls, N, H, W)


def maxpool_3x3_s2_p1(x):
    # TODO(synk): taps are materialized as 9 strided views; an in-kernel strided gather
    #             would make this 1x-read, but the op is tiny here.
    n, h, w, c = x.shape
    ho = (h + 2 - 3) // 2 + 1
    wo = (w + 2 - 3) // 2 + 1
    xp = jnp.pad(x, ((0, 0), (1, 1), (1, 1), (0, 0)), constant_values=-jnp.inf)
    views = [xp[:, ky:ky + 2 * ho:2, kx:kx + 2 * wo:2, :]
             for ky in range(3) for kx in range(3)]
    m = n * ho * wo
    stk = jnp.stack(views, axis=0).reshape(9, m, c)
    tm = 256 if m % 256 == 0 else (128 if m % 128 == 0 else m)
    out = pl.pallas_call(
        _max_reduce_kernel,
        out_shape=jax.ShapeDtypeStruct((m, c), x.dtype),
        grid=(m // tm,),
        in_specs=[pl.BlockSpec((9, tm, c), lambda i: (0, i, 0))],
        out_specs=pl.BlockSpec((tm, c), lambda i: (i, 0)),
        compiler_params=pltpu.CompilerParams(
            dimension_semantics=("parallel",),
            vmem_limit_bytes=_VMEM_LIMIT),
    )(stk)
    return out.reshape(n, ho, wo, c)


# -------------------- bilinear ConvTranspose2d (up2 / up8), separable --------------------

def _bilinear_filter_1d(k):
    factor = (k + 1) // 2
    center = factor - 1 if k % 2 == 1 else factor - 0.5
    og = np.arange(k, dtype=np.float64)
    return (1.0 - np.abs(og - center) / factor).astype(np.float32)


def _upsample_matrix(size_in, stride, k, pad):
    """1-D dense operator of ConvTranspose1d(bilinear kernel): (size_out, size_in)."""
    size_out = (size_in - 1) * stride - 2 * pad + k
    f = _bilinear_filter_1d(k)
    u = np.zeros((size_out, size_in), np.float32)
    for o in range(size_out):
        for i in range(size_in):
            t = o + pad - stride * i
            if 0 <= t < k:
                u[o, i] = f[t]
    return u


def bilinear_upsample(x_planes, stride, ksize, pad, *, residual=None):
    """Depthwise bilinear ConvTranspose2d on (B, H, W) planes (B = ncls * N).

    One Pallas kernel gridded over planes; the separable filter is applied as two tiny
    1-D dots (U_y @ X @ U_x).  An optional skip tensor is fused into the epilogue."""
    b, h, w = x_planes.shape
    uy = jnp.asarray(_upsample_matrix(h, stride, ksize, pad))      # (Ho, H)
    ux = jnp.asarray(_upsample_matrix(w, stride, ksize, pad).T)    # (W, Wo)
    ho, wo = uy.shape[0], ux.shape[1]

    in_specs = [pl.BlockSpec((1, h, w), lambda i: (i, 0, 0)),
                pl.BlockSpec((ho, h), lambda i: (0, 0)),
                pl.BlockSpec((w, wo), lambda i: (0, 0))]
    operands = [x_planes, uy, ux]
    if residual is not None:
        assert residual.shape == (b, ho, wo), (residual.shape, (b, ho, wo))
        in_specs.append(pl.BlockSpec((1, ho, wo), lambda i: (i, 0, 0)))
        operands.append(residual)
        kernel = _upsample_res_kernel
    else:
        kernel = _upsample_kernel

    return pl.pallas_call(
        kernel,
        out_shape=jax.ShapeDtypeStruct((b, ho, wo), jnp.float32),
        grid=(b,),
        in_specs=in_specs,
        out_specs=pl.BlockSpec((1, ho, wo), lambda i: (i, 0, 0)),
        compiler_params=pltpu.CompilerParams(
            dimension_semantics=("parallel",),
            vmem_limit_bytes=_VMEM_LIMIT),
    )(*operands)


# ----------------------------- parameters -----------------------------

def _make_conv_bn(key, k, cin, cout):
    """Conv(k,k,cin,cout) with BatchNorm (eval mode) folded in, GEMM layout, true-K, bf16."""
    k1, k2, k3, k4, k5 = jax.random.split(key, 5)
    w = jax.random.normal(k1, (k, k, cin, cout), jnp.float32) * np.sqrt(2.0 / (k * k * cin))
    gamma = 1.0 + 0.1 * jax.random.normal(k2, (cout,), jnp.float32)
    beta = 0.05 * jax.random.normal(k3, (cout,), jnp.float32)
    mean = 0.05 * jax.random.normal(k4, (cout,), jnp.float32)
    var = 1.0 + 0.1 * jax.random.uniform(k5, (cout,), jnp.float32)
    scale = gamma / jnp.sqrt(var + 1e-5)
    w_mat = (w * scale).reshape(k * k * cin, cout).astype(jnp.bfloat16)
    return w_mat, (beta - mean * scale).astype(jnp.float32)


def _make_pointwise_t(key, cin, cout):
    """1x1 head conv, stored transposed (cout, cin) bf16 for the lane-dense GEMM."""
    k1, k2 = jax.random.split(key)
    bound = 1.0 / np.sqrt(cin)
    w = jax.random.uniform(k1, (cin, cout), jnp.float32, -bound, bound)
    b = jax.random.uniform(k2, (cout,), jnp.float32, -bound, bound)
    return jnp.transpose(w).astype(jnp.bfloat16), b


def init_params(key, num_classes=NUM_CLASSES):
    p = {}
    key, ks = jax.random.split(key)
    p["stem"] = _make_conv_bn(ks, 7, 3, 64)
    cin = 64
    for li, (nblocks, cout, first_stride) in enumerate(LAYER_CFG):
        blocks = []
        for bi in range(nblocks):
            key, k1, k2, k3 = jax.random.split(key, 4)
            blk = {"conv1": _make_conv_bn(k1, 3, cin, cout),
                   "conv2": _make_conv_bn(k2, 3, cout, cout)}
            s = first_stride if bi == 0 else 1
            if s != 1 or cin != cout:
                blk["down"] = _make_conv_bn(k3, 1, cin, cout)
            blocks.append(blk)
            cin = cout
        p[f"layer{li + 1}"] = blocks
    key, k1, k2, k3 = jax.random.split(key, 4)
    p["conv1"] = _make_pointwise_t(k1, 512, num_classes)   # on stage3 output
    p["conv2"] = _make_pointwise_t(k2, 256, num_classes)   # on stage2 output
    p["conv3"] = _make_pointwise_t(k3, 128, num_classes)   # on stage1 output
    return p


# ----------------------------- forward pass -----------------------------

def _run_layer(x, blocks, first_stride):
    for bi, blk in enumerate(blocks):
        s = first_stride if bi == 0 else 1
        out = conv2d(x, *blk["conv1"], ksize=3, stride=s, pad=1, relu=True)
        idn = (conv2d(x, *blk["down"], ksize=1, stride=s, pad=0)
               if "down" in blk else x)
        # conv2 + folded BN + residual add + ReLU fused into one GEMM epilogue.
        x = conv2d(out, *blk["conv2"], ksize=3, stride=1, pad=1,
                   relu=True, residual=idn)
    return x


def fcn_forward(x_nchw, params):
    n = x_nchw.shape[0]
    x = jnp.transpose(x_nchw, (0, 2, 3, 1)).astype(jnp.bfloat16)   # NCHW -> NHWC
    # stage1 = resnet34 children[:-4]: conv1/bn1/relu, maxpool, layer1, layer2
    x = conv2d(x, *params["stem"], ksize=7, stride=2, pad=3, relu=True)
    x = maxpool_3x3_s2_p1(x)
    x = _run_layer(x, params["layer1"], LAYER_CFG[0][2])
    x = _run_layer(x, params["layer2"], LAYER_CFG[1][2])
    s1 = x                                                 # (N, H/8,  W/8,  128)
    x = _run_layer(x, params["layer3"], LAYER_CFG[2][2])   # stage2
    s2 = x                                                 # (N, H/16, W/16, 256)
    x = _run_layer(x, params["layer4"], LAYER_CFG[3][2])   # stage3
    s3 = x                                                 # (N, H/32, W/32, 512)

    # FCN head: lane-dense transposed 1x1 convs -> channels-major planes (ncls, N, H, W).
    s3h = head_conv_t(s3, *params["conv1"])
    s2h = head_conv_t(s2, *params["conv2"])
    s1h = head_conv_t(s1, *params["conv3"])
    ncls = s1h.shape[0]
    h1, w1 = s1h.shape[2], s1h.shape[3]

    # Mirrors the reference: s3 = up2(conv1(s3)); s2 = conv2(s2) + s3.
    # (This branch does not feed the returned value; XLA removes it under jit.
    #  The reference's second up2 branch, which was also dead, has been dropped.)
    _ = bilinear_upsample(s3h.reshape(-1, s3h.shape[2], s3h.shape[3]), 2, 4, 1,
                          residual=s2h.reshape(-1, s2h.shape[2], s2h.shape[3]))

    # s = up8(conv3(s1))  <- the value actually returned by the reference forward.
    out = bilinear_upsample(s1h.reshape(-1, h1, w1), 8, 16, 4)   # (ncls*N, 8h, 8w)
    out = out.reshape(ncls, n, h1 * 8, w1 * 8)
    return jnp.transpose(out, (1, 0, 2, 3))                      # (N, ncls, H, W)


if __name__ == "__main__":
    key = jax.random.PRNGKey(0)
    kx, kp = jax.random.split(key)
    x = jax.random.normal(kx, (2, 3, 64, 64), jnp.float32)        # NCHW, like PyTorch
    params = init_params(kp, NUM_CLASSES)

    fwd = jax.jit(fcn_forward)
    out = fwd(x, params)
    jax.block_until_ready(out)

    assert out.shape == (2, NUM_CLASSES, 64, 64), out.shape
    assert bool(jnp.all(jnp.isfinite(out)))
    print("KERNEL_OK")
</pallas_src>

<mosaic_0001>
module attributes {stable_mosaic.version = 11 : i64} {
  func.func @_gemm_k1_kernel(%arg0: i32, %arg1: i32, %arg2: i32, %arg3: memref<512x147xbf16, #tpu.memory_space<vmem>>, %arg4: memref<147x64xbf16, #tpu.memory_space<vmem>>, %arg5: memref<1x64xf32, #tpu.memory_space<vmem>>, %arg6: memref<512x64xbf16, #tpu.memory_space<vmem>>) attributes {dimension_semantics = [#tpu.dimension_semantics<parallel>, #tpu.dimension_semantics<parallel>, #tpu.dimension_semantics<arbitrary>], iteration_bounds = array<i64: 4, 1, 1>, scalar_prefetch = 0 : i64, scratch_operands = 0 : i64, tpu.core_type = #tpu.core_type<tc>, window_params = [{transform_indices = @transform_0, window_bounds = array<i64: 512, 147>}, {transform_indices = @transform_1, window_bounds = array<i64: 147, 64>}, {transform_indices = @transform_2, window_bounds = array<i64: 1, 64>}, {transform_indices = @transform_3, window_bounds = array<i64: 512, 64>}]} {
    %c0 = arith.constant 0 : index
    %c0_0 = arith.constant 0 : index
    %0 = vector.load %arg3[%c0, %c0_0] : memref<512x147xbf16, #tpu.memory_space<vmem>>, vector<512x147xbf16>
    %c0_1 = arith.constant 0 : index
    %c0_2 = arith.constant 0 : index
    %1 = vector.load %arg4[%c0_1, %c0_2] : memref<147x64xbf16, #tpu.memory_space<vmem>>, vector<147x64xbf16>
    %cst = arith.constant dense<0.000000e+00> : vector<512x64xf32>
    %2 = tpu.matmul %0, %1, %cst {dimension_numbers = #tpu.dot_dimension_numbers<[1], [0], [0], [1], [0, 0, 1, 1], [], []>} : vector<512x147xbf16>, vector<147x64xbf16>, vector<512x64xf32> -> vector<512x64xf32>
    %c0_3 = arith.constant 0 : index
    %c0_4 = arith.constant 0 : index
    %3 = vector.load %arg5[%c0_3, %c0_4] : memref<1x64xf32, #tpu.memory_space<vmem>>, vector<1x64xf32>
    %4 = vector.broadcast %3 : vector<1x64xf32> to vector<512x64xf32>
    %5 = arith.addf %2, %4 : vector<512x64xf32>
    %cst_5 = arith.constant 0.000000e+00 : f32
    %6 = vector.broadcast %cst_5 : f32 to vector<512x64xf32>
    %7 = arith.maximumf %5, %6 : vector<512x64xf32>
    %8 = arith.truncf %7 : vector<512x64xf32> to vector<512x64xbf16>
    %c0_6 = arith.constant 0 : index
    %c0_7 = arith.constant 0 : index
    %9 = vector.load %arg6[%c0_6, %c0_7] : memref<512x64xbf16, #tpu.memory_space<vmem>>, vector<512x64xbf16>
    tpu.vector_store %arg6[%c0_6, %c0_7], %8 {strides = array<i32>} : memref<512x64xbf16, #tpu.memory_space<vmem>>, vector<512x64xbf16>,
    return
  }
  func.func @transform_0(%arg0: i32, %arg1: i32, %arg2: i32) -> (i32, i32) {
    %c0_i32 = arith.constant 0 : i32
    return %arg0, %arg2 : i32, i32
  }
  func.func @transform_1(%arg0: i32, %arg1: i32, %arg2: i32) -> (i32, i32) {
    %c0_i32 = arith.constant 0 : i32
    return %arg2, %arg1 : i32, i32
  }
  func.func @transform_2(%arg0: i32, %arg1: i32, %arg2: i32) -> (i32, i32) {
    %c0_i32 = arith.constant 0 : i32
    %c0_i32_0 = arith.constant 0 : i32
    return %c0_i32, %arg1 : i32, i32
  }
  func.func @transform_3(%arg0: i32, %arg1: i32, %arg2: i32) -> (i32, i32) {
    %c0_i32 = arith.constant 0 : i32
    return %arg0, %arg1 : i32, i32
  }
}

module attributes {stable_mosaic.version = 11 : i64} {
  func.func @_max_reduce_kernel(%arg0: i32, %arg1: memref<9x256x64xbf16, #tpu.memory_space<vmem>>, %arg2: memref<256x64xbf16, #tpu.memory_space<vmem>>) attributes {dimension_semantics = [#tpu.dimension_semantics<parallel>], iteration_bounds = array<i64: 2>, scalar_prefetch = 0 : i64, scratch_operands = 0 : i64, tpu.core_type = #tpu.core_type<tc>, window_params = [{transform_indices = @transform_0, window_bounds = array<i64: 9, 256, 64>}, {transform_indices = @transform_1, window_bounds = array<i64: 256, 64>}]} {
    %c0 = arith.constant 0 : index
    %c0_0 = arith.constant 0 : index
    %c0_1 = arith.constant 0 : index
    %0 = vector.load %arg1[%c0, %c0_0, %c0_1] : memref<9x256x64xbf16, #tpu.memory_space<vmem>>, vector<1x256x64xbf16>
    %1 = vector.shape_cast %0 : vector<1x256x64xbf16> to vector<256x64xbf16>
    %c1 = arith.constant 1 : index
    %c0_2 = arith.constant 0 : index
    %c0_3 = arith.constant 0 : index
    %2 = vector.load %arg1[%c1, %c0_2, %c0_3] : memref<9x256x64xbf16, #tpu.memory_space<vmem>>, vector<1x256x64xbf16>
    %3 = vector.shape_cast %2 : vector<1x256x64xbf16> to vector<256x64xbf16>
    %4 = arith.maximumf %1, %3 : vector<256x64xbf16>
    %c2 = arith.constant 2 : index
    %c0_4 = arith.constant 0 : index
    %c0_5 = arith.constant 0 : index
    %5 = vector.load %arg1[%c2, %c0_4, %c0_5] : memref<9x256x64xbf16, #tpu.memory_space<vmem>>, vector<1x256x64xbf16>
    %6 = vector.shape_cast %5 : vector<1x256x64xbf16> to vector<256x64xbf16>
    %7 = arith.maximumf %4, %6 : vector<256x64xbf16>
    %c3 = arith.constant 3 : index
    %c0_6 = arith.constant 0 : index
    %c0_7 = arith.constant 0 : index
    %8 = vector.load %arg1[%c3, %c0_6, %c0_7] : memref<9x256x64xbf16, #tpu.memory_space<vmem>>, vector<1x256x64xbf16>
    %9 = vector.shape_cast %8 : vector<1x256x64xbf16> to vector<256x64xbf16>
    %10 = arith.maximumf %7, %9 : vector<256x64xbf16>
    %c4 = arith.constant 4 : index
    %c0_8 = arith.constant 0 : index
    %c0_9 = arith.constant 0 : index
    %11 = vector.load %arg1[%c4, %c0_8, %c0_9] : memref<9x256x64xbf16, #tpu.memory_space<vmem>>, vector<1x256x64xbf16>
    %12 = vector.shape_cast %11 : vector<1x256x64xbf16> to vector<256x64xbf16>
    %13 = arith.maximumf %10, %12 : vector<256x64xbf16>
    %c5 = arith.constant 5 : index
    %c0_10 = arith.constant 0 : index
    %c0_11 = arith.constant 0 : index
    %14 = vector.load %arg1[%c5, %c0_10, %c0_11] : memref<9x256x64xbf16, #tpu.memory_space<vmem>>, vector<1x256x64xbf16>
    %15 = vector.shape_cast %14 : vector<1x256x64xbf16> to vector<256x64xbf16>
    %16 = arith.maximumf %13, %15 : vector<256x64xbf16>
    %c6 = arith.constant 6 : index
    %c0_12 = arith.constant 0 : index
    %c0_13 = arith.constant 0 : index
    %17 = vector.load %arg1[%c6, %c0_12, %c0_13] : memref<9x256x64xbf16, #tpu.memory_space<vmem>>, vector<1x256x64xbf16>
    %18 = vector.shape_cast %17 : vector<1x256x64xbf16> to vector<256x64xbf16>
    %19 = arith.maximumf %16, %18 : vector<256x64xbf16>
    %c7 = arith.constant 7 : index
    %c0_14 = arith.constant 0 : index
    %c0_15 = arith.constant 0 : index
    %20 = vector.load %arg1[%c7, %c0_14, %c0_15] : memref<9x256x64xbf16, #tpu.memory_space<vmem>>, vector<1x256x64xbf16>
    %21 = vector.shape_cast %20 : vector<1x256x64xbf16> to vector<256x64xbf16>
    %22 = arith.maximumf %19, %21 : vector<256x64xbf16>
    %c8 = arith.constant 8 : index
    %c0_16 = arith.constant 0 : index
    %c0_17 = arith.constant 0 : index
    %23 = vector.load %arg1[%c8, %c0_16, %c0_17] : memref<9x256x64xbf16, #tpu.memory_space<vmem>>, vector<1x256x64xbf16>
    %24 = vector.shape_cast %23 : vector<1x256x64xbf16> to vector<256x64xbf16>
    %25 = arith.maximumf %22, %24 : vector<256x64xbf16>
    %c0_18 = arith.constant 0 : index
    %c0_19 = arith.constant 0 : index
    %26 = vector.load %arg2[%c0_18, %c0_19] : memref<256x64xbf16, #tpu.memory_space<vmem>>, vector<256x64xbf16>
    tpu.vector_store %arg2[%c0_18, %c0_19], %25 {strides = array<i32>} : memref<256x64xbf16, #tpu.memory_space<vmem>>, vector<256x64xbf16>,
    return
  }
  func.func @transform_0(%arg0: i32) -> (i32, i32, i32) {
    %c0_i32 = arith.constant 0 : i32
    %c0_i32_0 = arith.constant 0 : i32
    %c0_i32_1 = arith.constant 0 : i32
    return %c0_i32, %arg0, %c0_i32_0 : i32, i32, i32
  }
  func.func @transform_1(%arg0: i32) -> (i32, i32) {
    %c0_i32 = arith.constant 0 : i32
    %c0_i32_0 = arith.constant 0 : i32
    return %arg0, %c0_i32 : i32, i32
  }
}

module attributes {stable_mosaic.version = 11 : i64} {
  func.func @_gemm_k1_kernel(%arg0: i32, %arg1: i32, %arg2: i32, %arg3: memref<512x576xbf16, #tpu.memory_space<vmem>>, %arg4: memref<576x64xbf16, #tpu.memory_space<vmem>>, %arg5: memref<1x64xf32, #tpu.memory_space<vmem>>, %arg6: memref<512x64xbf16, #tpu.memory_space<vmem>>) attributes {dimension_semantics = [#tpu.dimension_semantics<parallel>, #tpu.dimension_semantics<parallel>, #tpu.dimension_semantics<arbitrary>], iteration_bounds = array<i64: 1, 1, 1>, scalar_prefetch = 0 : i64, scratch_operands = 0 : i64, tpu.core_type = #tpu.core_type<tc>, window_params = [{transform_indices = @transform_0, window_bounds = array<i64: 512, 576>}, {transform_indices = @transform_1, window_bounds = array<i64: 576, 64>}, {transform_indices = @transform_2, window_bounds = array<i64: 1, 64>}, {transform_indices = @transform_3, window_bounds = array<i64: 512, 64>}]} {
    %c0 = arith.constant 0 : index
    %c0_0 = arith.constant 0 : index
    %0 = vector.load %arg3[%c0, %c0_0] : memref<512x576xbf16, #tpu.memory_space<vmem>>, vector<512x576xbf16>
    %c0_1 = arith.constant 0 : index
    %c0_2 = arith.constant 0 : index
    %1 = vector.load %arg4[%c0_1, %c0_2] : memref<576x64xbf16, #tpu.memory_space<vmem>>, vector<576x64xbf16>
    %cst = arith.constant dense<0.000000e+00> : vector<512x64xf32>
    %2 = tpu.matmul %0, %1, %cst {dimension_numbers = #tpu.dot_dimension_numbers<[1], [0], [0], [1], [0, 0, 1, 1], [], []>} : vector<512x576xbf16>, vector<576x64xbf16>, vector<512x64xf32> -> vector<512x64xf32>
    %c0_3 = arith.constant 0 : index
    %c0_4 = arith.constant 0 : index
    %3 = vector.load %arg5[%c0_3, %c0_4] : memref<1x64xf32, #tpu.memory_space<vmem>>, vector<1x64xf32>
    %4 = vector.broadcast %3 : vector<1x64xf32> to vector<512x64xf32>
    %5 = arith.addf %2, %4 : vector<512x64xf32>
    %cst_5 = arith.constant 0.000000e+00 : f32
    %6 = vector.broadcast %cst_5 : f32 to vector<512x64xf32>
    %7 = arith.maximumf %5, %6 : vector<512x64xf32>
    %8 = arith.truncf %7 : vector<512x64xf32> to vector<512x64xbf16>
    %c0_6 = arith.constant 0 : index
    %c0_7 = arith.constant 0 : index
    %9 = vector.load %arg6[%c0_6, %c0_7] : memref<512x64xbf16, #tpu.memory_space<vmem>>, vector<512x64xbf16>
    tpu.vector_store %arg6[%c0_6, %c0_7], %8 {strides = array<i32>} : memref<512x64xbf16, #tpu.memory_space<vmem>>, vector<512x64xbf16>,
    return
  }
  func.func @transform_0(%arg0: i32, %arg1: i32, %arg2: i32) -> (i32, i32) {
    %c0_i32 = arith.constant 0 : i32
    return %arg0, %arg2 : i32, i32
  }
  func.func @transform_1(%arg0: i32, %arg1: i32, %arg2: i32) -> (i32, i32) {
    %c0_i32 = arith.constant 0 : i32
    return %arg2, %arg1 : i32, i32
  }
  func.func @transform_2(%arg0: i32, %arg1: i32, %arg2: i32) -> (i32, i32) {
    %c0_i32 = arith.constant 0 : i32
    %c0_i32_0 = arith.constant 0 : i32
    return %c0_i32, %arg1 : i32, i32
  }
  func.func @transform_3(%arg0: i32, %arg1: i32, %arg2: i32) -> (i32, i32) {
    %c0_i32 = arith.constant 0 : i32
    return %arg0, %arg1 : i32, i32
  }
}

module attributes {stable_mosaic.version = 11 : i64} {
  func.func @_gemm_k1_res_kernel(%arg0: i32, %arg1: i32, %arg2: i32, %arg3: memref<512x576xbf16, #tpu.memory_space<vmem>>, %arg4: memref<576x64xbf16, #tpu.memory_space<vmem>>, %arg5: memref<1x64xf32, #tpu.memory_space<vmem>>, %arg6: memref<512x64xbf16, #tpu.memory_space<vmem>>, %arg7: memref<512x64xbf16, #tpu.memory_space<vmem>>) attributes {dimension_semantics = [#tpu.dimension_semantics<parallel>, #tpu.dimension_semantics<parallel>, #tpu.dimension_semantics<arbitrary>], iteration_bounds = array<i64: 1, 1, 1>, scalar_prefetch = 0 : i64, scratch_operands = 0 : i64, tpu.core_type = #tpu.core_type<tc>, window_params = [{transform_indices = @transform_0, window_bounds = array<i64: 512, 576>}, {transform_indices = @transform_1, window_bounds = array<i64: 576, 64>}, {transform_indices = @transform_2, window_bounds = array<i64: 1, 64>}, {transform_indices = @transform_3, window_bounds = array<i64: 512, 64>}, {transform_indices = @transform_4, window_bounds = array<i64: 512, 64>}]} {
    %c0 = arith.constant 0 : index
    %c0_0 = arith.constant 0 : index
    %0 = vector.load %arg3[%c0, %c0_0] : memref<512x576xbf16, #tpu.memory_space<vmem>>, vector<512x576xbf16>
    %c0_1 = arith.constant 0 : index
    %c0_2 = arith.constant 0 : index
    %1 = vector.load %arg4[%c0_1, %c0_2] : memref<576x64xbf16, #tpu.memory_space<vmem>>, vector<576x64xbf16>
    %cst = arith.constant dense<0.000000e+00> : vector<512x64xf32>
    %2 = tpu.matmul %0, %1, %cst {dimension_numbers = #tpu.dot_dimension_numbers<[1], [0], [0], [1], [0, 0, 1, 1], [], []>} : vector<512x576xbf16>, vector<576x64xbf16>, vector<512x64xf32> -> vector<512x64xf32>
    %c0_3 = arith.constant 0 : index
    %c0_4 = arith.constant 0 : index
    %3 = vector.load %arg5[%c0_3, %c0_4] : memref<1x64xf32, #tpu.memory_space<vmem>>, vector<1x64xf32>
    %4 = vector.broadcast %3 : vector<1x64xf32> to vector<512x64xf32>
    %5 = arith.addf %2, %4 : vector<512x64xf32>
    %c0_5 = arith.constant 0 : index
    %c0_6 = arith.constant 0 : index
    %6 = vector.load %arg6[%c0_5, %c0_6] : memref<512x64xbf16, #tpu.memory_space<vmem>>, vector<512x64xbf16>
    %7 = arith.extf %6 : vector<512x64xbf16> to vector<512x64xf32>
    %8 = arith.addf %5, %7 : vector<512x64xf32>
    %cst_7 = arith.constant 0.000000e+00 : f32
    %9 = vector.broadcast %cst_7 : f32 to vector<512x64xf32>
    %10 = arith.maximumf %8, %9 : vector<512x64xf32>
    %11 = arith.truncf %10 : vector<512x64xf32> to vector<512x64xbf16>
    %c0_8 = arith.constant 0 : index
    %c0_9 = arith.constant 0 : index
    %12 = vector.load %arg7[%c0_8, %c0_9] : memref<512x64xbf16, #tpu.memory_space<vmem>>, vector<512x64xbf16>
    tpu.vector_store %arg7[%c0_8, %c0_9], %11 {strides = array<i32>} : memref<512x64xbf16, #tpu.memory_space<vmem>>, vector<512x64xbf16>,
    return
  }
  func.func @transform_0(%arg0: i32, %arg1: i32, %arg2: i32) -> (i32, i32) {
    %c0_i32 = arith.constant 0 : i32
    return %arg0, %arg2 : i32, i32
  }
  func.func @transform_1(%arg0: i32, %arg1: i32, %arg2: i32) -> (i32, i32) {
    %c0_i32 = arith.constant 0 : i32
    return %arg2, %arg1 : i32, i32
  }
  func.func @transform_2(%arg0: i32, %arg1: i32, %arg2: i32) -> (i32, i32) {
    %c0_i32 = arith.constant 0 : i32
    %c0_i32_0 = arith.constant 0 : i32
    return %c0_i32, %arg1 : i32, i32
  }
  func.func @transform_3(%arg0: i32, %arg1: i32, %arg2: i32) -> (i32, i32) {
    %c0_i32 = arith.constant 0 : i32
    return %arg0, %arg1 : i32, i32
  }
  func.func @transform_4(%arg0: i32, %arg1: i32, %arg2: i32) -> (i32, i32) {
    %c0_i32 = arith.constant 0 : i32
    return %arg0, %arg1 : i32, i32
  }
}

module attributes {stable_mosaic.version = 11 : i64} {
  func.func @_gemm_k1_kernel(%arg0: i32, %arg1: i32, %arg2: i32, %arg3: memref<128x576xbf16, #tpu.memory_space<vmem>>, %arg4: memref<576x128xbf16, #tpu.memory_space<vmem>>, %arg5: memref<1x128xf32, #tpu.memory_space<vmem>>, %arg6: memref<128x128xbf16, #tpu.memory_space<vmem>>) attributes {dimension_semantics = [#tpu.dimension_semantics<parallel>, #tpu.dimension_semantics<parallel>, #tpu.dimension_semantics<arbitrary>], iteration_bounds = array<i64: 1, 1, 1>, scalar_prefetch = 0 : i64, scratch_operands = 0 : i64, tpu.core_type = #tpu.core_type<tc>, window_params = [{transform_indices = @transform_0, window_bounds = array<i64: 128, 576>}, {transform_indices = @transform_1, window_bounds = array<i64: 576, 128>}, {transform_indices = @transform_2, window_bounds = array<i64: 1, 128>}, {transform_indices = @transform_3, window_bounds = array<i64: 128, 128>}]} {
    %c0 = arith.constant 0 : index
    %c0_0 = arith.constant 0 : index
    %0 = vector.load %arg3[%c0, %c0_0] : memref<128x576xbf16, #tpu.memory_space<vmem>>, vector<128x576xbf16>
    %c0_1 = arith.constant 0 : index
    %c0_2 = arith.constant 0 : index
    %1 = vector.load %arg4[%c0_1, %c0_2] : memref<576x128xbf16, #tpu.memory_space<vmem>>, vector<576x128xbf16>
    %cst = arith.constant dense<0.000000e+00> : vector<128x128xf32>
    %2 = tpu.matmul %0, %1, %cst {dimension_numbers = #tpu.dot_dimension_numbers<[1], [0], [0], [1], [0, 0, 1, 1], [], []>} : vector<128x576xbf16>, vector<576x128xbf16>, vector<128x128xf32> -> vector<128x128xf32>
    %c0_3 = arith.constant 0 : index
    %c0_4 = arith.constant 0 : index
    %3 = vector.load %arg5[%c0_3, %c0_4] : memref<1x128xf32, #tpu.memory_space<vmem>>, vector<1x128xf32>
    %4 = vector.broadcast %3 : vector<1x128xf32> to vector<128x128xf32>
    %5 = arith.addf %2, %4 : vector<128x128xf32>
    %cst_5 = arith.constant 0.000000e+00 : f32
    %6 = vector.broadcast %cst_5 : f32 to vector<128x128xf32>
    %7 = arith.maximumf %5, %6 : vector<128x128xf32>
    %8 = arith.truncf %7 : vector<128x128xf32> to vector<128x128xbf16>
    %c0_6 = arith.constant 0 : index
    %c0_7 = arith.constant 0 : index
    %9 = vector.load %arg6[%c0_6, %c0_7] : memref<128x128xbf16, #tpu.memory_space<vmem>>, vector<128x128xbf16>
    tpu.vector_store %arg6[%c0_6, %c0_7], %8 {strides = array<i32>} : memref<128x128xbf16, #tpu.memory_space<vmem>>, vector<128x128xbf16>,
    return
  }
  func.func @transform_0(%arg0: i32, %arg1: i32, %arg2: i32) -> (i32, i32) {
    %c0_i32 = arith.constant 0 : i32
    return %arg0, %arg2 : i32, i32
  }
  func.func @transform_1(%arg0: i32, %arg1: i32, %arg2: i32) -> (i32, i32) {
    %c0_i32 = arith.constant 0 : i32
    return %arg2, %arg1 : i32, i32
  }
  func.func @transform_2(%arg0: i32, %arg1: i32, %arg2: i32) -> (i32, i32) {
    %c0_i32 = arith.constant 0 : i32
    %c0_i32_0 = arith.constant 0 : i32
    return %c0_i32, %arg1 : i32, i32
  }
  func.func @transform_3(%arg0: i32, %arg1: i32, %arg2: i32) -> (i32, i32) {
    %c0_i32 = arith.constant 0 : i32
    return %arg0, %arg1 : i32, i32
  }
}

module attributes {stable_mosaic.version = 11 : i64} {
  func.func @_gemm_k1_res_kernel(%arg0: i32, %arg1: i32, %arg2: i32, %arg3: memref<128x1152xbf16, #tpu.memory_space<vmem>>, %arg4: memref<1152x128xbf16, #tpu.memory_space<vmem>>, %arg5: memref<1x128xf32, #tpu.memory_space<vmem>>, %arg6: memref<128x128xbf16, #tpu.memory_space<vmem>>, %arg7: memref<128x128xbf16, #tpu.memory_space<vmem>>) attributes {dimension_semantics = [#tpu.dimension_semantics<parallel>, #tpu.dimension_semantics<parallel>, #tpu.dimension_semantics<arbitrary>], iteration_bounds = array<i64: 1, 1, 1>, scalar_prefetch = 0 : i64, scratch_operands = 0 : i64, tpu.core_type = #tpu.core_type<tc>, window_params = [{transform_indices = @transform_0, window_bounds = array<i64: 128, 1152>}, {transform_indices = @transform_1, window_bounds = array<i64: 1152, 128>}, {transform_indices = @transform_2, window_bounds = array<i64: 1, 128>}, {transform_indices = @transform_3, window_bounds = array<i64: 128, 128>}, {transform_indices = @transform_4, window_bounds = array<i64: 128, 128>}]} {
    %c0 = arith.constant 0 : index
    %c0_0 = arith.constant 0 : index
    %0 = vector.load %arg3[%c0, %c0_0] : memref<128x1152xbf16, #tpu.memory_space<vmem>>, vector<128x1152xbf16>
    %c0_1 = arith.constant 0 : index
    %c0_2 = arith.constant 0 : index
    %1 = vector.load %arg4[%c0_1, %c0_2] : memref<1152x128xbf16, #tpu.memory_space<vmem>>, vector<1152x128xbf16>
    %cst = arith.constant dense<0.000000e+00> : vector<128x128xf32>
    %2 = tpu.matmul %0, %1, %cst {dimension_numbers = #tpu.dot_dimension_numbers<[1], [0], [0], [1], [0, 0, 1, 1], [], []>} : vector<128x1152xbf16>, vector<1152x128xbf16>, vector<128x128xf32> -> vector<128x128xf32>
    %c0_3 = arith.constant 0 : index
    %c0_4 = arith.constant 0 : index
    %3 = vector.load %arg5[%c0_3, %c0_4] : memref<1x128xf32, #tpu.memory_space<vmem>>, vector<1x128xf32>
    %4 = vector.broadcast %3 : vector<1x128xf32> to vector<128x128xf32>
    %5 = arith.addf %2, %4 : vector<128x128xf32>
    %c0_5 = arith.constant 0 : index
    %c0_6 = arith.constant 0 : index
    %6 = vector.load %arg6[%c0_5, %c0_6] : memref<128x128xbf16, #tpu.memory_space<vmem>>, vector<128x128xbf16>
    %7 = arith.extf %6 : vector<128x128xbf16> to vector<128x128xf32>
    %8 = arith.addf %5, %7 : vector<128x128xf32>
    %cst_7 = arith.constant 0.000000e+00 : f32
    %9 = vector.broadcast %cst_7 : f32 to vector<128x128xf32>
    %10 = arith.maximumf %8, %9 : vector<128x128xf32>
    %11 = arith.truncf %10 : vector<128x128xf32> to vector<128x128xbf16>
    %c0_8 = arith.constant 0 : index
    %c0_9 = arith.constant 0 : index
    %12 = vector.load %arg7[%c0_8, %c0_9] : memref<128x128xbf16, #tpu.memory_space<vmem>>, vector<128x128xbf16>
    tpu.vector_store %arg7[%c0_8, %c0_9], %11 {strides = array<i32>} : memref<128x128xbf16, #tpu.memory_space<vmem>>, vector<128x128xbf16>,
    return
  }
  func.func @transform_0(%arg0: i32, %arg1: i32, %arg2: i32) -> (i32, i32) {
    %c0_i32 = arith.constant 0 : i32
    return %arg0, %arg2 : i32, i32
  }
  func.func @transform_1(%arg0: i32, %arg1: i32, %arg2: i32) -> (i32, i32) {
    %c0_i32 = arith.constant 0 : i32
    return %arg2, %arg1 : i32, i32
  }
  func.func @transform_2(%arg0: i32, %arg1: i32, %arg2: i32) -> (i32, i32) {
    %c0_i32 = arith.constant 0 : i32
    %c0_i32_0 = arith.constant 0 : i32
    return %c0_i32, %arg1 : i32, i32
  }
  func.func @transform_3(%arg0: i32, %arg1: i32, %arg2: i32) -> (i32, i32) {
    %c0_i32 = arith.constant 0 : i32
    return %arg0, %arg1 : i32, i32
  }
  func.func @transform_4(%arg0: i32, %arg1: i32, %arg2: i32) -> (i32, i32) {
    %c0_i32 = arith.constant 0 : i32
    return %arg0, %arg1 : i32, i32
  }
}

module attributes {stable_mosaic.version = 11 : i64} {
  func.func @_gemm_k1_kernel(%arg0: i32, %arg1: i32, %arg2: i32, %arg3: memref<128x64xbf16, #tpu.memory_space<vmem>>, %arg4: memref<64x128xbf16, #tpu.memory_space<vmem>>, %arg5: memref<1x128xf32, #tpu.memory_space<vmem>>, %arg6: memref<128x128xbf16, #tpu.memory_space<vmem>>) attributes {dimension_semantics = [#tpu.dimension_semantics<parallel>, #tpu.dimension_semantics<parallel>, #tpu.dimension_semantics<arbitrary>], iteration_bounds = array<i64: 1, 1, 1>, scalar_prefetch = 0 : i64, scratch_operands = 0 : i64, tpu.core_type = #tpu.core_type<tc>, window_params = [{transform_indices = @transform_0, window_bounds = array<i64: 128, 64>}, {transform_indices = @transform_1, window_bounds = array<i64: 64, 128>}, {transform_indices = @transform_2, window_bounds = array<i64: 1, 128>}, {transform_indices = @transform_3, window_bounds = array<i64: 128, 128>}]} {
    %c0 = arith.constant 0 : index
    %c0_0 = arith.constant 0 : index
    %0 = vector.load %arg3[%c0, %c0_0] : memref<128x64xbf16, #tpu.memory_space<vmem>>, vector<128x64xbf16>
    %c0_1 = arith.constant 0 : index
    %c0_2 = arith.constant 0 : index
    %1 = vector.load %arg4[%c0_1, %c0_2] : memref<64x128xbf16, #tpu.memory_space<vmem>>, vector<64x128xbf16>
    %cst = arith.constant dense<0.000000e+00> : vector<128x128xf32>
    %2 = tpu.matmul %0, %1, %cst {dimension_numbers = #tpu.dot_dimension_numbers<[1], [0], [0], [1], [0, 0, 1, 1], [], []>} : vector<128x64xbf16>, vector<64x128xbf16>, vector<128x128xf32> -> vector<128x128xf32>
    %c0_3 = arith.constant 0 : index
    %c0_4 = arith.constant 0 : index
    %3 = vector.load %arg5[%c0_3, %c0_4] : memref<1x128xf32, #tpu.memory_space<vmem>>, vector<1x128xf32>
    %4 = vector.broadcast %3 : vector<1x128xf32> to vector<128x128xf32>
    %5 = arith.addf %2, %4 : vector<128x128xf32>
    %6 = arith.truncf %5 : vector<128x128xf32> to vector<128x128xbf16>
    %c0_5 = arith.constant 0 : index
    %c0_6 = arith.constant 0 : index
    %7 = vector.load %arg6[%c0_5, %c0_6] : memref<128x128xbf16, #tpu.memory_space<vmem>>, vector<128x128xbf16>
    tpu.vector_store %arg6[%c0_5, %c0_6], %6 {strides = array<i32>} : memref<128x128xbf16, #tpu.memory_space<vmem>>, vector<128x128xbf16>,
    return
  }
  func.func @transform_0(%arg0: i32, %arg1: i32, %arg2: i32) -> (i32, i32) {
    %c0_i32 = arith.constant 0 : i32
    return %arg0, %arg2 : i32, i32
  }
  func.func @transform_1(%arg0: i32, %arg1: i32, %arg2: i32) -> (i32, i32) {
    %c0_i32 = arith.constant 0 : i32
    return %arg2, %arg1 : i32, i32
  }
  func.func @transform_2(%arg0: i32, %arg1: i32, %arg2: i32) -> (i32, i32) {
    %c0_i32 = arith.constant 0 : i32
    %c0_i32_0 = arith.constant 0 : i32
    return %c0_i32, %arg1 : i32, i32
  }
  func.func @transform_3(%arg0: i32, %arg1: i32, %arg2: i32) -> (i32, i32) {
    %c0_i32 = arith.constant 0 : i32
    return %arg0, %arg1 : i32, i32
  }
}

module attributes {stable_mosaic.version = 11 : i64} {
  func.func @_gemm_k1_kernel(%arg0: i32, %arg1: i32, %arg2: i32, %arg3: memref<128x1152xbf16, #tpu.memory_space<vmem>>, %arg4: memref<1152x128xbf16, #tpu.memory_space<vmem>>, %arg5: memref<1x128xf32, #tpu.memory_space<vmem>>, %arg6: memref<128x128xbf16, #tpu.memory_space<vmem>>) attributes {dimension_semantics = [#tpu.dimension_semantics<parallel>, #tpu.dimension_semantics<parallel>, #tpu.dimension_semantics<arbitrary>], iteration_bounds = array<i64: 1, 1, 1>, scalar_prefetch = 0 : i64, scratch_operands = 0 : i64, tpu.core_type = #tpu.core_type<tc>, window_params = [{transform_indices = @transform_0, window_bounds = array<i64: 128, 1152>}, {transform_indices = @transform_1, window_bounds = array<i64: 1152, 128>}, {transform_indices = @transform_2, window_bounds = array<i64: 1, 128>}, {transform_indices = @transform_3, window_bounds = array<i64: 128, 128>}]} {
    %c0 = arith.constant 0 : index
    %c0_0 = arith.constant 0 : index
    %0 = vector.load %arg3[%c0, %c0_0] : memref<128x1152xbf16, #tpu.memory_space<vmem>>, vector<128x1152xbf16>
    %c0_1 = arith.constant 0 : index
    %c0_2 = arith.constant 0 : index
    %1 = vector.load %arg4[%c0_1, %c0_2] : memref<1152x128xbf16, #tpu.memory_space<vmem>>, vector<1152x128xbf16>
    %cst = arith.constant dense<0.000000e+00> : vector<128x128xf32>
    %2 = tpu.matmul %0, %1, %cst {dimension_numbers = #tpu.dot_dimension_numbers<[1], [0], [0], [1], [0, 0, 1, 1], [], []>} : vector<128x1152xbf16>, vector<1152x128xbf16>, vector<128x128xf32> -> vector<128x128xf32>
    %c0_3 = arith.constant 0 : index
    %c0_4 = arith.constant 0 : index
    %3 = vector.load %arg5[%c0_3, %c0_4] : memref<1x128xf32, #tpu.memory_space<vmem>>, vector<1x128xf32>
    %4 = vector.broadcast %3 : vector<1x128xf32> to vector<128x128xf32>
    %5 = arith.addf %2, %4 : vector<128x128xf32>
    %cst_5 = arith.constant 0.000000e+00 : f32
    %6 = vector.broadcast %cst_5 : f32 to vector<128x128xf32>
    %7 = arith.maximumf %5, %6 : vector<128x128xf32>
    %8 = arith.truncf %7 : vector<128x128xf32> to vector<128x128xbf16>
    %c0_6 = arith.constant 0 : index
    %c0_7 = arith.constant 0 : index
    %9 = vector.load %arg6[%c0_6, %c0_7] : memref<128x128xbf16, #tpu.memory_space<vmem>>, vector<128x128xbf16>
    tpu.vector_store %arg6[%c0_6, %c0_7], %8 {strides = array<i32>} : memref<128x128xbf16, #tpu.memory_space<vmem>>, vector<128x128xbf16>,
    return
  }
  func.func @transform_0(%arg0: i32, %arg1: i32, %arg2: i32) -> (i32, i32) {
    %c0_i32 = arith.constant 0 : i32
    return %arg0, %arg2 : i32, i32
  }
  func.func @transform_1(%arg0: i32, %arg1: i32, %arg2: i32) -> (i32, i32) {
    %c0_i32 = arith.constant 0 : i32
    return %arg2, %arg1 : i32, i32
  }
  func.func @transform_2(%arg0: i32, %arg1: i32, %arg2: i32) -> (i32, i32) {
    %c0_i32 = arith.constant 0 : i32
    %c0_i32_0 = arith.constant 0 : i32
    return %c0_i32, %arg1 : i32, i32
  }
  func.func @transform_3(%arg0: i32, %arg1: i32, %arg2: i32) -> (i32, i32) {
    %c0_i32 = arith.constant 0 : i32
    return %arg0, %arg1 : i32, i32
  }
}

module attributes {stable_mosaic.version = 11 : i64} {
  func.func @_gemm_k1_kernel(%arg0: i32, %arg1: i32, %arg2: i32, %arg3: memref<4x128xbf16, #tpu.memory_space<vmem>>, %arg4: memref<128x128xbf16, #tpu.memory_space<vmem>>, %arg5: memref<4x1xf32, #tpu.memory_space<vmem>>, %arg6: memref<4x128xf32, #tpu.memory_space<vmem>>) attributes {dimension_semantics = [#tpu.dimension_semantics<parallel>, #tpu.dimension_semantics<parallel>, #tpu.dimension_semantics<arbitrary>], iteration_bounds = array<i64: 1, 1, 1>, scalar_prefetch = 0 : i64, scratch_operands = 0 : i64, tpu.core_type = #tpu.core_type<tc>, window_params = [{transform_indices = @transform_0, window_bounds = array<i64: 4, 128>}, {transform_indices = @transform_1, window_bounds = array<i64: 128, 128>}, {transform_indices = @transform_2, window_bounds = array<i64: 4, 1>}, {transform_indices = @transform_3, window_bounds = array<i64: 4, 128>}]} {
    %c0 = arith.constant 0 : index
    %c0_0 = arith.constant 0 : index
    %0 = vector.load %arg3[%c0, %c0_0] : memref<4x128xbf16, #tpu.memory_space<vmem>>, vector<4x128xbf16>
    %c0_1 = arith.constant 0 : index
    %c0_2 = arith.constant 0 : index
    %1 = vector.load %arg4[%c0_1, %c0_2] : memref<128x128xbf16, #tpu.memory_space<vmem>>, vector<128x128xbf16>
    %cst = arith.constant dense<0.000000e+00> : vector<4x128xf32>
    %2 = tpu.matmul %0, %1, %cst {dimension_numbers = #tpu.dot_dimension_numbers<[1], [0], [0], [1], [0, 0, 1, 1], [], []>} : vector<4x128xbf16>, vector<128x128xbf16>, vector<4x128xf32> -> vector<4x128xf32>
    %c0_3 = arith.constant 0 : index
    %c0_4 = arith.constant 0 : index
    %3 = vector.load %arg5[%c0_3, %c0_4] : memref<4x1xf32, #tpu.memory_space<vmem>>, vector<4x1xf32>
    %4 = vector.broadcast %3 : vector<4x1xf32> to vector<4x128xf32>
    %5 = arith.addf %2, %4 : vector<4x128xf32>
    %c0_5 = arith.constant 0 : index
    %c0_6 = arith.constant 0 : index
    %6 = vector.load %arg6[%c0_5, %c0_6] : memref<4x128xf32, #tpu.memory_space<vmem>>, vector<4x128xf32>
    tpu.vector_store %arg6[%c0_5, %c0_6], %5 {strides = array<i32>} : memref<4x128xf32, #tpu.memory_space<vmem>>, vector<4x128xf32>,
    return
  }
  func.func @transform_0(%arg0: i32, %arg1: i32, %arg2: i32) -> (i32, i32) {
    %c0_i32 = arith.constant 0 : i32
    return %arg0, %arg2 : i32, i32
  }
  func.func @transform_1(%arg0: i32, %arg1: i32, %arg2: i32) -> (i32, i32) {
    %c0_i32 = arith.constant 0 : i32
    return %arg2, %arg1 : i32, i32
  }
  func.func @transform_2(%arg0: i32, %arg1: i32, %arg2: i32) -> (i32, i32) {
    %c0_i32 = arith.constant 0 : i32
    %c0_i32_0 = arith.constant 0 : i32
    return %arg0, %c0_i32 : i32, i32
  }
  func.func @transform_3(%arg0: i32, %arg1: i32, %arg2: i32) -> (i32, i32) {
    %c0_i32 = arith.constant 0 : i32
    return %arg0, %arg1 : i32, i32
  }
}

module attributes {stable_mosaic.version = 11 : i64} {
  func.func @_upsample_kernel(%arg0: i32, %arg1: memref<1x8x8xf32, #tpu.memory_space<vmem>>, %arg2: memref<64x8xf32, #tpu.memory_space<vmem>>, %arg3: memref<8x64xf32, #tpu.memory_space<vmem>>, %arg4: memref<1x64x64xf32, #tpu.memory_space<vmem>>) attributes {dimension_semantics = [#tpu.dimension_semantics<parallel>], iteration_bounds = array<i64: 8>, scalar_prefetch = 0 : i64, scratch_operands = 0 : i64, tpu.core_type = #tpu.core_type<tc>, window_params = [{transform_indices = @transform_0, window_bounds = array<i64: 1, 8, 8>}, {pipeline_mode = #tpu.pipeline_mode<synchronous>, transform_indices = @transform_1, window_bounds = array<i64: 64, 8>}, {pipeline_mode = #tpu.pipeline_mode<synchronous>, transform_indices = @transform_2, window_bounds = array<i64: 8, 64>}, {transform_indices = @transform_3, window_bounds = array<i64: 1, 64, 64>}]} {
    %c0 = arith.constant 0 : index
    %c0_0 = arith.constant 0 : index
    %c0_1 = arith.constant 0 : index
    %0 = vector.load %arg1[%c0, %c0_0, %c0_1] : memref<1x8x8xf32, #tpu.memory_space<vmem>>, vector<1x8x8xf32>
    %1 = vector.shape_cast %0 : vector<1x8x8xf32> to vector<8x8xf32>
    %c0_2 = arith.constant 0 : index
    %c0_3 = arith.constant 0 : index
    %2 = vector.load %arg2[%c0_2, %c0_3] : memref<64x8xf32, #tpu.memory_space<vmem>>, vector<64x8xf32>
    %cst = arith.constant dense<0.000000e+00> : vector<64x8xf32>
    %3 = tpu.matmul %2, %1, %cst {dimension_numbers = #tpu.dot_dimension_numbers<[1], [0], [0], [1], [0, 0, 1, 1], [], []>} : vector<64x8xf32>, vector<8x8xf32>, vector<64x8xf32> -> vector<64x8xf32>
    %c0_4 = arith.constant 0 : index
    %c0_5 = arith.constant 0 : index
    %4 = vector.load %arg3[%c0_4, %c0_5] : memref<8x64xf32, #tpu.memory_space<vmem>>, vector<8x64xf32>
    %cst_6 = arith.constant dense<0.000000e+00> : vector<64x64xf32>
    %5 = tpu.matmul %3, %4, %cst_6 {dimension_numbers = #tpu.dot_dimension_numbers<[1], [0], [0], [1], [0, 0, 1, 1], [], []>} : vector<64x8xf32>, vector<8x64xf32>, vector<64x64xf32> -> vector<64x64xf32>
    %c0_7 = arith.constant 0 : index
    %c0_8 = arith.constant 0 : index
    %c0_9 = arith.constant 0 : index
    %6 = vector.load %arg4[%c0_7, %c0_8, %c0_9] : memref<1x64x64xf32, #tpu.memory_space<vmem>>, vector<1x64x64xf32>
    %7 = vector.shape_cast %6 : vector<1x64x64xf32> to vector<64x64xf32>
    %8 = vector.shape_cast %5 : vector<64x64xf32> to vector<1x64x64xf32>
    tpu.vector_store %arg4[%c0_7, %c0_8, %c0_9], %8 {strides = array<i32>} : memref<1x64x64xf32, #tpu.memory_space<vmem>>, vector<1x64x64xf32>,
    return
  }
  func.func @transform_0(%arg0: i32) -> (i32, i32, i32) {
    %c0_i32 = arith.constant 0 : i32
    %c0_i32_0 = arith.constant 0 : i32
    %c0_i32_1 = arith.constant 0 : i32
    return %arg0, %c0_i32, %c0_i32_0 : i32, i32, i32
  }
  func.func @transform_1(%arg0: i32) -> (i32, i32) {
    %c0_i32 = arith.constant 0 : i32
    %c0_i32_0 = arith.constant 0 : i32
    %c0_i32_1 = arith.constant 0 : i32
    return %c0_i32, %c0_i32_0 : i32, i32
  }
  func.func @transform_2(%arg0: i32) -> (i32, i32) {
    %c0_i32 = arith.constant 0 : i32
    %c0_i32_0 = arith.constant 0 : i32
    %c0_i32_1 = arith.constant 0 : i32
    return %c0_i32, %c0_i32_0 : i32, i32
  }
  func.func @transform_3(%arg0: i32) -> (i32, i32, i32) {
    %c0_i32 = arith.constant 0 : i32
    %c0_i32_0 = arith.constant 0 : i32
    %c0_i32_1 = arith.constant 0 : i32
    return %arg0, %c0_i32, %c0_i32_0 : i32, i32, i32
  }
}

</mosaic_0001>

<bundles_post_ra>
// kernel: fcn_forward.19
= control target key start
LH: loop header
LB: loop body
LE: loop exit
PB: predicated region body
PF: predicated region fallthrough
CT: control target
= control target key end

     0   :  { %s2043_s12 = smov 0   ;;  %s2045_s13 = smov 0   ;;  %s2407_s0 = inlined_call_operand.vmem [shape: bf16[2048,147], index: 0, kind: input, shape index: {}]   ;;  %s2408_s1 = inlined_call_operand.vmem [shape: bf16[147,64], index: 1, kind: input, shape index: {}]   ;;  %s2409_s2 = inlined_call_operand.vmem [shape: f32[1,64], index: 2, kind: input, shape index: {}]   ;;  %s2410_s3 = inlined_call_operand.vmem [shape: bf16[2048,64], index: 3, kind: output, shape index: {}]  }
   0x1   :  { %s2047_s14 = smov 0  }
   0x2 LB: > { %s32_s15 = sadd.s32 1, %s2015_s13  ;;  %p1601_p0 = scmp.ge.s32.totalorder %s2019_s14, 1  ;;  %s2019_s14 = sphi %s2047_s14, %s13_s14   ;;  %s2015_s13 = sphi %s2045_s13, %s2412_s13   ;;  %s2011_s12 = sphi %s2043_s12, %s2411_s12  }
   0x3   : > { %p34_p1 = scmp.ge.s32.totalorder %s32_s15, 4  ;;  %p191_p2 = scmp.lt.s32.totalorder %s2019_s14, 5 }
   0x5   : > { %s2414_s15 = smov (%p34_p1, %s32_s15), 0  ;;  %p192_p3 = pnand %p1601_p0, %p191_p2 }
   0x6   : > { %v1891_v0 = vld [vmem:[%s2408_s1] sm:$0xff] (!%p192_p3)   ;;  %v2021_v1 = vmov (!%p192_p3), 0   ;;  %v1892_v2 = vld [vmem:[%s2408_s1 + $0x8] sm:$0xff] (!%p192_p3)   ;;  %v1893_v3 = vld [vmem:[%s2408_s1 + $0x10] sm:$0xff] (!%p192_p3)   ;;  %s1602_s22 = sshll.u32 (!%p192_p3), %s2011_s12, 6  ;;  %vm703_vm0 = vcmask (!%p192_p3), 154624  }
   0x7   : > { %195 = sbr.rel (%p192_p3) target bundleno = 388 (0x184), region = 32  ;;  %807 = vmatprep.subr.bf16.mxu0 (!%p192_p3), %v2021_v1  ;;  %1845 = vmatprep.subr.bf16.mxu1 (!%p192_p3), %v2021_v1  ;;  %p236_p4 = scmp.lt.s32.totalorder (!%p192_p3), %s1602_s22, 255  ;;  %v1894_v4 = vld [vmem:[%s2408_s1 + $0x18] sm:$0xff] (!%p192_p3)   ;;  %v1895_v5 = vld [vmem:[%s2408_s1 + $0x20] sm:$0xff] (!%p192_p3)   ;;  %v1896_v8 = vld [vmem:[%s2408_s1 + $0x28] sm:$0xff] (!%p192_p3)   ;;  %vm800_vm1 = vcmask (!%p192_p3), 1040384  }
   0x8   : > { %808 = vmatpush1.bf16.msra.mxu0 (!%p192_p3), %v1891_v0  ;;  %1855 = vmatpush1.bf16.msra.mxu1 (!%p192_p3), %v1891_v0  ;;  %v1897_v9 = vld [vmem:[%s2408_s1 + $0x30] sm:$0xff] (!%p192_p3)   ;;  %v1898_v10 = vld [vmem:[%s2408_s1 + $0x38] sm:$0xff] (!%p192_p3)   ;;  %vm801_vm2 = vcmask (!%p192_p3), 1041408   ;;  %v2022_v11 = vmov (!%p192_p3), 65535   ;;  %v1899_v13 = vld [vmem:[%s2408_s1 + $0x40] sm:$0xff] (!%p192_p3)   ;;  %vm1416_vm3 = vcmask (!%p192_p3), 519168  }
   0x9   : > { %809 = vmatprep.subr.bf16.mxu0 (!%p192_p3), %v2021_v1  ;;  %1846 = vmatprep.subr.bf16.mxu1 (!%p192_p3), %v2021_v1  ;;  %v802_v12 = vsel (!%p192_p3), %vm800_vm1, 4294967295, %v2022_v11  ;;  %v1900_v14 = vld [vmem:[%s2408_s1 + $0x48] ss:$0 sps:$4 sm:$0x33] (!%p192_p3)  }
   0xa   : > { %v803_v15 = vsel (!%p192_p3), %vm801_vm2, %v802_v12, 0 }
   0xb   : > { %v805_v16 = vand.u32 (!%p192_p3), %v1900_v14, %v803_v15  ;;  %v2198_v15 = vld [vmem:[%s2409_s2] ss:$0 sm:$0xff] (!%p192_p3) }
   0xc   : > { %810 = vmatpush1.bf16.msra.mxu0 (!%p192_p3), %v1892_v2  ;;  %1856 = vmatpush1.bf16.msra.mxu1 (!%p192_p3), %v1892_v2 }
   0xd   : > { %811 = vmatprep.subr.bf16.mxu0 (!%p192_p3), %v2021_v1  ;;  %1847 = vmatprep.subr.bf16.mxu1 (!%p192_p3), %v2021_v1 }
   0xe   : > { %s2416_s22 = smov (!%p236_p4, %s1602_s22), 255 }
   0xf   : > { %s1780_s25 = sshll.u32 %s2416_s22, 3  ;;  %s1606_s19 = sshll.u32 %s2416_s22, 2 }
  0x10   : > { %812 = vmatpush1.bf16.msra.mxu0 %v1893_v3  ;;  %1857 = vmatpush1.bf16.msra.mxu1 %v1893_v3  ;;  %s2079_s28 = scalar_lea.vmem %s2407_s0, %s1780_s25  ;;  %s2208_s22 = scalar_lea.vmem %s2410_s3, %s1606_s19 }
  0x11   : > { %813 = vmatprep.subr.bf16.mxu0 %v2021_v1  ;;  %1848 = vmatprep.subr.bf16.mxu1 %v2021_v1  ;;  %v1903_v6 = vld [vmem:[%s2079_s28 + $0x4] ss:$8 sps:$4 sm:$0xff]   ;;  %v1901_v17 = vld [vmem:[%s2079_s28] ss:$8 sps:$4 sm:$0xff]   ;;  %v1907_v19 = vld [vmem:[%s2079_s28 + $0x14] ss:$8 sps:$4 sm:$0xff]  }
  0x12   : > { %v1906_v7 = vld [vmem:[%s2079_s28 + $0x104] ss:$8 sps:$4 sm:$0xff]   ;;  %1682 = vmatprep.mubr.msk.bf16.mxu0 %vm703_vm0, %v1903_v6  ;;  %v1904_v18 = vld [vmem:[%s2079_s28 + $0x100] ss:$8 sps:$4 sm:$0xff]   ;;  %v1909_v20 = vld [vmem:[%s2079_s28 + $0x114] ss:$8 sps:$4 sm:$0xff]  }
  0x13   : > { %1698 = vmatprep.mubr.msk.bf16.mxu1 %vm703_vm0, %v1906_v7  ;;  %v1911_v21 = vld [vmem:[%s2079_s28 + $0x10] ss:$8 sps:$4 sm:$0xff]   ;;  %v1913_v23 = vld [vmem:[%s2079_s28 + $0x24] ss:$8 sps:$4 sm:$0xff]   ;;  %v1917_v25 = vld [vmem:[%s2079_s28 + $0x20] ss:$8 sps:$4 sm:$0xff]  }
  0x14   : > { %814 = vmatpush1.bf16.msra.mxu0 %v1894_v4  ;;  %1858 = vmatpush1.bf16.msra.mxu1 %v1894_v4  ;;  %v1912_v22 = vld [vmem:[%s2079_s28 + $0x110] ss:$8 sps:$4 sm:$0xff]   ;;  %v1915_v24 = vld [vmem:[%s2079_s28 + $0x124] ss:$8 sps:$4 sm:$0xff]   ;;  %v1918_v26 = vld [vmem:[%s2079_s28 + $0x120] ss:$8 sps:$4 sm:$0xff]  }
  0x15   : > { %815 = vmatprep.subr.bf16.mxu0 %v2021_v1  ;;  %1849 = vmatprep.subr.bf16.mxu1 %v2021_v1  ;;  %v1919_v27 = vld [vmem:[%s2079_s28 + $0x34] ss:$8 sps:$4 sm:$0xff]   ;;  %v1923_v29 = vld [vmem:[%s2079_s28 + $0x30] ss:$8 sps:$4 sm:$0xff]   ;;  %v1925_v31 = vld [vmem:[%s2079_s28 + $0x44] ss:$8 sps:$4 sm:$0xff]  }
  0x16   : > { %v1921_v28 = vld [vmem:[%s2079_s28 + $0x134] ss:$8 sps:$4 sm:$0xff]   ;;  %v1924_v30 = vld [vmem:[%s2079_s28 + $0x130] ss:$8 sps:$4 sm:$0xff]   ;;  %v1927_v32 = vld [vmem:[%s2079_s28 + $0x144] ss:$8 sps:$4 sm:$0xff]  }
  0x17   : > { %v1929_v33 = vld [vmem:[%s2079_s28 + $0x40] ss:$8 sps:$4 sm:$0xff]   ;;  %v1931_v35 = vld [vmem:[%s2079_s28 + $0x54] ss:$8 sps:$4 sm:$0xff]   ;;  %v1935_v37 = vld [vmem:[%s2079_s28 + $0x50] ss:$8 sps:$4 sm:$0xff]  }
  0x18   : > { %816 = vmatpush1.bf16.msra.mxu0 %v1895_v5  ;;  %1859 = vmatpush1.bf16.msra.mxu1 %v1895_v5  ;;  %v1930_v34 = vld [vmem:[%s2079_s28 + $0x140] ss:$8 sps:$4 sm:$0xff]   ;;  %v1933_v36 = vld [vmem:[%s2079_s28 + $0x154] ss:$8 sps:$4 sm:$0xff]   ;;  %v1936_v38 = vld [vmem:[%s2079_s28 + $0x150] ss:$8 sps:$4 sm:$0xff]  }
  0x19   : > { %817 = vmatprep.subr.bf16.mxu0 %v2021_v1  ;;  %1850 = vmatprep.subr.bf16.mxu1 %v2021_v1  ;;  %v1937_v39 = vld [vmem:[%s2079_s28 + $0x64] ss:$8 sps:$4 sm:$0xff]   ;;  %v1941_v41 = vld [vmem:[%s2079_s28 + $0x60] ss:$8 sps:$4 sm:$0xff]   ;;  %v1943_v43 = vld [vmem:[%s2079_s28 + $0x74] ss:$8 sps:$4 sm:$0xff]  }
  0x1a   : > { %v1939_v40 = vld [vmem:[%s2079_s28 + $0x164] ss:$8 sps:$4 sm:$0xff]   ;;  %v1942_v42 = vld [vmem:[%s2079_s28 + $0x160] ss:$8 sps:$4 sm:$0xff]   ;;  %v1945_v44 = vld [vmem:[%s2079_s28 + $0x174] ss:$8 sps:$4 sm:$0xff]  }
  0x1b   : > { %v1947_v45 = vld [vmem:[%s2079_s28 + $0x70] ss:$8 sps:$4 sm:$0xff]   ;;  %v1949_v47 = vld [vmem:[%s2079_s28 + $0x84] ss:$8 sps:$4 sm:$0xff]   ;;  %v1953_v49 = vld [vmem:[%s2079_s28 + $0x80] ss:$8 sps:$4 sm:$0xff]  }
  0x1c   : > { %818 = vmatpush1.bf16.msra.mxu0 %v1896_v8  ;;  %1860 = vmatpush1.bf16.msra.mxu1 %v1896_v8  ;;  %v1948_v46 = vld [vmem:[%s2079_s28 + $0x170] ss:$8 sps:$4 sm:$0xff]   ;;  %v1951_v48 = vld [vmem:[%s2079_s28 + $0x184] ss:$8 sps:$4 sm:$0xff]   ;;  %v1954_v50 = vld [vmem:[%s2079_s28 + $0x180] ss:$8 sps:$4 sm:$0xff]  }
  0x1d   : > { %819 = vmatprep.subr.bf16.mxu0 %v2021_v1  ;;  %1851 = vmatprep.subr.bf16.mxu1 %v2021_v1  ;;  %v1955_v51 = vld [vmem:[%s2079_s28 + $0x94] ss:$8 sps:$4 sm:$0xff]   ;;  %v1959_v53 = vld [vmem:[%s2079_s28 + $0x90] ss:$8 sps:$4 sm:$0xff]   ;;  %v1961_v55 = vld [vmem:[%s2079_s28 + $0xa4] ss:$8 sps:$4 sm:$0xff]  }
  0x1e   : > { %v1957_v52 = vld [vmem:[%s2079_s28 + $0x194] ss:$8 sps:$4 sm:$0xff]   ;;  %v1960_v54 = vld [vmem:[%s2079_s28 + $0x190] ss:$8 sps:$4 sm:$0xff]   ;;  %v1963_v56 = vld [vmem:[%s2079_s28 + $0x1a4] ss:$8 sps:$4 sm:$0xff]  }
  0x1f   : > { %v1965_v57 = vld [vmem:[%s2079_s28 + $0xa0] ss:$8 sps:$4 sm:$0xff]   ;;  %v1967_v59 = vld [vmem:[%s2079_s28 + $0xb4] ss:$8 sps:$4 sm:$0xff]   ;;  %v1971_v61 = vld [vmem:[%s2079_s28 + $0xb0] ss:$8 sps:$4 sm:$0xff]  }
  0x20   : > { %820 = vmatpush1.bf16.msra.mxu0 %v1897_v9  ;;  %1861 = vmatpush1.bf16.msra.mxu1 %v1897_v9  ;;  %v1966_v58 = vld [vmem:[%s2079_s28 + $0x1a0] ss:$8 sps:$4 sm:$0xff]   ;;  %v1969_v60 = vld [vmem:[%s2079_s28 + $0x1b4] ss:$8 sps:$4 sm:$0xff]   ;;  %v1972_v62 = vld [vmem:[%s2079_s28 + $0x1b0] ss:$8 sps:$4 sm:$0xff]  }
  0x21   : > { %821 = vmatprep.subr.bf16.mxu0 %v2021_v1  ;;  %1852 = vmatprep.subr.bf16.mxu1 %v2021_v1  ;;  %v1973_v63 = vld [vmem:[%s2079_s28 + $0xc4] ss:$8 sps:$4 sm:$0xff]   ;;  %v1978_v2 = vld [vmem:[%s2079_s28 + $0x1c0] ss:$8 sps:$4 sm:$0xff]   ;;  %v1979_v3 = vld [vmem:[%s2079_s28 + $0xd4] ss:$8 sps:$4 sm:$0xff]  }
  0x22   : > { %v1975_v0 = vld [vmem:[%s2079_s28 + $0x1c4] ss:$8 sps:$4 sm:$0xff]   ;;  %v1981_v4 = vld [vmem:[%s2079_s28 + $0x1d4] ss:$8 sps:$4 sm:$0xff]   ;;  %v1983_v5 = vld [vmem:[%s2079_s28 + $0xd0] ss:$8 sps:$4 sm:$0xff]  }
  0x23   : > { %v1984_v6 = vld [vmem:[%s2079_s28 + $0x1d0] ss:$8 sps:$4 sm:$0xff]   ;;  %v1985_v7 = vld [vmem:[%s2079_s28 + $0xe4] ss:$8 sps:$4 sm:$0xff]   ;;  %v1989_v9 = vld [vmem:[%s2079_s28 + $0xe0] ss:$8 sps:$4 sm:$0xff]  }
  0x24   : > { %822 = vmatpush1.bf16.msra.mxu0 %v1898_v10  ;;  %1862 = vmatpush1.bf16.msra.mxu1 %v1898_v10  ;;  %v1987_v8 = vld [vmem:[%s2079_s28 + $0x1e4] ss:$8 sps:$4 sm:$0xff]   ;;  %v1990_v10 = vld [vmem:[%s2079_s28 + $0x1e0] ss:$8 sps:$4 sm:$0xff]   ;;  %v1991_v11 = vld [vmem:[%s2079_s28 + $0xf4] ss:$8 sps:$4 sm:$0xff]  }
  0x25   : > { %823 = vmatprep.subr.bf16.mxu0 %v2021_v1  ;;  %1853 = vmatprep.subr.bf16.mxu1 %v2021_v1  ;;  %v1993_v12 = vld [vmem:[%s2079_s28 + $0x1f4] ss:$8 sps:$4 sm:$0xff]   ;;  %v1996_v14 = vld [vmem:[%s2079_s28 + $0x1f0] ss:$8 sps:$4 sm:$0xff]  }
  0x28   : > { %824 = vmatpush1.bf16.msra.mxu0 %v1899_v13  ;;  %1863 = vmatpush1.bf16.msra.mxu1 %v1899_v13  ;;  %v1995_v13 = vld [vmem:[%s2079_s28 + $0xf0] ss:$8 sps:$4 sm:$0xff]  }
  0x29   : > { %825 = vmatprep.subr.bf16.mxu0 %v2021_v1  ;;  %1854 = vmatprep.subr.bf16.mxu1 %v2021_v1  ;;  %v1977_v1 = vld [vmem:[%s2079_s28 + $0xc0] ss:$8 sps:$4 sm:$0xff]  }
  0x2c   : > { %826 = vmatpush1.bf16.msra.mxu0 %v805_v16  ;;  %1864 = vmatpush1.bf16.msra.mxu1 %v805_v16 }
  0x2f   : > { %840 = vmatmul.mubr.bf16.vlgmr.msra.gmra.mrb[0].mxu0 %v1901_v17  ;;  %968 = vmatmul.mubr.bf16.vlgmr.msra.gmra.mrb[0].mxu1 %v1904_v18 }
  0x30   : > { %1683 = vmatprep.mubr.msk.bf16.mxu0 %vm703_vm0, %v1907_v19  ;;  %1699 = vmatprep.mubr.msk.bf16.mxu1 %vm703_vm0, %v1909_v20 }
  0x37   : > { %848 = vmatmul.mubr.bf16.gmra.mrb[4].mxu0 %v1911_v21  ;;  %976 = vmatmul.mubr.bf16.gmra.mrb[4].mxu1 %v1912_v22 }
  0x38   : > { %1684 = vmatprep.mubr.msk.bf16.mxu0 %vm703_vm0, %v1913_v23  ;;  %1700 = vmatprep.mubr.msk.bf16.mxu1 %vm703_vm0, %v1915_v24 }
  0x3f   : > { %856 = vmatmul.mubr.bf16.gmra.mrb[8].mxu0 %v1917_v25  ;;  %984 = vmatmul.mubr.bf16.gmra.mrb[8].mxu1 %v1918_v26 }
  0x40   : > { %1685 = vmatprep.mubr.msk.bf16.mxu0 %vm703_vm0, %v1919_v27  ;;  %1701 = vmatprep.mubr.msk.bf16.mxu1 %vm703_vm0, %v1921_v28 }
  0x47   : > { %864 = vmatmul.mubr.bf16.gmra.mrb[12].mxu0 %v1923_v29  ;;  %992 = vmatmul.mubr.bf16.gmra.mrb[12].mxu1 %v1924_v30 }
  0x48   : > { %1686 = vmatprep.mubr.msk.bf16.mxu0 %vm703_vm0, %v1925_v31  ;;  %1702 = vmatprep.mubr.msk.bf16.mxu1 %vm703_vm0, %v1927_v32 }
  0x4f   : > { %872 = vmatmul.mubr.bf16.gmra.mrb[16].mxu0 %v1929_v33  ;;  %1000 = vmatmul.mubr.bf16.gmra.mrb[16].mxu1 %v1930_v34 }
  0x50   : > { %1687 = vmatprep.mubr.msk.bf16.mxu0 %vm703_vm0, %v1931_v35  ;;  %1703 = vmatprep.mubr.msk.bf16.mxu1 %vm703_vm0, %v1933_v36 }
  0x57   : > { %880 = vmatmul.mubr.bf16.gmra.mrb[20].mxu0 %v1935_v37  ;;  %1008 = vmatmul.mubr.bf16.gmra.mrb[20].mxu1 %v1936_v38 }
  0x58   : > { %1688 = vmatprep.mubr.msk.bf16.mxu0 %vm703_vm0, %v1937_v39  ;;  %1704 = vmatprep.mubr.msk.bf16.mxu1 %vm703_vm0, %v1939_v40 }
  0x5f   : > { %888 = vmatmul.mubr.bf16.gmra.mrb[24].mxu0 %v1941_v41  ;;  %1016 = vmatmul.mubr.bf16.gmra.mrb[24].mxu1 %v1942_v42 }
  0x60   : > { %1689 = vmatprep.mubr.msk.bf16.mxu0 %vm703_vm0, %v1943_v43  ;;  %1705 = vmatprep.mubr.msk.bf16.mxu1 %vm703_vm0, %v1945_v44 }
  0x67   : > { %896 = vmatmul.mubr.bf16.gmra.mrb[28].mxu0 %v1947_v45  ;;  %1024 = vmatmul.mubr.bf16.gmra.mrb[28].mxu1 %v1948_v46 }
  0x68   : > { %1690 = vmatprep.mubr.msk.bf16.mxu0 %vm703_vm0, %v1949_v47  ;;  %1706 = vmatprep.mubr.msk.bf16.mxu1 %vm703_vm0, %v1951_v48 }
  0x6f   : > { %904 = vmatmul.mubr.bf16.gmra.mrb[32].mxu0 %v1953_v49  ;;  %1032 = vmatmul.mubr.bf16.gmra.mrb[32].mxu1 %v1954_v50 }
  0x70   : > { %1691 = vmatprep.mubr.msk.bf16.mxu0 %vm703_vm0, %v1955_v51  ;;  %1707 = vmatprep.mubr.msk.bf16.mxu1 %vm703_vm0, %v1957_v52 }
  0x77   : > { %912 = vmatmul.mubr.bf16.gmra.mrb[36].mxu0 %v1959_v53  ;;  %1040 = vmatmul.mubr.bf16.gmra.mrb[36].mxu1 %v1960_v54 }
  0x78   : > { %1692 = vmatprep.mubr.msk.bf16.mxu0 %vm703_vm0, %v1961_v55  ;;  %1708 = vmatprep.mubr.msk.bf16.mxu1 %vm703_vm0, %v1963_v56 }
  0x7f   : > { %920 = vmatmul.mubr.bf16.gmra.mrb[40].mxu0 %v1965_v57  ;;  %1048 = vmatmul.mubr.bf16.gmra.mrb[40].mxu1 %v1966_v58 }
  0x80   : > { %1693 = vmatprep.mubr.msk.bf16.mxu0 %vm703_vm0, %v1967_v59  ;;  %1709 = vmatprep.mubr.msk.bf16.mxu1 %vm703_vm0, %v1969_v60 }
  0x87   : > { %928 = vmatmul.mubr.bf16.gmra.mrb[44].mxu0 %v1971_v61  ;;  %1056 = vmatmul.mubr.bf16.gmra.mrb[44].mxu1 %v1972_v62 }
  0x88   : > { %1694 = vmatprep.mubr.msk.bf16.mxu0 %vm703_vm0, %v1973_v63  ;;  %1710 = vmatprep.mubr.msk.bf16.mxu1 %vm703_vm0, %v1975_v0 }
  0x8f   : > { %936 = vmatmul.mubr.bf16.gmra.mrb[48].mxu0 %v1977_v1  ;;  %1064 = vmatmul.mubr.bf16.gmra.mrb[48].mxu1 %v1978_v2 }
  0x90   : > { %1695 = vmatprep.mubr.msk.bf16.mxu0 %vm703_vm0, %v1979_v3  ;;  %1711 = vmatprep.mubr.msk.bf16.mxu1 %vm703_vm0, %v1981_v4 }
  0x97   : > { %944 = vmatmul.mubr.bf16.gmra.mrb[52].mxu0 %v1983_v5  ;;  %1072 = vmatmul.mubr.bf16.gmra.mrb[52].mxu1 %v1984_v6 }
  0x98   : > { %1696 = vmatprep.mubr.msk.bf16.mxu0 %vm703_vm0, %v1985_v7  ;;  %1712 = vmatprep.mubr.msk.bf16.mxu1 %vm703_vm0, %v1987_v8 }
  0x9f   : > { %952 = vmatmul.mubr.bf16.gmra.mrb[56].mxu0 %v1989_v9  ;;  %1080 = vmatmul.mubr.bf16.gmra.mrb[56].mxu1 %v1990_v10 }
  0xa0   : > { %1697 = vmatprep.mubr.msk.bf16.mxu0 %vm703_vm0, %v1991_v11  ;;  %1713 = vmatprep.mubr.msk.bf16.mxu1 %vm703_vm0, %v1993_v12 }
  0xa7   : > { %960 = vmatmul.mubr.bf16.gmra.mrb[60].mxu0 %v1995_v13  ;;  %1088 = vmatmul.mubr.bf16.gmra.mrb[60].mxu1 %v1996_v14 }
 0x102   : > { %v841_v16 = vpop.f32.mrb[0].mxu0  ;;  %v969_v17 = vpop.f32.mrb[0].mxu1 }
 0x103   : > { %v842_v18 = vadd.f32 %v2198_v15, %v841_v16  ;;  %v970_v19 = vadd.f32 %v2198_v15, %v969_v17  ;;  %v843_v20 = vpop.f32.mrb[1].mxu0  ;;  %v971_v21 = vpop.f32.mrb[1].mxu1 }
 0x104   : > { %v844_v22 = vpop.f32.mrb[2].mxu0  ;;  %v972_v23 = vpop.f32.mrb[2].mxu1 }
 0x105   : > { %v1096_v24 = vmax.f32 %v842_v18, 0.0  ;;  %v1128_v25 = vmax.f32 %v970_v19, 0.0  ;;  %v845_v26 = vadd.f32 %v2198_v15, %v844_v22  ;;  %v973_v27 = vadd.f32 %v2198_v15, %v972_v23  ;;  %v846_v28 = vpop.f32.mrb[3].mxu0  ;;  %v974_v29 = vpop.f32.mrb[3].mxu1 }
 0x107   : > { %v1781_v30 = vpack.c.bf16 %v1096_v24, %v1096_v24  ;;  %v1813_v31 = vpack.c.bf16 %v1128_v25, %v1128_v25  ;;  %v1097_v32 = vmax.f32 %v845_v26, 0.0  ;;  %v1129_v33 = vmax.f32 %v973_v27, 0.0 }
 0x109   : > { %1417 = vst.msk [vmem:[%s2208_s22] sm:$0xf] %vm1416_vm3, %v1781_v30  ;;  %1449 = vst.msk [vmem:[%s2208_s22 + $0x80] sm:$0xf] %vm1416_vm3, %v1813_v31  ;;  %v1782_v34 = vpack.c.bf16 %v1097_v32, %v1097_v32  ;;  %v1814_v35 = vpack.c.bf16 %v1129_v33, %v1129_v33 }
 0x10a   : > { %v849_v36 = vpop.f32.mrb[4].mxu0  ;;  %v977_v37 = vpop.f32.mrb[4].mxu1 }
 0x10b   : > { %1418 = vst.msk [vmem:[%s2208_s22 + $0x4] sm:$0xf] %vm1416_vm3, %v1782_v34  ;;  %1450 = vst.msk [vmem:[%s2208_s22 + $0x84] sm:$0xf] %vm1416_vm3, %v1814_v35  ;;  %v850_v38 = vadd.f32 %v2198_v15, %v849_v36  ;;  %v978_v39 = vadd.f32 %v2198_v15, %v977_v37  ;;  %v851_v40 = vpop.f32.mrb[5].mxu0  ;;  %v979_v41 = vpop.f32.mrb[5].mxu1 }
 0x10c   : > { %v852_v42 = vpop.f32.mrb[6].mxu0  ;;  %v980_v43 = vpop.f32.mrb[6].mxu1 }
 0x10d   : > { %v1098_v44 = vmax.f32 %v850_v38, 0.0  ;;  %v1130_v45 = vmax.f32 %v978_v39, 0.0  ;;  %v853_v46 = vadd.f32 %v2198_v15, %v852_v42  ;;  %v981_v47 = vadd.f32 %v2198_v15, %v980_v43  ;;  %v854_v48 = vpop.f32.mrb[7].mxu0  ;;  %v982_v49 = vpop.f32.mrb[7].mxu1 }
 0x10f   : > { %v1783_v50 = vpack.c.bf16 %v1098_v44, %v1098_v44  ;;  %v1815_v51 = vpack.c.bf16 %v1130_v45, %v1130_v45  ;;  %v1099_v52 = vmax.f32 %v853_v46, 0.0  ;;  %v1131_v53 = vmax.f32 %v981_v47, 0.0 }
 0x111   : > { %1419 = vst.msk [vmem:[%s2208_s22 + $0x8] sm:$0xf] %vm1416_vm3, %v1783_v50  ;;  %1451 = vst.msk [vmem:[%s2208_s22 + $0x88] sm:$0xf] %vm1416_vm3, %v1815_v51  ;;  %v1784_v54 = vpack.c.bf16 %v1099_v52, %v1099_v52  ;;  %v1816_v55 = vpack.c.bf16 %v1131_v53, %v1131_v53 }
 0x112   : > { %v857_v56 = vpop.f32.mrb[8].mxu0  ;;  %v985_v57 = vpop.f32.mrb[8].mxu1 }
 0x113   : > { %1420 = vst.msk [vmem:[%s2208_s22 + $0xc] sm:$0xf] %vm1416_vm3, %v1784_v54  ;;  %1452 = vst.msk [vmem:[%s2208_s22 + $0x8c] sm:$0xf] %vm1416_vm3, %v1816_v55  ;;  %v858_v58 = vadd.f32 %v2198_v15, %v857_v56  ;;  %v986_v59 = vadd.f32 %v2198_v15, %v985_v57  ;;  %v859_v60 = vpop.f32.mrb[9].mxu0  ;;  %v987_v61 = vpop.f32.mrb[9].mxu1 }
 0x114   : > { %v860_v62 = vpop.f32.mrb[10].mxu0  ;;  %v988_v63 = vpop.f32.mrb[10].mxu1 }
 0x115   : > { %v1100_v0 = vmax.f32 %v858_v58, 0.0  ;;  %v1132_v1 = vmax.f32 %v986_v59, 0.0  ;;  %v861_v2 = vadd.f32 %v2198_v15, %v860_v62  ;;  %v989_v3 = vadd.f32 %v2198_v15, %v988_v63  ;;  %v862_v4 = vpop.f32.mrb[11].mxu0  ;;  %v990_v5 = vpop.f32.mrb[11].mxu1 }
 0x117   : > { %v1785_v6 = vpack.c.bf16 %v1100_v0, %v1100_v0  ;;  %v1817_v7 = vpack.c.bf16 %v1132_v1, %v1132_v1  ;;  %v1101_v8 = vmax.f32 %v861_v2, 0.0  ;;  %v1133_v9 = vmax.f32 %v989_v3, 0.0 }
 0x119   : > { %1421 = vst.msk [vmem:[%s2208_s22 + $0x10] sm:$0xf] %vm1416_vm3, %v1785_v6  ;;  %1453 = vst.msk [vmem:[%s2208_s22 + $0x90] sm:$0xf] %vm1416_vm3, %v1817_v7  ;;  %v1786_v10 = vpack.c.bf16 %v1101_v8, %v1101_v8  ;;  %v1818_v11 = vpack.c.bf16 %v1133_v9, %v1133_v9 }
 0x11a   : > { %v865_v12 = vpop.f32.mrb[12].mxu0  ;;  %v993_v13 = vpop.f32.mrb[12].mxu1 }
 0x11b   : > { %1422 = vst.msk [vmem:[%s2208_s22 + $0x14] sm:$0xf] %vm1416_vm3, %v1786_v10  ;;  %1454 = vst.msk [vmem:[%s2208_s22 + $0x94] sm:$0xf] %vm1416_vm3, %v1818_v11  ;;  %v866_v14 = vadd.f32 %v2198_v15, %v865_v12  ;;  %v994_v16 = vadd.f32 %v2198_v15, %v993_v13  ;;  %v867_v17 = vpop.f32.mrb[13].mxu0  ;;  %v995_v18 = vpop.f32.mrb[13].mxu1 }
 0x11c   : > { %v868_v19 = vpop.f32.mrb[14].mxu0  ;;  %v996_v20 = vpop.f32.mrb[14].mxu1 }
 0x11d   : > { %v1102_v21 = vmax.f32 %v866_v14, 0.0  ;;  %v1134_v22 = vmax.f32 %v994_v16, 0.0  ;;  %v869_v23 = vadd.f32 %v2198_v15, %v868_v19  ;;  %v997_v24 = vadd.f32 %v2198_v15, %v996_v20  ;;  %v870_v25 = vpop.f32.mrb[15].mxu0  ;;  %v998_v26 = vpop.f32.mrb[15].mxu1 }
 0x11f   : > { %v1787_v27 = vpack.c.bf16 %v1102_v21, %v1102_v21  ;;  %v1819_v28 = vpack.c.bf16 %v1134_v22, %v1134_v22  ;;  %v1103_v29 = vmax.f32 %v869_v23, 0.0  ;;  %v1135_v30 = vmax.f32 %v997_v24, 0.0 }
 0x121   : > { %1423 = vst.msk [vmem:[%s2208_s22 + $0x18] sm:$0xf] %vm1416_vm3, %v1787_v27  ;;  %1455 = vst.msk [vmem:[%s2208_s22 + $0x98] sm:$0xf] %vm1416_vm3, %v1819_v28  ;;  %v1788_v31 = vpack.c.bf16 %v1103_v29, %v1103_v29  ;;  %v1820_v32 = vpack.c.bf16 %v1135_v30, %v1135_v30 }
 0x122   : > { %v873_v33 = vpop.f32.mrb[16].mxu0  ;;  %v1001_v34 = vpop.f32.mrb[16].mxu1 }
 0x123   : > { %1424 = vst.msk [vmem:[%s2208_s22 + $0x1c] sm:$0xf] %vm1416_vm3, %v1788_v31  ;;  %1456 = vst.msk [vmem:[%s2208_s22 + $0x9c] sm:$0xf] %vm1416_vm3, %v1820_v32  ;;  %v874_v35 = vadd.f32 %v2198_v15, %v873_v33  ;;  %v1002_v36 = vadd.f32 %v2198_v15, %v1001_v34  ;;  %v875_v37 = vpop.f32.mrb[17].mxu0  ;;  %v1003_v38 = vpop.f32.mrb[17].mxu1 }
 0x124   : > { %v876_v39 = vpop.f32.mrb[18].mxu0  ;;  %v1004_v40 = vpop.f32.mrb[18].mxu1 }
 0x125   : > { %v1104_v41 = vmax.f32 %v874_v35, 0.0  ;;  %v1136_v42 = vmax.f32 %v1002_v36, 0.0  ;;  %v877_v43 = vadd.f32 %v2198_v15, %v876_v39  ;;  %v1005_v44 = vadd.f32 %v2198_v15, %v1004_v40  ;;  %v878_v45 = vpop.f32.mrb[19].mxu0  ;;  %v1006_v46 = vpop.f32.mrb[19].mxu1 }
 0x127   : > { %v1789_v47 = vpack.c.bf16 %v1104_v41, %v1104_v41  ;;  %v1821_v48 = vpack.c.bf16 %v1136_v42, %v1136_v42  ;;  %v1105_v49 = vmax.f32 %v877_v43, 0.0  ;;  %v1137_v50 = vmax.f32 %v1005_v44, 0.0 }
 0x129   : > { %1425 = vst.msk [vmem:[%s2208_s22 + $0x20] sm:$0xf] %vm1416_vm3, %v1789_v47  ;;  %1457 = vst.msk [vmem:[%s2208_s22 + $0xa0] sm:$0xf] %vm1416_vm3, %v1821_v48  ;;  %v1790_v51 = vpack.c.bf16 %v1105_v49, %v1105_v49  ;;  %v1822_v52 = vpack.c.bf16 %v1137_v50, %v1137_v50 }
 0x12a   : > { %v881_v53 = vpop.f32.mrb[20].mxu0  ;;  %v1009_v54 = vpop.f32.mrb[20].mxu1 }
 0x12b   : > { %1426 = vst.msk [vmem:[%s2208_s22 + $0x24] sm:$0xf] %vm1416_vm3, %v1790_v51  ;;  %1458 = vst.msk [vmem:[%s2208_s22 + $0xa4] sm:$0xf] %vm1416_vm3, %v1822_v52  ;;  %v882_v55 = vadd.f32 %v2198_v15, %v881_v53  ;;  %v1010_v56 = vadd.f32 %v2198_v15, %v1009_v54  ;;  %v883_v57 = vpop.f32.mrb[21].mxu0  ;;  %v1011_v58 = vpop.f32.mrb[21].mxu1 }
 0x12c   : > { %v884_v59 = vpop.f32.mrb[22].mxu0  ;;  %v1012_v60 = vpop.f32.mrb[22].mxu1 }
 0x12d   : > { %v1106_v61 = vmax.f32 %v882_v55, 0.0  ;;  %v1138_v62 = vmax.f32 %v1010_v56, 0.0  ;;  %v885_v63 = vadd.f32 %v2198_v15, %v884_v59  ;;  %v1013_v0 = vadd.f32 %v2198_v15, %v1012_v60  ;;  %v886_v1 = vpop.f32.mrb[23].mxu0  ;;  %v1014_v2 = vpop.f32.mrb[23].mxu1 }
 0x12f   : > { %v1791_v3 = vpack.c.bf16 %v1106_v61, %v1106_v61  ;;  %v1823_v4 = vpack.c.bf16 %v1138_v62, %v1138_v62  ;;  %v1107_v5 = vmax.f32 %v885_v63, 0.0  ;;  %v1139_v6 = vmax.f32 %v1013_v0, 0.0 }
 0x131   : > { %1427 = vst.msk [vmem:[%s2208_s22 + $0x28] sm:$0xf] %vm1416_vm3, %v1791_v3  ;;  %1459 = vst.msk [vmem:[%s2208_s22 + $0xa8] sm:$0xf] %vm1416_vm3, %v1823_v4  ;;  %v1792_v7 = vpack.c.bf16 %v1107_v5, %v1107_v5  ;;  %v1824_v8 = vpack.c.bf16 %v1139_v6, %v1139_v6 }
 0x132   : > { %v889_v9 = vpop.f32.mrb[24].mxu0  ;;  %v1017_v10 = vpop.f32.mrb[24].mxu1 }
 0x133   : > { %1428 = vst.msk [vmem:[%s2208_s22 + $0x2c] sm:$0xf] %vm1416_vm3, %v1792_v7  ;;  %1460 = vst.msk [vmem:[%s2208_s22 + $0xac] sm:$0xf] %vm1416_vm3, %v1824_v8  ;;  %v890_v11 = vadd.f32 %v2198_v15, %v889_v9  ;;  %v1018_v12 = vadd.f32 %v2198_v15, %v1017_v10  ;;  %v891_v13 = vpop.f32.mrb[25].mxu0  ;;  %v1019_v14 = vpop.f32.mrb[25].mxu1 }
 0x134   : > { %v892_v16 = vpop.f32.mrb[26].mxu0  ;;  %v1020_v17 = vpop.f32.mrb[26].mxu1 }
 0x135   : > { %v1108_v18 = vmax.f32 %v890_v11, 0.0  ;;  %v1140_v19 = vmax.f32 %v1018_v12, 0.0  ;;  %v893_v20 = vadd.f32 %v2198_v15, %v892_v16  ;;  %v1021_v21 = vadd.f32 %v2198_v15, %v1020_v17  ;;  %v894_v22 = vpop.f32.mrb[27].mxu0  ;;  %v1022_v23 = vpop.f32.mrb[27].mxu1 }
 0x137   : > { %v1793_v24 = vpack.c.bf16 %v1108_v18, %v1108_v18  ;;  %v1825_v25 = vpack.c.bf16 %v1140_v19, %v1140_v19  ;;  %v1109_v26 = vmax.f32 %v893_v20, 0.0  ;;  %v1141_v27 = vmax.f32 %v1021_v21, 0.0 }
 0x139   : > { %1429 = vst.msk [vmem:[%s2208_s22 + $0x30] sm:$0xf] %vm1416_vm3, %v1793_v24  ;;  %1461 = vst.msk [vmem:[%s2208_s22 + $0xb0] sm:$0xf] %vm1416_vm3, %v1825_v25  ;;  %v1794_v28 = vpack.c.bf16 %v1109_v26, %v1109_v26  ;;  %v1826_v29 = vpack.c.bf16 %v1141_v27, %v1141_v27 }
 0x13a   : > { %v897_v30 = vpop.f32.mrb[28].mxu0  ;;  %v1025_v31 = vpop.f32.mrb[28].mxu1 }
 0x13b   : > { %1430 = vst.msk [vmem:[%s2208_s22 + $0x34] sm:$0xf] %vm1416_vm3, %v1794_v28  ;;  %1462 = vst.msk [vmem:[%s2208_s22 + $0xb4] sm:$0xf] %vm1416_vm3, %v1826_v29  ;;  %v898_v32 = vadd.f32 %v2198_v15, %v897_v30  ;;  %v1026_v33 = vadd.f32 %v2198_v15, %v1025_v31  ;;  %v899_v34 = vpop.f32.mrb[29].mxu0  ;;  %v1027_v35 = vpop.f32.mrb[29].mxu1 }
 0x13c   : > { %v900_v36 = vpop.f32.mrb[30].mxu0  ;;  %v1028_v37 = vpop.f32.mrb[30].mxu1 }
 0x13d   : > { %v1110_v38 = vmax.f32 %v898_v32, 0.0  ;;  %v1142_v39 = vmax.f32 %v1026_v33, 0.0  ;;  %v901_v40 = vadd.f32 %v2198_v15, %v900_v36  ;;  %v1029_v41 = vadd.f32 %v2198_v15, %v1028_v37  ;;  %v902_v42 = vpop.f32.mrb[31].mxu0  ;;  %v1030_v43 = vpop.f32.mrb[31].mxu1 }
 0x13f   : > { %v1795_v44 = vpack.c.bf16 %v1110_v38, %v1110_v38  ;;  %v1827_v45 = vpack.c.bf16 %v1142_v39, %v1142_v39  ;;  %v1111_v46 = vmax.f32 %v901_v40, 0.0  ;;  %v1143_v47 = vmax.f32 %v1029_v41, 0.0 }
 0x141   : > { %1431 = vst.msk [vmem:[%s2208_s22 + $0x38] sm:$0xf] %vm1416_vm3, %v1795_v44  ;;  %1463 = vst.msk [vmem:[%s2208_s22 + $0xb8] sm:$0xf] %vm1416_vm3, %v1827_v45  ;;  %v1796_v48 = vpack.c.bf16 %v1111_v46, %v1111_v46  ;;  %v1828_v49 = vpack.c.bf16 %v1143_v47, %v1143_v47 }
 0x142   : > { %v905_v50 = vpop.f32.mrb[32].mxu0  ;;  %v1033_v51 = vpop.f32.mrb[32].mxu1 }
 0x143   : > { %1432 = vst.msk [vmem:[%s2208_s22 + $0x3c] sm:$0xf] %vm1416_vm3, %v1796_v48  ;;  %1464 = vst.msk [vmem:[%s2208_s22 + $0xbc] sm:$0xf] %vm1416_vm3, %v1828_v49  ;;  %v906_v52 = vadd.f32 %v2198_v15, %v905_v50  ;;  %v1034_v53 = vadd.f32 %v2198_v15, %v1033_v51  ;;  %v907_v54 = vpop.f32.mrb[33].mxu0  ;;  %v1035_v55 = vpop.f32.mrb[33].mxu1 }
 0x144   : > { %v908_v56 = vpop.f32.mrb[34].mxu0  ;;  %v1036_v57 = vpop.f32.mrb[34].mxu1 }
 0x145   : > { %v1112_v58 = vmax.f32 %v906_v52, 0.0  ;;  %v1144_v59 = vmax.f32 %v1034_v53, 0.0  ;;  %v909_v60 = vadd.f32 %v2198_v15, %v908_v56  ;;  %v1037_v61 = vadd.f32 %v2198_v15, %v1036_v57  ;;  %v910_v62 = vpop.f32.mrb[35].mxu0  ;;  %v1038_v63 = vpop.f32.mrb[35].mxu1 }
 0x147   : > { %v1797_v0 = vpack.c.bf16 %v1112_v58, %v1112_v58  ;;  %v1829_v1 = vpack.c.bf16 %v1144_v59, %v1144_v59  ;;  %v1113_v2 = vmax.f32 %v909_v60, 0.0  ;;  %v1145_v3 = vmax.f32 %v1037_v61, 0.0 }
 0x149   : > { %1433 = vst.msk [vmem:[%s2208_s22 + $0x40] sm:$0xf] %vm1416_vm3, %v1797_v0  ;;  %1465 = vst.msk [vmem:[%s2208_s22 + $0xc0] sm:$0xf] %vm1416_vm3, %v1829_v1  ;;  %v1798_v4 = vpack.c.bf16 %v1113_v2, %v1113_v2  ;;  %v1830_v5 = vpack.c.bf16 %v1145_v3, %v1145_v3 }
 0x14a   : > { %v913_v6 = vpop.f32.mrb[36].mxu0  ;;  %v1041_v7 = vpop.f32.mrb[36].mxu1 }
 0x14b   : > { %1434 = vst.msk [vmem:[%s2208_s22 + $0x44] sm:$0xf] %vm1416_vm3, %v1798_v4  ;;  %1466 = vst.msk [vmem:[%s2208_s22 + $0xc4] sm:$0xf] %vm1416_vm3, %v1830_v5  ;;  %v914_v8 = vadd.f32 %v2198_v15, %v913_v6  ;;  %v1042_v9 = vadd.f32 %v2198_v15, %v1041_v7  ;;  %v915_v10 = vpop.f32.mrb[37].mxu0  ;;  %v1043_v11 = vpop.f32.mrb[37].mxu1 }
 0x14c   : > { %v916_v12 = vpop.f32.mrb[38].mxu0  ;;  %v1044_v13 = vpop.f32.mrb[38].mxu1 }
 0x14d   : > { %v1114_v14 = vmax.f32 %v914_v8, 0.0  ;;  %v1146_v16 = vmax.f32 %v1042_v9, 0.0  ;;  %v917_v17 = vadd.f32 %v2198_v15, %v916_v12  ;;  %v1045_v18 = vadd.f32 %v2198_v15, %v1044_v13  ;;  %v918_v19 = vpop.f32.mrb[39].mxu0  ;;  %v1046_v20 = vpop.f32.mrb[39].mxu1 }
 0x14f   : > { %v1799_v21 = vpack.c.bf16 %v1114_v14, %v1114_v14  ;;  %v1831_v22 = vpack.c.bf16 %v1146_v16, %v1146_v16  ;;  %v1115_v23 = vmax.f32 %v917_v17, 0.0  ;;  %v1147_v24 = vmax.f32 %v1045_v18, 0.0 }
 0x151   : > { %1435 = vst.msk [vmem:[%s2208_s22 + $0x48] sm:$0xf] %vm1416_vm3, %v1799_v21  ;;  %1467 = vst.msk [vmem:[%s2208_s22 + $0xc8] sm:$0xf] %vm1416_vm3, %v1831_v22  ;;  %v1800_v25 = vpack.c.bf16 %v1115_v23, %v1115_v23  ;;  %v1832_v26 = vpack.c.bf16 %v1147_v24, %v1147_v24 }
 0x152   : > { %v921_v27 = vpop.f32.mrb[40].mxu0  ;;  %v1049_v28 = vpop.f32.mrb[40].mxu1 }
 0x153   : > { %1436 = vst.msk [vmem:[%s2208_s22 + $0x4c] sm:$0xf] %vm1416_vm3, %v1800_v25  ;;  %1468 = vst.msk [vmem:[%s2208_s22 + $0xcc] sm:$0xf] %vm1416_vm3, %v1832_v26  ;;  %v922_v29 = vadd.f32 %v2198_v15, %v921_v27  ;;  %v1050_v30 = vadd.f32 %v2198_v15, %v1049_v28  ;;  %v923_v31 = vpop.f32.mrb[41].mxu0  ;;  %v1051_v32 = vpop.f32.mrb[41].mxu1 }
 0x154   : > { %v924_v33 = vpop.f32.mrb[42].mxu0  ;;  %v1052_v34 = vpop.f32.mrb[42].mxu1 }
 0x155   : > { %v1116_v35 = vmax.f32 %v922_v29, 0.0  ;;  %v1148_v36 = vmax.f32 %v1050_v30, 0.0  ;;  %v925_v37 = vadd.f32 %v2198_v15, %v924_v33  ;;  %v1053_v38 = vadd.f32 %v2198_v15, %v1052_v34  ;;  %v926_v39 = vpop.f32.mrb[43].mxu0  ;;  %v1054_v40 = vpop.f32.mrb[43].mxu1 }
 0x157   : > { %v1801_v41 = vpack.c.bf16 %v1116_v35, %v1116_v35  ;;  %v1833_v42 = vpack.c.bf16 %v1148_v36, %v1148_v36  ;;  %v1117_v43 = vmax.f32 %v925_v37, 0.0  ;;  %v1149_v44 = vmax.f32 %v1053_v38, 0.0 }
 0x159   : > { %1437 = vst.msk [vmem:[%s2208_s22 + $0x50] sm:$0xf] %vm1416_vm3, %v1801_v41  ;;  %1469 = vst.msk [vmem:[%s2208_s22 + $0xd0] sm:$0xf] %vm1416_vm3, %v1833_v42  ;;  %v1802_v45 = vpack.c.bf16 %v1117_v43, %v1117_v43  ;;  %v1834_v46 = vpack.c.bf16 %v1149_v44, %v1149_v44 }
 0x15a   : > { %v929_v47 = vpop.f32.mrb[44].mxu0  ;;  %v1057_v48 = vpop.f32.mrb[44].mxu1 }
 0x15b   : > { %1438 = vst.msk [vmem:[%s2208_s22 + $0x54] sm:$0xf] %vm1416_vm3, %v1802_v45  ;;  %1470 = vst.msk [vmem:[%s2208_s22 + $0xd4] sm:$0xf] %vm1416_vm3, %v1834_v46  ;;  %v930_v49 = vadd.f32 %v2198_v15, %v929_v47  ;;  %v1058_v50 = vadd.f32 %v2198_v15, %v1057_v48  ;;  %v931_v51 = vpop.f32.mrb[45].mxu0  ;;  %v1059_v52 = vpop.f32.mrb[45].mxu1 }
 0x15c   : > { %v932_v53 = vpop.f32.mrb[46].mxu0  ;;  %v1060_v54 = vpop.f32.mrb[46].mxu1 }
 0x15d   : > { %v1118_v55 = vmax.f32 %v930_v49, 0.0  ;;  %v1150_v56 = vmax.f32 %v1058_v50, 0.0  ;;  %v933_v57 = vadd.f32 %v2198_v15, %v932_v53  ;;  %v1061_v58 = vadd.f32 %v2198_v15, %v1060_v54  ;;  %v934_v59 = vpop.f32.mrb[47].mxu0  ;;  %v1062_v60 = vpop.f32.mrb[47].mxu1 }
 0x15f   : > { %v1803_v61 = vpack.c.bf16 %v1118_v55, %v1118_v55  ;;  %v1835_v62 = vpack.c.bf16 %v1150_v56, %v1150_v56  ;;  %v1119_v63 = vmax.f32 %v933_v57, 0.0  ;;  %v1151_v0 = vmax.f32 %v1061_v58, 0.0 }
 0x161   : > { %1439 = vst.msk [vmem:[%s2208_s22 + $0x58] sm:$0xf] %vm1416_vm3, %v1803_v61  ;;  %1471 = vst.msk [vmem:[%s2208_s22 + $0xd8] sm:$0xf] %vm1416_vm3, %v1835_v62  ;;  %v1804_v1 = vpack.c.bf16 %v1119_v63, %v1119_v63  ;;  %v1836_v2 = vpack.c.bf16 %v1151_v0, %v1151_v0 }
 0x162   : > { %v937_v3 = vpop.f32.mrb[48].mxu0  ;;  %v1065_v4 = vpop.f32.mrb[48].mxu1 }
 0x163   : > { %1440 = vst.msk [vmem:[%s2208_s22 + $0x5c] sm:$0xf] %vm1416_vm3, %v1804_v1  ;;  %1472 = vst.msk [vmem:[%s2208_s22 + $0xdc] sm:$0xf] %vm1416_vm3, %v1836_v2  ;;  %v938_v5 = vadd.f32 %v2198_v15, %v937_v3  ;;  %v1066_v6 = vadd.f32 %v2198_v15, %v1065_v4  ;;  %v939_v7 = vpop.f32.mrb[49].mxu0  ;;  %v1067_v8 = vpop.f32.mrb[49].mxu1 }
 0x164   : > { %v940_v9 = vpop.f32.mrb[50].mxu0  ;;  %v1068_v10 = vpop.f32.mrb[50].mxu1 }
 0x165   : > { %v1120_v11 = vmax.f32 %v938_v5, 0.0  ;;  %v1152_v12 = vmax.f32 %v1066_v6, 0.0  ;;  %v941_v13 = vadd.f32 %v2198_v15, %v940_v9  ;;  %v1069_v14 = vadd.f32 %v2198_v15, %v1068_v10  ;;  %v942_v16 = vpop.f32.mrb[51].mxu0  ;;  %v1070_v17 = vpop.f32.mrb[51].mxu1 }
 0x167   : > { %v1805_v18 = vpack.c.bf16 %v1120_v11, %v1120_v11  ;;  %v1837_v19 = vpack.c.bf16 %v1152_v12, %v1152_v12  ;;  %v1121_v20 = vmax.f32 %v941_v13, 0.0  ;;  %v1153_v21 = vmax.f32 %v1069_v14, 0.0 }
 0x169   : > { %1441 = vst.msk [vmem:[%s2208_s22 + $0x60] sm:$0xf] %vm1416_vm3, %v1805_v18  ;;  %1473 = vst.msk [vmem:[%s2208_s22 + $0xe0] sm:$0xf] %vm1416_vm3, %v1837_v19  ;;  %v1806_v22 = vpack.c.bf16 %v1121_v20, %v1121_v20  ;;  %v1838_v23 = vpack.c.bf16 %v1153_v21, %v1153_v21 }
 0x16a   : > { %v945_v24 = vpop.f32.mrb[52].mxu0  ;;  %v1073_v25 = vpop.f32.mrb[52].mxu1 }
 0x16b   : > { %1442 = vst.msk [vmem:[%s2208_s22 + $0x64] sm:$0xf] %vm1416_vm3, %v1806_v22  ;;  %1474 = vst.msk [vmem:[%s2208_s22 + $0xe4] sm:$0xf] %vm1416_vm3, %v1838_v23  ;;  %v946_v26 = vadd.f32 %v2198_v15, %v945_v24  ;;  %v1074_v27 = vadd.f32 %v2198_v15, %v1073_v25  ;;  %v947_v28 = vpop.f32.mrb[53].mxu0  ;;  %v1075_v29 = vpop.f32.mrb[53].mxu1 }
 0x16c   : > { %v948_v30 = vpop.f32.mrb[54].mxu0  ;;  %v1076_v31 = vpop.f32.mrb[54].mxu1 }
 0x16d   : > { %v1122_v32 = vmax.f32 %v946_v26, 0.0  ;;  %v1154_v33 = vmax.f32 %v1074_v27, 0.0  ;;  %v949_v34 = vadd.f32 %v2198_v15, %v948_v30  ;;  %v1077_v35 = vadd.f32 %v2198_v15, %v1076_v31  ;;  %v950_v36 = vpop.f32.mrb[55].mxu0  ;;  %v1078_v37 = vpop.f32.mrb[55].mxu1 }
 0x16f   : > { %v1807_v38 = vpack.c.bf16 %v1122_v32, %v1122_v32  ;;  %v1839_v39 = vpack.c.bf16 %v1154_v33, %v1154_v33  ;;  %v1123_v40 = vmax.f32 %v949_v34, 0.0  ;;  %v1155_v41 = vmax.f32 %v1077_v35, 0.0 }
 0x171   : > { %1443 = vst.msk [vmem:[%s2208_s22 + $0x68] sm:$0xf] %vm1416_vm3, %v1807_v38  ;;  %1475 = vst.msk [vmem:[%s2208_s22 + $0xe8] sm:$0xf] %vm1416_vm3, %v1839_v39  ;;  %v1808_v42 = vpack.c.bf16 %v1123_v40, %v1123_v40  ;;  %v1840_v43 = vpack.c.bf16 %v1155_v41, %v1155_v41 }
 0x172   : > { %v953_v44 = vpop.f32.mrb[56].mxu0  ;;  %v1081_v45 = vpop.f32.mrb[56].mxu1 }
 0x173   : > { %1444 = vst.msk [vmem:[%s2208_s22 + $0x6c] sm:$0xf] %vm1416_vm3, %v1808_v42  ;;  %1476 = vst.msk [vmem:[%s2208_s22 + $0xec] sm:$0xf] %vm1416_vm3, %v1840_v43  ;;  %v954_v46 = vadd.f32 %v2198_v15, %v953_v44  ;;  %v1082_v47 = vadd.f32 %v2198_v15, %v1081_v45  ;;  %v955_v48 = vpop.f32.mrb[57].mxu0  ;;  %v1083_v49 = vpop.f32.mrb[57].mxu1 }
 0x174   : > { %v956_v50 = vpop.f32.mrb[58].mxu0  ;;  %v1084_v51 = vpop.f32.mrb[58].mxu1 }
 0x175   : > { %v1124_v52 = vmax.f32 %v954_v46, 0.0  ;;  %v1156_v53 = vmax.f32 %v1082_v47, 0.0  ;;  %v957_v54 = vadd.f32 %v2198_v15, %v956_v50  ;;  %v1085_v55 = vadd.f32 %v2198_v15, %v1084_v51  ;;  %v958_v56 = vpop.f32.mrb[59].mxu0  ;;  %v1086_v57 = vpop.f32.mrb[59].mxu1 }
 0x177   : > { %v1809_v58 = vpack.c.bf16 %v1124_v52, %v1124_v52  ;;  %v1841_v59 = vpack.c.bf16 %v1156_v53, %v1156_v53  ;;  %v1125_v60 = vmax.f32 %v957_v54, 0.0  ;;  %v1157_v61 = vmax.f32 %v1085_v55, 0.0 }
 0x179   : > { %1445 = vst.msk [vmem:[%s2208_s22 + $0x70] sm:$0xf] %vm1416_vm3, %v1809_v58  ;;  %1477 = vst.msk [vmem:[%s2208_s22 + $0xf0] sm:$0xf] %vm1416_vm3, %v1841_v59  ;;  %v1810_v62 = vpack.c.bf16 %v1125_v60, %v1125_v60  ;;  %v1842_v63 = vpack.c.bf16 %v1157_v61, %v1157_v61 }
 0x17a   : > { %v961_v0 = vpop.f32.mrb[60].mxu0  ;;  %v1089_v1 = vpop.f32.mrb[60].mxu1 }
 0x17b   : > { %1446 = vst.msk [vmem:[%s2208_s22 + $0x74] sm:$0xf] %vm1416_vm3, %v1810_v62  ;;  %1478 = vst.msk [vmem:[%s2208_s22 + $0xf4] sm:$0xf] %vm1416_vm3, %v1842_v63  ;;  %v962_v2 = vadd.f32 %v2198_v15, %v961_v0  ;;  %v1090_v3 = vadd.f32 %v2198_v15, %v1089_v1  ;;  %v963_v4 = vpop.f32.mrb[61].mxu0  ;;  %v1091_v5 = vpop.f32.mrb[61].mxu1 }
 0x17c   : > { %v964_v6 = vpop.f32.mrb[62].mxu0  ;;  %v1092_v7 = vpop.f32.mrb[62].mxu1 }
 0x17d   : > { %v1126_v8 = vmax.f32 %v962_v2, 0.0  ;;  %v1158_v9 = vmax.f32 %v1090_v3, 0.0  ;;  %v965_v10 = vadd.f32 %v2198_v15, %v964_v6  ;;  %v1093_v11 = vadd.f32 %v2198_v15, %v1092_v7  ;;  %v966_v12 = vpop.f32.mrb[63].mxu0  ;;  %v1094_v13 = vpop.f32.mrb[63].mxu1 }
 0x17f   : > { %v1811_v14 = vpack.c.bf16 %v1126_v8, %v1126_v8  ;;  %v1843_v16 = vpack.c.bf16 %v1158_v9, %v1158_v9  ;;  %v1127_v17 = vmax.f32 %v965_v10, 0.0  ;;  %v1159_v18 = vmax.f32 %v1093_v11, 0.0 }
 0x181   : > { %1447 = vst.msk [vmem:[%s2208_s22 + $0x78] sm:$0xf] %vm1416_vm3, %v1811_v14  ;;  %1479 = vst.msk [vmem:[%s2208_s22 + $0xf8] sm:$0xf] %vm1416_vm3, %v1843_v16  ;;  %v1812_v19 = vpack.c.bf16 %v1127_v17, %v1127_v17  ;;  %v1844_v20 = vpack.c.bf16 %v1159_v18, %v1159_v18 }
 0x183   : > { %1448 = vst.msk [vmem:[%s2208_s22 + $0x7c] sm:$0xf] %vm1416_vm3, %v1812_v19  ;;  %1480 = vst.msk [vmem:[%s2208_s22 + $0xfc] sm:$0xf] %vm1416_vm3, %v1844_v20 }
 0x184 PF: > { %s13_s14 = sadd.s32 1, %s2019_s14   ;;  %s2411_s12 = smov %s2015_s13 }
 0x185   : > { %p10_p5 = scmp.ge.s32.totalorder %s13_s14, 6   ;;  %s2412_s13 = smov %s2414_s15 }
 0x187   :  { %12 = sbr.rel (!%p10_p5) target bundleno = 2 (0x2), region = 68 }

// kernel: fcn_forward.20
= control target key start
LH: loop header
LB: loop body
LE: loop exit
PB: predicated region body
PF: predicated region fallthrough
CT: control target
= control target key end

     0   :  { %s2284_s6 = smov 0   ;;  %s2286_s7 = smov 0   ;;  %s2987_s0 = inlined_call_operand.vmem [shape: bf16[9,512,64], index: 0, kind: input, shape index: {}]   ;;  %s2988_s1 = inlined_call_operand.vmem [shape: bf16[512,64], index: 1, kind: output, shape index: {}]  }
   0x1   :  { %s2288_s8 = smov 0  }
   0x2 LB: > { %s1956_s9 = sadd.s32 4294967295, %s2272_s8   ;;  %s2301_s10 = sadd.s32 1, %s2272_s8   ;;  %s2272_s8 = sphi %s2288_s8, %s2991_s8   ;;  %s2268_s7 = sphi %s2286_s7, %s2990_s7   ;;  %s2264_s6 = sphi %s2284_s6, %s2989_s6  }
   0x3   : > { %s15_s11 = ssub.s32 %s2272_s8, %s2301_s10  ;;  %s18_s12 = sadd.s32 1, %s2268_s7 }
   0x4   : > { %p16_p0 = scmp.eq.s32.totalorder %s15_s11, 0  ;;  %p25_p1 = scmp.ne.s32.totalorder %s2268_s7, %s2264_s6 }
   0x5   : > { %p26_p2 = scmp.eq.s32.totalorder %s2272_s8, 0  ;;  %p1959_p4 = scmp.ge.s32.totalorder %s2272_s8, 2 }
   0x6   : > { %s2310_s13 = scalar_select %p16_p0, %s2268_s7, %s18_s12  }
   0x7   : > { %p27_p3 = por %p26_p2, %p25_p1  ;;  %77 = sbr.rel (%p1959_p4) target bundleno = 91 (0x5b), region = 16 }
   0xe   : > { %80 = sbr.rel (!%p27_p3) target bundleno = 91 (0x5b), region = 20  ;;  %s82_s14 = sand.u32 (%p27_p3), 1, %s2268_s7  }
   0xf   : > { %s2223_s15 = sshll.u32 (%p27_p3), %s2272_s8, 7  ;;  %s2224_s16 = smul.u32 (%p27_p3), 1152, %s82_s14 }
  0x10   : > { %s2318_s19 = scalar_lea.vmem (%p27_p3), %s2987_s0, %s2223_s15 }
  0x11   : > { %v103_v0 = vld [vmem:[%s2318_s19] sm:$0xff] (%p27_p3)   ;;  %v107_v1 = vld [vmem:[%s2318_s19 + $0x8] sm:$0xff] (%p27_p3)   ;;  %v111_v2 = vld [vmem:[%s2318_s19 + $0x10] sm:$0xff] (%p27_p3)   ;;  %s2326_s20 = scalar_lea.vmem (%p27_p3), [#allocation2], %s2224_s16 }
  0x12   : > { %v115_v3 = vld [vmem:[%s2318_s19 + $0x18] sm:$0xff] (%p27_p3)   ;;  %v119_v4 = vld [vmem:[%s2318_s19 + $0x20] sm:$0xff] (%p27_p3)   ;;  %v123_v5 = vld [vmem:[%s2318_s19 + $0x28] sm:$0xff] (%p27_p3)   ;;  %104 = vst [vmem:[%s2326_s20] sm:$0xff] (%p27_p3), %v103_v0  }
  0x13   : > { %108 = vst [vmem:[%s2326_s20 + $0x8] sm:$0xff] (%p27_p3), %v107_v1   ;;  %112 = vst [vmem:[%s2326_s20 + $0x10] sm:$0xff] (%p27_p3), %v111_v2   ;;  %v127_v6 = vld [vmem:[%s2318_s19 + $0x30] sm:$0xff] (%p27_p3)   ;;  %v131_v7 = vld [vmem:[%s2318_s19 + $0x38] sm:$0xff] (%p27_p3)  }
  0x14   : > { %116 = vst [vmem:[%s2326_s20 + $0x18] sm:$0xff] (%p27_p3), %v115_v3   ;;  %120 = vst [vmem:[%s2326_s20 + $0x20] sm:$0xff] (%p27_p3), %v119_v4   ;;  %v135_v8 = vld [vmem:[%s2318_s19 + $0x40] sm:$0xff] (%p27_p3)   ;;  %v139_v9 = vld [vmem:[%s2318_s19 + $0x48] sm:$0xff] (%p27_p3)  }
  0x15   : > { %124 = vst [vmem:[%s2326_s20 + $0x28] sm:$0xff] %v123_v5   ;;  %128 = vst [vmem:[%s2326_s20 + $0x30] sm:$0xff] %v127_v6   ;;  %v143_v10 = vld [vmem:[%s2318_s19 + $0x50] sm:$0xff]   ;;  %v147_v11 = vld [vmem:[%s2318_s19 + $0x58] sm:$0xff]  }
  0x16   : > { %132 = vst [vmem:[%s2326_s20 + $0x38] sm:$0xff] %v131_v7   ;;  %136 = vst [vmem:[%s2326_s20 + $0x40] sm:$0xff] %v135_v8   ;;  %v151_v12 = vld [vmem:[%s2318_s19 + $0x60] sm:$0xff]   ;;  %v155_v13 = vld [vmem:[%s2318_s19 + $0x68] sm:$0xff]  }
  0x17   : > { %140 = vst [vmem:[%s2326_s20 + $0x48] sm:$0xff] %v139_v9   ;;  %144 = vst [vmem:[%s2326_s20 + $0x50] sm:$0xff] %v143_v10   ;;  %v159_v14 = vld [vmem:[%s2318_s19 + $0x70] sm:$0xff]   ;;  %v163_v15 = vld [vmem:[%s2318_s19 + $0x78] sm:$0xff]  }
  0x18   : > { %148 = vst [vmem:[%s2326_s20 + $0x58] sm:$0xff] %v147_v11   ;;  %152 = vst [vmem:[%s2326_s20 + $0x60] sm:$0xff] %v151_v12   ;;  %v167_v16 = vld [vmem:[%s2318_s19 + $0x100] sm:$0xff]   ;;  %v171_v17 = vld [vmem:[%s2318_s19 + $0x108] sm:$0xff]  }
  0x19   : > { %156 = vst [vmem:[%s2326_s20 + $0x68] sm:$0xff] %v155_v13   ;;  %160 = vst [vmem:[%s2326_s20 + $0x70] sm:$0xff] %v159_v14   ;;  %v175_v18 = vld [vmem:[%s2318_s19 + $0x110] sm:$0xff]   ;;  %v179_v19 = vld [vmem:[%s2318_s19 + $0x118] sm:$0xff]  }
  0x1a   : > { %164 = vst [vmem:[%s2326_s20 + $0x78] sm:$0xff] %v163_v15   ;;  %168 = vst [vmem:[%s2326_s20 + $0x80] sm:$0xff] %v167_v16   ;;  %v183_v20 = vld [vmem:[%s2318_s19 + $0x120] sm:$0xff]   ;;  %v187_v21 = vld [vmem:[%s2318_s19 + $0x128] sm:$0xff]  }
  0x1b   : > { %172 = vst [vmem:[%s2326_s20 + $0x88] sm:$0xff] %v171_v17   ;;  %176 = vst [vmem:[%s2326_s20 + $0x90] sm:$0xff] %v175_v18   ;;  %v191_v22 = vld [vmem:[%s2318_s19 + $0x130] sm:$0xff]   ;;  %v195_v23 = vld [vmem:[%s2318_s19 + $0x138] sm:$0xff]  }
  0x1c   : > { %180 = vst [vmem:[%s2326_s20 + $0x98] sm:$0xff] %v179_v19   ;;  %184 = vst [vmem:[%s2326_s20 + $0xa0] sm:$0xff] %v183_v20   ;;  %v199_v24 = vld [vmem:[%s2318_s19 + $0x140] sm:$0xff]   ;;  %v203_v25 = vld [vmem:[%s2318_s19 + $0x148] sm:$0xff]  }
  0x1d   : > { %188 = vst [vmem:[%s2326_s20 + $0xa8] sm:$0xff] %v187_v21   ;;  %192 = vst [vmem:[%s2326_s20 + $0xb0] sm:$0xff] %v191_v22   ;;  %v207_v26 = vld [vmem:[%s2318_s19 + $0x150] sm:$0xff]   ;;  %v211_v27 = vld [vmem:[%s2318_s19 + $0x158] sm:$0xff]  }
  0x1e   : > { %196 = vst [vmem:[%s2326_s20 + $0xb8] sm:$0xff] %v195_v23   ;;  %200 = vst [vmem:[%s2326_s20 + $0xc0] sm:$0xff] %v199_v24   ;;  %v215_v28 = vld [vmem:[%s2318_s19 + $0x160] sm:$0xff]   ;;  %v219_v29 = vld [vmem:[%s2318_s19 + $0x168] sm:$0xff]  }
  0x1f   : > { %204 = vst [vmem:[%s2326_s20 + $0xc8] sm:$0xff] %v203_v25   ;;  %208 = vst [vmem:[%s2326_s20 + $0xd0] sm:$0xff] %v207_v26   ;;  %v223_v30 = vld [vmem:[%s2318_s19 + $0x170] sm:$0xff]   ;;  %v227_v31 = vld [vmem:[%s2318_s19 + $0x178] sm:$0xff]  }
  0x20   : > { %212 = vst [vmem:[%s2326_s20 + $0xd8] sm:$0xff] %v211_v27   ;;  %216 = vst [vmem:[%s2326_s20 + $0xe0] sm:$0xff] %v215_v28   ;;  %v231_v32 = vld [vmem:[%s2318_s19 + $0x200] sm:$0xff]   ;;  %v235_v33 = vld [vmem:[%s2318_s19 + $0x208] sm:$0xff]  }
  0x21   : > { %220 = vst [vmem:[%s2326_s20 + $0xe8] sm:$0xff] %v219_v29   ;;  %224 = vst [vmem:[%s2326_s20 + $0xf0] sm:$0xff] %v223_v30   ;;  %v239_v34 = vld [vmem:[%s2318_s19 + $0x210] sm:$0xff]   ;;  %v243_v35 = vld [vmem:[%s2318_s19 + $0x218] sm:$0xff]  }
  0x22   : > { %228 = vst [vmem:[%s2326_s20 + $0xf8] sm:$0xff] %v227_v31   ;;  %232 = vst [vmem:[%s2326_s20 + $0x100] sm:$0xff] %v231_v32   ;;  %v247_v36 = vld [vmem:[%s2318_s19 + $0x220] sm:$0xff]   ;;  %v251_v37 = vld [vmem:[%s2318_s19 + $0x228] sm:$0xff]  }
  0x23   : > { %236 = vst [vmem:[%s2326_s20 + $0x108] sm:$0xff] %v235_v33   ;;  %240 = vst [vmem:[%s2326_s20 + $0x110] sm:$0xff] %v239_v34   ;;  %v255_v38 = vld [vmem:[%s2318_s19 + $0x230] sm:$0xff]   ;;  %v259_v39 = vld [vmem:[%s2318_s19 + $0x238] sm:$0xff]  }
  0x24   : > { %244 = vst [vmem:[%s2326_s20 + $0x118] sm:$0xff] %v243_v35   ;;  %248 = vst [vmem:[%s2326_s20 + $0x120] sm:$0xff] %v247_v36   ;;  %v263_v40 = vld [vmem:[%s2318_s19 + $0x240] sm:$0xff]   ;;  %v267_v41 = vld [vmem:[%s2318_s19 + $0x248] sm:$0xff]  }
  0x25   : > { %252 = vst [vmem:[%s2326_s20 + $0x128] sm:$0xff] %v251_v37   ;;  %256 = vst [vmem:[%s2326_s20 + $0x130] sm:$0xff] %v255_v38   ;;  %v271_v42 = vld [vmem:[%s2318_s19 + $0x250] sm:$0xff]   ;;  %v275_v43 = vld [vmem:[%s2318_s19 + $0x258] sm:$0xff]  }
  0x26   : > { %260 = vst [vmem:[%s2326_s20 + $0x138] sm:$0xff] %v259_v39   ;;  %264 = vst [vmem:[%s2326_s20 + $0x140] sm:$0xff] %v263_v40   ;;  %v279_v44 = vld [vmem:[%s2318_s19 + $0x260] sm:$0xff]   ;;  %v283_v45 = vld [vmem:[%s2318_s19 + $0x268] sm:$0xff]  }
  0x27   : > { %268 = vst [vmem:[%s2326_s20 + $0x148] sm:$0xff] %v267_v41   ;;  %272 = vst [vmem:[%s2326_s20 + $0x150] sm:$0xff] %v271_v42   ;;  %v287_v46 = vld [vmem:[%s2318_s19 + $0x270] sm:$0xff]   ;;  %v291_v47 = vld [vmem:[%s2318_s19 + $0x278] sm:$0xff]  }
  0x28   : > { %276 = vst [vmem:[%s2326_s20 + $0x158] sm:$0xff] %v275_v43   ;;  %280 = vst [vmem:[%s2326_s20 + $0x160] sm:$0xff] %v279_v44   ;;  %v295_v48 = vld [vmem:[%s2318_s19 + $0x300] sm:$0xff]   ;;  %v299_v49 = vld [vmem:[%s2318_s19 + $0x308] sm:$0xff]  }
  0x29   : > { %284 = vst [vmem:[%s2326_s20 + $0x168] sm:$0xff] %v283_v45   ;;  %288 = vst [vmem:[%s2326_s20 + $0x170] sm:$0xff] %v287_v46   ;;  %v303_v50 = vld [vmem:[%s2318_s19 + $0x310] sm:$0xff]   ;;  %v307_v51 = vld [vmem:[%s2318_s19 + $0x318] sm:$0xff]  }
  0x2a   : > { %292 = vst [vmem:[%s2326_s20 + $0x178] sm:$0xff] %v291_v47   ;;  %296 = vst [vmem:[%s2326_s20 + $0x180] sm:$0xff] %v295_v48   ;;  %v311_v52 = vld [vmem:[%s2318_s19 + $0x320] sm:$0xff]   ;;  %v315_v53 = vld [vmem:[%s2318_s19 + $0x328] sm:$0xff]  }
  0x2b   : > { %300 = vst [vmem:[%s2326_s20 + $0x188] sm:$0xff] %v299_v49   ;;  %304 = vst [vmem:[%s2326_s20 + $0x190] sm:$0xff] %v303_v50   ;;  %v319_v54 = vld [vmem:[%s2318_s19 + $0x330] sm:$0xff]   ;;  %v323_v55 = vld [vmem:[%s2318_s19 + $0x338] sm:$0xff]  }
  0x2c   : > { %308 = vst [vmem:[%s2326_s20 + $0x198] sm:$0xff] %v307_v51   ;;  %312 = vst [vmem:[%s2326_s20 + $0x1a0] sm:$0xff] %v311_v52   ;;  %v327_v56 = vld [vmem:[%s2318_s19 + $0x340] sm:$0xff]   ;;  %v331_v57 = vld [vmem:[%s2318_s19 + $0x348] sm:$0xff]  }
  0x2d   : > { %316 = vst [vmem:[%s2326_s20 + $0x1a8] sm:$0xff] %v315_v53   ;;  %320 = vst [vmem:[%s2326_s20 + $0x1b0] sm:$0xff] %v319_v54   ;;  %v335_v58 = vld [vmem:[%s2318_s19 + $0x350] sm:$0xff]   ;;  %v339_v59 = vld [vmem:[%s2318_s19 + $0x358] sm:$0xff]  }
  0x2e   : > { %324 = vst [vmem:[%s2326_s20 + $0x1b8] sm:$0xff] %v323_v55   ;;  %328 = vst [vmem:[%s2326_s20 + $0x1c0] sm:$0xff] %v327_v56   ;;  %v343_v60 = vld [vmem:[%s2318_s19 + $0x360] sm:$0xff]   ;;  %v347_v61 = vld [vmem:[%s2318_s19 + $0x368] sm:$0xff]  }
  0x2f   : > { %332 = vst [vmem:[%s2326_s20 + $0x1c8] sm:$0xff] %v331_v57   ;;  %336 = vst [vmem:[%s2326_s20 + $0x1d0] sm:$0xff] %v335_v58   ;;  %v351_v62 = vld [vmem:[%s2318_s19 + $0x370] sm:$0xff]   ;;  %v355_v63 = vld [vmem:[%s2318_s19 + $0x378] sm:$0xff]  }
  0x30   : > { %340 = vst [vmem:[%s2326_s20 + $0x1d8] sm:$0xff] %v339_v59   ;;  %344 = vst [vmem:[%s2326_s20 + $0x1e0] sm:$0xff] %v343_v60   ;;  %v359_v0 = vld [vmem:[%s2318_s19 + $0x400] sm:$0xff]   ;;  %v363_v1 = vld [vmem:[%s2318_s19 + $0x408] sm:$0xff]  }
  0x31   : > { %348 = vst [vmem:[%s2326_s20 + $0x1e8] sm:$0xff] %v347_v61   ;;  %352 = vst [vmem:[%s2326_s20 + $0x1f0] sm:$0xff] %v351_v62   ;;  %v367_v2 = vld [vmem:[%s2318_s19 + $0x410] sm:$0xff]   ;;  %v371_v3 = vld [vmem:[%s2318_s19 + $0x418] sm:$0xff]  }
  0x32   : > { %356 = vst [vmem:[%s2326_s20 + $0x1f8] sm:$0xff] %v355_v63   ;;  %360 = vst [vmem:[%s2326_s20 + $0x200] sm:$0xff] %v359_v0   ;;  %v375_v4 = vld [vmem:[%s2318_s19 + $0x420] sm:$0xff]   ;;  %v379_v5 = vld [vmem:[%s2318_s19 + $0x428] sm:$0xff]  }
  0x33   : > { %364 = vst [vmem:[%s2326_s20 + $0x208] sm:$0xff] %v363_v1   ;;  %368 = vst [vmem:[%s2326_s20 + $0x210] sm:$0xff] %v367_v2   ;;  %v383_v6 = vld [vmem:[%s2318_s19 + $0x430] sm:$0xff]   ;;  %v387_v7 = vld [vmem:[%s2318_s19 + $0x438] sm:$0xff]  }
  0x34   : > { %372 = vst [vmem:[%s2326_s20 + $0x218] sm:$0xff] %v371_v3   ;;  %376 = vst [vmem:[%s2326_s20 + $0x220] sm:$0xff] %v375_v4   ;;  %v391_v8 = vld [vmem:[%s2318_s19 + $0x440] sm:$0xff]   ;;  %v395_v9 = vld [vmem:[%s2318_s19 + $0x448] sm:$0xff]  }
  0x35   : > { %380 = vst [vmem:[%s2326_s20 + $0x228] sm:$0xff] %v379_v5   ;;  %384 = vst [vmem:[%s2326_s20 + $0x230] sm:$0xff] %v383_v6   ;;  %v399_v10 = vld [vmem:[%s2318_s19 + $0x450] sm:$0xff]   ;;  %v403_v11 = vld [vmem:[%s2318_s19 + $0x458] sm:$0xff]  }
  0x36   : > { %388 = vst [vmem:[%s2326_s20 + $0x238] sm:$0xff] %v387_v7   ;;  %392 = vst [vmem:[%s2326_s20 + $0x240] sm:$0xff] %v391_v8   ;;  %v407_v12 = vld [vmem:[%s2318_s19 + $0x460] sm:$0xff]   ;;  %v411_v13 = vld [vmem:[%s2318_s19 + $0x468] sm:$0xff]  }
  0x37   : > { %396 = vst [vmem:[%s2326_s20 + $0x248] sm:$0xff] %v395_v9   ;;  %400 = vst [vmem:[%s2326_s20 + $0x250] sm:$0xff] %v399_v10   ;;  %v415_v14 = vld [vmem:[%s2318_s19 + $0x470] sm:$0xff]   ;;  %v419_v15 = vld [vmem:[%s2318_s19 + $0x478] sm:$0xff]  }
  0x38   : > { %404 = vst [vmem:[%s2326_s20 + $0x258] sm:$0xff] %v403_v11   ;;  %408 = vst [vmem:[%s2326_s20 + $0x260] sm:$0xff] %v407_v12   ;;  %v423_v16 = vld [vmem:[%s2318_s19 + $0x500] sm:$0xff]   ;;  %v427_v17 = vld [vmem:[%s2318_s19 + $0x508] sm:$0xff]  }
  0x39   : > { %412 = vst [vmem:[%s2326_s20 + $0x268] sm:$0xff] %v411_v13   ;;  %416 = vst [vmem:[%s2326_s20 + $0x270] sm:$0xff] %v415_v14   ;;  %v431_v18 = vld [vmem:[%s2318_s19 + $0x510] sm:$0xff]   ;;  %v435_v19 = vld [vmem:[%s2318_s19 + $0x518] sm:$0xff]  }
  0x3a   : > { %420 = vst [vmem:[%s2326_s20 + $0x278] sm:$0xff] %v419_v15   ;;  %424 = vst [vmem:[%s2326_s20 + $0x280] sm:$0xff] %v423_v16   ;;  %v439_v20 = vld [vmem:[%s2318_s19 + $0x520] sm:$0xff]   ;;  %v443_v21 = vld [vmem:[%s2318_s19 + $0x528] sm:$0xff]  }
  0x3b   : > { %428 = vst [vmem:[%s2326_s20 + $0x288] sm:$0xff] %v427_v17   ;;  %432 = vst [vmem:[%s2326_s20 + $0x290] sm:$0xff] %v431_v18   ;;  %v447_v22 = vld [vmem:[%s2318_s19 + $0x530] sm:$0xff]   ;;  %v451_v23 = vld [vmem:[%s2318_s19 + $0x538] sm:$0xff]  }
  0x3c   : > { %436 = vst [vmem:[%s2326_s20 + $0x298] sm:$0xff] %v435_v19   ;;  %440 = vst [vmem:[%s2326_s20 + $0x2a0] sm:$0xff] %v439_v20   ;;  %v455_v24 = vld [vmem:[%s2318_s19 + $0x540] sm:$0xff]   ;;  %v459_v25 = vld [vmem:[%s2318_s19 + $0x548] sm:$0xff]  }
  0x3d   : > { %444 = vst [vmem:[%s2326_s20 + $0x2a8] sm:$0xff] %v443_v21   ;;  %448 = vst [vmem:[%s2326_s20 + $0x2b0] sm:$0xff] %v447_v22   ;;  %v463_v26 = vld [vmem:[%s2318_s19 + $0x550] sm:$0xff]   ;;  %v467_v27 = vld [vmem:[%s2318_s19 + $0x558] sm:$0xff]  }
  0x3e   : > { %452 = vst [vmem:[%s2326_s20 + $0x2b8] sm:$0xff] %v451_v23   ;;  %456 = vst [vmem:[%s2326_s20 + $0x2c0] sm:$0xff] %v455_v24   ;;  %v471_v28 = vld [vmem:[%s2318_s19 + $0x560] sm:$0xff]   ;;  %v475_v29 = vld [vmem:[%s2318_s19 + $0x568] sm:$0xff]  }
  0x3f   : > { %460 = vst [vmem:[%s2326_s20 + $0x2c8] sm:$0xff] %v459_v25   ;;  %464 = vst [vmem:[%s2326_s20 + $0x2d0] sm:$0xff] %v463_v26   ;;  %v479_v30 = vld [vmem:[%s2318_s19 + $0x570] sm:$0xff]   ;;  %v483_v31 = vld [vmem:[%s2318_s19 + $0x578] sm:$0xff]  }
  0x40   : > { %468 = vst [vmem:[%s2326_s20 + $0x2d8] sm:$0xff] %v467_v27   ;;  %472 = vst [vmem:[%s2326_s20 + $0x2e0] sm:$0xff] %v471_v28   ;;  %v487_v32 = vld [vmem:[%s2318_s19 + $0x600] sm:$0xff]   ;;  %v491_v33 = vld [vmem:[%s2318_s19 + $0x608] sm:$0xff]  }
  0x41   : > { %476 = vst [vmem:[%s2326_s20 + $0x2e8] sm:$0xff] %v475_v29   ;;  %480 = vst [vmem:[%s2326_s20 + $0x2f0] sm:$0xff] %v479_v30   ;;  %v495_v34 = vld [vmem:[%s2318_s19 + $0x610] sm:$0xff]   ;;  %v499_v35 = vld [vmem:[%s2318_s19 + $0x618] sm:$0xff]  }
  0x42   : > { %484 = vst [vmem:[%s2326_s20 + $0x2f8] sm:$0xff] %v483_v31   ;;  %488 = vst [vmem:[%s2326_s20 + $0x300] sm:$0xff] %v487_v32   ;;  %v503_v36 = vld [vmem:[%s2318_s19 + $0x620] sm:$0xff]   ;;  %v507_v37 = vld [vmem:[%s2318_s19 + $0x628] sm:$0xff]  }
  0x43   : > { %492 = vst [vmem:[%s2326_s20 + $0x308] sm:$0xff] %v491_v33   ;;  %496 = vst [vmem:[%s2326_s20 + $0x310] sm:$0xff] %v495_v34   ;;  %v511_v38 = vld [vmem:[%s2318_s19 + $0x630] sm:$0xff]   ;;  %v515_v39 = vld [vmem:[%s2318_s19 + $0x638] sm:$0xff]  }
  0x44   : > { %500 = vst [vmem:[%s2326_s20 + $0x318] sm:$0xff] %v499_v35   ;;  %504 = vst [vmem:[%s2326_s20 + $0x320] sm:$0xff] %v503_v36   ;;  %v519_v40 = vld [vmem:[%s2318_s19 + $0x640] sm:$0xff]   ;;  %v523_v41 = vld [vmem:[%s2318_s19 + $0x648] sm:$0xff]  }
  0x45   : > { %508 = vst [vmem:[%s2326_s20 + $0x328] sm:$0xff] %v507_v37   ;;  %512 = vst [vmem:[%s2326_s20 + $0x330] sm:$0xff] %v511_v38   ;;  %v527_v42 = vld [vmem:[%s2318_s19 + $0x650] sm:$0xff]   ;;  %v531_v43 = vld [vmem:[%s2318_s19 + $0x658] sm:$0xff]  }
  0x46   : > { %516 = vst [vmem:[%s2326_s20 + $0x338] sm:$0xff] %v515_v39   ;;  %520 = vst [vmem:[%s2326_s20 + $0x340] sm:$0xff] %v519_v40   ;;  %v535_v44 = vld [vmem:[%s2318_s19 + $0x660] sm:$0xff]   ;;  %v539_v45 = vld [vmem:[%s2318_s19 + $0x668] sm:$0xff]  }
  0x47   : > { %524 = vst [vmem:[%s2326_s20 + $0x348] sm:$0xff] %v523_v41   ;;  %528 = vst [vmem:[%s2326_s20 + $0x350] sm:$0xff] %v527_v42   ;;  %v543_v46 = vld [vmem:[%s2318_s19 + $0x670] sm:$0xff]   ;;  %v547_v47 = vld [vmem:[%s2318_s19 + $0x678] sm:$0xff]  }
  0x48   : > { %532 = vst [vmem:[%s2326_s20 + $0x358] sm:$0xff] %v531_v43   ;;  %536 = vst [vmem:[%s2326_s20 + $0x360] sm:$0xff] %v535_v44   ;;  %v551_v48 = vld [vmem:[%s2318_s19 + $0x700] sm:$0xff]   ;;  %v555_v49 = vld [vmem:[%s2318_s19 + $0x708] sm:$0xff]  }
  0x49   : > { %540 = vst [vmem:[%s2326_s20 + $0x368] sm:$0xff] %v539_v45   ;;  %544 = vst [vmem:[%s2326_s20 + $0x370] sm:$0xff] %v543_v46   ;;  %v559_v50 = vld [vmem:[%s2318_s19 + $0x710] sm:$0xff]   ;;  %v563_v51 = vld [vmem:[%s2318_s19 + $0x718] sm:$0xff]  }
  0x4a   : > { %548 = vst [vmem:[%s2326_s20 + $0x378] sm:$0xff] %v547_v47   ;;  %552 = vst [vmem:[%s2326_s20 + $0x380] sm:$0xff] %v551_v48   ;;  %v567_v52 = vld [vmem:[%s2318_s19 + $0x720] sm:$0xff]   ;;  %v571_v53 = vld [vmem:[%s2318_s19 + $0x728] sm:$0xff]  }
  0x4b   : > { %556 = vst [vmem:[%s2326_s20 + $0x388] sm:$0xff] %v555_v49   ;;  %560 = vst [vmem:[%s2326_s20 + $0x390] sm:$0xff] %v559_v50   ;;  %v575_v54 = vld [vmem:[%s2318_s19 + $0x730] sm:$0xff]   ;;  %v579_v55 = vld [vmem:[%s2318_s19 + $0x738] sm:$0xff]  }
  0x4c   : > { %564 = vst [vmem:[%s2326_s20 + $0x398] sm:$0xff] %v563_v51   ;;  %568 = vst [vmem:[%s2326_s20 + $0x3a0] sm:$0xff] %v567_v52   ;;  %v583_v56 = vld [vmem:[%s2318_s19 + $0x740] sm:$0xff]   ;;  %v587_v57 = vld [vmem:[%s2318_s19 + $0x748] sm:$0xff]  }
  0x4d   : > { %572 = vst [vmem:[%s2326_s20 + $0x3a8] sm:$0xff] %v571_v53   ;;  %576 = vst [vmem:[%s2326_s20 + $0x3b0] sm:$0xff] %v575_v54   ;;  %v591_v58 = vld [vmem:[%s2318_s19 + $0x750] sm:$0xff]   ;;  %v595_v59 = vld [vmem:[%s2318_s19 + $0x758] sm:$0xff]  }
  0x4e   : > { %580 = vst [vmem:[%s2326_s20 + $0x3b8] sm:$0xff] %v579_v55   ;;  %584 = vst [vmem:[%s2326_s20 + $0x3c0] sm:$0xff] %v583_v56   ;;  %v599_v60 = vld [vmem:[%s2318_s19 + $0x760] sm:$0xff]   ;;  %v603_v61 = vld [vmem:[%s2318_s19 + $0x768] sm:$0xff]  }
  0x4f   : > { %588 = vst [vmem:[%s2326_s20 + $0x3c8] sm:$0xff] %v587_v57   ;;  %592 = vst [vmem:[%s2326_s20 + $0x3d0] sm:$0xff] %v591_v58   ;;  %v607_v62 = vld [vmem:[%s2318_s19 + $0x770] sm:$0xff]   ;;  %v611_v63 = vld [vmem:[%s2318_s19 + $0x778] sm:$0xff]  }
  0x50   : > { %596 = vst [vmem:[%s2326_s20 + $0x3d8] sm:$0xff] %v595_v59   ;;  %600 = vst [vmem:[%s2326_s20 + $0x3e0] sm:$0xff] %v599_v60   ;;  %v615_v0 = vld [vmem:[%s2318_s19 + $0x800] sm:$0xff]   ;;  %v619_v1 = vld [vmem:[%s2318_s19 + $0x808] sm:$0xff]  }
  0x51   : > { %604 = vst [vmem:[%s2326_s20 + $0x3e8] sm:$0xff] %v603_v61   ;;  %608 = vst [vmem:[%s2326_s20 + $0x3f0] sm:$0xff] %v607_v62   ;;  %v623_v2 = vld [vmem:[%s2318_s19 + $0x810] sm:$0xff]   ;;  %v627_v3 = vld [vmem:[%s2318_s19 + $0x818] sm:$0xff]  }
  0x52   : > { %612 = vst [vmem:[%s2326_s20 + $0x3f8] sm:$0xff] %v611_v63   ;;  %616 = vst [vmem:[%s2326_s20 + $0x400] sm:$0xff] %v615_v0   ;;  %v631_v4 = vld [vmem:[%s2318_s19 + $0x820] sm:$0xff]   ;;  %v635_v5 = vld [vmem:[%s2318_s19 + $0x828] sm:$0xff]  }
  0x53   : > { %620 = vst [vmem:[%s2326_s20 + $0x408] sm:$0xff] %v619_v1   ;;  %624 = vst [vmem:[%s2326_s20 + $0x410] sm:$0xff] %v623_v2   ;;  %v639_v6 = vld [vmem:[%s2318_s19 + $0x830] sm:$0xff]   ;;  %v643_v7 = vld [vmem:[%s2318_s19 + $0x838] sm:$0xff]  }
  0x54   : > { %628 = vst [vmem:[%s2326_s20 + $0x418] sm:$0xff] %v627_v3   ;;  %632 = vst [vmem:[%s2326_s20 + $0x420] sm:$0xff] %v631_v4   ;;  %v647_v8 = vld [vmem:[%s2318_s19 + $0x840] sm:$0xff]   ;;  %v651_v9 = vld [vmem:[%s2318_s19 + $0x848] sm:$0xff]  }
  0x55   : > { %636 = vst [vmem:[%s2326_s20 + $0x428] sm:$0xff] %v635_v5   ;;  %640 = vst [vmem:[%s2326_s20 + $0x430] sm:$0xff] %v639_v6   ;;  %v655_v10 = vld [vmem:[%s2318_s19 + $0x850] sm:$0xff]   ;;  %v659_v11 = vld [vmem:[%s2318_s19 + $0x858] sm:$0xff]  }
  0x56   : > { %644 = vst [vmem:[%s2326_s20 + $0x438] sm:$0xff] %v643_v7   ;;  %648 = vst [vmem:[%s2326_s20 + $0x440] sm:$0xff] %v647_v8   ;;  %v663_v12 = vld [vmem:[%s2318_s19 + $0x860] sm:$0xff]   ;;  %v667_v13 = vld [vmem:[%s2318_s19 + $0x868] sm:$0xff]  }
  0x57   : > { %652 = vst [vmem:[%s2326_s20 + $0x448] sm:$0xff] %v651_v9   ;;  %656 = vst [vmem:[%s2326_s20 + $0x450] sm:$0xff] %v655_v10   ;;  %v671_v14 = vld [vmem:[%s2318_s19 + $0x870] sm:$0xff]   ;;  %v675_v15 = vld [vmem:[%s2318_s19 + $0x878] sm:$0xff]  }
  0x58   : > { %660 = vst [vmem:[%s2326_s20 + $0x458] sm:$0xff] %v659_v11   ;;  %664 = vst [vmem:[%s2326_s20 + $0x460] sm:$0xff] %v663_v12  }
  0x59   : > { %668 = vst [vmem:[%s2326_s20 + $0x468] sm:$0xff] %v667_v13   ;;  %672 = vst [vmem:[%s2326_s20 + $0x470] sm:$0xff] %v671_v14  }
  0x5a   : > { %676 = vst [vmem:[%s2326_s20 + $0x478] sm:$0xff] %v675_v15  }
  0x5b PF: > { %p1962_p5 = scmp.ge.s32.totalorder %s2272_s8, 1  ;;  %p1276_p6 = scmp.lt.s32.totalorder %s2272_s8, 3 }
  0x5d   : > { %p1277_p7 = pnand %p1962_p5, %p1276_p6 }
  0x5e   : > { %s1283_s21 = sand.u32 (!%p1277_p7), 1, %s2264_s6   ;;  %s1963_s23 = sshll.u32 (!%p1277_p7), %s1956_s9, 5  ;;  %vm1861_vm0 = vcmask (!%p1277_p7), 519168  }
  0x5f   : > { %1280 = sbr.rel (%p1277_p7) target bundleno = 216 (0xd8), region = 61  ;;  %p1304_p8 = scmp.lt.s32.totalorder (!%p1277_p7), %s1963_s23, 63 }
  0x60   : > { %s2225_s22 = smul.u32 (!%p1277_p7), 1152, %s1283_s21 }
  0x62   : > { %s2615_s24 = scalar_lea.vmem (!%p1277_p7), [#allocation2], %s2225_s22 }
  0x63   : > { %v1309_v16 = vld [vmem:[%s2615_s24] sm:$0xf] (!%p1277_p7)  ;;  %v1310_v22 = vld [vmem:[%s2615_s24 + $0x4] sm:$0xf] (!%p1277_p7)  ;;  %v1311_v30 = vld [vmem:[%s2615_s24 + $0x8] sm:$0xf] (!%p1277_p7) }
  0x64   : > { %v1965_v17 = vld [vmem:[%s2615_s24 + $0x80] sm:$0xf] (!%p1277_p7)  ;;  %v1966_v24 = vld [vmem:[%s2615_s24 + $0x84] sm:$0xf] (!%p1277_p7)  ;;  %v1967_v33 = vld [vmem:[%s2615_s24 + $0x88] sm:$0xf] (!%p1277_p7) }
  0x65   : > { %v1374_v18 = vmax.bf16 (!%p1277_p7), %v1965_v17, %v1309_v16  ;;  %v1997_v19 = vld [vmem:[%s2615_s24 + $0x100] sm:$0xf] (!%p1277_p7)  ;;  %v1998_v25 = vld [vmem:[%s2615_s24 + $0x104] sm:$0xf] (!%p1277_p7)  ;;  %v1375_v27 = vmax.bf16 (!%p1277_p7), %v1966_v24, %v1310_v22  ;;  %v1999_v34 = vld [vmem:[%s2615_s24 + $0x108] sm:$0xf] (!%p1277_p7)  ;;  %v1376_v37 = vmax.bf16 (!%p1277_p7), %v1967_v33, %v1311_v30 }
  0x66   : > { %v2029_v20 = vld [vmem:[%s2615_s24 + $0x180] sm:$0xf]  ;;  %v2030_v29 = vld [vmem:[%s2615_s24 + $0x184] sm:$0xf]  ;;  %s2993_s23 = smov (!%p1304_p8, %s1963_s23), 63 }
  0x67   : > { %v1439_v21 = vmax.bf16 %v1997_v19, %v1374_v18  ;;  %v2061_v23 = vld [vmem:[%s2615_s24 + $0x200] sm:$0xf]  ;;  %v1440_v32 = vmax.bf16 %v1998_v25, %v1375_v27  ;;  %v2062_v36 = vld [vmem:[%s2615_s24 + $0x204] sm:$0xf]  ;;  %v2031_v41 = vld [vmem:[%s2615_s24 + $0x188] sm:$0xf]  ;;  %v1441_v44 = vmax.bf16 %v1999_v34, %v1376_v37 }
  0x68   : > { %v2093_v28 = vld [vmem:[%s2615_s24 + $0x280] sm:$0xf]  ;;  %v1312_v42 = vld [vmem:[%s2615_s24 + $0xc] sm:$0xf]  ;;  %v2094_v43 = vld [vmem:[%s2615_s24 + $0x284] sm:$0xf] }
  0x69   : > { %v1504_v26 = vmax.bf16 %v2029_v20, %v1439_v21  ;;  %v2125_v35 = vld [vmem:[%s2615_s24 + $0x300] sm:$0xf]  ;;  %v1505_v40 = vmax.bf16 %v2030_v29, %v1440_v32  ;;  %v1968_v45 = vld [vmem:[%s2615_s24 + $0x8c] sm:$0xf]  ;;  %s1964_s25 = sshll.u32 %s2993_s23, 2  ;;  %v1506_v53 = vmax.bf16 %v2031_v41, %v1441_v44 }
  0x6a   : > { %v2157_v39 = vld [vmem:[%s2615_s24 + $0x380] sm:$0xf]  ;;  %v2000_v46 = vld [vmem:[%s2615_s24 + $0x10c] sm:$0xf]  ;;  %v2063_v50 = vld [vmem:[%s2615_s24 + $0x208] sm:$0xf]  ;;  %v1377_v51 = vmax.bf16 %v1968_v45, %v1312_v42  ;;  %s2652_s28 = scalar_lea.vmem %s2988_s1, %s1964_s25 }
  0x6b   : > { %v1569_v31 = vmax.bf16 %v2061_v23, %v1504_v26  ;;  %v2189_v48 = vld [vmem:[%s2615_s24 + $0x400] sm:$0xf]  ;;  %v1570_v49 = vmax.bf16 %v2062_v36, %v1505_v40  ;;  %v2126_v52 = vld [vmem:[%s2615_s24 + $0x304] sm:$0xf]  ;;  %v2032_v54 = vld [vmem:[%s2615_s24 + $0x18c] sm:$0xf]  ;;  %v1571_v0 = vmax.bf16 %v2063_v50, %v1506_v53 }
  0x6c   : > { %v1313_v55 = vld [vmem:[%s2615_s24 + $0x10] sm:$0xf]  ;;  %v2095_v58 = vld [vmem:[%s2615_s24 + $0x288] sm:$0xf]  ;;  %v1442_v59 = vmax.bf16 %v2000_v46, %v1377_v51  ;;  %v2158_v62 = vld [vmem:[%s2615_s24 + $0x384] sm:$0xf] }
  0x6d   : > { %v1634_v38 = vmax.bf16 %v2093_v28, %v1569_v31  ;;  %v1635_v57 = vmax.bf16 %v2094_v43, %v1570_v49  ;;  %v1969_v60 = vld [vmem:[%s2615_s24 + $0x90] sm:$0xf]  ;;  %v2190_v63 = vld [vmem:[%s2615_s24 + $0x404] sm:$0xf]  ;;  %v2064_v1 = vld [vmem:[%s2615_s24 + $0x20c] sm:$0xf]  ;;  %v1636_v9 = vmax.bf16 %v2095_v58, %v1571_v0 }
  0x6e   : > { %v2001_v61 = vld [vmem:[%s2615_s24 + $0x110] sm:$0xf]  ;;  %v1378_v2 = vmax.bf16 %v1969_v60, %v1313_v55  ;;  %v2127_v5 = vld [vmem:[%s2615_s24 + $0x308] sm:$0xf]  ;;  %v1507_v6 = vmax.bf16 %v2032_v54, %v1442_v59  ;;  %v1314_v8 = vld [vmem:[%s2615_s24 + $0x14] sm:$0xf] }
  0x6f   : > { %v1699_v47 = vmax.bf16 %v2125_v35, %v1634_v38  ;;  %v1700_v4 = vmax.bf16 %v2126_v52, %v1635_v57  ;;  %v2033_v7 = vld [vmem:[%s2615_s24 + $0x190] sm:$0xf]  ;;  %v2096_v10 = vld [vmem:[%s2615_s24 + $0x28c] sm:$0xf]  ;;  %v1970_v12 = vld [vmem:[%s2615_s24 + $0x94] sm:$0xf]  ;;  %v1701_v20 = vmax.bf16 %v2127_v5, %v1636_v9 }
  0x70   : > { %v1443_v11 = vmax.bf16 %v2001_v61, %v1378_v2  ;;  %v2002_v13 = vld [vmem:[%s2615_s24 + $0x114] sm:$0xf]  ;;  %v2159_v15 = vld [vmem:[%s2615_s24 + $0x388] sm:$0xf]  ;;  %v1572_v17 = vmax.bf16 %v2064_v1, %v1507_v6  ;;  %v2065_v18 = vld [vmem:[%s2615_s24 + $0x210] sm:$0xf]  ;;  %v1379_v19 = vmax.bf16 %v1970_v12, %v1314_v8 }
  0x71   : > { %v1764_v56 = vmax.bf16 %v2157_v39, %v1699_v47  ;;  %v1765_v14 = vmax.bf16 %v2158_v62, %v1700_v4  ;;  %v2191_v16 = vld [vmem:[%s2615_s24 + $0x408] sm:$0xf]  ;;  %v2128_v21 = vld [vmem:[%s2615_s24 + $0x30c] sm:$0xf]  ;;  %v2034_v23 = vld [vmem:[%s2615_s24 + $0x194] sm:$0xf]  ;;  %v1766_v31 = vmax.bf16 %v2159_v15, %v1701_v20 }
  0x72   : > { %v1508_v22 = vmax.bf16 %v2033_v7, %v1443_v11  ;;  %v1315_v24 = vld [vmem:[%s2615_s24 + $0x18] sm:$0xf]  ;;  %v1637_v26 = vmax.bf16 %v2096_v10, %v1572_v17  ;;  %v2097_v27 = vld [vmem:[%s2615_s24 + $0x290] sm:$0xf]  ;;  %v1444_v28 = vmax.bf16 %v2002_v13, %v1379_v19  ;;  %v2160_v32 = vld [vmem:[%s2615_s24 + $0x38c] sm:$0xf] }
  0x73   : > { %v1829_v3 = vmax.bf16 %v2189_v48, %v1764_v56  ;;  %v1830_v25 = vmax.bf16 %v2190_v63, %v1765_v14  ;;  %v1971_v29 = vld [vmem:[%s2615_s24 + $0x98] sm:$0xf]  ;;  %v2192_v33 = vld [vmem:[%s2615_s24 + $0x40c] sm:$0xf]  ;;  %v2066_v35 = vld [vmem:[%s2615_s24 + $0x214] sm:$0xf]  ;;  %v1831_v42 = vmax.bf16 %v2191_v16, %v1766_v31 }
  0x74   : > { %v2003_v30 = vld [vmem:[%s2615_s24 + $0x118] sm:$0xf]  ;;  %v1573_v34 = vmax.bf16 %v2065_v18, %v1508_v22  ;;  %v1380_v36 = vmax.bf16 %v1971_v29, %v1315_v24  ;;  %v1702_v37 = vmax.bf16 %v2128_v21, %v1637_v26  ;;  %v2129_v38 = vld [vmem:[%s2615_s24 + $0x310] sm:$0xf]  ;;  %v1509_v39 = vmax.bf16 %v2034_v23, %v1444_v28  ;;  %v1316_v41 = vld [vmem:[%s2615_s24 + $0x1c] sm:$0xf] }
  0x75   : > { %1862 = vst.msk [vmem:[%s2652_s28] sm:$0xf] %vm1861_vm0, %v1829_v3  ;;  %1863 = vst.msk [vmem:[%s2652_s28 + $0x4] sm:$0xf] %vm1861_vm0, %v1830_v25  ;;  %v2035_v40 = vld [vmem:[%s2615_s24 + $0x198] sm:$0xf] }
  0x76   : > { %v1638_v43 = vmax.bf16 %v2097_v27, %v1573_v34  ;;  %v2098_v44 = vld [vmem:[%s2615_s24 + $0x294] sm:$0xf]  ;;  %v1445_v45 = vmax.bf16 %v2003_v30, %v1380_v36  ;;  %v1972_v46 = vld [vmem:[%s2615_s24 + $0x9c] sm:$0xf]  ;;  %v1767_v48 = vmax.bf16 %v2160_v32, %v1702_v37  ;;  %v2161_v49 = vld [vmem:[%s2615_s24 + $0x390] sm:$0xf]  ;;  %v1574_v51 = vmax.bf16 %v2066_v35, %v1509_v39 }
  0x77   : > { %v2004_v47 = vld [vmem:[%s2615_s24 + $0x11c] sm:$0xf]  ;;  %v2193_v50 = vld [vmem:[%s2615_s24 + $0x410] sm:$0xf]  ;;  %v2067_v52 = vld [vmem:[%s2615_s24 + $0x218] sm:$0xf]  ;;  %v1381_v53 = vmax.bf16 %v1972_v46, %v1316_v41 }
  0x78   : > { %1864 = vst.msk [vmem:[%s2652_s28 + $0x8] sm:$0xf] %vm1861_vm0, %v1831_v42  ;;  %v1703_v54 = vmax.bf16 %v2129_v38, %v1638_v43  ;;  %v2130_v55 = vld [vmem:[%s2615_s24 + $0x314] sm:$0xf]  ;;  %v1510_v56 = vmax.bf16 %v2035_v40, %v1445_v45  ;;  %v2036_v57 = vld [vmem:[%s2615_s24 + $0x19c] sm:$0xf]  ;;  %v1832_v59 = vmax.bf16 %v2192_v33, %v1767_v48  ;;  %v1639_v60 = vmax.bf16 %v2098_v44, %v1574_v51 }
  0x79   : > { %v1317_v58 = vld [vmem:[%s2615_s24 + $0x20] sm:$0xf]  ;;  %v2099_v61 = vld [vmem:[%s2615_s24 + $0x298] sm:$0xf]  ;;  %v1446_v62 = vmax.bf16 %v2004_v47, %v1381_v53  ;;  %v2162_v2 = vld [vmem:[%s2615_s24 + $0x394] sm:$0xf] }
  0x7a   : > { %v1973_v63 = vld [vmem:[%s2615_s24 + $0xa0] sm:$0xf]  ;;  %v1768_v1 = vmax.bf16 %v2161_v49, %v1703_v54  ;;  %v2194_v3 = vld [vmem:[%s2615_s24 + $0x414] sm:$0xf]  ;;  %v1575_v4 = vmax.bf16 %v2067_v52, %v1510_v56  ;;  %v2068_v5 = vld [vmem:[%s2615_s24 + $0x21c] sm:$0xf]  ;;  %v1704_v7 = vmax.bf16 %v2130_v55, %v1639_v60 }
  0x7b   : > { %v2005_v0 = vld [vmem:[%s2615_s24 + $0x120] sm:$0xf]  ;;  %v1382_v6 = vmax.bf16 %v1973_v63, %v1317_v58  ;;  %1865 = vst.msk [vmem:[%s2652_s28 + $0xc] sm:$0xf] %vm1861_vm0, %v1832_v59  ;;  %v2131_v8 = vld [vmem:[%s2615_s24 + $0x318] sm:$0xf]  ;;  %v1511_v9 = vmax.bf16 %v2036_v57, %v1446_v62 }
  0x7c   : > { %v2037_v10 = vld [vmem:[%s2615_s24 + $0x1a0] sm:$0xf]  ;;  %v1318_v11 = vld [vmem:[%s2615_s24 + $0x24] sm:$0xf]  ;;  %v1833_v12 = vmax.bf16 %v2193_v50, %v1768_v1  ;;  %v1640_v13 = vmax.bf16 %v2099_v61, %v1575_v4  ;;  %v2100_v14 = vld [vmem:[%s2615_s24 + $0x29c] sm:$0xf]  ;;  %v1769_v18 = vmax.bf16 %v2162_v2, %v1704_v7 }
  0x7d   : > { %v1447_v15 = vmax.bf16 %v2005_v0, %v1382_v6  ;;  %v1974_v16 = vld [vmem:[%s2615_s24 + $0xa4] sm:$0xf]  ;;  %v2163_v19 = vld [vmem:[%s2615_s24 + $0x398] sm:$0xf]  ;;  %v1576_v21 = vmax.bf16 %v2068_v5, %v1511_v9  ;;  %v2069_v22 = vld [vmem:[%s2615_s24 + $0x220] sm:$0xf] }
  0x7e   : > { %v2006_v17 = vld [vmem:[%s2615_s24 + $0x124] sm:$0xf]  ;;  %v2195_v20 = vld [vmem:[%s2615_s24 + $0x418] sm:$0xf]  ;;  %v1383_v23 = vmax.bf16 %v1974_v16, %v1318_v11  ;;  %1866 = vst.msk [vmem:[%s2652_s28 + $0x10] sm:$0xf] %vm1861_vm0, %v1833_v12  ;;  %v1705_v24 = vmax.bf16 %v2131_v8, %v1640_v13  ;;  %v1834_v29 = vmax.bf16 %v2194_v3, %v1769_v18 }
  0x7f   : > { %v2132_v25 = vld [vmem:[%s2615_s24 + $0x31c] sm:$0xf]  ;;  %v1512_v26 = vmax.bf16 %v2037_v10, %v1447_v15  ;;  %v2038_v27 = vld [vmem:[%s2615_s24 + $0x1a4] sm:$0xf]  ;;  %v1319_v28 = vld [vmem:[%s2615_s24 + $0x28] sm:$0xf]  ;;  %v1641_v30 = vmax.bf16 %v2100_v14, %v1576_v21 }
  0x80   : > { %v2101_v31 = vld [vmem:[%s2615_s24 + $0x2a0] sm:$0xf]  ;;  %v1448_v32 = vmax.bf16 %v2006_v17, %v1383_v23  ;;  %v1975_v33 = vld [vmem:[%s2615_s24 + $0xa8] sm:$0xf]  ;;  %v1770_v35 = vmax.bf16 %v2163_v19, %v1705_v24  ;;  %v2164_v36 = vld [vmem:[%s2615_s24 + $0x39c] sm:$0xf] }
  0x81   : > { %v2007_v34 = vld [vmem:[%s2615_s24 + $0x128] sm:$0xf]  ;;  %v2196_v37 = vld [vmem:[%s2615_s24 + $0x41c] sm:$0xf]  ;;  %v1577_v38 = vmax.bf16 %v2069_v22, %v1512_v26  ;;  %v2070_v39 = vld [vmem:[%s2615_s24 + $0x224] sm:$0xf]  ;;  %v1384_v40 = vmax.bf16 %v1975_v33, %v1319_v28  ;;  %v1706_v41 = vmax.bf16 %v2132_v25, %v1641_v30 }
  0x82   : > { %1867 = vst.msk [vmem:[%s2652_s28 + $0x14] sm:$0xf] %vm1861_vm0, %v1834_v29  ;;  %v2133_v42 = vld [vmem:[%s2615_s24 + $0x320] sm:$0xf]  ;;  %v1513_v43 = vmax.bf16 %v2038_v27, %v1448_v32  ;;  %v2039_v44 = vld [vmem:[%s2615_s24 + $0x1a8] sm:$0xf]  ;;  %v1835_v46 = vmax.bf16 %v2195_v20, %v1770_v35 }
  0x83   : > { %v1320_v45 = vld [vmem:[%s2615_s24 + $0x2c] sm:$0xf]  ;;  %v1642_v47 = vmax.bf16 %v2101_v31, %v1577_v38  ;;  %v2102_v48 = vld [vmem:[%s2615_s24 + $0x2a4] sm:$0xf]  ;;  %v1449_v49 = vmax.bf16 %v2007_v34, %v1384_v40  ;;  %v1771_v52 = vmax.bf16 %v2164_v36, %v1706_v41  ;;  %v2165_v53 = vld [vmem:[%s2615_s24 + $0x3a0] sm:$0xf] }
  0x84   : > { %v1976_v50 = vld [vmem:[%s2615_s24 + $0xac] sm:$0xf]  ;;  %v2197_v54 = vld [vmem:[%s2615_s24 + $0x420] sm:$0xf]  ;;  %v1578_v55 = vmax.bf16 %v2070_v39, %v1513_v43  ;;  %v2071_v56 = vld [vmem:[%s2615_s24 + $0x228] sm:$0xf] }
  0x85   : > { %v2008_v51 = vld [vmem:[%s2615_s24 + $0x12c] sm:$0xf]  ;;  %v1385_v57 = vmax.bf16 %v1976_v50, %v1320_v45  ;;  %1868 = vst.msk [vmem:[%s2652_s28 + $0x18] sm:$0xf] %vm1861_vm0, %v1835_v46  ;;  %v1707_v58 = vmax.bf16 %v2133_v42, %v1642_v47  ;;  %v2134_v59 = vld [vmem:[%s2615_s24 + $0x324] sm:$0xf]  ;;  %v1514_v60 = vmax.bf16 %v2039_v44, %v1449_v49  ;;  %v1836_v63 = vmax.bf16 %v2196_v37, %v1771_v52 }
  0x86   : > { %v2040_v61 = vld [vmem:[%s2615_s24 + $0x1ac] sm:$0xf]  ;;  %v1321_v62 = vld [vmem:[%s2615_s24 + $0x30] sm:$0xf]  ;;  %v1643_v0 = vmax.bf16 %v2102_v48, %v1578_v55  ;;  %v2103_v1 = vld [vmem:[%s2615_s24 + $0x2a8] sm:$0xf] }
  0x87   : > { %v1450_v2 = vmax.bf16 %v2008_v51, %v1385_v57  ;;  %v1977_v3 = vld [vmem:[%s2615_s24 + $0xb0] sm:$0xf]  ;;  %v1772_v5 = vmax.bf16 %v2165_v53, %v1707_v58  ;;  %v2166_v6 = vld [vmem:[%s2615_s24 + $0x3a4] sm:$0xf]  ;;  %v1579_v8 = vmax.bf16 %v2071_v56, %v1514_v60  ;;  %v2072_v9 = vld [vmem:[%s2615_s24 + $0x22c] sm:$0xf] }
  0x88   : > { %v2009_v4 = vld [vmem:[%s2615_s24 + $0x130] sm:$0xf]  ;;  %v2198_v7 = vld [vmem:[%s2615_s24 + $0x424] sm:$0xf]  ;;  %v1386_v10 = vmax.bf16 %v1977_v3, %v1321_v62  ;;  %1869 = vst.msk [vmem:[%s2652_s28 + $0x1c] sm:$0xf] %vm1861_vm0, %v1836_v63  ;;  %v1708_v11 = vmax.bf16 %v2134_v59, %v1643_v0 }
  0x89   : > { %v2135_v12 = vld [vmem:[%s2615_s24 + $0x328] sm:$0xf]  ;;  %v1515_v13 = vmax.bf16 %v2040_v61, %v1450_v2  ;;  %v2041_v14 = vld [vmem:[%s2615_s24 + $0x1b0] sm:$0xf]  ;;  %v1322_v15 = vld [vmem:[%s2615_s24 + $0x34] sm:$0xf]  ;;  %v1837_v16 = vmax.bf16 %v2197_v54, %v1772_v5  ;;  %v1644_v17 = vmax.bf16 %v2103_v1, %v1579_v8 }
  0x8a   : > { %v2104_v18 = vld [vmem:[%s2615_s24 + $0x2ac] sm:$0xf]  ;;  %v1451_v19 = vmax.bf16 %v2009_v4, %v1386_v10  ;;  %v1978_v20 = vld [vmem:[%s2615_s24 + $0xb4] sm:$0xf]  ;;  %v1773_v22 = vmax.bf16 %v2166_v6, %v1708_v11  ;;  %v2167_v23 = vld [vmem:[%s2615_s24 + $0x3a8] sm:$0xf] }
  0x8b   : > { %v2010_v21 = vld [vmem:[%s2615_s24 + $0x134] sm:$0xf]  ;;  %v2199_v24 = vld [vmem:[%s2615_s24 + $0x428] sm:$0xf]  ;;  %v1580_v25 = vmax.bf16 %v2072_v9, %v1515_v13  ;;  %v2073_v26 = vld [vmem:[%s2615_s24 + $0x230] sm:$0xf]  ;;  %v1387_v27 = vmax.bf16 %v1978_v20, %v1322_v15  ;;  %v1709_v28 = vmax.bf16 %v2135_v12, %v1644_v17 }
  0x8c   : > { %1870 = vst.msk [vmem:[%s2652_s28 + $0x20] sm:$0xf] %vm1861_vm0, %v1837_v16  ;;  %v2136_v29 = vld [vmem:[%s2615_s24 + $0x32c] sm:$0xf]  ;;  %v1516_v30 = vmax.bf16 %v2041_v14, %v1451_v19  ;;  %v2042_v31 = vld [vmem:[%s2615_s24 + $0x1b4] sm:$0xf]  ;;  %v1838_v33 = vmax.bf16 %v2198_v7, %v1773_v22 }
  0x8d   : > { %v1323_v32 = vld [vmem:[%s2615_s24 + $0x38] sm:$0xf]  ;;  %v1645_v34 = vmax.bf16 %v2104_v18, %v1580_v25  ;;  %v2105_v35 = vld [vmem:[%s2615_s24 + $0x2b0] sm:$0xf]  ;;  %v1452_v36 = vmax.bf16 %v2010_v21, %v1387_v27  ;;  %v1774_v39 = vmax.bf16 %v2167_v23, %v1709_v28  ;;  %v2168_v40 = vld [vmem:[%s2615_s24 + $0x3ac] sm:$0xf] }
  0x8e   : > { %v1979_v37 = vld [vmem:[%s2615_s24 + $0xb8] sm:$0xf]  ;;  %v2200_v41 = vld [vmem:[%s2615_s24 + $0x42c] sm:$0xf]  ;;  %v1581_v42 = vmax.bf16 %v2073_v26, %v1516_v30  ;;  %v2074_v43 = vld [vmem:[%s2615_s24 + $0x234] sm:$0xf] }
  0x8f   : > { %v2011_v38 = vld [vmem:[%s2615_s24 + $0x138] sm:$0xf]  ;;  %v1388_v44 = vmax.bf16 %v1979_v37, %v1323_v32  ;;  %1871 = vst.msk [vmem:[%s2652_s28 + $0x24] sm:$0xf] %vm1861_vm0, %v1838_v33  ;;  %v1710_v45 = vmax.bf16 %v2136_v29, %v1645_v34  ;;  %v2137_v46 = vld [vmem:[%s2615_s24 + $0x330] sm:$0xf]  ;;  %v1517_v47 = vmax.bf16 %v2042_v31, %v1452_v36  ;;  %v1839_v50 = vmax.bf16 %v2199_v24, %v1774_v39 }
  0x90   : > { %v2043_v48 = vld [vmem:[%s2615_s24 + $0x1b8] sm:$0xf]  ;;  %v1324_v49 = vld [vmem:[%s2615_s24 + $0x3c] sm:$0xf]  ;;  %v1646_v51 = vmax.bf16 %v2105_v35, %v1581_v42  ;;  %v2106_v52 = vld [vmem:[%s2615_s24 + $0x2b4] sm:$0xf] }
  0x91   : > { %v1453_v53 = vmax.bf16 %v2011_v38, %v1388_v44  ;;  %v1980_v54 = vld [vmem:[%s2615_s24 + $0xbc] sm:$0xf]  ;;  %v1775_v56 = vmax.bf16 %v2168_v40, %v1710_v45  ;;  %v2169_v57 = vld [vmem:[%s2615_s24 + $0x3b0] sm:$0xf]  ;;  %v1582_v59 = vmax.bf16 %v2074_v43, %v1517_v47  ;;  %v2075_v60 = vld [vmem:[%s2615_s24 + $0x238] sm:$0xf] }
  0x92   : > { %v2012_v55 = vld [vmem:[%s2615_s24 + $0x13c] sm:$0xf]  ;;  %v2201_v58 = vld [vmem:[%s2615_s24 + $0x430] sm:$0xf]  ;;  %v1389_v61 = vmax.bf16 %v1980_v54, %v1324_v49  ;;  %1872 = vst.msk [vmem:[%s2652_s28 + $0x28] sm:$0xf] %vm1861_vm0, %v1839_v50  ;;  %v1711_v62 = vmax.bf16 %v2137_v46, %v1646_v51 }
  0x93   : > { %v2138_v63 = vld [vmem:[%s2615_s24 + $0x334] sm:$0xf]  ;;  %v1518_v0 = vmax.bf16 %v2043_v48, %v1453_v53  ;;  %v2044_v1 = vld [vmem:[%s2615_s24 + $0x1bc] sm:$0xf]  ;;  %v1325_v2 = vld [vmem:[%s2615_s24 + $0x40] sm:$0xf]  ;;  %v1840_v3 = vmax.bf16 %v2200_v41, %v1775_v56  ;;  %v1647_v4 = vmax.bf16 %v2106_v52, %v1582_v59 }
  0x94   : > { %v2107_v5 = vld [vmem:[%s2615_s24 + $0x2b8] sm:$0xf]  ;;  %v1454_v6 = vmax.bf16 %v2012_v55, %v1389_v61  ;;  %v1981_v7 = vld [vmem:[%s2615_s24 + $0xc0] sm:$0xf]  ;;  %v1776_v9 = vmax.bf16 %v2169_v57, %v1711_v62  ;;  %v2170_v10 = vld [vmem:[%s2615_s24 + $0x3b4] sm:$0xf] }
  0x95   : > { %v2013_v8 = vld [vmem:[%s2615_s24 + $0x140] sm:$0xf]  ;;  %v2202_v11 = vld [vmem:[%s2615_s24 + $0x434] sm:$0xf]  ;;  %v1583_v12 = vmax.bf16 %v2075_v60, %v1518_v0  ;;  %v2076_v13 = vld [vmem:[%s2615_s24 + $0x23c] sm:$0xf]  ;;  %v1390_v14 = vmax.bf16 %v1981_v7, %v1325_v2  ;;  %v1712_v15 = vmax.bf16 %v2138_v63, %v1647_v4 }
  0x96   : > { %1873 = vst.msk [vmem:[%s2652_s28 + $0x2c] sm:$0xf] %vm1861_vm0, %v1840_v3  ;;  %v2139_v16 = vld [vmem:[%s2615_s24 + $0x338] sm:$0xf]  ;;  %v1519_v17 = vmax.bf16 %v2044_v1, %v1454_v6  ;;  %v2045_v18 = vld [vmem:[%s2615_s24 + $0x1c0] sm:$0xf]  ;;  %v1841_v20 = vmax.bf16 %v2201_v58, %v1776_v9 }
  0x97   : > { %v1326_v19 = vld [vmem:[%s2615_s24 + $0x44] sm:$0xf]  ;;  %v1648_v21 = vmax.bf16 %v2107_v5, %v1583_v12  ;;  %v2108_v22 = vld [vmem:[%s2615_s24 + $0x2bc] sm:$0xf]  ;;  %v1455_v23 = vmax.bf16 %v2013_v8, %v1390_v14  ;;  %v1777_v26 = vmax.bf16 %v2170_v10, %v1712_v15  ;;  %v2171_v27 = vld [vmem:[%s2615_s24 + $0x3b8] sm:$0xf] }
  0x98   : > { %v1982_v24 = vld [vmem:[%s2615_s24 + $0xc4] sm:$0xf]  ;;  %v2203_v28 = vld [vmem:[%s2615_s24 + $0x438] sm:$0xf]  ;;  %v1584_v29 = vmax.bf16 %v2076_v13, %v1519_v17  ;;  %v2077_v30 = vld [vmem:[%s2615_s24 + $0x240] sm:$0xf] }
  0x99   : > { %v2014_v25 = vld [vmem:[%s2615_s24 + $0x144] sm:$0xf]  ;;  %v1391_v31 = vmax.bf16 %v1982_v24, %v1326_v19  ;;  %1874 = vst.msk [vmem:[%s2652_s28 + $0x30] sm:$0xf] %vm1861_vm0, %v1841_v20  ;;  %v1713_v32 = vmax.bf16 %v2139_v16, %v1648_v21  ;;  %v2140_v33 = vld [vmem:[%s2615_s24 + $0x33c] sm:$0xf]  ;;  %v1520_v34 = vmax.bf16 %v2045_v18, %v1455_v23  ;;  %v1842_v37 = vmax.bf16 %v2202_v11, %v1777_v26 }
  0x9a   : > { %v2046_v35 = vld [vmem:[%s2615_s24 + $0x1c4] sm:$0xf]  ;;  %v1327_v36 = vld [vmem:[%s2615_s24 + $0x48] sm:$0xf]  ;;  %v1649_v38 = vmax.bf16 %v2108_v22, %v1584_v29  ;;  %v2109_v39 = vld [vmem:[%s2615_s24 + $0x2c0] sm:$0xf] }
  0x9b   : > { %v1456_v40 = vmax.bf16 %v2014_v25, %v1391_v31  ;;  %v1983_v41 = vld [vmem:[%s2615_s24 + $0xc8] sm:$0xf]  ;;  %v1778_v43 = vmax.bf16 %v2171_v27, %v1713_v32  ;;  %v2172_v44 = vld [vmem:[%s2615_s24 + $0x3bc] sm:$0xf]  ;;  %v1585_v46 = vmax.bf16 %v2077_v30, %v1520_v34  ;;  %v2078_v47 = vld [vmem:[%s2615_s24 + $0x244] sm:$0xf] }
  0x9c   : > { %v2015_v42 = vld [vmem:[%s2615_s24 + $0x148] sm:$0xf]  ;;  %v2204_v45 = vld [vmem:[%s2615_s24 + $0x43c] sm:$0xf]  ;;  %v1392_v48 = vmax.bf16 %v1983_v41, %v1327_v36  ;;  %1875 = vst.msk [vmem:[%s2652_s28 + $0x34] sm:$0xf] %vm1861_vm0, %v1842_v37  ;;  %v1714_v49 = vmax.bf16 %v2140_v33, %v1649_v38 }
  0x9d   : > { %v2141_v50 = vld [vmem:[%s2615_s24 + $0x340] sm:$0xf]  ;;  %v1521_v51 = vmax.bf16 %v2046_v35, %v1456_v40  ;;  %v2047_v52 = vld [vmem:[%s2615_s24 + $0x1c8] sm:$0xf]  ;;  %v1328_v53 = vld [vmem:[%s2615_s24 + $0x4c] sm:$0xf]  ;;  %v1843_v54 = vmax.bf16 %v2203_v28, %v1778_v43  ;;  %v1650_v55 = vmax.bf16 %v2109_v39, %v1585_v46 }
  0x9e   : > { %v2110_v56 = vld [vmem:[%s2615_s24 + $0x2c4] sm:$0xf]  ;;  %v1457_v57 = vmax.bf16 %v2015_v42, %v1392_v48  ;;  %v1984_v58 = vld [vmem:[%s2615_s24 + $0xcc] sm:$0xf]  ;;  %v1779_v60 = vmax.bf16 %v2172_v44, %v1714_v49  ;;  %v2173_v61 = vld [vmem:[%s2615_s24 + $0x3c0] sm:$0xf] }
  0x9f   : > { %v2016_v59 = vld [vmem:[%s2615_s24 + $0x14c] sm:$0xf]  ;;  %v2205_v62 = vld [vmem:[%s2615_s24 + $0x440] sm:$0xf]  ;;  %v1586_v63 = vmax.bf16 %v2078_v47, %v1521_v51  ;;  %v2079_v0 = vld [vmem:[%s2615_s24 + $0x248] sm:$0xf]  ;;  %v1393_v1 = vmax.bf16 %v1984_v58, %v1328_v53  ;;  %v1715_v2 = vmax.bf16 %v2141_v50, %v1650_v55 }
  0xa0   : > { %1876 = vst.msk [vmem:[%s2652_s28 + $0x38] sm:$0xf] %vm1861_vm0, %v1843_v54  ;;  %v2142_v3 = vld [vmem:[%s2615_s24 + $0x344] sm:$0xf]  ;;  %v1522_v4 = vmax.bf16 %v2047_v52, %v1457_v57  ;;  %v2048_v5 = vld [vmem:[%s2615_s24 + $0x1cc] sm:$0xf]  ;;  %v1844_v7 = vmax.bf16 %v2204_v45, %v1779_v60 }
  0xa1   : > { %v1329_v6 = vld [vmem:[%s2615_s24 + $0x50] sm:$0xf]  ;;  %v1651_v8 = vmax.bf16 %v2110_v56, %v1586_v63  ;;  %v2111_v9 = vld [vmem:[%s2615_s24 + $0x2c8] sm:$0xf]  ;;  %v1458_v10 = vmax.bf16 %v2016_v59, %v1393_v1  ;;  %v1780_v13 = vmax.bf16 %v2173_v61, %v1715_v2  ;;  %v2174_v14 = vld [vmem:[%s2615_s24 + $0x3c4] sm:$0xf] }
  0xa2   : > { %v1985_v11 = vld [vmem:[%s2615_s24 + $0xd0] sm:$0xf]  ;;  %v2206_v15 = vld [vmem:[%s2615_s24 + $0x444] sm:$0xf]  ;;  %v1587_v16 = vmax.bf16 %v2079_v0, %v1522_v4  ;;  %v2080_v17 = vld [vmem:[%s2615_s24 + $0x24c] sm:$0xf] }
  0xa3   : > { %v2017_v12 = vld [vmem:[%s2615_s24 + $0x150] sm:$0xf]  ;;  %v1394_v18 = vmax.bf16 %v1985_v11, %v1329_v6  ;;  %1877 = vst.msk [vmem:[%s2652_s28 + $0x3c] sm:$0xf] %vm1861_vm0, %v1844_v7  ;;  %v1716_v19 = vmax.bf16 %v2142_v3, %v1651_v8  ;;  %v2143_v20 = vld [vmem:[%s2615_s24 + $0x348] sm:$0xf]  ;;  %v1523_v21 = vmax.bf16 %v2048_v5, %v1458_v10  ;;  %v1845_v24 = vmax.bf16 %v2205_v62, %v1780_v13 }
  0xa4   : > { %v2049_v22 = vld [vmem:[%s2615_s24 + $0x1d0] sm:$0xf]  ;;  %v1330_v23 = vld [vmem:[%s2615_s24 + $0x54] sm:$0xf]  ;;  %v1652_v25 = vmax.bf16 %v2111_v9, %v1587_v16  ;;  %v2112_v26 = vld [vmem:[%s2615_s24 + $0x2cc] sm:$0xf] }
  0xa5   : > { %v1459_v27 = vmax.bf16 %v2017_v12, %v1394_v18  ;;  %v1986_v28 = vld [vmem:[%s2615_s24 + $0xd4] sm:$0xf]  ;;  %v1781_v30 = vmax.bf16 %v2174_v14, %v1716_v19  ;;  %v2175_v31 = vld [vmem:[%s2615_s24 + $0x3c8] sm:$0xf]  ;;  %v1588_v33 = vmax.bf16 %v2080_v17, %v1523_v21  ;;  %v2081_v34 = vld [vmem:[%s2615_s24 + $0x250] sm:$0xf] }
  0xa6   : > { %v2018_v29 = vld [vmem:[%s2615_s24 + $0x154] sm:$0xf]  ;;  %v2207_v32 = vld [vmem:[%s2615_s24 + $0x448] sm:$0xf]  ;;  %v1395_v35 = vmax.bf16 %v1986_v28, %v1330_v23  ;;  %1878 = vst.msk [vmem:[%s2652_s28 + $0x40] sm:$0xf] %vm1861_vm0, %v1845_v24  ;;  %v1717_v36 = vmax.bf16 %v2143_v20, %v1652_v25 }
  0xa7   : > { %v2144_v37 = vld [vmem:[%s2615_s24 + $0x34c] sm:$0xf]  ;;  %v1524_v38 = vmax.bf16 %v2049_v22, %v1459_v27  ;;  %v2050_v39 = vld [vmem:[%s2615_s24 + $0x1d4] sm:$0xf]  ;;  %v1331_v40 = vld [vmem:[%s2615_s24 + $0x58] sm:$0xf]  ;;  %v1846_v41 = vmax.bf16 %v2206_v15, %v1781_v30  ;;  %v1653_v42 = vmax.bf16 %v2112_v26, %v1588_v33 }
  0xa8   : > { %v2113_v43 = vld [vmem:[%s2615_s24 + $0x2d0] sm:$0xf]  ;;  %v1460_v44 = vmax.bf16 %v2018_v29, %v1395_v35  ;;  %v1987_v45 = vld [vmem:[%s2615_s24 + $0xd8] sm:$0xf]  ;;  %v1782_v47 = vmax.bf16 %v2175_v31, %v1717_v36  ;;  %v2176_v48 = vld [vmem:[%s2615_s24 + $0x3cc] sm:$0xf] }
  0xa9   : > { %v2019_v46 = vld [vmem:[%s2615_s24 + $0x158] sm:$0xf]  ;;  %v2208_v49 = vld [vmem:[%s2615_s24 + $0x44c] sm:$0xf]  ;;  %v1589_v50 = vmax.bf16 %v2081_v34, %v1524_v38  ;;  %v2082_v51 = vld [vmem:[%s2615_s24 + $0x254] sm:$0xf]  ;;  %v1396_v52 = vmax.bf16 %v1987_v45, %v1331_v40  ;;  %v1718_v53 = vmax.bf16 %v2144_v37, %v1653_v42 }
  0xaa   : > { %1879 = vst.msk [vmem:[%s2652_s28 + $0x44] sm:$0xf] %vm1861_vm0, %v1846_v41  ;;  %v2145_v54 = vld [vmem:[%s2615_s24 + $0x350] sm:$0xf]  ;;  %v1525_v55 = vmax.bf16 %v2050_v39, %v1460_v44  ;;  %v2051_v56 = vld [vmem:[%s2615_s24 + $0x1d8] sm:$0xf]  ;;  %v1847_v58 = vmax.bf16 %v2207_v32, %v1782_v47 }
  0xab   : > { %v1332_v57 = vld [vmem:[%s2615_s24 + $0x5c] sm:$0xf]  ;;  %v1654_v59 = vmax.bf16 %v2113_v43, %v1589_v50  ;;  %v2114_v60 = vld [vmem:[%s2615_s24 + $0x2d4] sm:$0xf]  ;;  %v1461_v61 = vmax.bf16 %v2019_v46, %v1396_v52  ;;  %v1783_v0 = vmax.bf16 %v2176_v48, %v1718_v53  ;;  %v2177_v1 = vld [vmem:[%s2615_s24 + $0x3d0] sm:$0xf] }
  0xac   : > { %v1988_v62 = vld [vmem:[%s2615_s24 + $0xdc] sm:$0xf]  ;;  %v2209_v2 = vld [vmem:[%s2615_s24 + $0x450] sm:$0xf]  ;;  %v1590_v3 = vmax.bf16 %v2082_v51, %v1525_v55  ;;  %v2083_v4 = vld [vmem:[%s2615_s24 + $0x258] sm:$0xf] }
  0xad   : > { %v2020_v63 = vld [vmem:[%s2615_s24 + $0x15c] sm:$0xf]  ;;  %v1397_v5 = vmax.bf16 %v1988_v62, %v1332_v57  ;;  %1880 = vst.msk [vmem:[%s2652_s28 + $0x48] sm:$0xf] %vm1861_vm0, %v1847_v58  ;;  %v1719_v6 = vmax.bf16 %v2145_v54, %v1654_v59  ;;  %v2146_v7 = vld [vmem:[%s2615_s24 + $0x354] sm:$0xf]  ;;  %v1526_v8 = vmax.bf16 %v2051_v56, %v1461_v61  ;;  %v1848_v11 = vmax.bf16 %v2208_v49, %v1783_v0 }
  0xae   : > { %v2052_v9 = vld [vmem:[%s2615_s24 + $0x1dc] sm:$0xf]  ;;  %v1333_v10 = vld [vmem:[%s2615_s24 + $0x60] sm:$0xf]  ;;  %v1655_v12 = vmax.bf16 %v2114_v60, %v1590_v3  ;;  %v2115_v13 = vld [vmem:[%s2615_s24 + $0x2d8] sm:$0xf] }
  0xaf   : > { %v1462_v14 = vmax.bf16 %v2020_v63, %v1397_v5  ;;  %v1989_v15 = vld [vmem:[%s2615_s24 + $0xe0] sm:$0xf]  ;;  %v1784_v17 = vmax.bf16 %v2177_v1, %v1719_v6  ;;  %v2178_v18 = vld [vmem:[%s2615_s24 + $0x3d4] sm:$0xf]  ;;  %v1591_v20 = vmax.bf16 %v2083_v4, %v1526_v8  ;;  %v2084_v21 = vld [vmem:[%s2615_s24 + $0x25c] sm:$0xf] }
  0xb0   : > { %v2021_v16 = vld [vmem:[%s2615_s24 + $0x160] sm:$0xf]  ;;  %v2210_v19 = vld [vmem:[%s2615_s24 + $0x454] sm:$0xf]  ;;  %v1398_v22 = vmax.bf16 %v1989_v15, %v1333_v10  ;;  %1881 = vst.msk [vmem:[%s2652_s28 + $0x4c] sm:$0xf] %vm1861_vm0, %v1848_v11  ;;  %v1720_v23 = vmax.bf16 %v2146_v7, %v1655_v12 }
  0xb1   : > { %v2147_v24 = vld [vmem:[%s2615_s24 + $0x358] sm:$0xf]  ;;  %v1527_v25 = vmax.bf16 %v2052_v9, %v1462_v14  ;;  %v2053_v26 = vld [vmem:[%s2615_s24 + $0x1e0] sm:$0xf]  ;;  %v1334_v27 = vld [vmem:[%s2615_s24 + $0x64] sm:$0xf]  ;;  %v1849_v28 = vmax.bf16 %v2209_v2, %v1784_v17  ;;  %v1656_v29 = vmax.bf16 %v2115_v13, %v1591_v20 }
  0xb2   : > { %v2116_v30 = vld [vmem:[%s2615_s24 + $0x2dc] sm:$0xf]  ;;  %v1463_v31 = vmax.bf16 %v2021_v16, %v1398_v22  ;;  %v1990_v32 = vld [vmem:[%s2615_s24 + $0xe4] sm:$0xf]  ;;  %v1785_v34 = vmax.bf16 %v2178_v18, %v1720_v23  ;;  %v2179_v35 = vld [vmem:[%s2615_s24 + $0x3d8] sm:$0xf] }
  0xb3   : > { %v2022_v33 = vld [vmem:[%s2615_s24 + $0x164] sm:$0xf]  ;;  %v2211_v36 = vld [vmem:[%s2615_s24 + $0x458] sm:$0xf]  ;;  %v1592_v37 = vmax.bf16 %v2084_v21, %v1527_v25  ;;  %v2085_v38 = vld [vmem:[%s2615_s24 + $0x260] sm:$0xf]  ;;  %v1399_v39 = vmax.bf16 %v1990_v32, %v1334_v27  ;;  %v1721_v40 = vmax.bf16 %v2147_v24, %v1656_v29 }
  0xb4   : > { %1882 = vst.msk [vmem:[%s2652_s28 + $0x50] sm:$0xf] %vm1861_vm0, %v1849_v28  ;;  %v2148_v41 = vld [vmem:[%s2615_s24 + $0x35c] sm:$0xf]  ;;  %v1528_v42 = vmax.bf16 %v2053_v26, %v1463_v31  ;;  %v2054_v43 = vld [vmem:[%s2615_s24 + $0x1e4] sm:$0xf]  ;;  %v1850_v45 = vmax.bf16 %v2210_v19, %v1785_v34 }
  0xb5   : > { %v1335_v44 = vld [vmem:[%s2615_s24 + $0x68] sm:$0xf]  ;;  %v1657_v46 = vmax.bf16 %v2116_v30, %v1592_v37  ;;  %v2117_v47 = vld [vmem:[%s2615_s24 + $0x2e0] sm:$0xf]  ;;  %v1464_v48 = vmax.bf16 %v2022_v33, %v1399_v39  ;;  %v1786_v51 = vmax.bf16 %v2179_v35, %v1721_v40  ;;  %v2180_v52 = vld [vmem:[%s2615_s24 + $0x3dc] sm:$0xf] }
  0xb6   : > { %v1991_v49 = vld [vmem:[%s2615_s24 + $0xe8] sm:$0xf]  ;;  %v2212_v53 = vld [vmem:[%s2615_s24 + $0x45c] sm:$0xf]  ;;  %v1593_v54 = vmax.bf16 %v2085_v38, %v1528_v42  ;;  %v2086_v55 = vld [vmem:[%s2615_s24 + $0x264] sm:$0xf] }
  0xb7   : > { %v2023_v50 = vld [vmem:[%s2615_s24 + $0x168] sm:$0xf]  ;;  %v1400_v56 = vmax.bf16 %v1991_v49, %v1335_v44  ;;  %1883 = vst.msk [vmem:[%s2652_s28 + $0x54] sm:$0xf] %vm1861_vm0, %v1850_v45  ;;  %v1722_v57 = vmax.bf16 %v2148_v41, %v1657_v46  ;;  %v2149_v58 = vld [vmem:[%s2615_s24 + $0x360] sm:$0xf]  ;;  %v1529_v59 = vmax.bf16 %v2054_v43, %v1464_v48  ;;  %v1851_v62 = vmax.bf16 %v2211_v36, %v1786_v51 }
  0xb8   : > { %v2055_v60 = vld [vmem:[%s2615_s24 + $0x1e8] sm:$0xf]  ;;  %v1336_v61 = vld [vmem:[%s2615_s24 + $0x6c] sm:$0xf]  ;;  %v1658_v63 = vmax.bf16 %v2117_v47, %v1593_v54  ;;  %v2118_v0 = vld [vmem:[%s2615_s24 + $0x2e4] sm:$0xf] }
  0xb9   : > { %v1465_v1 = vmax.bf16 %v2023_v50, %v1400_v56  ;;  %v1992_v2 = vld [vmem:[%s2615_s24 + $0xec] sm:$0xf]  ;;  %v1787_v4 = vmax.bf16 %v2180_v52, %v1722_v57  ;;  %v2181_v5 = vld [vmem:[%s2615_s24 + $0x3e0] sm:$0xf]  ;;  %v1594_v7 = vmax.bf16 %v2086_v55, %v1529_v59  ;;  %v2087_v8 = vld [vmem:[%s2615_s24 + $0x268] sm:$0xf] }
  0xba   : > { %v2024_v3 = vld [vmem:[%s2615_s24 + $0x16c] sm:$0xf]  ;;  %v2213_v6 = vld [vmem:[%s2615_s24 + $0x460] sm:$0xf]  ;;  %v1401_v9 = vmax.bf16 %v1992_v2, %v1336_v61  ;;  %1884 = vst.msk [vmem:[%s2652_s28 + $0x58] sm:$0xf] %vm1861_vm0, %v1851_v62  ;;  %v1723_v10 = vmax.bf16 %v2149_v58, %v1658_v63 }
  0xbb   : > { %v2150_v11 = vld [vmem:[%s2615_s24 + $0x364] sm:$0xf]  ;;  %v1530_v12 = vmax.bf16 %v2055_v60, %v1465_v1  ;;  %v2056_v13 = vld [vmem:[%s2615_s24 + $0x1ec] sm:$0xf]  ;;  %v1337_v14 = vld [vmem:[%s2615_s24 + $0x70] sm:$0xf]  ;;  %v1852_v15 = vmax.bf16 %v2212_v53, %v1787_v4  ;;  %v1659_v16 = vmax.bf16 %v2118_v0, %v1594_v7 }
  0xbc   : > { %v2119_v17 = vld [vmem:[%s2615_s24 + $0x2e8] sm:$0xf]  ;;  %v1466_v18 = vmax.bf16 %v2024_v3, %v1401_v9  ;;  %v1993_v19 = vld [vmem:[%s2615_s24 + $0xf0] sm:$0xf]  ;;  %v1788_v21 = vmax.bf16 %v2181_v5, %v1723_v10  ;;  %v2182_v22 = vld [vmem:[%s2615_s24 + $0x3e4] sm:$0xf] }
  0xbd   : > { %v2025_v20 = vld [vmem:[%s2615_s24 + $0x170] sm:$0xf]  ;;  %v2214_v23 = vld [vmem:[%s2615_s24 + $0x464] sm:$0xf]  ;;  %v1595_v24 = vmax.bf16 %v2087_v8, %v1530_v12  ;;  %v2088_v25 = vld [vmem:[%s2615_s24 + $0x26c] sm:$0xf]  ;;  %v1402_v26 = vmax.bf16 %v1993_v19, %v1337_v14  ;;  %v1724_v27 = vmax.bf16 %v2150_v11, %v1659_v16 }
  0xbe   : > { %1885 = vst.msk [vmem:[%s2652_s28 + $0x5c] sm:$0xf] %vm1861_vm0, %v1852_v15  ;;  %v2151_v28 = vld [vmem:[%s2615_s24 + $0x368] sm:$0xf]  ;;  %v1531_v29 = vmax.bf16 %v2056_v13, %v1466_v18  ;;  %v2057_v30 = vld [vmem:[%s2615_s24 + $0x1f0] sm:$0xf]  ;;  %v1853_v32 = vmax.bf16 %v2213_v6, %v1788_v21 }
  0xbf   : > { %v1338_v31 = vld [vmem:[%s2615_s24 + $0x74] sm:$0xf]  ;;  %v1660_v33 = vmax.bf16 %v2119_v17, %v1595_v24  ;;  %v2120_v34 = vld [vmem:[%s2615_s24 + $0x2ec] sm:$0xf]  ;;  %v1467_v35 = vmax.bf16 %v2025_v20, %v1402_v26  ;;  %v1789_v38 = vmax.bf16 %v2182_v22, %v1724_v27  ;;  %v2183_v39 = vld [vmem:[%s2615_s24 + $0x3e8] sm:$0xf] }
  0xc0   : > { %v1994_v36 = vld [vmem:[%s2615_s24 + $0xf4] sm:$0xf]  ;;  %v2215_v40 = vld [vmem:[%s2615_s24 + $0x468] sm:$0xf]  ;;  %v1596_v41 = vmax.bf16 %v2088_v25, %v1531_v29  ;;  %v2089_v42 = vld [vmem:[%s2615_s24 + $0x270] sm:$0xf] }
  0xc1   : > { %v2026_v37 = vld [vmem:[%s2615_s24 + $0x174] sm:$0xf]  ;;  %v1403_v43 = vmax.bf16 %v1994_v36, %v1338_v31  ;;  %1886 = vst.msk [vmem:[%s2652_s28 + $0x60] sm:$0xf] %vm1861_vm0, %v1853_v32  ;;  %v1725_v44 = vmax.bf16 %v2151_v28, %v1660_v33  ;;  %v2152_v45 = vld [vmem:[%s2615_s24 + $0x36c] sm:$0xf]  ;;  %v1532_v46 = vmax.bf16 %v2057_v30, %v1467_v35  ;;  %v1854_v49 = vmax.bf16 %v2214_v23, %v1789_v38 }
  0xc2   : > { %v2058_v47 = vld [vmem:[%s2615_s24 + $0x1f4] sm:$0xf]  ;;  %v1339_v48 = vld [vmem:[%s2615_s24 + $0x78] sm:$0xf]  ;;  %v1661_v50 = vmax.bf16 %v2120_v34, %v1596_v41  ;;  %v2121_v51 = vld [vmem:[%s2615_s24 + $0x2f0] sm:$0xf] }
  0xc3   : > { %v1468_v52 = vmax.bf16 %v2026_v37, %v1403_v43  ;;  %v1995_v53 = vld [vmem:[%s2615_s24 + $0xf8] sm:$0xf]  ;;  %v1790_v55 = vmax.bf16 %v2183_v39, %v1725_v44  ;;  %v2184_v56 = vld [vmem:[%s2615_s24 + $0x3ec] sm:$0xf]  ;;  %v1597_v58 = vmax.bf16 %v2089_v42, %v1532_v46  ;;  %v2090_v59 = vld [vmem:[%s2615_s24 + $0x274] sm:$0xf] }
  0xc4   : > { %v2027_v54 = vld [vmem:[%s2615_s24 + $0x178] sm:$0xf]  ;;  %v2216_v57 = vld [vmem:[%s2615_s24 + $0x46c] sm:$0xf]  ;;  %v1404_v60 = vmax.bf16 %v1995_v53, %v1339_v48  ;;  %1887 = vst.msk [vmem:[%s2652_s28 + $0x64] sm:$0xf] %vm1861_vm0, %v1854_v49  ;;  %v1726_v61 = vmax.bf16 %v2152_v45, %v1661_v50 }
  0xc5   : > { %v2153_v62 = vld [vmem:[%s2615_s24 + $0x370] sm:$0xf]  ;;  %v1533_v63 = vmax.bf16 %v2058_v47, %v1468_v52  ;;  %v2059_v0 = vld [vmem:[%s2615_s24 + $0x1f8] sm:$0xf]  ;;  %v1340_v1 = vld [vmem:[%s2615_s24 + $0x7c] sm:$0xf]  ;;  %v1855_v2 = vmax.bf16 %v2215_v40, %v1790_v55  ;;  %v1662_v3 = vmax.bf16 %v2121_v51, %v1597_v58 }
  0xc6   : > { %v2122_v4 = vld [vmem:[%s2615_s24 + $0x2f4] sm:$0xf]  ;;  %v1469_v5 = vmax.bf16 %v2027_v54, %v1404_v60  ;;  %v1996_v6 = vld [vmem:[%s2615_s24 + $0xfc] sm:$0xf]  ;;  %v1791_v8 = vmax.bf16 %v2184_v56, %v1726_v61  ;;  %v2185_v9 = vld [vmem:[%s2615_s24 + $0x3f0] sm:$0xf] }
  0xc7   : > { %v2028_v7 = vld [vmem:[%s2615_s24 + $0x17c] sm:$0xf]  ;;  %v1598_v10 = vmax.bf16 %v2090_v59, %v1533_v63  ;;  %v2091_v11 = vld [vmem:[%s2615_s24 + $0x278] sm:$0xf]  ;;  %v1405_v12 = vmax.bf16 %v1996_v6, %v1340_v1  ;;  %1888 = vst.msk [vmem:[%s2652_s28 + $0x68] sm:$0xf] %vm1861_vm0, %v1855_v2  ;;  %v1727_v13 = vmax.bf16 %v2153_v62, %v1662_v3 }
  0xc8   : > { %v2154_v14 = vld [vmem:[%s2615_s24 + $0x374] sm:$0xf]  ;;  %v1534_v15 = vmax.bf16 %v2059_v0, %v1469_v5  ;;  %v2060_v16 = vld [vmem:[%s2615_s24 + $0x1fc] sm:$0xf]  ;;  %v1856_v17 = vmax.bf16 %v2216_v57, %v1791_v8  ;;  %v2217_v18 = vld [vmem:[%s2615_s24 + $0x470] sm:$0xf] }
  0xc9   : > { %v1663_v19 = vmax.bf16 %v2122_v4, %v1598_v10  ;;  %v2123_v20 = vld [vmem:[%s2615_s24 + $0x2f8] sm:$0xf]  ;;  %v1470_v21 = vmax.bf16 %v2028_v7, %v1405_v12  ;;  %v1792_v22 = vmax.bf16 %v2185_v9, %v1727_v13  ;;  %v2186_v23 = vld [vmem:[%s2615_s24 + $0x3f4] sm:$0xf]  ;;  %v2092_v25 = vld [vmem:[%s2615_s24 + $0x27c] sm:$0xf] }
  0xca   : > { %v1599_v24 = vmax.bf16 %v2091_v11, %v1534_v15  ;;  %1889 = vst.msk [vmem:[%s2652_s28 + $0x6c] sm:$0xf] %vm1861_vm0, %v1856_v17  ;;  %v2155_v27 = vld [vmem:[%s2615_s24 + $0x378] sm:$0xf]  ;;  %v2218_v30 = vld [vmem:[%s2615_s24 + $0x474] sm:$0xf] }
  0xcb   : > { %v1728_v26 = vmax.bf16 %v2154_v14, %v1663_v19  ;;  %v1535_v28 = vmax.bf16 %v2060_v16, %v1470_v21  ;;  %v1857_v29 = vmax.bf16 %v2217_v18, %v1792_v22  ;;  %v2124_v32 = vld [vmem:[%s2615_s24 + $0x2fc] sm:$0xf]  ;;  %v2187_v34 = vld [vmem:[%s2615_s24 + $0x3f8] sm:$0xf] }
  0xcc   : > { %v1664_v31 = vmax.bf16 %v2123_v20, %v1599_v24  ;;  %v2156_v37 = vld [vmem:[%s2615_s24 + $0x37c] sm:$0xf]  ;;  %v2219_v39 = vld [vmem:[%s2615_s24 + $0x478] sm:$0xf] }
  0xcd   : > { %v1793_v33 = vmax.bf16 %v2186_v23, %v1728_v26  ;;  %v1600_v35 = vmax.bf16 %v2092_v25, %v1535_v28  ;;  %1890 = vst.msk [vmem:[%s2652_s28 + $0x70] sm:$0xf] %vm1861_vm0, %v1857_v29  ;;  %v2188_v42 = vld [vmem:[%s2615_s24 + $0x3fc] sm:$0xf] }
  0xce   : > { %v1729_v36 = vmax.bf16 %v2155_v27, %v1664_v31  ;;  %v2220_v45 = vld [vmem:[%s2615_s24 + $0x47c] sm:$0xf] }
  0xcf   : > { %v1858_v38 = vmax.bf16 %v2218_v30, %v1793_v33  ;;  %v1665_v40 = vmax.bf16 %v2124_v32, %v1600_v35 }
  0xd0   : > { %v1794_v41 = vmax.bf16 %v2187_v34, %v1729_v36 }
  0xd1   : > { %1891 = vst.msk [vmem:[%s2652_s28 + $0x74] sm:$0xf] %vm1861_vm0, %v1858_v38  ;;  %v1730_v43 = vmax.bf16 %v2156_v37, %v1665_v40 }
  0xd2   : > { %v1859_v44 = vmax.bf16 %v2219_v39, %v1794_v41 }
  0xd3   : > { %v1795_v46 = vmax.bf16 %v2188_v42, %v1730_v43 }
  0xd4   : > { %1892 = vst.msk [vmem:[%s2652_s28 + $0x78] sm:$0xf] %vm1861_vm0, %v1859_v44 }
  0xd5   : > { %v1860_v47 = vmax.bf16 %v2220_v45, %v1795_v46 }
  0xd7   : > { %1893 = vst.msk [vmem:[%s2652_s28 + $0x7c] sm:$0xf] %vm1861_vm0, %v1860_v47 }
  0xd8 PF: > { %p8_p9 = scmp.ge.s32.totalorder %s2301_s10, 4   ;;  %s2989_s6 = smov %s2268_s7 }
  0xd9   : > { %s2990_s7 = smov %s2310_s13  ;;  %s2991_s8 = smov %s2301_s10 }
  0xda   :  { %10 = sbr.rel (!%p8_p9) target bundleno = 2 (0x2), region = 108 }

// kernel: fcn_forward.21
= control target key start
LH: loop header
LB: loop body
LE: loop exit
PB: predicated region body
PF: predicated region fallthrough
CT: control target
= control target key end

     0   :  { %v3558_v0 = vmov 0   ;;  %vm1302_vm0 = vcmask 523264   ;;  %vm2586_vm1 = vcmask 519168   ;;  %s4879_s1 = inlined_call_operand.vmem [shape: bf16[576,64], index: 1, kind: input, shape index: {}]   ;;  %s4880_s0 = inlined_call_operand.vmem [shape: bf16[512,576], index: 0, kind: input, shape index: {}]   ;;  %s4881_s2 = inlined_call_operand.vmem [shape: f32[1,64], index: 2, kind: input, shape index: {}]   ;;  %s4882_s3 = inlined_call_operand.vmem [shape: bf16[512,64], index: 3, kind: output, shape index: {}]  }
   0x1   :  { %1399 = vmatprep.subr.bf16.mxu0 %v3558_v0  ;;  %3120 = vmatprep.subr.bf16.mxu1 %v3558_v0  ;;  %v3297_v1 = vld [vmem:[%s4879_s1] sm:$0xff]   ;;  %v3298_v2 = vld [vmem:[%s4879_s1 + $0x8] sm:$0xff]   ;;  %v3299_v3 = vld [vmem:[%s4879_s1 + $0x10] sm:$0xff]  }
   0x2   :  { %1400 = vmatpush1.bf16.msra.mxu0 %v3297_v1  ;;  %3136 = vmatpush1.bf16.msra.mxu1 %v3297_v1  ;;  %v3300_v4 = vld [vmem:[%s4879_s1 + $0x18] sm:$0xff]   ;;  %v3301_v5 = vld [vmem:[%s4879_s1 + $0x20] sm:$0xff]   ;;  %v3302_v7 = vld [vmem:[%s4879_s1 + $0x28] sm:$0xff]  }
   0x3   :  { %1401 = vmatprep.subr.bf16.mxu0 %v3558_v0  ;;  %3121 = vmatprep.subr.bf16.mxu1 %v3558_v0  ;;  %v3315_v6 = vld [vmem:[%s4880_s0 + $0x4] ss:$20 sps:$4 sm:$0xff]   ;;  %v3303_v9 = vld [vmem:[%s4879_s1 + $0x30] sm:$0xff]   ;;  %v3306_v12 = vld [vmem:[%s4879_s1 + $0x48] sm:$0xff]  }
   0x4   :  { %v3318_v8 = vld [vmem:[%s4880_s0 + $0x144] ss:$20 sps:$4 sm:$0xff]   ;;  %1431 = vmatprep.mubr.bf16.mxu0 %v3315_v6  ;;  %v3307_v13 = vld [vmem:[%s4879_s1 + $0x50] sm:$0xff]   ;;  %v3310_v16 = vld [vmem:[%s4879_s1 + $0x68] sm:$0xff]  }
   0x5   :  { %1495 = vmatprep.mubr.bf16.mxu1 %v3318_v8  ;;  %v3304_v10 = vld [vmem:[%s4879_s1 + $0x38] sm:$0xff]   ;;  %v3305_v11 = vld [vmem:[%s4879_s1 + $0x40] sm:$0xff]   ;;  %v3311_v17 = vld [vmem:[%s4879_s1 + $0x70] sm:$0xff]  }
   0x6   :  { %1402 = vmatpush1.bf16.msra.mxu0 %v3298_v2  ;;  %3137 = vmatpush1.bf16.msra.mxu1 %v3298_v2  ;;  %v3308_v14 = vld [vmem:[%s4879_s1 + $0x58] sm:$0xff]   ;;  %v3309_v15 = vld [vmem:[%s4879_s1 + $0x60] sm:$0xff]   ;;  %v3369_v25 = vld [vmem:[%s4879_s1 + $0x108] sm:$0xff]  }
   0x7   :  { %1403 = vmatprep.subr.bf16.mxu0 %v3558_v0  ;;  %3122 = vmatprep.subr.bf16.mxu1 %v3558_v0  ;;  %v3312_v18 = vld [vmem:[%s4879_s1 + $0x78] sm:$0xff]   ;;  %v3320_v19 = vld [vmem:[%s4879_s1 + $0x100] sm:$0xff]   ;;  %v3321_v26 = vld [vmem:[%s4879_s1 + $0x88] sm:$0xff]  }
   0x8   :  { %v3313_v20 = vld [vmem:[%s4880_s0] ss:$20 sps:$4 sm:$0xff]   ;;  %v3326_v27 = vld [vmem:[%s4880_s0 + $0x28] ss:$20 sps:$4 sm:$0xff]   ;;  %v3334_v34 = vld [vmem:[%s4880_s0 + $0x50] ss:$20 sps:$4 sm:$0xff]  }
   0x9   :  { %v3316_v21 = vld [vmem:[%s4880_s0 + $0x140] ss:$20 sps:$4 sm:$0xff]   ;;  %v3327_v28 = vld [vmem:[%s4880_s0 + $0x168] ss:$20 sps:$4 sm:$0xff]   ;;  %v3335_v35 = vld [vmem:[%s4880_s0 + $0x190] ss:$20 sps:$4 sm:$0xff]  }
   0xa   :  { %1404 = vmatpush1.bf16.msra.mxu0 %v3299_v3  ;;  %3138 = vmatpush1.bf16.msra.mxu1 %v3299_v3  ;;  %v3319_v22 = vld [vmem:[%s4879_s1 + $0x80] sm:$0xff]   ;;  %v3328_v29 = vld [vmem:[%s4879_s1 + $0x90] sm:$0xff]   ;;  %v3329_v33 = vld [vmem:[%s4879_s1 + $0x98] sm:$0xff]  }
   0xb   :  { %1405 = vmatprep.subr.bf16.mxu0 %v3558_v0  ;;  %3123 = vmatprep.subr.bf16.mxu1 %v3558_v0  ;;  %v3322_v23 = vld [vmem:[%s4880_s0 + $0x2c] ss:$20 sps:$4 sm:$0xff]   ;;  %v3409_v30 = vld [vmem:[%s4879_s1 + $0x110] sm:$0xff]   ;;  %v3346_v43 = vld [vmem:[%s4880_s0 + $0xa4] ss:$20 sps:$4 sm:$0xff]  }
   0xc   :  { %v3324_v24 = vld [vmem:[%s4880_s0 + $0x16c] ss:$20 sps:$4 sm:$0xff]   ;;  %v3330_v31 = vld [vmem:[%s4880_s0 + $0x54] ss:$20 sps:$4 sm:$0xff]   ;;  %v3338_v37 = vld [vmem:[%s4880_s0 + $0x7c] ss:$20 sps:$4 sm:$0xff]  }
   0xd   :  { %v3332_v32 = vld [vmem:[%s4880_s0 + $0x194] ss:$20 sps:$4 sm:$0xff]   ;;  %v3336_v36 = vld [vmem:[%s4879_s1 + $0xa0] sm:$0xff]   ;;  %v3340_v38 = vld [vmem:[%s4880_s0 + $0x1bc] ss:$20 sps:$4 sm:$0xff]  }
   0xe   :  { %1406 = vmatpush1.bf16.msra.mxu0 %v3300_v4  ;;  %3139 = vmatpush1.bf16.msra.mxu1 %v3300_v4  ;;  %v3337_v39 = vld [vmem:[%s4879_s1 + $0xa8] sm:$0xff]   ;;  %v3344_v42 = vld [vmem:[%s4879_s1 + $0xb0] sm:$0xff]   ;;  %v3446_v44 = vld [vmem:[%s4879_s1 + $0x118] sm:$0xff]  }
   0xf   :  { %1407 = vmatprep.subr.bf16.mxu0 %v3558_v0  ;;  %3124 = vmatprep.subr.bf16.mxu1 %v3558_v0  ;;  %v3342_v40 = vld [vmem:[%s4880_s0 + $0x78] ss:$20 sps:$4 sm:$0xff]   ;;  %v3350_v47 = vld [vmem:[%s4880_s0 + $0xa0] ss:$20 sps:$4 sm:$0xff]   ;;  %v3358_v53 = vld [vmem:[%s4880_s0 + $0xc8] ss:$20 sps:$4 sm:$0xff]  }
  0x10   :  { %v3343_v41 = vld [vmem:[%s4880_s0 + $0x1b8] ss:$20 sps:$4 sm:$0xff]   ;;  %v3351_v48 = vld [vmem:[%s4880_s0 + $0x1e0] ss:$20 sps:$4 sm:$0xff]   ;;  %v3359_v54 = vld [vmem:[%s4880_s0 + $0x208] ss:$20 sps:$4 sm:$0xff]  }
  0x11   :  { %v3348_v45 = vld [vmem:[%s4880_s0 + $0x1e4] ss:$20 sps:$4 sm:$0xff]   ;;  %v3354_v50 = vld [vmem:[%s4880_s0 + $0xcc] ss:$20 sps:$4 sm:$0xff]   ;;  %v3360_v55 = vld [vmem:[%s4879_s1 + $0xd0] sm:$0xff]  }
  0x12   :  { %1408 = vmatpush1.bf16.msra.mxu0 %v3301_v5  ;;  %3140 = vmatpush1.bf16.msra.mxu1 %v3301_v5  ;;  %v3345_v46 = vld [vmem:[%s4879_s1 + $0xb8] sm:$0xff]   ;;  %v3352_v49 = vld [vmem:[%s4879_s1 + $0xc0] sm:$0xff]   ;;  %v3353_v52 = vld [vmem:[%s4879_s1 + $0xc8] sm:$0xff]  }
  0x13   :  { %1409 = vmatprep.subr.bf16.mxu0 %v3558_v0  ;;  %3125 = vmatprep.subr.bf16.mxu1 %v3558_v0  ;;  %v3356_v51 = vld [vmem:[%s4880_s0 + $0x20c] ss:$20 sps:$4 sm:$0xff]   ;;  %v3362_v56 = vld [vmem:[%s4880_s0 + $0xf4] ss:$20 sps:$4 sm:$0xff]   ;;  %v3361_v58 = vld [vmem:[%s4879_s1 + $0xd8] sm:$0xff]  }
  0x14   :  { %v3364_v57 = vld [vmem:[%s4880_s0 + $0x234] ss:$20 sps:$4 sm:$0xff]   ;;  %v3366_v59 = vld [vmem:[%s4880_s0 + $0xf0] ss:$20 sps:$4 sm:$0xff]   ;;  %v3375_v2 = vld [vmem:[%s4880_s0 + $0x118] ss:$20 sps:$4 sm:$0xff]  }
  0x15   :  { %v3367_v60 = vld [vmem:[%s4880_s0 + $0x230] ss:$20 sps:$4 sm:$0xff]   ;;  %v3370_v1 = vld [vmem:[%s4879_s1 + $0xe8] sm:$0xff]  }
  0x16   :  { %1410 = vmatpush1.bf16.msra.mxu0 %v3302_v7  ;;  %3141 = vmatpush1.bf16.msra.mxu1 %v3302_v7  ;;  %v3368_v61 = vld [vmem:[%s4879_s1 + $0xe0] sm:$0xff]   ;;  %v3371_v62 = vld [vmem:[%s4880_s0 + $0x11c] ss:$20 sps:$4 sm:$0xff]   ;;  %v3376_v3 = vld [vmem:[%s4880_s0 + $0x258] ss:$20 sps:$4 sm:$0xff]  }
  0x17   :  { %1411 = vmatprep.subr.bf16.mxu0 %v3558_v0  ;;  %3126 = vmatprep.subr.bf16.mxu1 %v3558_v0  ;;  %v3373_v63 = vld [vmem:[%s4880_s0 + $0x25c] ss:$20 sps:$4 sm:$0xff]   ;;  %v3379_v5 = vld [vmem:[%s4880_s0 + $0x284] ss:$20 sps:$4 sm:$0xff]   ;;  %v3383_v6 = vld [vmem:[%s4880_s0 + $0xc] ss:$20 sps:$4 sm:$0xff]  }
  0x18   :  { %v3377_v4 = vld [vmem:[%s4879_s1 + $0xf0] sm:$0xff]   ;;  %v3378_v7 = vld [vmem:[%s4879_s1 + $0xf8] sm:$0xff]  }
  0x19   :  { %v3381_v8 = vld [vmem:[%s4880_s0 + $0x8] ss:$20 sps:$4 sm:$0xff]  }
  0x1a   :  { %1412 = vmatpush1.bf16.msra.mxu0 %v3303_v9  ;;  %3142 = vmatpush1.bf16.msra.mxu1 %v3303_v9  ;;  %v3384_v9 = vld [vmem:[%s4880_s0 + $0x280] ss:$20 sps:$4 sm:$0xff]  }
  0x1b   :  { %1413 = vmatprep.subr.bf16.mxu0 %v3558_v0  ;;  %3127 = vmatprep.subr.bf16.mxu1 %v3558_v0 }
  0x1e   :  { %1414 = vmatpush1.bf16.msra.mxu0 %v3304_v10  ;;  %3143 = vmatpush1.bf16.msra.mxu1 %v3304_v10  ;;  %v3385_v10 = vld [vmem:[%s4880_s0 + $0x2ac] ss:$20 sps:$4 sm:$0xff]  }
  0x1f   :  { %1415 = vmatprep.subr.bf16.mxu0 %v3558_v0  ;;  %3128 = vmatprep.subr.bf16.mxu1 %v3558_v0 }
  0x22   :  { %1416 = vmatpush1.bf16.msra.mxu0 %v3305_v11  ;;  %3144 = vmatpush1.bf16.msra.mxu1 %v3305_v11  ;;  %v3387_v11 = vld [vmem:[%s4880_s0 + $0x34] ss:$20 sps:$4 sm:$0xff]  }
  0x23   :  { %1417 = vmatprep.subr.bf16.mxu0 %v3558_v0  ;;  %3129 = vmatprep.subr.bf16.mxu1 %v3558_v0 }
  0x26   :  { %1418 = vmatpush1.bf16.msra.mxu0 %v3306_v12  ;;  %3145 = vmatpush1.bf16.msra.mxu1 %v3306_v12  ;;  %v3390_v12 = vld [vmem:[%s4880_s0 + $0x30] ss:$20 sps:$4 sm:$0xff]  }
  0x27   :  { %1419 = vmatprep.subr.bf16.mxu0 %v3558_v0  ;;  %3130 = vmatprep.subr.bf16.mxu1 %v3558_v0 }
  0x2a   :  { %1420 = vmatpush1.bf16.msra.mxu0 %v3307_v13  ;;  %3146 = vmatpush1.bf16.msra.mxu1 %v3307_v13  ;;  %v3391_v13 = vld [vmem:[%s4880_s0 + $0x2d4] ss:$20 sps:$4 sm:$0xff]  }
  0x2b   :  { %1421 = vmatprep.subr.bf16.mxu0 %v3558_v0  ;;  %3131 = vmatprep.subr.bf16.mxu1 %v3558_v0 }
  0x2e   :  { %1422 = vmatpush1.bf16.msra.mxu0 %v3308_v14  ;;  %3147 = vmatpush1.bf16.msra.mxu1 %v3308_v14  ;;  %v3393_v14 = vld [vmem:[%s4880_s0 + $0x5c] ss:$20 sps:$4 sm:$0xff]  }
  0x2f   :  { %1423 = vmatprep.subr.bf16.mxu0 %v3558_v0  ;;  %3132 = vmatprep.subr.bf16.mxu1 %v3558_v0 }
  0x32   :  { %1424 = vmatpush1.bf16.msra.mxu0 %v3309_v15  ;;  %3148 = vmatpush1.bf16.msra.mxu1 %v3309_v15  ;;  %v3395_v15 = vld [vmem:[%s4880_s0 + $0x2d0] ss:$20 sps:$4 sm:$0xff]  }
  0x33   :  { %1425 = vmatprep.subr.bf16.mxu0 %v3558_v0  ;;  %3133 = vmatprep.subr.bf16.mxu1 %v3558_v0 }
  0x36   :  { %1426 = vmatpush1.bf16.msra.mxu0 %v3310_v16  ;;  %3149 = vmatpush1.bf16.msra.mxu1 %v3310_v16  ;;  %v3396_v16 = vld [vmem:[%s4880_s0 + $0x58] ss:$20 sps:$4 sm:$0xff]  }
  0x37   :  { %1427 = vmatprep.subr.bf16.mxu0 %v3558_v0  ;;  %3134 = vmatprep.subr.bf16.mxu1 %v3558_v0 }
  0x3a   :  { %1428 = vmatpush1.bf16.msra.mxu0 %v3311_v17  ;;  %3150 = vmatpush1.bf16.msra.mxu1 %v3311_v17  ;;  %v3397_v17 = vld [vmem:[%s4880_s0 + $0x2fc] ss:$20 sps:$4 sm:$0xff]  }
  0x3b   :  { %1429 = vmatprep.subr.bf16.mxu0 %v3558_v0  ;;  %3135 = vmatprep.subr.bf16.mxu1 %v3558_v0 }
  0x3e   :  { %1430 = vmatpush1.bf16.msra.mxu0 %v3312_v18  ;;  %3151 = vmatpush1.bf16.msra.mxu1 %v3312_v18  ;;  %v3399_v18 = vld [vmem:[%s4880_s0 + $0x84] ss:$20 sps:$4 sm:$0xff]  }
  0x3f   :  { %1688 = vmatprep.subr.bf16.mxu0 %v3558_v0  ;;  %3048 = vmatprep.subr.bf16.mxu1 %v3320_v19 }
  0x41   :  { %1432 = vmatmul.mubr.bf16.vlgmr.msra.gmra.mrb[0].mxu0 %v3313_v20  ;;  %1496 = vmatmul.mubr.bf16.vlgmr.msra.gmra.mrb[0].mxu1 %v3316_v21  ;;  %v3402_v20 = vld [vmem:[%s4880_s0 + $0x80] ss:$20 sps:$4 sm:$0xff]   ;;  %v3403_v21 = vld [vmem:[%s4880_s0 + $0x324] ss:$20 sps:$4 sm:$0xff]  }
  0x42   :  { %1689 = vmatpush1.bf16.msra.mxu0 %v3319_v22  ;;  %3049 = vmatpush3.bf16.msra.mxu1 %v3320_v19  ;;  %v3401_v19 = vld [vmem:[%s4880_s0 + $0x2f8] ss:$20 sps:$4 sm:$0xff]  }
  0x43   :  { %1690 = vmatprep.subr.bf16.mxu0 %v3558_v0  ;;  %1439 = vmatprep.mubr.bf16.mxu0 %v3322_v23  ;;  %v3405_v22 = vld [vmem:[%s4880_s0 + $0xac] ss:$20 sps:$4 sm:$0xff]  }
  0x44   :  { %1503 = vmatprep.mubr.bf16.mxu1 %v3324_v24  ;;  %3050 = vmatprep.subr.bf16.mxu1 %v3369_v25  ;;  %v3407_v23 = vld [vmem:[%s4880_s0 + $0x320] ss:$20 sps:$4 sm:$0xff]   ;;  %v3408_v24 = vld [vmem:[%s4880_s0 + $0xa8] ss:$20 sps:$4 sm:$0xff]  }
  0x46   :  { %1691 = vmatpush1.bf16.msra.mxu0 %v3321_v26  ;;  %3051 = vmatpush3.bf16.msra.mxu1 %v3369_v25  ;;  %v3410_v25 = vld [vmem:[%s4880_s0 + $0x34c] ss:$20 sps:$4 sm:$0xff]   ;;  %v3412_v26 = vld [vmem:[%s4880_s0 + $0xd4] ss:$20 sps:$4 sm:$0xff]  }
  0x47   :  { %1692 = vmatprep.subr.bf16.mxu0 %v3558_v0  ;;  %3052 = vmatprep.subr.bf16.mxu1 %v3409_v30 }
  0x49   :  { %1440 = vmatmul.mubr.bf16.gmra.mrb[4].mxu0 %v3326_v27  ;;  %1504 = vmatmul.mubr.bf16.gmra.mrb[4].mxu1 %v3327_v28  ;;  %v3414_v27 = vld [vmem:[%s4880_s0 + $0x348] ss:$20 sps:$4 sm:$0xff]   ;;  %v3415_v28 = vld [vmem:[%s4880_s0 + $0xd0] ss:$20 sps:$4 sm:$0xff]  }
  0x4a   :  { %1693 = vmatpush1.bf16.msra.mxu0 %v3328_v29  ;;  %1447 = vmatprep.mubr.bf16.mxu0 %v3330_v31  ;;  %v3416_v29 = vld [vmem:[%s4880_s0 + $0x374] ss:$20 sps:$4 sm:$0xff]   ;;  %v3420_v31 = vld [vmem:[%s4880_s0 + $0x370] ss:$20 sps:$4 sm:$0xff]  }
  0x4b   :  { %1694 = vmatprep.subr.bf16.mxu0 %v3558_v0  ;;  %1511 = vmatprep.mubr.bf16.mxu1 %v3332_v32  ;;  %v3421_v32 = vld [vmem:[%s4880_s0 + $0xf8] ss:$20 sps:$4 sm:$0xff]  }
  0x4c   :  { %3053 = vmatpush3.bf16.msra.mxu1 %v3409_v30  ;;  %v3418_v30 = vld [vmem:[%s4880_s0 + $0xfc] ss:$20 sps:$4 sm:$0xff]  }
  0x4d   :  { %3054 = vmatprep.subr.bf16.mxu1 %v3446_v44 }
  0x4e   :  { %1695 = vmatpush1.bf16.msra.mxu0 %v3329_v33  ;;  %v3422_v33 = vld [vmem:[%s4880_s0 + $0x39c] ss:$20 sps:$4 sm:$0xff]  }
  0x4f   :  { %1696 = vmatprep.subr.bf16.mxu0 %v3558_v0 }
  0x50   :  { %3055 = vmatpush3.bf16.msra.mxu1 %v3446_v44  ;;  %v3439_v44 = vld [vmem:[%s4880_s0 + $0x170] ss:$20 sps:$4 sm:$0xff]  }
  0x51   :  { %1448 = vmatmul.mubr.bf16.gmra.mrb[8].mxu0 %v3334_v34  ;;  %1512 = vmatmul.mubr.bf16.gmra.mrb[8].mxu1 %v3335_v35  ;;  %v3424_v34 = vld [vmem:[%s4880_s0 + $0x124] ss:$20 sps:$4 sm:$0xff]  }
  0x52   :  { %1697 = vmatpush1.bf16.msra.mxu0 %v3336_v36  ;;  %1455 = vmatprep.mubr.bf16.mxu0 %v3338_v37  ;;  %v3426_v35 = vld [vmem:[%s4880_s0 + $0x398] ss:$20 sps:$4 sm:$0xff]   ;;  %v3427_v36 = vld [vmem:[%s4880_s0 + $0x120] ss:$20 sps:$4 sm:$0xff]  }
  0x53   :  { %1698 = vmatprep.subr.bf16.mxu0 %v3558_v0  ;;  %1519 = vmatprep.mubr.bf16.mxu1 %v3340_v38  ;;  %v3428_v37 = vld [vmem:[%s4880_s0 + $0x3c4] ss:$20 sps:$4 sm:$0xff]   ;;  %v3430_v38 = vld [vmem:[%s4880_s0 + $0x14c] ss:$20 sps:$4 sm:$0xff]  }
  0x56   :  { %1699 = vmatpush1.bf16.msra.mxu0 %v3337_v39  ;;  %v3432_v39 = vld [vmem:[%s4880_s0 + $0x3c0] ss:$20 sps:$4 sm:$0xff]  }
  0x57   :  { %1700 = vmatprep.subr.bf16.mxu0 %v3558_v0 }
  0x59   :  { %1456 = vmatmul.mubr.bf16.gmra.mrb[12].mxu0 %v3342_v40  ;;  %1520 = vmatmul.mubr.bf16.gmra.mrb[12].mxu1 %v3343_v41  ;;  %v3433_v40 = vld [vmem:[%s4880_s0 + $0x148] ss:$20 sps:$4 sm:$0xff]   ;;  %v3434_v41 = vld [vmem:[%s4880_s0 + $0x3ec] ss:$20 sps:$4 sm:$0xff]  }
  0x5a   :  { %1701 = vmatpush1.bf16.msra.mxu0 %v3344_v42  ;;  %1463 = vmatprep.mubr.bf16.mxu0 %v3346_v43  ;;  %v3436_v42 = vld [vmem:[%s4880_s0 + $0x174] ss:$20 sps:$4 sm:$0xff]  }
  0x5b   :  { %1702 = vmatprep.subr.bf16.mxu0 %v3558_v0  ;;  %1527 = vmatprep.mubr.bf16.mxu1 %v3348_v45  ;;  %v3438_v43 = vld [vmem:[%s4880_s0 + $0x3e8] ss:$20 sps:$4 sm:$0xff]  }
  0x5c   :  { %v3440_v45 = vld [vmem:[%s4880_s0 + $0x414] ss:$20 sps:$4 sm:$0xff]  }
  0x5e   :  { %1703 = vmatpush1.bf16.msra.mxu0 %v3345_v46  ;;  %v3442_v46 = vld [vmem:[%s4880_s0 + $0x19c] ss:$20 sps:$4 sm:$0xff]  }
  0x5f   :  { %1704 = vmatprep.subr.bf16.mxu0 %v3558_v0 }
  0x61   :  { %1464 = vmatmul.mubr.bf16.gmra.mrb[16].mxu0 %v3350_v47  ;;  %1528 = vmatmul.mubr.bf16.gmra.mrb[16].mxu1 %v3351_v48  ;;  %v3444_v47 = vld [vmem:[%s4880_s0 + $0x410] ss:$20 sps:$4 sm:$0xff]   ;;  %v3445_v48 = vld [vmem:[%s4880_s0 + $0x198] ss:$20 sps:$4 sm:$0xff]  }
  0x62   :  { %1705 = vmatpush1.bf16.msra.mxu0 %v3352_v49  ;;  %1471 = vmatprep.mubr.bf16.mxu0 %v3354_v50  ;;  %v3447_v49 = vld [vmem:[%s4880_s0 + $0x43c] ss:$20 sps:$4 sm:$0xff]   ;;  %v3449_v50 = vld [vmem:[%s4880_s0 + $0x1c4] ss:$20 sps:$4 sm:$0xff]  }
  0x63   :  { %1706 = vmatprep.subr.bf16.mxu0 %v3558_v0  ;;  %1535 = vmatprep.mubr.bf16.mxu1 %v3356_v51  ;;  %v3451_v51 = vld [vmem:[%s4880_s0 + $0x438] ss:$20 sps:$4 sm:$0xff]  }
  0x66   :  { %1707 = vmatpush1.bf16.msra.mxu0 %v3353_v52  ;;  %v3452_v52 = vld [vmem:[%s4880_s0 + $0x1c0] ss:$20 sps:$4 sm:$0xff]  }
  0x67   :  { %1708 = vmatprep.subr.bf16.mxu0 %v3558_v0 }
  0x69   :  { %1472 = vmatmul.mubr.bf16.gmra.mrb[20].mxu0 %v3358_v53  ;;  %1536 = vmatmul.mubr.bf16.gmra.mrb[20].mxu1 %v3359_v54  ;;  %v3453_v53 = vld [vmem:[%s4880_s0 + $0x464] ss:$20 sps:$4 sm:$0xff]   ;;  %v3455_v54 = vld [vmem:[%s4880_s0 + $0x1ec] ss:$20 sps:$4 sm:$0xff]  }
  0x6a   :  { %1709 = vmatpush1.bf16.msra.mxu0 %v3360_v55  ;;  %1479 = vmatprep.mubr.bf16.mxu0 %v3362_v56  ;;  %v3457_v55 = vld [vmem:[%s4880_s0 + $0x460] ss:$20 sps:$4 sm:$0xff]   ;;  %v3458_v56 = vld [vmem:[%s4880_s0 + $0x1e8] ss:$20 sps:$4 sm:$0xff]  }
  0x6b   :  { %1710 = vmatprep.subr.bf16.mxu0 %v3558_v0  ;;  %1543 = vmatprep.mubr.bf16.mxu1 %v3364_v57  ;;  %v3459_v57 = vld [vmem:[%s4880_s0 + $0x48c] ss:$20 sps:$4 sm:$0xff]  }
  0x6e   :  { %1711 = vmatpush1.bf16.msra.mxu0 %v3361_v58  ;;  %v3461_v58 = vld [vmem:[%s4880_s0 + $0x214] ss:$20 sps:$4 sm:$0xff]  }
  0x6f   :  { %1712 = vmatprep.subr.bf16.mxu0 %v3558_v0 }
  0x71   :  { %1480 = vmatmul.mubr.bf16.gmra.mrb[24].mxu0 %v3366_v59  ;;  %1544 = vmatmul.mubr.bf16.gmra.mrb[24].mxu1 %v3367_v60  ;;  %v3463_v59 = vld [vmem:[%s4880_s0 + $0x488] ss:$20 sps:$4 sm:$0xff]   ;;  %v3464_v60 = vld [vmem:[%s4880_s0 + $0x210] ss:$20 sps:$4 sm:$0xff]  }
  0x72   :  { %1713 = vmatpush1.bf16.msra.mxu0 %v3368_v61  ;;  %1487 = vmatprep.mubr.bf16.mxu0 %v3371_v62  ;;  %v3465_v61 = vld [vmem:[%s4880_s0 + $0x4b4] ss:$20 sps:$4 sm:$0xff]   ;;  %v3467_v62 = vld [vmem:[%s4880_s0 + $0x23c] ss:$20 sps:$4 sm:$0xff]  }
  0x73   :  { %1714 = vmatprep.subr.bf16.mxu0 %v3558_v0  ;;  %1551 = vmatprep.mubr.bf16.mxu1 %v3373_v63  ;;  %v3469_v63 = vld [vmem:[%s4880_s0 + $0x4b0] ss:$20 sps:$4 sm:$0xff]  }
  0x76   :  { %1715 = vmatpush1.bf16.msra.mxu0 %v3370_v1  ;;  %v3470_v1 = vld [vmem:[%s4880_s0 + $0x238] ss:$20 sps:$4 sm:$0xff]  }
  0x77   :  { %1716 = vmatprep.subr.bf16.mxu0 %v3558_v0 }
  0x79   :  { %1488 = vmatmul.mubr.bf16.gmra.mrb[28].mxu0 %v3375_v2  ;;  %1552 = vmatmul.mubr.bf16.gmra.mrb[28].mxu1 %v3376_v3  ;;  %v3471_v2 = vld [vmem:[%s4880_s0 + $0x4dc] ss:$20 sps:$4 sm:$0xff]   ;;  %v3473_v3 = vld [vmem:[%s4880_s0 + $0x264] ss:$20 sps:$4 sm:$0xff]  }
  0x7a   :  { %1717 = vmatpush1.bf16.msra.mxu0 %v3377_v4  ;;  %1559 = vmatprep.mubr.bf16.mxu1 %v3379_v5  ;;  %v3475_v4 = vld [vmem:[%s4880_s0 + $0x4d8] ss:$20 sps:$4 sm:$0xff]   ;;  %v3476_v5 = vld [vmem:[%s4880_s0 + $0x260] ss:$20 sps:$4 sm:$0xff]  }
  0x7b   :  { %1718 = vmatprep.subr.bf16.mxu0 %v3558_v0  ;;  %1720 = vmatprep.mubr.bf16.mxu0 %v3383_v6  ;;  %v3389_v0 = vld [vmem:[%s4880_s0 + $0x2a8] ss:$20 sps:$4 sm:$0xff]   ;;  %v3477_v6 = vld [vmem:[%s4880_s0 + $0x28c] ss:$20 sps:$4 sm:$0xff]  }
  0x7e   :  { %1719 = vmatpush1.bf16.msra.mxu0 %v3378_v7  ;;  %v3479_v7 = vld [vmem:[%s4880_s0 + $0x10] ss:$20 sps:$4 sm:$0xff]  }
  0x81   :  { %1560 = vmatmul.mubr.bf16.gmra.mrb[32].mxu1 %v3384_v9  ;;  %1721 = vmatmul.mubr.bf16.vlgmr.msra.gmra.mrb[0].mxu0 %v3381_v8  ;;  %v3480_v8 = vld [vmem:[%s4880_s0 + $0x288] ss:$20 sps:$4 sm:$0xff]   ;;  %v3481_v9 = vld [vmem:[%s4880_s0 + $0x38] ss:$20 sps:$4 sm:$0xff]  }
  0x82   :  { %1567 = vmatprep.mubr.bf16.mxu1 %v3385_v10  ;;  %1728 = vmatprep.mubr.bf16.mxu0 %v3387_v11  ;;  %v3482_v10 = vld [vmem:[%s4880_s0 + $0x2b4] ss:$20 sps:$4 sm:$0xff]  }
  0x83   :  { %v3484_v11 = vld [vmem:[%s4880_s0 + $0x60] ss:$20 sps:$4 sm:$0xff]  }
  0x89   :  { %1568 = vmatmul.mubr.bf16.gmra.mrb[36].mxu1 %v3389_v0  ;;  %1729 = vmatmul.mubr.bf16.gmra.mrb[4].mxu0 %v3390_v12  ;;  %v3485_v0 = vld [vmem:[%s4880_s0 + $0x2b0] ss:$20 sps:$4 sm:$0xff]   ;;  %v3486_v12 = vld [vmem:[%s4880_s0 + $0x88] ss:$20 sps:$4 sm:$0xff]  }
  0x8a   :  { %1575 = vmatprep.mubr.bf16.mxu1 %v3391_v13  ;;  %1736 = vmatprep.mubr.bf16.mxu0 %v3393_v14  ;;  %v3487_v13 = vld [vmem:[%s4880_s0 + $0x2dc] ss:$20 sps:$4 sm:$0xff]  }
  0x8b   :  { %v3489_v14 = vld [vmem:[%s4880_s0 + $0xb0] ss:$20 sps:$4 sm:$0xff]  }
  0x91   :  { %1576 = vmatmul.mubr.bf16.gmra.mrb[40].mxu1 %v3395_v15  ;;  %1737 = vmatmul.mubr.bf16.gmra.mrb[8].mxu0 %v3396_v16  ;;  %v3490_v15 = vld [vmem:[%s4880_s0 + $0x2d8] ss:$20 sps:$4 sm:$0xff]  }
  0x92   :  { %1583 = vmatprep.mubr.bf16.mxu1 %v3397_v17  ;;  %1744 = vmatprep.mubr.bf16.mxu0 %v3399_v18  ;;  %v3491_v16 = vld [vmem:[%s4880_s0 + $0xd8] ss:$20 sps:$4 sm:$0xff]   ;;  %v3494_v18 = vld [vmem:[%s4880_s0 + $0x100] ss:$20 sps:$4 sm:$0xff]  }
  0x93   :  { %v3492_v17 = vld [vmem:[%s4880_s0 + $0x304] ss:$20 sps:$4 sm:$0xff]  }
  0x99   :  { %1584 = vmatmul.mubr.bf16.gmra.mrb[44].mxu1 %v3401_v19  ;;  %1745 = vmatmul.mubr.bf16.gmra.mrb[12].mxu0 %v3402_v20 }
  0x9a   :  { %1591 = vmatprep.mubr.bf16.mxu1 %v3403_v21  ;;  %1752 = vmatprep.mubr.bf16.mxu0 %v3405_v22  ;;  %v3495_v21 = vld [vmem:[%s4880_s0 + $0x300] ss:$20 sps:$4 sm:$0xff]   ;;  %v3496_v22 = vld [vmem:[%s4880_s0 + $0x128] ss:$20 sps:$4 sm:$0xff]  }
  0xa1   :  { %1592 = vmatmul.mubr.bf16.gmra.mrb[48].mxu1 %v3407_v23  ;;  %1753 = vmatmul.mubr.bf16.gmra.mrb[16].mxu0 %v3408_v24  ;;  %v3497_v24 = vld [vmem:[%s4880_s0 + $0x32c] ss:$20 sps:$4 sm:$0xff]  }
  0xa2   :  { %1599 = vmatprep.mubr.bf16.mxu1 %v3410_v25  ;;  %1760 = vmatprep.mubr.bf16.mxu0 %v3412_v26  ;;  %v3499_v25 = vld [vmem:[%s4880_s0 + $0x150] ss:$20 sps:$4 sm:$0xff]  }
  0xa9   :  { %1600 = vmatmul.mubr.bf16.gmra.mrb[52].mxu1 %v3414_v27  ;;  %1761 = vmatmul.mubr.bf16.gmra.mrb[20].mxu0 %v3415_v28 }
  0xaa   :  { %1607 = vmatprep.mubr.bf16.mxu1 %v3416_v29  ;;  %1768 = vmatprep.mubr.bf16.mxu0 %v3418_v30  ;;  %v3500_v29 = vld [vmem:[%s4880_s0 + $0x328] ss:$20 sps:$4 sm:$0xff]   ;;  %v3501_v30 = vld [vmem:[%s4880_s0 + $0x178] ss:$20 sps:$4 sm:$0xff]  }
  0xb1   :  { %1608 = vmatmul.mubr.bf16.gmra.mrb[56].mxu1 %v3420_v31  ;;  %1769 = vmatmul.mubr.bf16.gmra.mrb[24].mxu0 %v3421_v32  ;;  %v3502_v32 = vld [vmem:[%s4880_s0 + $0x354] ss:$20 sps:$4 sm:$0xff]  }
  0xb2   :  { %1615 = vmatprep.mubr.bf16.mxu1 %v3422_v33  ;;  %1776 = vmatprep.mubr.bf16.mxu0 %v3424_v34  ;;  %v3504_v33 = vld [vmem:[%s4880_s0 + $0x1a0] ss:$20 sps:$4 sm:$0xff]  }
  0xb9   :  { %1616 = vmatmul.mubr.bf16.gmra.mrb[60].mxu1 %v3426_v35  ;;  %1777 = vmatmul.mubr.bf16.gmra.mrb[28].mxu0 %v3427_v36 }
  0xba   :  { %1623 = vmatprep.mubr.bf16.mxu1 %v3428_v37  ;;  %1784 = vmatprep.mubr.bf16.mxu0 %v3430_v38  ;;  %v3505_v37 = vld [vmem:[%s4880_s0 + $0x350] ss:$20 sps:$4 sm:$0xff]   ;;  %v3506_v38 = vld [vmem:[%s4880_s0 + $0x1c8] ss:$20 sps:$4 sm:$0xff]  }
  0xc1   :  { %1624 = vmatmul.mubr.bf16.gmra.mrb[64].mxu1 %v3432_v39  ;;  %1785 = vmatmul.mubr.bf16.gmra.mrb[32].mxu0 %v3433_v40  ;;  %v3507_v40 = vld [vmem:[%s4880_s0 + $0x37c] ss:$20 sps:$4 sm:$0xff]  }
  0xc2   :  { %1631 = vmatprep.mubr.bf16.mxu1 %v3434_v41  ;;  %1792 = vmatprep.mubr.bf16.mxu0 %v3436_v42  ;;  %v3509_v41 = vld [vmem:[%s4880_s0 + $0x1f0] ss:$20 sps:$4 sm:$0xff]  }
  0xc9   :  { %1632 = vmatmul.mubr.bf16.gmra.mrb[68].mxu1 %v3438_v43  ;;  %1793 = vmatmul.mubr.bf16.gmra.mrb[36].mxu0 %v3439_v44 }
  0xca   :  { %1639 = vmatprep.mubr.bf16.mxu1 %v3440_v45  ;;  %1800 = vmatprep.mubr.bf16.mxu0 %v3442_v46  ;;  %v3510_v45 = vld [vmem:[%s4880_s0 + $0x378] ss:$20 sps:$4 sm:$0xff]  }
  0xcb   :  { %v3511_v46 = vld [vmem:[%s4880_s0 + $0x218] ss:$20 sps:$4 sm:$0xff]  }
  0xd1   :  { %1640 = vmatmul.mubr.bf16.gmra.mrb[72].mxu1 %v3444_v47  ;;  %1801 = vmatmul.mubr.bf16.gmra.mrb[40].mxu0 %v3445_v48  ;;  %v3512_v48 = vld [vmem:[%s4880_s0 + $0x3a4] ss:$20 sps:$4 sm:$0xff]  }
  0xd2   :  { %1647 = vmatprep.mubr.bf16.mxu1 %v3447_v49  ;;  %1808 = vmatprep.mubr.bf16.mxu0 %v3449_v50  ;;  %v3514_v49 = vld [vmem:[%s4880_s0 + $0x240] ss:$20 sps:$4 sm:$0xff]  }
  0xd9   :  { %1648 = vmatmul.mubr.bf16.gmra.mrb[76].mxu1 %v3451_v51  ;;  %1809 = vmatmul.mubr.bf16.gmra.mrb[44].mxu0 %v3452_v52 }
  0xda   :  { %1655 = vmatprep.mubr.bf16.mxu1 %v3453_v53  ;;  %1816 = vmatprep.mubr.bf16.mxu0 %v3455_v54  ;;  %v3515_v53 = vld [vmem:[%s4880_s0 + $0x3a0] ss:$20 sps:$4 sm:$0xff]   ;;  %v3516_v54 = vld [vmem:[%s4880_s0 + $0x268] ss:$20 sps:$4 sm:$0xff]  }
  0xe1   :  { %1656 = vmatmul.mubr.bf16.gmra.mrb[80].mxu1 %v3457_v55  ;;  %1817 = vmatmul.mubr.bf16.gmra.mrb[48].mxu0 %v3458_v56  ;;  %v3517_v56 = vld [vmem:[%s4880_s0 + $0x3cc] ss:$20 sps:$4 sm:$0xff]  }
  0xe2   :  { %1663 = vmatprep.mubr.bf16.mxu1 %v3459_v57  ;;  %1824 = vmatprep.mubr.bf16.mxu0 %v3461_v58  ;;  %v3519_v57 = vld [vmem:[%s4880_s0 + $0x290] ss:$20 sps:$4 sm:$0xff]  }
  0xe9   :  { %1664 = vmatmul.mubr.bf16.gmra.mrb[84].mxu1 %v3463_v59  ;;  %1825 = vmatmul.mubr.bf16.gmra.mrb[52].mxu0 %v3464_v60 }
  0xea   :  { %1671 = vmatprep.mubr.bf16.mxu1 %v3465_v61  ;;  %1832 = vmatprep.mubr.bf16.mxu0 %v3467_v62  ;;  %v3520_v61 = vld [vmem:[%s4880_s0 + $0x3c8] ss:$20 sps:$4 sm:$0xff]   ;;  %v3521_v62 = vld [vmem:[%s4880_s0 + $0x2b8] ss:$20 sps:$4 sm:$0xff]  }
  0xf1   :  { %1672 = vmatmul.mubr.bf16.gmra.mrb[88].mxu1 %v3469_v63  ;;  %1833 = vmatmul.mubr.bf16.gmra.mrb[56].mxu0 %v3470_v1  ;;  %v3522_v1 = vld [vmem:[%s4880_s0 + $0x3f4] ss:$20 sps:$4 sm:$0xff]  }
  0xf2   :  { %1679 = vmatprep.mubr.bf16.mxu1 %v3471_v2  ;;  %1840 = vmatprep.mubr.bf16.mxu0 %v3473_v3  ;;  %v3524_v2 = vld [vmem:[%s4880_s0 + $0x2e0] ss:$20 sps:$4 sm:$0xff]  }
  0xf9   :  { %1680 = vmatmul.mubr.bf16.gmra.mrb[92].mxu1 %v3475_v4  ;;  %1841 = vmatmul.mubr.bf16.gmra.mrb[60].mxu0 %v3476_v5 }
  0xfa   :  { %1848 = vmatprep.mubr.bf16.mxu0 %v3477_v6  ;;  %3056 = vmatprep.mubr.msk.bf16.mxu1 %vm1302_vm0, %v3479_v7  ;;  %v3525_v6 = vld [vmem:[%s4880_s0 + $0x3f0] ss:$20 sps:$4 sm:$0xff]   ;;  %v3526_v7 = vld [vmem:[%s4880_s0 + $0x308] ss:$20 sps:$4 sm:$0xff]  }
 0x101   :  { %1849 = vmatmul.mubr.bf16.gmra.mrb[64].mxu0 %v3480_v8  ;;  %3057 = vmatmul.mubr.msk.bf16.vlgmr.msra.gmra.mrb[96].mxu1 %vm1302_vm0, %v3481_v9  ;;  %v3527_v9 = vld [vmem:[%s4880_s0 + $0x41c] ss:$20 sps:$4 sm:$0xff]  }
 0x102   :  { %1856 = vmatprep.mubr.bf16.mxu0 %v3482_v10  ;;  %3060 = vmatprep.mubr.msk.bf16.mxu1 %vm1302_vm0, %v3484_v11  ;;  %v3529_v10 = vld [vmem:[%s4880_s0 + $0x330] ss:$20 sps:$4 sm:$0xff]  }
 0x109   :  { %1857 = vmatmul.mubr.bf16.gmra.mrb[68].mxu0 %v3485_v0  ;;  %3061 = vmatmul.mubr.msk.bf16.gmra.mrb[100].mxu1 %vm1302_vm0, %v3486_v12 }
 0x10a   :  { %1864 = vmatprep.mubr.bf16.mxu0 %v3487_v13  ;;  %3064 = vmatprep.mubr.msk.bf16.mxu1 %vm1302_vm0, %v3489_v14  ;;  %v3530_v13 = vld [vmem:[%s4880_s0 + $0x418] ss:$20 sps:$4 sm:$0xff]  }
 0x10b   :  { %v3531_v14 = vld [vmem:[%s4880_s0 + $0x358] ss:$20 sps:$4 sm:$0xff]  }
 0x111   :  { %1865 = vmatmul.mubr.bf16.gmra.mrb[72].mxu0 %v3490_v15  ;;  %3065 = vmatmul.mubr.msk.bf16.gmra.mrb[104].mxu1 %vm1302_vm0, %v3491_v16  ;;  %v3532_v16 = vld [vmem:[%s4880_s0 + $0x444] ss:$20 sps:$4 sm:$0xff]  }
 0x112   :  { %1872 = vmatprep.mubr.bf16.mxu0 %v3492_v17  ;;  %3068 = vmatprep.mubr.msk.bf16.mxu1 %vm1302_vm0, %v3494_v18  ;;  %v3534_v17 = vld [vmem:[%s4880_s0 + $0x380] ss:$20 sps:$4 sm:$0xff]  }
 0x114   :  { %v4072_v19 = vpop.f32.mrb[0].mxu1 }
 0x115   :  { %v1499_v20 = vpop.f32.mrb[1].mxu1 }
 0x116   :  { %v4080_v23 = vpop.f32.mrb[2].mxu1 }
 0x117   :  { %v1502_v26 = vpop.f32.mrb[3].mxu1 }
 0x118   :  { %v3536_v26 = vld [vmem:[%s4880_s0 + $0x3a8] ss:$20 sps:$4 sm:$0xff]  }
 0x119   :  { %1873 = vmatmul.mubr.bf16.gmra.mrb[76].mxu0 %v3495_v21  ;;  %3069 = vmatmul.mubr.msk.bf16.gmra.mrb[108].mxu1 %vm1302_vm0, %v3496_v22 }
 0x11a   :  { %1880 = vmatprep.mubr.bf16.mxu0 %v3497_v24  ;;  %3072 = vmatprep.mubr.msk.bf16.mxu1 %vm1302_vm0, %v3499_v25  ;;  %v3535_v25 = vld [vmem:[%s4880_s0 + $0x440] ss:$20 sps:$4 sm:$0xff]  }
 0x11c   :  { %v4090_v27 = vpop.f32.mrb[4].mxu1 }
 0x11d   :  { %v1507_v28 = vpop.f32.mrb[5].mxu1 }
 0x11e   :  { %v4098_v31 = vpop.f32.mrb[6].mxu1 }
 0x11f   :  { %v1510_v34 = vpop.f32.mrb[7].mxu1 }
 0x121   :  { %1881 = vmatmul.mubr.bf16.gmra.mrb[80].mxu0 %v3500_v29  ;;  %3073 = vmatmul.mubr.msk.bf16.gmra.mrb[112].mxu1 %vm1302_vm0, %v3501_v30  ;;  %v3537_v30 = vld [vmem:[%s4880_s0 + $0x46c] ss:$20 sps:$4 sm:$0xff]  }
 0x122   :  { %1888 = vmatprep.mubr.bf16.mxu0 %v3502_v32  ;;  %3076 = vmatprep.mubr.msk.bf16.mxu1 %vm1302_vm0, %v3504_v33  ;;  %v3539_v32 = vld [vmem:[%s4880_s0 + $0x3d0] ss:$20 sps:$4 sm:$0xff]  }
 0x124   :  { %v4108_v35 = vpop.f32.mrb[8].mxu1 }
 0x125   :  { %v1515_v36 = vpop.f32.mrb[9].mxu1 }
 0x126   :  { %v4116_v39 = vpop.f32.mrb[10].mxu1 }
 0x127   :  { %v1518_v42 = vpop.f32.mrb[11].mxu1 }
 0x128   :  { %v3541_v42 = vld [vmem:[%s4880_s0 + $0x3f8] ss:$20 sps:$4 sm:$0xff]  }
 0x129   :  { %1889 = vmatmul.mubr.bf16.gmra.mrb[84].mxu0 %v3505_v37  ;;  %3077 = vmatmul.mubr.msk.bf16.gmra.mrb[116].mxu1 %vm1302_vm0, %v3506_v38 }
 0x12a   :  { %1896 = vmatprep.mubr.bf16.mxu0 %v3507_v40  ;;  %3080 = vmatprep.mubr.msk.bf16.mxu1 %vm1302_vm0, %v3509_v41  ;;  %v3540_v41 = vld [vmem:[%s4880_s0 + $0x468] ss:$20 sps:$4 sm:$0xff]  }
 0x12c   :  { %v4126_v43 = vpop.f32.mrb[12].mxu1 }
 0x12d   :  { %v1523_v44 = vpop.f32.mrb[13].mxu1 }
 0x12e   :  { %v4134_v47 = vpop.f32.mrb[14].mxu1 }
 0x12f   :  { %v1526_v50 = vpop.f32.mrb[15].mxu1 }
 0x131   :  { %1897 = vmatmul.mubr.bf16.gmra.mrb[88].mxu0 %v3510_v45  ;;  %3081 = vmatmul.mubr.msk.bf16.gmra.mrb[120].mxu1 %vm1302_vm0, %v3511_v46  ;;  %v3542_v46 = vld [vmem:[%s4880_s0 + $0x494] ss:$20 sps:$4 sm:$0xff]  }
 0x132   :  { %1904 = vmatprep.mubr.bf16.mxu0 %v3512_v48  ;;  %3084 = vmatprep.mubr.msk.bf16.mxu1 %vm1302_vm0, %v3514_v49  ;;  %v3544_v48 = vld [vmem:[%s4880_s0 + $0x420] ss:$20 sps:$4 sm:$0xff]  }
 0x134   :  { %v4144_v51 = vpop.f32.mrb[16].mxu1 }
 0x135   :  { %v1531_v52 = vpop.f32.mrb[17].mxu1 }
 0x136   :  { %v4152_v55 = vpop.f32.mrb[18].mxu1 }
 0x137   :  { %v1534_v58 = vpop.f32.mrb[19].mxu1 }
 0x138   :  { %v3546_v58 = vld [vmem:[%s4880_s0 + $0x448] ss:$20 sps:$4 sm:$0xff]  }
 0x139   :  { %1905 = vmatmul.mubr.bf16.gmra.mrb[92].mxu0 %v3515_v53  ;;  %3085 = vmatmul.mubr.msk.bf16.gmra.mrb[124].mxu1 %vm1302_vm0, %v3516_v54 }
 0x13a   :  { %1912 = vmatprep.mubr.bf16.mxu0 %v3517_v56  ;;  %3088 = vmatprep.mubr.msk.bf16.mxu1 %vm1302_vm0, %v3519_v57  ;;  %v3545_v57 = vld [vmem:[%s4880_s0 + $0x490] ss:$20 sps:$4 sm:$0xff]  }
 0x13c   :  { %v4162_v59 = vpop.f32.mrb[20].mxu1 }
 0x13d   :  { %v1539_v60 = vpop.f32.mrb[21].mxu1 }
 0x13e   :  { %v4170_v63 = vpop.f32.mrb[22].mxu1 }
 0x13f   :  { %v1542_v3 = vpop.f32.mrb[23].mxu1 }
 0x141   :  { %1913 = vmatmul.mubr.bf16.gmra.mrb[96].mxu0 %v3520_v61  ;;  %3089 = vmatmul.mubr.msk.bf16.gmra.mrb[128].mxu1 %vm1302_vm0, %v3521_v62  ;;  %v3547_v62 = vld [vmem:[%s4880_s0 + $0x4bc] ss:$20 sps:$4 sm:$0xff]  }
 0x142   :  { %1920 = vmatprep.mubr.bf16.mxu0 %v3522_v1  ;;  %3092 = vmatprep.mubr.msk.bf16.mxu1 %vm1302_vm0, %v3524_v2  ;;  %v3549_v1 = vld [vmem:[%s4880_s0 + $0x470] ss:$20 sps:$4 sm:$0xff]  }
 0x144   :  { %v4180_v4 = vpop.f32.mrb[24].mxu1 }
 0x145   :  { %v1547_v5 = vpop.f32.mrb[25].mxu1 }
 0x146   :  { %v4188_v8 = vpop.f32.mrb[26].mxu1 }
 0x147   :  { %v1550_v11 = vpop.f32.mrb[27].mxu1 }
 0x148   :  { %v3551_v11 = vld [vmem:[%s4880_s0 + $0x498] ss:$20 sps:$4 sm:$0xff]  }
 0x149   :  { %1921 = vmatmul.mubr.bf16.gmra.mrb[100].mxu0 %v3525_v6  ;;  %3093 = vmatmul.mubr.msk.bf16.gmra.mrb[132].mxu1 %vm1302_vm0, %v3526_v7 }
 0x14a   :  { %1928 = vmatprep.mubr.bf16.mxu0 %v3527_v9  ;;  %3096 = vmatprep.mubr.msk.bf16.mxu1 %vm1302_vm0, %v3529_v10  ;;  %v3550_v10 = vld [vmem:[%s4880_s0 + $0x4b8] ss:$20 sps:$4 sm:$0xff]  }
 0x14c   :  { %v4198_v0 = vpop.f32.mrb[28].mxu1 }
 0x14d   :  { %v1555_v12 = vpop.f32.mrb[29].mxu1 }
 0x14e   :  { %v4206_v15 = vpop.f32.mrb[30].mxu1 }
 0x14f   :  { %v1558_v18 = vpop.f32.mrb[31].mxu1 }
 0x151   :  { %1929 = vmatmul.mubr.bf16.gmra.mrb[104].mxu0 %v3530_v13  ;;  %3097 = vmatmul.mubr.msk.bf16.gmra.mrb[136].mxu1 %vm1302_vm0, %v3531_v14  ;;  %v3552_v14 = vld [vmem:[%s4880_s0 + $0x4e4] ss:$20 sps:$4 sm:$0xff]  }
 0x152   :  { %1936 = vmatprep.mubr.bf16.mxu0 %v3532_v16  ;;  %3100 = vmatprep.mubr.msk.bf16.mxu1 %vm1302_vm0, %v3534_v17  ;;  %v3554_v16 = vld [vmem:[%s4880_s0 + $0x4c0] ss:$20 sps:$4 sm:$0xff]  }
 0x154   :  { %v4216_v20 = vpop.f32.mrb[32].mxu1  ;;  %v4218_v21 = vpop.f32.mrb[0].mxu0 }
 0x155   :  { %v1563_v22 = vpop.f32.mrb[33].mxu1  ;;  %v1724_v24 = vpop.f32.mrb[1].mxu0 }
 0x156   :  { %v4226_v28 = vpop.f32.mrb[34].mxu1  ;;  %v4228_v29 = vpop.f32.mrb[2].mxu0 }
 0x157   :  { %v1566_v33 = vpop.f32.mrb[35].mxu1  ;;  %v1727_v34 = vpop.f32.mrb[3].mxu0 }
 0x159   :  { %1937 = vmatmul.mubr.bf16.gmra.mrb[108].mxu0 %v3535_v25  ;;  %3101 = vmatmul.mubr.msk.bf16.gmra.mrb[140].mxu1 %vm1302_vm0, %v3536_v26 }
 0x15a   :  { %1944 = vmatprep.mubr.bf16.mxu0 %v3537_v30  ;;  %3104 = vmatprep.mubr.msk.bf16.mxu1 %vm1302_vm0, %v3539_v32  ;;  %v3555_v30 = vld [vmem:[%s4880_s0 + $0x4e0] ss:$20 sps:$4 sm:$0xff]   ;;  %v3556_v32 = vld [vmem:[%s4880_s0 + $0x4e8] ss:$20 sps:$4 sm:$0xff]  }
 0x15c   :  { %v4238_v36 = vpop.f32.mrb[36].mxu1  ;;  %v4240_v37 = vpop.f32.mrb[4].mxu0 }
 0x15d   :  { %v1571_v38 = vpop.f32.mrb[37].mxu1  ;;  %v1732_v40 = vpop.f32.mrb[5].mxu0 }
 0x15e   :  { %v4248_v44 = vpop.f32.mrb[38].mxu1  ;;  %v4250_v45 = vpop.f32.mrb[6].mxu0 }
 0x15f   :  { %v1574_v49 = vpop.f32.mrb[39].mxu1  ;;  %v1735_v50 = vpop.f32.mrb[7].mxu0 }
 0x161   :  { %1945 = vmatmul.mubr.bf16.gmra.mrb[112].mxu0 %v3540_v41  ;;  %3105 = vmatmul.mubr.msk.bf16.gmra.mrb[144].mxu1 %vm1302_vm0, %v3541_v42 }
 0x162   :  { %1952 = vmatprep.mubr.bf16.mxu0 %v3542_v46  ;;  %3108 = vmatprep.mubr.msk.bf16.mxu1 %vm1302_vm0, %v3544_v48 }
 0x164   :  { %v4260_v52 = vpop.f32.mrb[40].mxu1  ;;  %v4262_v53 = vpop.f32.mrb[8].mxu0 }
 0x165   :  { %v1579_v54 = vpop.f32.mrb[41].mxu1  ;;  %v1740_v56 = vpop.f32.mrb[9].mxu0 }
 0x166   :  { %v4270_v60 = vpop.f32.mrb[42].mxu1  ;;  %v4272_v61 = vpop.f32.mrb[10].mxu0 }
 0x167   :  { %v1582_v2 = vpop.f32.mrb[43].mxu1  ;;  %v1743_v3 = vpop.f32.mrb[11].mxu0 }
 0x169   :  { %1953 = vmatmul.mubr.bf16.gmra.mrb[116].mxu0 %v3545_v57  ;;  %3109 = vmatmul.mubr.msk.bf16.gmra.mrb[148].mxu1 %vm1302_vm0, %v3546_v58 }
 0x16a   :  { %1960 = vmatprep.mubr.bf16.mxu0 %v3547_v62  ;;  %3112 = vmatprep.mubr.msk.bf16.mxu1 %vm1302_vm0, %v3549_v1 }
 0x16c   :  { %v4282_v5 = vpop.f32.mrb[44].mxu1  ;;  %v4284_v6 = vpop.f32.mrb[12].mxu0 }
 0x16d   :  { %v1587_v7 = vpop.f32.mrb[45].mxu1  ;;  %v1748_v9 = vpop.f32.mrb[13].mxu0 }
 0x16e   :  { %v4292_v12 = vpop.f32.mrb[46].mxu1  ;;  %v4294_v13 = vpop.f32.mrb[14].mxu0 }
 0x16f   :  { %v1590_v17 = vpop.f32.mrb[47].mxu1  ;;  %v1751_v18 = vpop.f32.mrb[15].mxu0 }
 0x171   :  { %1961 = vmatmul.mubr.bf16.gmra.mrb[120].mxu0 %v3550_v10  ;;  %3113 = vmatmul.mubr.msk.bf16.gmra.mrb[152].mxu1 %vm1302_vm0, %v3551_v11 }
 0x172   :  { %1968 = vmatprep.mubr.bf16.mxu0 %v3552_v14  ;;  %3116 = vmatprep.mubr.msk.bf16.mxu1 %vm1302_vm0, %v3554_v16 }
 0x174   :  { %v4304_v22 = vpop.f32.mrb[48].mxu1  ;;  %v4306_v24 = vpop.f32.mrb[16].mxu0 }
 0x175   :  { %v1595_v25 = vpop.f32.mrb[49].mxu1  ;;  %v1756_v26 = vpop.f32.mrb[17].mxu0 }
 0x176   :  { %v4314_v33 = vpop.f32.mrb[50].mxu1  ;;  %v4316_v34 = vpop.f32.mrb[18].mxu0 }
 0x177   :  { %v1598_v38 = vpop.f32.mrb[51].mxu1  ;;  %v1759_v40 = vpop.f32.mrb[19].mxu0 }
 0x179   :  { %1969 = vmatmul.mubr.bf16.gmra.mrb[124].mxu0 %v3555_v30  ;;  %3117 = vmatmul.mubr.msk.bf16.gmra.mrb[156].mxu1 %vm1302_vm0, %v3556_v32  ;;  %v4346_v30 = vld [vmem:[%s4881_s2] ss:$0 sm:$0xff] }
 0x17a   :  { %v1498_v32 = vadd.f32 %v4346_v30, %v4072_v19  ;;  %v1506_v19 = vadd.f32 %v4346_v30, %v4090_v27  ;;  %v1514_v27 = vadd.f32 %v4346_v30, %v4108_v35  ;;  %v1522_v35 = vadd.f32 %v4346_v30, %v4126_v43 }
 0x17b   :  { %v1530_v43 = vadd.f32 %v4346_v30, %v4144_v51  ;;  %v1538_v51 = vadd.f32 %v4346_v30, %v4162_v59  ;;  %v1546_v59 = vadd.f32 %v4346_v30, %v4180_v4  ;;  %v1554_v4 = vadd.f32 %v4346_v30, %v4198_v0 }
 0x17c   :  { %v4319_v41 = vpop.f32.mrb[52].mxu1  ;;  %v4321_v42 = vpop.f32.mrb[20].mxu0  ;;  %v1562_v0 = vadd.f32 %v4346_v30, %v4216_v20  ;;  %v3153_v20 = vadd.f32 %v4346_v30, %v4228_v29  ;;  %v3158_v29 = vadd.f32 %v4346_v30, %v4284_v6  ;;  %v1573_v6 = vadd.f32 %v4346_v30, %v4248_v44 }
 0x17d   :  { %v1603_v46 = vpop.f32.mrb[53].mxu1  ;;  %v1764_v48 = vpop.f32.mrb[21].mxu0 }
 0x17e   :  { %v4323_v49 = vpop.f32.mrb[54].mxu1  ;;  %v4325_v50 = vpop.f32.mrb[22].mxu0  ;;  %v1501_v46 = vadd.f32 %v4346_v30, %v4080_v23  ;;  %v1509_v23 = vadd.f32 %v4346_v30, %v4098_v31  ;;  %v1517_v31 = vadd.f32 %v4346_v30, %v4116_v39  ;;  %v1525_v39 = vadd.f32 %v4346_v30, %v4134_v47 }
 0x17f   :  { %v1606_v54 = vpop.f32.mrb[55].mxu1  ;;  %v1767_v56 = vpop.f32.mrb[23].mxu0  ;;  %v1533_v47 = vadd.f32 %v4346_v30, %v4152_v55  ;;  %v1541_v55 = vadd.f32 %v4346_v30, %v4170_v63  ;;  %v1549_v63 = vadd.f32 %v4346_v30, %v4188_v8  ;;  %v1557_v8 = vadd.f32 %v4346_v30, %v4206_v15 }
 0x180   :  { %v3152_v15 = vadd.f32 %v4346_v30, %v4218_v21 }
 0x184   :  { %v4327_v57 = vpop.f32.mrb[56].mxu1  ;;  %v4329_v58 = vpop.f32.mrb[24].mxu0 }
 0x185   :  { %v1611_v62 = vpop.f32.mrb[57].mxu1  ;;  %v1772_v1 = vpop.f32.mrb[25].mxu0 }
 0x186   :  { %v4331_v2 = vpop.f32.mrb[58].mxu1  ;;  %v4333_v3 = vpop.f32.mrb[26].mxu0 }
 0x187   :  { %v1614_v7 = vpop.f32.mrb[59].mxu1  ;;  %v1775_v9 = vpop.f32.mrb[27].mxu0 }
 0x18c   :  { %v4335_v10 = vpop.f32.mrb[60].mxu1  ;;  %v4337_v11 = vpop.f32.mrb[28].mxu0 }
 0x18d   :  { %v1619_v14 = vpop.f32.mrb[61].mxu1  ;;  %v1780_v16 = vpop.f32.mrb[29].mxu0 }
 0x18e   :  { %v4339_v17 = vpop.f32.mrb[62].mxu1  ;;  %v4341_v18 = vpop.f32.mrb[30].mxu0 }
 0x18f   :  { %v1622_v25 = vpop.f32.mrb[63].mxu1  ;;  %v1783_v26 = vpop.f32.mrb[31].mxu0 }
 0x194   :  { %v4350_v38 = vpop.f32.mrb[64].mxu1  ;;  %v1786_v40 = vpop.f32.mrb[32].mxu0 }
 0x195   :  { %4883 = vst [vmem:[#allocation2_spill] sm:$0xff] %v4350_v38  ;;  %v4354_v48 = vadd.f32 %v1786_v40, %v1498_v32  ;;  %v1627_v54 = vpop.f32.mrb[65].mxu1  ;;  %v1788_v56 = vpop.f32.mrb[33].mxu0 }
 0x196   :  { %v4356_v62 = vpop.f32.mrb[66].mxu1  ;;  %v1789_v1 = vpop.f32.mrb[34].mxu0 }
 0x197   :  { %4884 = vst [vmem:[#allocation3_spill] sm:$0xff] %v4356_v62  ;;  %v4358_v7 = vadd.f32 %v1789_v1, %v1501_v46  ;;  %v1630_v9 = vpop.f32.mrb[67].mxu1  ;;  %v1791_v14 = vpop.f32.mrb[35].mxu0 }
 0x19c   :  { %v4362_v16 = vpop.f32.mrb[68].mxu1  ;;  %v1794_v25 = vpop.f32.mrb[36].mxu0 }
 0x19d   :  { %4885 = vst [vmem:[#allocation4_spill] sm:$0xff] %v4362_v16  ;;  %v4366_v26 = vadd.f32 %v1794_v25, %v1506_v19  ;;  %v1635_v32 = vpop.f32.mrb[69].mxu1  ;;  %v1796_v40 = vpop.f32.mrb[37].mxu0 }
 0x19e   :  { %v4368_v54 = vpop.f32.mrb[70].mxu1  ;;  %v1797_v56 = vpop.f32.mrb[38].mxu0 }
 0x19f   :  { %4886 = vst [vmem:[#allocation5_spill] sm:$0xff] %v4368_v54  ;;  %v4370_v46 = vadd.f32 %v1797_v56, %v1509_v23  ;;  %v1638_v1 = vpop.f32.mrb[71].mxu1  ;;  %v1799_v9 = vpop.f32.mrb[39].mxu0 }
 0x1a4   :  { %v4374_v14 = vpop.f32.mrb[72].mxu1  ;;  %v1802_v16 = vpop.f32.mrb[40].mxu0 }
 0x1a5   :  { %4887 = vst [vmem:[#allocation6_spill] sm:$0xff] %v4374_v14  ;;  %v4378_v19 = vadd.f32 %v1802_v16, %v1514_v27  ;;  %v1643_v25 = vpop.f32.mrb[73].mxu1  ;;  %v1804_v32 = vpop.f32.mrb[41].mxu0 }
 0x1a6   :  { %v4380_v40 = vpop.f32.mrb[74].mxu1  ;;  %v1805_v54 = vpop.f32.mrb[42].mxu0 }
 0x1a7   :  { %4888 = vst [vmem:[#allocation7_spill] sm:$0xff] %v4380_v40  ;;  %v4382_v23 = vadd.f32 %v1805_v54, %v1517_v31  ;;  %v1646_v56 = vpop.f32.mrb[75].mxu1  ;;  %v1807_v1 = vpop.f32.mrb[43].mxu0 }
 0x1ac   :  { %v4386_v9 = vpop.f32.mrb[76].mxu1  ;;  %v1810_v14 = vpop.f32.mrb[44].mxu0 }
 0x1ad   :  { %4889 = vst [vmem:[#allocation8_spill] sm:$0xff] %v4386_v9  ;;  %v4390_v16 = vadd.f32 %v1810_v14, %v1522_v35  ;;  %v1651_v27 = vpop.f32.mrb[77].mxu1  ;;  %v1812_v25 = vpop.f32.mrb[45].mxu0 }
 0x1ae   :  { %v4392_v32 = vpop.f32.mrb[78].mxu1  ;;  %v1813_v40 = vpop.f32.mrb[46].mxu0 }
 0x1af   :  { %4890 = vst [vmem:[#allocation9_spill] sm:$0xff] %v4392_v32  ;;  %v4394_v54 = vadd.f32 %v1813_v40, %v1525_v39  ;;  %v1654_v31 = vpop.f32.mrb[79].mxu1  ;;  %v1815_v56 = vpop.f32.mrb[47].mxu0 }
 0x1b4   :  { %v4398_v1 = vpop.f32.mrb[80].mxu1  ;;  %v1818_v9 = vpop.f32.mrb[48].mxu0 }
 0x1b5   :  { %4891 = vst [vmem:[#allocation10_spill] sm:$0xff] %v4398_v1  ;;  %v4402_v14 = vadd.f32 %v1818_v9, %v1530_v43  ;;  %v1659_v35 = vpop.f32.mrb[81].mxu1  ;;  %v1820_v27 = vpop.f32.mrb[49].mxu0 }
 0x1b6   :  { %v4404_v25 = vpop.f32.mrb[82].mxu1  ;;  %v1821_v32 = vpop.f32.mrb[50].mxu0 }
 0x1b7   :  { %4892 = vst [vmem:[#allocation11_spill] sm:$0xff] %v4404_v25  ;;  %v4406_v40 = vadd.f32 %v1821_v32, %v1533_v47  ;;  %v1662_v39 = vpop.f32.mrb[83].mxu1  ;;  %v1823_v31 = vpop.f32.mrb[51].mxu0 }
 0x1bc   :  { %v4410_v56 = vpop.f32.mrb[84].mxu1  ;;  %v1826_v1 = vpop.f32.mrb[52].mxu0 }
 0x1bd   :  { %4893 = vst [vmem:[#allocation12_spill] sm:$0xff] %v4410_v56  ;;  %v4414_v9 = vadd.f32 %v1826_v1, %v1538_v51  ;;  %v1667_v43 = vpop.f32.mrb[85].mxu1  ;;  %v1828_v35 = vpop.f32.mrb[53].mxu0 }
 0x1be   :  { %v4416_v27 = vpop.f32.mrb[86].mxu1  ;;  %v1829_v25 = vpop.f32.mrb[54].mxu0 }
 0x1bf   :  { %4894 = vst [vmem:[#allocation13_spill] sm:$0xff] %v4416_v27  ;;  %v4418_v32 = vadd.f32 %v1829_v25, %v1541_v55  ;;  %v1670_v47 = vpop.f32.mrb[87].mxu1  ;;  %v1831_v39 = vpop.f32.mrb[55].mxu0 }
 0x1c4   :  { %v4422_v31 = vpop.f32.mrb[88].mxu1  ;;  %v1834_v56 = vpop.f32.mrb[56].mxu0 }
 0x1c5   :  { %4895 = vst [vmem:[#allocation14_spill] sm:$0xff] %v4422_v31  ;;  %v4426_v1 = vadd.f32 %v1834_v56, %v1546_v59  ;;  %v1675_v51 = vpop.f32.mrb[89].mxu1  ;;  %v1836_v43 = vpop.f32.mrb[57].mxu0 }
 0x1c6   :  { %v4428_v35 = vpop.f32.mrb[90].mxu1  ;;  %v1837_v27 = vpop.f32.mrb[58].mxu0 }
 0x1c7   :  { %4896 = vst [vmem:[#allocation15_spill] sm:$0xff] %v4428_v35  ;;  %v4430_v25 = vadd.f32 %v1837_v27, %v1549_v63  ;;  %v1678_v55 = vpop.f32.mrb[91].mxu1  ;;  %v1839_v47 = vpop.f32.mrb[59].mxu0 }
 0x1c8   :  { %v3154_v47 = vadd.f32 %v4346_v30, %v4240_v37 }
 0x1c9   :  { %4897 = vst [vmem:[#allocation16_spill] sm:$0xff] %v4430_v25 }
 0x1cc   :  { %v4434_v39 = vpop.f32.mrb[92].mxu1  ;;  %v1842_v31 = vpop.f32.mrb[60].mxu0 }
 0x1cd   :  { %4898 = vst [vmem:[#allocation17_spill] sm:$0xff] %v4434_v39  ;;  %v4438_v56 = vadd.f32 %v1842_v31, %v1554_v4  ;;  %v1683_v59 = vpop.f32.mrb[93].mxu1  ;;  %v1844_v51 = vpop.f32.mrb[61].mxu0 }
 0x1ce   :  { %v4440_v43 = vpop.f32.mrb[94].mxu1  ;;  %v1845_v35 = vpop.f32.mrb[62].mxu0  ;;  %v1565_v59 = vadd.f32 %v4346_v30, %v4226_v28 }
 0x1cf   :  { %4899 = vst [vmem:[#allocation18_spill] sm:$0xff] %v4440_v43  ;;  %v4442_v27 = vadd.f32 %v1845_v35, %v1557_v8  ;;  %v1686_v63 = vpop.f32.mrb[95].mxu1  ;;  %v1847_v55 = vpop.f32.mrb[63].mxu0  ;;  %v3155_v35 = vadd.f32 %v4346_v30, %v4250_v45 }
 0x1d1   :  { %4900 = vst [vmem:[#allocation19_spill] sm:$0xff] %v4442_v27 }
 0x1d4   :  { %v1850_v31 = vpop.f32.mrb[64].mxu0  ;;  %v3058_v4 = vpop.f32.mrb[96].mxu1 }
 0x1d5   :  { %v4454_v8 = vadd.f32 %v1850_v31, %v1562_v0  ;;  %v2020_v51 = vadd.f32 %v3154_v47, %v3058_v4  ;;  %v1852_v63 = vpop.f32.mrb[65].mxu0  ;;  %v2011_v55 = vpop.f32.mrb[97].mxu1 }
 0x1d6   :  { %v2012_v37 = vadd.f32 %v3152_v15, %v2011_v55  ;;  %v1853_v43 = vpop.f32.mrb[66].mxu0  ;;  %v3059_v39 = vpop.f32.mrb[98].mxu1  ;;  %v1570_v63 = vadd.f32 %v4346_v30, %v4238_v36 }
 0x1d7   :  { %v2268_v21 = vmax.f32 %v2020_v51, 0.0  ;;  %v4458_v62 = vadd.f32 %v1853_v43, %v1565_v59  ;;  %v2023_v38 = vadd.f32 %v3155_v35, %v3059_v39  ;;  %v1855_v25 = vpop.f32.mrb[67].mxu0  ;;  %v2014_v28 = vpop.f32.mrb[99].mxu1  ;;  %v3156_v39 = vadd.f32 %v4346_v30, %v4262_v53 }
 0x1d8   :  { %v2266_v27 = vmax.f32 %v2012_v37, 0.0  ;;  %v2015_v45 = vadd.f32 %v3153_v20, %v2014_v28  ;;  %v3157_v51 = vadd.f32 %v4346_v30, %v4272_v61 }
 0x1d9   :  { %v2950_v0 = vpack.c.bf16 %v2268_v21, %v2268_v21  ;;  %v2269_v31 = vmax.f32 %v2023_v38, 0.0 }
 0x1da   :  { %v2948_v47 = vpack.c.bf16 %v2266_v27, %v2266_v27  ;;  %v2267_v4 = vmax.f32 %v2015_v45, 0.0  ;;  %v3159_v27 = vadd.f32 %v4346_v30, %v4294_v13 }
 0x1db   :  { %2589 = vst.msk [vmem:[%s4882_s3 + $0x8] sm:$0xf] %vm2586_vm1, %v2950_v0  ;;  %v2951_v25 = vpack.c.bf16 %v2269_v31, %v2269_v31 }
 0x1dc   :  { %2587 = vst.msk [vmem:[%s4882_s3] sm:$0xf] %vm2586_vm1, %v2948_v47  ;;  %v2949_v38 = vpack.c.bf16 %v2267_v4, %v2267_v4  ;;  %v1858_v43 = vpop.f32.mrb[68].mxu0  ;;  %v3062_v36 = vpop.f32.mrb[100].mxu1 }
 0x1dd   :  { %2590 = vst.msk [vmem:[%s4882_s3 + $0xc] sm:$0xf] %vm2586_vm1, %v2951_v25  ;;  %v4482_v53 = vadd.f32 %v1858_v43, %v1570_v63  ;;  %v2036_v15 = vadd.f32 %v3158_v29, %v3062_v36  ;;  %v1860_v59 = vpop.f32.mrb[69].mxu0  ;;  %v2027_v35 = vpop.f32.mrb[101].mxu1  ;;  %v1578_v29 = vadd.f32 %v4346_v30, %v4260_v52  ;;  %v3162_v25 = vadd.f32 %v4346_v30, %v4321_v42 }
 0x1de   :  { %2588 = vst.msk [vmem:[%s4882_s3 + $0x4] sm:$0xf] %vm2586_vm1, %v2949_v38  ;;  %v2028_v44 = vadd.f32 %v3156_v39, %v2027_v35  ;;  %v1861_v13 = vpop.f32.mrb[70].mxu0  ;;  %v3063_v55 = vpop.f32.mrb[102].mxu1  ;;  %v3160_v38 = vadd.f32 %v4346_v30, %v4306_v24  ;;  %v1581_v42 = vadd.f32 %v4346_v30, %v4270_v60  ;;  %v3161_v35 = vadd.f32 %v4346_v30, %v4316_v34 }
 0x1df   :  { %v2272_v20 = vmax.f32 %v2036_v15, 0.0  ;;  %v4490_v37 = vadd.f32 %v1861_v13, %v1573_v6  ;;  %v2039_v21 = vadd.f32 %v3159_v27, %v3063_v55  ;;  %v1863_v28 = vpop.f32.mrb[71].mxu0  ;;  %v2030_v45 = vpop.f32.mrb[103].mxu1  ;;  %v3163_v6 = vadd.f32 %v4346_v30, %v4325_v50 }
 0x1e0   :  { %v2270_v0 = vmax.f32 %v2028_v44, 0.0  ;;  %v2031_v31 = vadd.f32 %v3157_v51, %v2030_v45 }
 0x1e1   :  { %v2954_v47 = vpack.c.bf16 %v2272_v20, %v2272_v20  ;;  %v2273_v4 = vmax.f32 %v2039_v21, 0.0 }
 0x1e2   :  { %v2952_v63 = vpack.c.bf16 %v2270_v0, %v2270_v0  ;;  %v2271_v61 = vmax.f32 %v2031_v31, 0.0 }
 0x1e3   :  { %2593 = vst.msk [vmem:[%s4882_s3 + $0x18] sm:$0xf] %vm2586_vm1, %v2954_v47  ;;  %v2955_v39 = vpack.c.bf16 %v2273_v4, %v2273_v4  ;;  %v1586_v4 = vadd.f32 %v4346_v30, %v4282_v5 }
 0x1e4   :  { %2591 = vst.msk [vmem:[%s4882_s3 + $0x10] sm:$0xf] %vm2586_vm1, %v2952_v63  ;;  %v2953_v43 = vpack.c.bf16 %v2271_v61, %v2271_v61  ;;  %v1866_v36 = vpop.f32.mrb[72].mxu0  ;;  %v3066_v52 = vpop.f32.mrb[104].mxu1  ;;  %v3166_v63 = vadd.f32 %v4346_v30, %v4337_v11  ;;  %v1589_v11 = vadd.f32 %v4346_v30, %v4292_v12 }
 0x1e5   :  { %2594 = vst.msk [vmem:[%s4882_s3 + $0x1c] sm:$0xf] %vm2586_vm1, %v2955_v39  ;;  %v4514_v24 = vadd.f32 %v1866_v36, %v1578_v29  ;;  %v2052_v27 = vadd.f32 %v3162_v25, %v3066_v52  ;;  %v1868_v15 = vpop.f32.mrb[73].mxu0  ;;  %v2043_v59 = vpop.f32.mrb[105].mxu1  ;;  %v3164_v29 = vadd.f32 %v4346_v30, %v4329_v58 }
 0x1e6   :  { %2592 = vst.msk [vmem:[%s4882_s3 + $0x14] sm:$0xf] %vm2586_vm1, %v2953_v43  ;;  %v2044_v60 = vadd.f32 %v3160_v38, %v2043_v59  ;;  %v1869_v50 = vpop.f32.mrb[74].mxu0  ;;  %v3067_v51 = vpop.f32.mrb[106].mxu1  ;;  %v3167_v38 = vadd.f32 %v4346_v30, %v4341_v18 }
 0x1e7   :  { %v2276_v44 = vmax.f32 %v2052_v27, 0.0  ;;  %v4522_v13 = vadd.f32 %v1869_v50, %v1581_v42  ;;  %v2055_v55 = vadd.f32 %v3163_v6, %v3067_v51  ;;  %v1871_v20 = vpop.f32.mrb[75].mxu0  ;;  %v2046_v21 = vpop.f32.mrb[107].mxu1  ;;  %v3165_v42 = vadd.f32 %v4346_v30, %v4333_v3 }
 0x1e8   :  { %v2274_v28 = vmax.f32 %v2044_v60, 0.0  ;;  %v2047_v45 = vadd.f32 %v3161_v35, %v2046_v21  ;;  %v1594_v21 = vadd.f32 %v4346_v30, %v4304_v22 }
 0x1e9   :  { %v2958_v0 = vpack.c.bf16 %v2276_v44, %v2276_v44  ;;  %v2277_v31 = vmax.f32 %v2055_v55, 0.0 }
 0x1ea   :  { %v2956_v47 = vpack.c.bf16 %v2274_v28, %v2274_v28  ;;  %v2275_v34 = vmax.f32 %v2047_v45, 0.0 }
 0x1eb   :  { %2597 = vst.msk [vmem:[%s4882_s3 + $0x28] sm:$0xf] %vm2586_vm1, %v2958_v0  ;;  %v2959_v61 = vpack.c.bf16 %v2277_v31, %v2277_v31 }
 0x1ec   :  { %2595 = vst.msk [vmem:[%s4882_s3 + $0x20] sm:$0xf] %vm2586_vm1, %v2956_v47  ;;  %v2957_v25 = vpack.c.bf16 %v2275_v34, %v2275_v34  ;;  %v1874_v39 = vpop.f32.mrb[76].mxu0  ;;  %v3070_v5 = vpop.f32.mrb[108].mxu1  ;;  %v1597_v47 = vadd.f32 %v4346_v30, %v4314_v33 }
 0x1ed   :  { %2598 = vst.msk [vmem:[%s4882_s3 + $0x2c] sm:$0xf] %vm2586_vm1, %v2959_v61  ;;  %v4546_v58 = vadd.f32 %v1874_v39, %v1586_v4  ;;  %v2068_v43 = vadd.f32 %v3166_v63, %v3070_v5  ;;  %v1876_v36 = vpop.f32.mrb[77].mxu0  ;;  %v2059_v52 = vpop.f32.mrb[109].mxu1 }
 0x1ee   :  { %2596 = vst.msk [vmem:[%s4882_s3 + $0x24] sm:$0xf] %vm2586_vm1, %v2957_v25  ;;  %v2060_v12 = vadd.f32 %v3164_v29, %v2059_v52  ;;  %v1877_v18 = vpop.f32.mrb[78].mxu0  ;;  %v3071_v6 = vpop.f32.mrb[110].mxu1 }
 0x1ef   :  { %v2280_v27 = vmax.f32 %v2068_v43, 0.0  ;;  %v4554_v15 = vadd.f32 %v1877_v18, %v1589_v11  ;;  %v2071_v59 = vadd.f32 %v3167_v38, %v3071_v6  ;;  %v1879_v35 = vpop.f32.mrb[79].mxu0  ;;  %v2062_v60 = vpop.f32.mrb[111].mxu1  ;;  %v1602_v18 = vadd.f32 %v4346_v30, %v4319_v41 }
 0x1f0   :  { %v2278_v50 = vmax.f32 %v2060_v12, 0.0  ;;  %v2063_v51 = vadd.f32 %v3165_v42, %v2062_v60 }
 0x1f1   :  { %v2962_v44 = vpack.c.bf16 %v2280_v27, %v2280_v27  ;;  %v2281_v55 = vmax.f32 %v2071_v59, 0.0  ;;  %v1605_v27 = vadd.f32 %v4346_v30, %v4323_v49 }
 0x1f2   :  { %v2960_v20 = vpack.c.bf16 %v2278_v50, %v2278_v50  ;;  %v2279_v3 = vmax.f32 %v2063_v51, 0.0 }
 0x1f3   :  { %2601 = vst.msk [vmem:[%s4882_s3 + $0x38] sm:$0xf] %vm2586_vm1, %v2962_v44  ;;  %v2963_v28 = vpack.c.bf16 %v2281_v55, %v2281_v55 }
 0x1f4   :  { %2599 = vst.msk [vmem:[%s4882_s3 + $0x30] sm:$0xf] %vm2586_vm1, %v2960_v20  ;;  %v2961_v45 = vpack.c.bf16 %v2279_v3, %v2279_v3  ;;  %v1882_v0 = vpop.f32.mrb[80].mxu0  ;;  %v3074_v31 = vpop.f32.mrb[112].mxu1 }
 0x1f5   :  { %2602 = vst.msk [vmem:[%s4882_s3 + $0x3c] sm:$0xf] %vm2586_vm1, %v2963_v28  ;;  %v4572_v22 = vadd.f32 %v1882_v0, %v1594_v21  ;;  %v2084_v34 = vadd.f32 %v3074_v31, %v4366_v26  ;;  %v1884_v4 = vpop.f32.mrb[81].mxu0  ;;  %v2075_v63 = vpop.f32.mrb[113].mxu1 }
 0x1f6   :  { %2600 = vst.msk [vmem:[%s4882_s3 + $0x34] sm:$0xf] %vm2586_vm1, %v2961_v45  ;;  %v2076_v61 = vadd.f32 %v2075_v63, %v4354_v48  ;;  %v1885_v29 = vpop.f32.mrb[82].mxu0  ;;  %v3075_v33 = vpop.f32.mrb[114].mxu1  ;;  %v1613_v63 = vadd.f32 %v4346_v30, %v4331_v2 }
 0x1f7   :  { %v2284_v25 = vmax.f32 %v2084_v34, 0.0  ;;  %v4580_v39 = vadd.f32 %v1885_v29, %v1597_v47  ;;  %v2087_v5 = vadd.f32 %v3075_v33, %v4370_v46  ;;  %v1887_v11 = vpop.f32.mrb[83].mxu0  ;;  %v2078_v38 = vpop.f32.mrb[115].mxu1  ;;  %v1610_v34 = vadd.f32 %v4346_v30, %v4327_v57 }
 0x1f8   :  { %v2282_v43 = vmax.f32 %v2076_v61, 0.0  ;;  %v2079_v26 = vadd.f32 %v2078_v38, %v4358_v7 }
 0x1f9   :  { %v2966_v36 = vpack.c.bf16 %v2284_v25, %v2284_v25  ;;  %v2285_v52 = vmax.f32 %v2087_v5, 0.0 }
 0x1fa   :  { %v2964_v42 = vpack.c.bf16 %v2282_v43, %v2282_v43  ;;  %v2283_v12 = vmax.f32 %v2079_v26, 0.0 }
 0x1fb   :  { %2605 = vst.msk [vmem:[%s4882_s3 + $0x48] sm:$0xf] %vm2586_vm1, %v2966_v36  ;;  %v2967_v48 = vpack.c.bf16 %v2285_v52, %v2285_v52 }
 0x1fc   :  { %2603 = vst.msk [vmem:[%s4882_s3 + $0x40] sm:$0xf] %vm2586_vm1, %v2964_v42  ;;  %v2965_v46 = vpack.c.bf16 %v2283_v12, %v2283_v12  ;;  %v1890_v7 = vpop.f32.mrb[84].mxu0  ;;  %v3078_v6 = vpop.f32.mrb[116].mxu1 }
 0x1fd   :  { %2606 = vst.msk [vmem:[%s4882_s3 + $0x4c] sm:$0xf] %vm2586_vm1, %v2967_v48  ;;  %v4600_v41 = vadd.f32 %v1890_v7, %v1602_v18  ;;  %v2100_v59 = vadd.f32 %v3078_v6, %v4390_v16  ;;  %v1892_v35 = vpop.f32.mrb[85].mxu0  ;;  %v2091_v60 = vpop.f32.mrb[117].mxu1  ;;  %v1621_v6 = vadd.f32 %v4346_v30, %v4339_v17 }
 0x1fe   :  { %2604 = vst.msk [vmem:[%s4882_s3 + $0x44] sm:$0xf] %vm2586_vm1, %v2965_v46  ;;  %v2092_v50 = vadd.f32 %v2091_v60, %v4378_v19  ;;  %v1893_v51 = vpop.f32.mrb[86].mxu0  ;;  %v3079_v49 = vpop.f32.mrb[118].mxu1  ;;  %v1618_v46 = vadd.f32 %v4346_v30, %v4335_v10 }
 0x1ff   :  { %v2288_v44 = vmax.f32 %v2100_v59, 0.0  ;;  %v4608_v55 = vadd.f32 %v1893_v51, %v1605_v27  ;;  %v2103_v20 = vadd.f32 %v3079_v49, %v4394_v54  ;;  %v1895_v3 = vpop.f32.mrb[87].mxu0  ;;  %v2094_v21 = vpop.f32.mrb[119].mxu1 }
 0x200   :  { %v2286_v28 = vmax.f32 %v2092_v50, 0.0  ;;  %v2095_v16 = vadd.f32 %v2094_v21, %v4382_v23 }
 0x201   :  { %v2970_v45 = vpack.c.bf16 %v2288_v44, %v2288_v44  ;;  %v2289_v0 = vmax.f32 %v2103_v20, 0.0  ;;  %v4901_v44 = vld [vmem:[#allocation19_spill] sm:$0xff] }
 0x202   :  { %v2968_v31 = vpack.c.bf16 %v2286_v28, %v2286_v28  ;;  %v2287_v47 = vmax.f32 %v2095_v16, 0.0 }
 0x203   :  { %2609 = vst.msk [vmem:[%s4882_s3 + $0x58] sm:$0xf] %vm2586_vm1, %v2970_v45  ;;  %v2971_v19 = vpack.c.bf16 %v2289_v0, %v2289_v0 }
 0x204   :  { %2607 = vst.msk [vmem:[%s4882_s3 + $0x50] sm:$0xf] %vm2586_vm1, %v2968_v31  ;;  %v2969_v54 = vpack.c.bf16 %v2287_v47, %v2287_v47  ;;  %v1898_v23 = vpop.f32.mrb[88].mxu0  ;;  %v3082_v4 = vpop.f32.mrb[120].mxu1 }
 0x205   :  { %2610 = vst.msk [vmem:[%s4882_s3 + $0x5c] sm:$0xf] %vm2586_vm1, %v2971_v19  ;;  %v4628_v57 = vadd.f32 %v1898_v23, %v1610_v34  ;;  %v2116_v61 = vadd.f32 %v3082_v4, %v4414_v9  ;;  %v1900_v29 = vpop.f32.mrb[89].mxu0  ;;  %v2107_v33 = vpop.f32.mrb[121].mxu1  ;;  %v4903_v34 = vld [vmem:[#allocation2_spill] sm:$0xff] }
 0x206   :  { %2608 = vst.msk [vmem:[%s4882_s3 + $0x54] sm:$0xf] %vm2586_vm1, %v2969_v54  ;;  %v2108_v25 = vadd.f32 %v2107_v33, %v4402_v14  ;;  %v1901_v5 = vpop.f32.mrb[90].mxu0  ;;  %v3083_v2 = vpop.f32.mrb[122].mxu1  ;;  %v1626_v19 = vadd.f32 %v4346_v30, %v4903_v34  ;;  %v4907_v34 = vld [vmem:[#allocation6_spill] sm:$0xff] }
 0x207   :  { %v2292_v11 = vmax.f32 %v2116_v61, 0.0  ;;  %v4636_v38 = vadd.f32 %v1901_v5, %v1613_v63  ;;  %v2119_v43 = vadd.f32 %v3083_v2, %v4418_v32  ;;  %v1903_v26 = vpop.f32.mrb[91].mxu0  ;;  %v2110_v36 = vpop.f32.mrb[123].mxu1  ;;  %v4904_v63 = vld [vmem:[#allocation3_spill] sm:$0xff] }
 0x208   :  { %v2290_v52 = vmax.f32 %v2108_v25, 0.0  ;;  %v2111_v9 = vadd.f32 %v2110_v36, %v4406_v40  ;;  %v1629_v61 = vadd.f32 %v4346_v30, %v4904_v63 }
 0x209   :  { %v2974_v42 = vpack.c.bf16 %v2292_v11, %v2292_v11  ;;  %v2293_v12 = vmax.f32 %v2119_v43, 0.0 }
 0x20a   :  { %v2972_v18 = vpack.c.bf16 %v2290_v52, %v2290_v52  ;;  %v2291_v48 = vmax.f32 %v2111_v9, 0.0 }
 0x20b   :  { %2613 = vst.msk [vmem:[%s4882_s3 + $0x68] sm:$0xf] %vm2586_vm1, %v2974_v42  ;;  %v2975_v14 = vpack.c.bf16 %v2293_v12, %v2293_v12 }
 0x20c   :  { %2611 = vst.msk [vmem:[%s4882_s3 + $0x60] sm:$0xf] %vm2586_vm1, %v2972_v18  ;;  %v2973_v32 = vpack.c.bf16 %v2291_v48, %v2291_v48  ;;  %v1906_v40 = vpop.f32.mrb[92].mxu0  ;;  %v3086_v7 = vpop.f32.mrb[124].mxu1 }
 0x20d   :  { %2614 = vst.msk [vmem:[%s4882_s3 + $0x6c] sm:$0xf] %vm2586_vm1, %v2975_v14  ;;  %v4656_v10 = vadd.f32 %v1906_v40, %v1618_v46  ;;  %v2132_v27 = vadd.f32 %v3086_v7, %v4438_v56  ;;  %v1908_v59 = vpop.f32.mrb[93].mxu0  ;;  %v2123_v35 = vpop.f32.mrb[125].mxu1  ;;  %v4902_v56 = vld [vmem:[#allocation16_spill] sm:$0xff] }
 0x20e   :  { %2612 = vst.msk [vmem:[%s4882_s3 + $0x64] sm:$0xf] %vm2586_vm1, %v2973_v32  ;;  %v2124_v60 = vadd.f32 %v2123_v35, %v4426_v1  ;;  %v1909_v50 = vpop.f32.mrb[94].mxu0  ;;  %v3087_v17 = vpop.f32.mrb[126].mxu1  ;;  %v4905_v32 = vld [vmem:[#allocation4_spill] sm:$0xff] }
 0x20f   :  { %v2296_v51 = vmax.f32 %v2132_v27, 0.0  ;;  %v4664_v49 = vadd.f32 %v1909_v50, %v1621_v6  ;;  %v2135_v20 = vadd.f32 %v3087_v17, %v4901_v44  ;;  %v1911_v3 = vpop.f32.mrb[95].mxu0  ;;  %v2126_v21 = vpop.f32.mrb[127].mxu1  ;;  %v1634_v40 = vadd.f32 %v4346_v30, %v4905_v32  ;;  %v4906_v6 = vld [vmem:[#allocation5_spill] sm:$0xff] }
 0x210   :  { %v2294_v28 = vmax.f32 %v2124_v60, 0.0  ;;  %v2127_v16 = vadd.f32 %v2126_v21, %v4902_v56  ;;  %v1637_v27 = vadd.f32 %v4346_v30, %v4906_v6 }
 0x211   :  { %v2978_v45 = vpack.c.bf16 %v2296_v51, %v2296_v51  ;;  %v2297_v0 = vmax.f32 %v2135_v20, 0.0 }
 0x212   :  { %v2976_v31 = vpack.c.bf16 %v2294_v28, %v2294_v28  ;;  %v2295_v47 = vmax.f32 %v2127_v16, 0.0 }
 0x213   :  { %2617 = vst.msk [vmem:[%s4882_s3 + $0x78] sm:$0xf] %vm2586_vm1, %v2978_v45  ;;  %v2979_v1 = vpack.c.bf16 %v2297_v0, %v2297_v0 }
 0x214   :  { %2615 = vst.msk [vmem:[%s4882_s3 + $0x70] sm:$0xf] %vm2586_vm1, %v2976_v31  ;;  %v2977_v54 = vpack.c.bf16 %v2295_v47, %v2295_v47  ;;  %v1914_v23 = vpop.f32.mrb[96].mxu0  ;;  %v3090_v4 = vpop.f32.mrb[128].mxu1 }
 0x215   :  { %2618 = vst.msk [vmem:[%s4882_s3 + $0x7c] sm:$0xf] %vm2586_vm1, %v2979_v1  ;;  %v4684_v29 = vadd.f32 %v1914_v23, %v1626_v19  ;;  %v2148_v33 = vadd.f32 %v3090_v4, %v4482_v53  ;;  %v1916_v25 = vpop.f32.mrb[97].mxu0  ;;  %v2139_v5 = vpop.f32.mrb[129].mxu1  ;;  %v1642_v19 = vadd.f32 %v4346_v30, %v4907_v34 }
 0x216   :  { %2616 = vst.msk [vmem:[%s4882_s3 + $0x74] sm:$0xf] %vm2586_vm1, %v2977_v54  ;;  %v2140_v2 = vadd.f32 %v2139_v5, %v4454_v8  ;;  %v1917_v11 = vpop.f32.mrb[98].mxu0  ;;  %v3091_v43 = vpop.f32.mrb[130].mxu1  ;;  %v4908_v54 = vld [vmem:[#allocation7_spill] sm:$0xff] }
 0x217   :  { %v2300_v26 = vmax.f32 %v2148_v33, 0.0  ;;  %v4692_v36 = vadd.f32 %v1917_v11, %v1629_v61  ;;  %v2151_v52 = vadd.f32 %v3091_v43, %v4490_v37  ;;  %v1919_v9 = vpop.f32.mrb[99].mxu0  ;;  %v2142_v42 = vpop.f32.mrb[131].mxu1  ;;  %v1645_v23 = vadd.f32 %v4346_v30, %v4908_v54 }
 0x218   :  { %v2298_v12 = vmax.f32 %v2140_v2, 0.0  ;;  %v2143_v53 = vadd.f32 %v2142_v42, %v4458_v62 }
 0x219   :  { %v2982_v18 = vpack.c.bf16 %v2300_v26, %v2300_v26  ;;  %v2301_v48 = vmax.f32 %v2151_v52, 0.0 }
 0x21a   :  { %v2980_v46 = vpack.c.bf16 %v2298_v12, %v2298_v12  ;;  %v2299_v14 = vmax.f32 %v2143_v53, 0.0 }
 0x21b   :  { %2621 = vst.msk [vmem:[%s4882_s3 + $0x88] sm:$0xf] %vm2586_vm1, %v2982_v18  ;;  %v2983_v8 = vpack.c.bf16 %v2301_v48, %v2301_v48 }
 0x21c   :  { %2619 = vst.msk [vmem:[%s4882_s3 + $0x80] sm:$0xf] %vm2586_vm1, %v2980_v46  ;;  %v2981_v37 = vpack.c.bf16 %v2299_v14, %v2299_v14  ;;  %v1922_v62 = vpop.f32.mrb[100].mxu0  ;;  %v3094_v7 = vpop.f32.mrb[132].mxu1  ;;  %v4909_v46 = vld [vmem:[#allocation8_spill] sm:$0xff] }
 0x21d   :  { %2622 = vst.msk [vmem:[%s4882_s3 + $0x8c] sm:$0xf] %vm2586_vm1, %v2983_v8  ;;  %v4712_v59 = vadd.f32 %v1922_v62, %v1634_v40  ;;  %v2164_v35 = vadd.f32 %v3094_v7, %v4546_v58  ;;  %v1924_v60 = vpop.f32.mrb[101].mxu0  ;;  %v2155_v50 = vpop.f32.mrb[133].mxu1  ;;  %v1650_v14 = vadd.f32 %v4346_v30, %v4909_v46  ;;  %v4910_v40 = vld [vmem:[#allocation9_spill] sm:$0xff] }
 0x21e   :  { %2620 = vst.msk [vmem:[%s4882_s3 + $0x84] sm:$0xf] %vm2586_vm1, %v2981_v37  ;;  %v2156_v17 = vadd.f32 %v2155_v50, %v4514_v24  ;;  %v1925_v51 = vpop.f32.mrb[102].mxu0  ;;  %v3095_v44 = vpop.f32.mrb[134].mxu1  ;;  %v1653_v8 = vadd.f32 %v4346_v30, %v4910_v40 }
 0x21f   :  { %v2304_v20 = vmax.f32 %v2164_v35, 0.0  ;;  %v4720_v3 = vadd.f32 %v1925_v51, %v1637_v27  ;;  %v2167_v21 = vadd.f32 %v3095_v44, %v4554_v15  ;;  %v1927_v28 = vpop.f32.mrb[103].mxu0  ;;  %v2158_v56 = vpop.f32.mrb[135].mxu1 }
 0x220   :  { %v2302_v16 = vmax.f32 %v2156_v17, 0.0  ;;  %v2159_v58 = vadd.f32 %v2158_v56, %v4522_v13 }
 0x221   :  { %v2986_v45 = vpack.c.bf16 %v2304_v20, %v2304_v20  ;;  %v2305_v0 = vmax.f32 %v2167_v21, 0.0 }
 0x222   :  { %v2984_v31 = vpack.c.bf16 %v2302_v16, %v2302_v16  ;;  %v2303_v47 = vmax.f32 %v2159_v58, 0.0 }
 0x223   :  { %2625 = vst.msk [vmem:[%s4882_s3 + $0x98] sm:$0xf] %vm2586_vm1, %v2986_v45  ;;  %v2987_v24 = vpack.c.bf16 %v2305_v0, %v2305_v0  ;;  %v4911_v45 = vld [vmem:[#allocation10_spill] sm:$0xff] }
 0x224   :  { %2623 = vst.msk [vmem:[%s4882_s3 + $0x90] sm:$0xf] %vm2586_vm1, %v2984_v31  ;;  %v2985_v15 = vpack.c.bf16 %v2303_v47, %v2303_v47  ;;  %v1930_v13 = vpop.f32.mrb[104].mxu0  ;;  %v3098_v1 = vpop.f32.mrb[136].mxu1  ;;  %v1658_v0 = vadd.f32 %v4346_v30, %v4911_v45  ;;  %v4912_v47 = vld [vmem:[#allocation11_spill] sm:$0xff] }
 0x225   :  { %2626 = vst.msk [vmem:[%s4882_s3 + $0x9c] sm:$0xf] %vm2586_vm1, %v2987_v24  ;;  %v4740_v4 = vadd.f32 %v1930_v13, %v1642_v19  ;;  %v2180_v63 = vadd.f32 %v3098_v1, %v4600_v41  ;;  %v1932_v61 = vpop.f32.mrb[105].mxu0  ;;  %v2171_v33 = vpop.f32.mrb[137].mxu1  ;;  %v1661_v34 = vadd.f32 %v4346_v30, %v4912_v47 }
 0x226   :  { %2624 = vst.msk [vmem:[%s4882_s3 + $0x94] sm:$0xf] %vm2586_vm1, %v2985_v15  ;;  %v2172_v25 = vadd.f32 %v2171_v33, %v4572_v22  ;;  %v1933_v5 = vpop.f32.mrb[106].mxu0  ;;  %v3099_v2 = vpop.f32.mrb[138].mxu1 }
 0x227   :  { %v2308_v11 = vmax.f32 %v2180_v63, 0.0  ;;  %v4748_v43 = vadd.f32 %v1933_v5, %v1645_v23  ;;  %v2183_v26 = vadd.f32 %v3099_v2, %v4608_v55  ;;  %v1935_v52 = vpop.f32.mrb[107].mxu0  ;;  %v2174_v9 = vpop.f32.mrb[139].mxu1 }
 0x228   :  { %v2306_v42 = vmax.f32 %v2172_v25, 0.0  ;;  %v2175_v41 = vadd.f32 %v2174_v9, %v4580_v39 }
 0x229   :  { %v2990_v12 = vpack.c.bf16 %v2308_v11, %v2308_v11  ;;  %v2309_v53 = vmax.f32 %v2183_v26, 0.0 }
 0x22a   :  { %v2988_v18 = vpack.c.bf16 %v2306_v42, %v2306_v42  ;;  %v2307_v48 = vmax.f32 %v2175_v41, 0.0  ;;  %v4913_v42 = vld [vmem:[#allocation12_spill] sm:$0xff] }
 0x22b   :  { %2629 = vst.msk [vmem:[%s4882_s3 + $0xa8] sm:$0xf] %vm2586_vm1, %v2990_v12  ;;  %v2991_v22 = vpack.c.bf16 %v2309_v53, %v2309_v53  ;;  %v1666_v41 = vadd.f32 %v4346_v30, %v4913_v42  ;;  %v4914_v53 = vld [vmem:[#allocation13_spill] sm:$0xff] }
 0x22c   :  { %2627 = vst.msk [vmem:[%s4882_s3 + $0xa0] sm:$0xf] %vm2586_vm1, %v2988_v18  ;;  %v2989_v55 = vpack.c.bf16 %v2307_v48, %v2307_v48  ;;  %v1938_v39 = vpop.f32.mrb[108].mxu0  ;;  %v3102_v32 = vpop.f32.mrb[140].mxu1  ;;  %v1669_v18 = vadd.f32 %v4346_v30, %v4914_v53 }
 0x22d   :  { %2630 = vst.msk [vmem:[%s4882_s3 + $0xac] sm:$0xf] %vm2586_vm1, %v2991_v22  ;;  %v1939_v37 = vadd.f32 %v1938_v39, %v1650_v14  ;;  %v2196_v62 = vadd.f32 %v3102_v32, %v4656_v10  ;;  %v1940_v7 = vpop.f32.mrb[109].mxu0  ;;  %v2187_v6 = vpop.f32.mrb[141].mxu1 }
 0x22e   :  { %2628 = vst.msk [vmem:[%s4882_s3 + $0xa4] sm:$0xf] %vm2586_vm1, %v2989_v55  ;;  %v2188_v27 = vadd.f32 %v2187_v6, %v4628_v57  ;;  %v1941_v35 = vpop.f32.mrb[110].mxu0  ;;  %v3103_v60 = vpop.f32.mrb[142].mxu1 }
 0x22f   :  { %v2312_v50 = vmax.f32 %v2196_v62, 0.0  ;;  %v1942_v17 = vadd.f32 %v1941_v35, %v1653_v8  ;;  %v2199_v51 = vadd.f32 %v3103_v60, %v4664_v49  ;;  %v1943_v44 = vpop.f32.mrb[111].mxu0  ;;  %v2190_v20 = vpop.f32.mrb[143].mxu1 }
 0x230   :  { %v2310_v21 = vmax.f32 %v2188_v27, 0.0  ;;  %v2191_v10 = vadd.f32 %v2190_v20, %v4636_v38  ;;  %v4915_v44 = vld [vmem:[#allocation14_spill] sm:$0xff] }
 0x231   :  { %v2994_v28 = vpack.c.bf16 %v2312_v50, %v2312_v50  ;;  %v2313_v56 = vmax.f32 %v2199_v51, 0.0  ;;  %v1674_v20 = vadd.f32 %v4346_v30, %v4915_v44 }
 0x232   :  { %v2992_v16 = vpack.c.bf16 %v2310_v21, %v2310_v21  ;;  %v2311_v58 = vmax.f32 %v2191_v10, 0.0  ;;  %v4916_v10 = vld [vmem:[#allocation15_spill] sm:$0xff] }
 0x233   :  { %2633 = vst.msk [vmem:[%s4882_s3 + $0xb8] sm:$0xf] %vm2586_vm1, %v2994_v28  ;;  %v2995_v57 = vpack.c.bf16 %v2313_v56, %v2313_v56  ;;  %v1677_v28 = vadd.f32 %v4346_v30, %v4916_v10 }
 0x234   :  { %2631 = vst.msk [vmem:[%s4882_s3 + $0xb0] sm:$0xf] %vm2586_vm1, %v2992_v16  ;;  %v2993_v49 = vpack.c.bf16 %v2311_v58, %v2311_v58  ;;  %v1946_v38 = vpop.f32.mrb[112].mxu0  ;;  %v3106_v31 = vpop.f32.mrb[144].mxu1 }
 0x235   :  { %2634 = vst.msk [vmem:[%s4882_s3 + $0xbc] sm:$0xf] %vm2586_vm1, %v2995_v57  ;;  %v1947_v19 = vadd.f32 %v1946_v38, %v1658_v0  ;;  %v2212_v24 = vadd.f32 %v3106_v31, %v4712_v59  ;;  %v1948_v15 = vpop.f32.mrb[113].mxu0  ;;  %v2203_v13 = vpop.f32.mrb[145].mxu1 }
 0x236   :  { %2632 = vst.msk [vmem:[%s4882_s3 + $0xb4] sm:$0xf] %vm2586_vm1, %v2993_v49  ;;  %v2204_v1 = vadd.f32 %v2203_v13, %v4684_v29  ;;  %v1949_v54 = vpop.f32.mrb[114].mxu0  ;;  %v3107_v23 = vpop.f32.mrb[146].mxu1 }
 0x237   :  { %v2316_v63 = vmax.f32 %v2212_v24, 0.0  ;;  %v1950_v61 = vadd.f32 %v1949_v54, %v1661_v34  ;;  %v2215_v33 = vadd.f32 %v3107_v23, %v4720_v3  ;;  %v1951_v25 = vpop.f32.mrb[115].mxu0  ;;  %v2206_v5 = vpop.f32.mrb[147].mxu1 }
 0x238   :  { %v2314_v2 = vmax.f32 %v2204_v1, 0.0  ;;  %v2207_v59 = vadd.f32 %v2206_v5, %v4692_v36 }
 0x239   :  { %v2998_v11 = vpack.c.bf16 %v2316_v63, %v2316_v63  ;;  %v2317_v26 = vmax.f32 %v2215_v33, 0.0  ;;  %v3557_v63 = vld [vmem:[%s4881_s2] ss:$0 sm:$0xff]  ;;  %v4917_v33 = vld [vmem:[#allocation17_spill] sm:$0xff] }
 0x23a   :  { %v2996_v52 = vpack.c.bf16 %v2314_v2, %v2314_v2  ;;  %v2315_v9 = vmax.f32 %v2207_v59, 0.0  ;;  %v1682_v25 = vadd.f32 %v3557_v63, %v4917_v33  ;;  %v4918_v59 = vld [vmem:[#allocation18_spill] sm:$0xff] }
 0x23b   :  { %2637 = vst.msk [vmem:[%s4882_s3 + $0xc8] sm:$0xf] %vm2586_vm1, %v2998_v11  ;;  %v2999_v29 = vpack.c.bf16 %v2317_v26, %v2317_v26  ;;  %v1685_v11 = vadd.f32 %v3557_v63, %v4918_v59 }
 0x23c   :  { %2635 = vst.msk [vmem:[%s4882_s3 + $0xc0] sm:$0xf] %vm2586_vm1, %v2996_v52  ;;  %v2997_v3 = vpack.c.bf16 %v2315_v9, %v2315_v9  ;;  %v1954_v36 = vpop.f32.mrb[116].mxu0  ;;  %v3110_v12 = vpop.f32.mrb[148].mxu1 }
 0x23d   :  { %2638 = vst.msk [vmem:[%s4882_s3 + $0xcc] sm:$0xf] %vm2586_vm1, %v2999_v29  ;;  %v1955_v48 = vadd.f32 %v1954_v36, %v1666_v41  ;;  %v2228_v46 = vadd.f32 %v3110_v12, %v1939_v37  ;;  %v1956_v14 = vpop.f32.mrb[117].mxu0  ;;  %v2219_v22 = vpop.f32.mrb[149].mxu1 }
 0x23e   :  { %2636 = vst.msk [vmem:[%s4882_s3 + $0xc4] sm:$0xf] %vm2586_vm1, %v2997_v3  ;;  %v2220_v55 = vadd.f32 %v2219_v22, %v4740_v4  ;;  %v1957_v39 = vpop.f32.mrb[118].mxu0  ;;  %v3111_v32 = vpop.f32.mrb[150].mxu1 }
 0x23f   :  { %v2320_v40 = vmax.f32 %v2228_v46, 0.0  ;;  %v1958_v8 = vadd.f32 %v1957_v39, %v1669_v18  ;;  %v2231_v62 = vadd.f32 %v3111_v32, %v1942_v17  ;;  %v1959_v7 = vpop.f32.mrb[119].mxu0  ;;  %v2222_v6 = vpop.f32.mrb[151].mxu1 }
 0x240   :  { %v2318_v27 = vmax.f32 %v2220_v55, 0.0  ;;  %v2223_v35 = vadd.f32 %v2222_v6, %v4748_v43 }
 0x241   :  { %v3002_v37 = vpack.c.bf16 %v2320_v40, %v2320_v40  ;;  %v2321_v60 = vmax.f32 %v2231_v62, 0.0 }
 0x242   :  { %v3000_v50 = vpack.c.bf16 %v2318_v27, %v2318_v27  ;;  %v2319_v51 = vmax.f32 %v2223_v35, 0.0 }
 0x243   :  { %2641 = vst.msk [vmem:[%s4882_s3 + $0xd8] sm:$0xf] %vm2586_vm1, %v3002_v37  ;;  %v3003_v4 = vpack.c.bf16 %v2321_v60, %v2321_v60 }
 0x244   :  { %2639 = vst.msk [vmem:[%s4882_s3 + $0xd0] sm:$0xf] %vm2586_vm1, %v3000_v50  ;;  %v3001_v17 = vpack.c.bf16 %v2319_v51, %v2319_v51  ;;  %v1962_v43 = vpop.f32.mrb[120].mxu0  ;;  %v3114_v21 = vpop.f32.mrb[152].mxu1 }
 0x245   :  { %2642 = vst.msk [vmem:[%s4882_s3 + $0xdc] sm:$0xf] %vm2586_vm1, %v3003_v4  ;;  %v1963_v56 = vadd.f32 %v1962_v43, %v1674_v20  ;;  %v2244_v16 = vadd.f32 %v3114_v21, %v1955_v48  ;;  %v1964_v58 = vpop.f32.mrb[121].mxu0  ;;  %v2235_v45 = vpop.f32.mrb[153].mxu1 }
 0x246   :  { %2640 = vst.msk [vmem:[%s4882_s3 + $0xd4] sm:$0xf] %vm2586_vm1, %v3001_v17  ;;  %v2236_v0 = vadd.f32 %v2235_v45, %v1947_v19  ;;  %v1965_v57 = vpop.f32.mrb[122].mxu0  ;;  %v3115_v49 = vpop.f32.mrb[154].mxu1 }
 0x247   :  { %v2324_v38 = vmax.f32 %v2244_v16, 0.0  ;;  %v1966_v31 = vadd.f32 %v1965_v57, %v1677_v28  ;;  %v2247_v30 = vadd.f32 %v3115_v49, %v1958_v8  ;;  %v1967_v47 = vpop.f32.mrb[123].mxu0  ;;  %v2238_v34 = vpop.f32.mrb[155].mxu1 }
 0x248   :  { %v2322_v24 = vmax.f32 %v2236_v0, 0.0  ;;  %v2239_v15 = vadd.f32 %v2238_v34, %v1950_v61 }
 0x249   :  { %v3006_v13 = vpack.c.bf16 %v2324_v38, %v2324_v38  ;;  %v2325_v1 = vmax.f32 %v2247_v30, 0.0 }
 0x24a   :  { %v3004_v54 = vpack.c.bf16 %v2322_v24, %v2322_v24  ;;  %v2323_v23 = vmax.f32 %v2239_v15, 0.0 }
 0x24b   :  { %2645 = vst.msk [vmem:[%s4882_s3 + $0xe8] sm:$0xf] %vm2586_vm1, %v3006_v13  ;;  %v3007_v19 = vpack.c.bf16 %v2325_v1, %v2325_v1 }
 0x24c   :  { %2643 = vst.msk [vmem:[%s4882_s3 + $0xe0] sm:$0xf] %vm2586_vm1, %v3004_v54  ;;  %v3005_v61 = vpack.c.bf16 %v2323_v23, %v2323_v23  ;;  %v1970_v5 = vpop.f32.mrb[124].mxu0  ;;  %v3118_v2 = vpop.f32.mrb[156].mxu1 }
 0x24d   :  { %2646 = vst.msk [vmem:[%s4882_s3 + $0xec] sm:$0xf] %vm2586_vm1, %v3007_v19  ;;  %v1971_v26 = vadd.f32 %v1970_v5, %v1682_v25  ;;  %v1972_v52 = vpop.f32.mrb[125].mxu0  ;;  %v2251_v9 = vpop.f32.mrb[157].mxu1 }
 0x24e   :  { %2644 = vst.msk [vmem:[%s4882_s3 + $0xe4] sm:$0xf] %vm2586_vm1, %v3005_v61  ;;  %v2252_v42 = vadd.f32 %v2251_v9, %v1963_v56  ;;  %v1973_v41 = vpop.f32.mrb[126].mxu0  ;;  %v3119_v29 = vpop.f32.mrb[158].mxu1 }
 0x24f   :  { %v2260_v3 = vadd.f32 %v3118_v2, %v1971_v26  ;;  %v1974_v36 = vadd.f32 %v1973_v41, %v1685_v11  ;;  %v1975_v12 = vpop.f32.mrb[127].mxu0  ;;  %v2254_v53 = vpop.f32.mrb[159].mxu1 }
 0x250   :  { %v2326_v18 = vmax.f32 %v2252_v42, 0.0  ;;  %v2255_v48 = vadd.f32 %v2254_v53, %v1966_v31 }
 0x251   :  { %v2328_v46 = vmax.f32 %v2260_v3, 0.0  ;;  %v2263_v14 = vadd.f32 %v3119_v29, %v1974_v36 }
 0x252   :  { %v3008_v22 = vpack.c.bf16 %v2326_v18, %v2326_v18  ;;  %v2327_v55 = vmax.f32 %v2255_v48, 0.0 }
 0x253   :  { %v3010_v39 = vpack.c.bf16 %v2328_v46, %v2328_v46  ;;  %v2329_v32 = vmax.f32 %v2263_v14, 0.0 }
 0x254   :  { %2647 = vst.msk [vmem:[%s4882_s3 + $0xf0] sm:$0xf] %vm2586_vm1, %v3008_v22  ;;  %v3009_v40 = vpack.c.bf16 %v2327_v55, %v2327_v55 }
 0x255   :  { %2649 = vst.msk [vmem:[%s4882_s3 + $0xf8] sm:$0xf] %vm2586_vm1, %v3010_v39  ;;  %v3011_v8 = vpack.c.bf16 %v2329_v32, %v2329_v32 }
 0x256   :  { %2648 = vst.msk [vmem:[%s4882_s3 + $0xf4] sm:$0xf] %vm2586_vm1, %v3009_v40 }
 0x257   :  { %2650 = vst.msk [vmem:[%s4882_s3 + $0xfc] sm:$0xf] %vm2586_vm1, %v3011_v8 }

// kernel: fcn_forward.22
= control target key start
LH: loop header
LB: loop body
LE: loop exit
PB: predicated region body
PF: predicated region fallthrough
CT: control target
= control target key end

     0   :  { %v3912_v0 = vmov 0   ;;  %vm1305_vm0 = vcmask 523264   ;;  %vm2781_vm1 = vcmask 519168   ;;  %s5350_s1 = inlined_call_operand.vmem [shape: bf16[576,64], index: 1, kind: input, shape index: {}]   ;;  %s5351_s0 = inlined_call_operand.vmem [shape: bf16[512,576], index: 0, kind: input, shape index: {}]   ;;  %s5352_s2 = inlined_call_operand.vmem [shape: f32[1,64], index: 2, kind: input, shape index: {}]   ;;  %s5353_s3 = inlined_call_operand.vmem [shape: bf16[512,64], index: 3, kind: input, shape index: {}]   ;;  %s5354_s4 = inlined_call_operand.vmem [shape: bf16[512,64], index: 4, kind: output, shape index: {}]  }
   0x1   :  { %1402 = vmatprep.subr.bf16.mxu0 %v3912_v0  ;;  %3474 = vmatprep.subr.bf16.mxu1 %v3912_v0  ;;  %v3651_v1 = vld [vmem:[%s5350_s1] sm:$0xff]   ;;  %v3652_v2 = vld [vmem:[%s5350_s1 + $0x8] sm:$0xff]   ;;  %v3653_v3 = vld [vmem:[%s5350_s1 + $0x10] sm:$0xff]  }
   0x2   :  { %1403 = vmatpush1.bf16.msra.mxu0 %v3651_v1  ;;  %3490 = vmatpush1.bf16.msra.mxu1 %v3651_v1  ;;  %v3654_v4 = vld [vmem:[%s5350_s1 + $0x18] sm:$0xff]   ;;  %v3655_v5 = vld [vmem:[%s5350_s1 + $0x20] sm:$0xff]   ;;  %v3656_v7 = vld [vmem:[%s5350_s1 + $0x28] sm:$0xff]  }
   0x3   :  { %1404 = vmatprep.subr.bf16.mxu0 %v3912_v0  ;;  %3475 = vmatprep.subr.bf16.mxu1 %v3912_v0  ;;  %v3669_v6 = vld [vmem:[%s5351_s0 + $0x4] ss:$20 sps:$4 sm:$0xff]   ;;  %v3657_v9 = vld [vmem:[%s5350_s1 + $0x30] sm:$0xff]   ;;  %v3660_v12 = vld [vmem:[%s5350_s1 + $0x48] sm:$0xff]  }
   0x4   :  { %v3672_v8 = vld [vmem:[%s5351_s0 + $0x144] ss:$20 sps:$4 sm:$0xff]   ;;  %1434 = vmatprep.mubr.bf16.mxu0 %v3669_v6  ;;  %v3661_v13 = vld [vmem:[%s5350_s1 + $0x50] sm:$0xff]   ;;  %v3664_v16 = vld [vmem:[%s5350_s1 + $0x68] sm:$0xff]  }
   0x5   :  { %1498 = vmatprep.mubr.bf16.mxu1 %v3672_v8  ;;  %v3658_v10 = vld [vmem:[%s5350_s1 + $0x38] sm:$0xff]   ;;  %v3659_v11 = vld [vmem:[%s5350_s1 + $0x40] sm:$0xff]   ;;  %v3665_v17 = vld [vmem:[%s5350_s1 + $0x70] sm:$0xff]  }
   0x6   :  { %1405 = vmatpush1.bf16.msra.mxu0 %v3652_v2  ;;  %3491 = vmatpush1.bf16.msra.mxu1 %v3652_v2  ;;  %v3662_v14 = vld [vmem:[%s5350_s1 + $0x58] sm:$0xff]   ;;  %v3663_v15 = vld [vmem:[%s5350_s1 + $0x60] sm:$0xff]   ;;  %v3723_v25 = vld [vmem:[%s5350_s1 + $0x108] sm:$0xff]  }
   0x7   :  { %1406 = vmatprep.subr.bf16.mxu0 %v3912_v0  ;;  %3476 = vmatprep.subr.bf16.mxu1 %v3912_v0  ;;  %v3666_v18 = vld [vmem:[%s5350_s1 + $0x78] sm:$0xff]   ;;  %v3674_v19 = vld [vmem:[%s5350_s1 + $0x100] sm:$0xff]   ;;  %v3675_v26 = vld [vmem:[%s5350_s1 + $0x88] sm:$0xff]  }
   0x8   :  { %v3667_v20 = vld [vmem:[%s5351_s0] ss:$20 sps:$4 sm:$0xff]   ;;  %v3680_v27 = vld [vmem:[%s5351_s0 + $0x28] ss:$20 sps:$4 sm:$0xff]   ;;  %v3688_v34 = vld [vmem:[%s5351_s0 + $0x50] ss:$20 sps:$4 sm:$0xff]  }
   0x9   :  { %v3670_v21 = vld [vmem:[%s5351_s0 + $0x140] ss:$20 sps:$4 sm:$0xff]   ;;  %v3681_v28 = vld [vmem:[%s5351_s0 + $0x168] ss:$20 sps:$4 sm:$0xff]   ;;  %v3689_v35 = vld [vmem:[%s5351_s0 + $0x190] ss:$20 sps:$4 sm:$0xff]  }
   0xa   :  { %1407 = vmatpush1.bf16.msra.mxu0 %v3653_v3  ;;  %3492 = vmatpush1.bf16.msra.mxu1 %v3653_v3  ;;  %v3673_v22 = vld [vmem:[%s5350_s1 + $0x80] sm:$0xff]   ;;  %v3682_v29 = vld [vmem:[%s5350_s1 + $0x90] sm:$0xff]   ;;  %v3683_v33 = vld [vmem:[%s5350_s1 + $0x98] sm:$0xff]  }
   0xb   :  { %1408 = vmatprep.subr.bf16.mxu0 %v3912_v0  ;;  %3477 = vmatprep.subr.bf16.mxu1 %v3912_v0  ;;  %v3676_v23 = vld [vmem:[%s5351_s0 + $0x2c] ss:$20 sps:$4 sm:$0xff]   ;;  %v3763_v30 = vld [vmem:[%s5350_s1 + $0x110] sm:$0xff]   ;;  %v3700_v43 = vld [vmem:[%s5351_s0 + $0xa4] ss:$20 sps:$4 sm:$0xff]  }
   0xc   :  { %v3678_v24 = vld [vmem:[%s5351_s0 + $0x16c] ss:$20 sps:$4 sm:$0xff]   ;;  %v3684_v31 = vld [vmem:[%s5351_s0 + $0x54] ss:$20 sps:$4 sm:$0xff]   ;;  %v3692_v37 = vld [vmem:[%s5351_s0 + $0x7c] ss:$20 sps:$4 sm:$0xff]  }
   0xd   :  { %v3686_v32 = vld [vmem:[%s5351_s0 + $0x194] ss:$20 sps:$4 sm:$0xff]   ;;  %v3690_v36 = vld [vmem:[%s5350_s1 + $0xa0] sm:$0xff]   ;;  %v3694_v38 = vld [vmem:[%s5351_s0 + $0x1bc] ss:$20 sps:$4 sm:$0xff]  }
   0xe   :  { %1409 = vmatpush1.bf16.msra.mxu0 %v3654_v4  ;;  %3493 = vmatpush1.bf16.msra.mxu1 %v3654_v4  ;;  %v3691_v39 = vld [vmem:[%s5350_s1 + $0xa8] sm:$0xff]   ;;  %v3698_v42 = vld [vmem:[%s5350_s1 + $0xb0] sm:$0xff]   ;;  %v3800_v44 = vld [vmem:[%s5350_s1 + $0x118] sm:$0xff]  }
   0xf   :  { %1410 = vmatprep.subr.bf16.mxu0 %v3912_v0  ;;  %3478 = vmatprep.subr.bf16.mxu1 %v3912_v0  ;;  %v3696_v40 = vld [vmem:[%s5351_s0 + $0x78] ss:$20 sps:$4 sm:$0xff]   ;;  %v3704_v47 = vld [vmem:[%s5351_s0 + $0xa0] ss:$20 sps:$4 sm:$0xff]   ;;  %v3712_v53 = vld [vmem:[%s5351_s0 + $0xc8] ss:$20 sps:$4 sm:$0xff]  }
  0x10   :  { %v3697_v41 = vld [vmem:[%s5351_s0 + $0x1b8] ss:$20 sps:$4 sm:$0xff]   ;;  %v3705_v48 = vld [vmem:[%s5351_s0 + $0x1e0] ss:$20 sps:$4 sm:$0xff]   ;;  %v3713_v54 = vld [vmem:[%s5351_s0 + $0x208] ss:$20 sps:$4 sm:$0xff]  }
  0x11   :  { %v3702_v45 = vld [vmem:[%s5351_s0 + $0x1e4] ss:$20 sps:$4 sm:$0xff]   ;;  %v3708_v50 = vld [vmem:[%s5351_s0 + $0xcc] ss:$20 sps:$4 sm:$0xff]   ;;  %v3714_v55 = vld [vmem:[%s5350_s1 + $0xd0] sm:$0xff]  }
  0x12   :  { %1411 = vmatpush1.bf16.msra.mxu0 %v3655_v5  ;;  %3494 = vmatpush1.bf16.msra.mxu1 %v3655_v5  ;;  %v3699_v46 = vld [vmem:[%s5350_s1 + $0xb8] sm:$0xff]   ;;  %v3706_v49 = vld [vmem:[%s5350_s1 + $0xc0] sm:$0xff]   ;;  %v3707_v52 = vld [vmem:[%s5350_s1 + $0xc8] sm:$0xff]  }
  0x13   :  { %1412 = vmatprep.subr.bf16.mxu0 %v3912_v0  ;;  %3479 = vmatprep.subr.bf16.mxu1 %v3912_v0  ;;  %v3710_v51 = vld [vmem:[%s5351_s0 + $0x20c] ss:$20 sps:$4 sm:$0xff]   ;;  %v3716_v56 = vld [vmem:[%s5351_s0 + $0xf4] ss:$20 sps:$4 sm:$0xff]   ;;  %v3715_v58 = vld [vmem:[%s5350_s1 + $0xd8] sm:$0xff]  }
  0x14   :  { %v3718_v57 = vld [vmem:[%s5351_s0 + $0x234] ss:$20 sps:$4 sm:$0xff]   ;;  %v3720_v59 = vld [vmem:[%s5351_s0 + $0xf0] ss:$20 sps:$4 sm:$0xff]   ;;  %v3729_v2 = vld [vmem:[%s5351_s0 + $0x118] ss:$20 sps:$4 sm:$0xff]  }
  0x15   :  { %v3721_v60 = vld [vmem:[%s5351_s0 + $0x230] ss:$20 sps:$4 sm:$0xff]   ;;  %v3724_v1 = vld [vmem:[%s5350_s1 + $0xe8] sm:$0xff]  }
  0x16   :  { %1413 = vmatpush1.bf16.msra.mxu0 %v3656_v7  ;;  %3495 = vmatpush1.bf16.msra.mxu1 %v3656_v7  ;;  %v3722_v61 = vld [vmem:[%s5350_s1 + $0xe0] sm:$0xff]   ;;  %v3725_v62 = vld [vmem:[%s5351_s0 + $0x11c] ss:$20 sps:$4 sm:$0xff]   ;;  %v3730_v3 = vld [vmem:[%s5351_s0 + $0x258] ss:$20 sps:$4 sm:$0xff]  }
  0x17   :  { %1414 = vmatprep.subr.bf16.mxu0 %v3912_v0  ;;  %3480 = vmatprep.subr.bf16.mxu1 %v3912_v0  ;;  %v3727_v63 = vld [vmem:[%s5351_s0 + $0x25c] ss:$20 sps:$4 sm:$0xff]   ;;  %v3733_v5 = vld [vmem:[%s5351_s0 + $0x284] ss:$20 sps:$4 sm:$0xff]   ;;  %v3737_v6 = vld [vmem:[%s5351_s0 + $0xc] ss:$20 sps:$4 sm:$0xff]  }
  0x18   :  { %v3731_v4 = vld [vmem:[%s5350_s1 + $0xf0] sm:$0xff]   ;;  %v3732_v7 = vld [vmem:[%s5350_s1 + $0xf8] sm:$0xff]  }
  0x19   :  { %v3735_v8 = vld [vmem:[%s5351_s0 + $0x8] ss:$20 sps:$4 sm:$0xff]  }
  0x1a   :  { %1415 = vmatpush1.bf16.msra.mxu0 %v3657_v9  ;;  %3496 = vmatpush1.bf16.msra.mxu1 %v3657_v9  ;;  %v3738_v9 = vld [vmem:[%s5351_s0 + $0x280] ss:$20 sps:$4 sm:$0xff]  }
  0x1b   :  { %1416 = vmatprep.subr.bf16.mxu0 %v3912_v0  ;;  %3481 = vmatprep.subr.bf16.mxu1 %v3912_v0 }
  0x1e   :  { %1417 = vmatpush1.bf16.msra.mxu0 %v3658_v10  ;;  %3497 = vmatpush1.bf16.msra.mxu1 %v3658_v10  ;;  %v3739_v10 = vld [vmem:[%s5351_s0 + $0x2ac] ss:$20 sps:$4 sm:$0xff]  }
  0x1f   :  { %1418 = vmatprep.subr.bf16.mxu0 %v3912_v0  ;;  %3482 = vmatprep.subr.bf16.mxu1 %v3912_v0 }
  0x22   :  { %1419 = vmatpush1.bf16.msra.mxu0 %v3659_v11  ;;  %3498 = vmatpush1.bf16.msra.mxu1 %v3659_v11  ;;  %v3741_v11 = vld [vmem:[%s5351_s0 + $0x34] ss:$20 sps:$4 sm:$0xff]  }
  0x23   :  { %1420 = vmatprep.subr.bf16.mxu0 %v3912_v0  ;;  %3483 = vmatprep.subr.bf16.mxu1 %v3912_v0 }
  0x26   :  { %1421 = vmatpush1.bf16.msra.mxu0 %v3660_v12  ;;  %3499 = vmatpush1.bf16.msra.mxu1 %v3660_v12  ;;  %v3744_v12 = vld [vmem:[%s5351_s0 + $0x30] ss:$20 sps:$4 sm:$0xff]  }
  0x27   :  { %1422 = vmatprep.subr.bf16.mxu0 %v3912_v0  ;;  %3484 = vmatprep.subr.bf16.mxu1 %v3912_v0 }
  0x2a   :  { %1423 = vmatpush1.bf16.msra.mxu0 %v3661_v13  ;;  %3500 = vmatpush1.bf16.msra.mxu1 %v3661_v13  ;;  %v3745_v13 = vld [vmem:[%s5351_s0 + $0x2d4] ss:$20 sps:$4 sm:$0xff]  }
  0x2b   :  { %1424 = vmatprep.subr.bf16.mxu0 %v3912_v0  ;;  %3485 = vmatprep.subr.bf16.mxu1 %v3912_v0 }
  0x2e   :  { %1425 = vmatpush1.bf16.msra.mxu0 %v3662_v14  ;;  %3501 = vmatpush1.bf16.msra.mxu1 %v3662_v14  ;;  %v3747_v14 = vld [vmem:[%s5351_s0 + $0x5c] ss:$20 sps:$4 sm:$0xff]  }
  0x2f   :  { %1426 = vmatprep.subr.bf16.mxu0 %v3912_v0  ;;  %3486 = vmatprep.subr.bf16.mxu1 %v3912_v0 }
  0x32   :  { %1427 = vmatpush1.bf16.msra.mxu0 %v3663_v15  ;;  %3502 = vmatpush1.bf16.msra.mxu1 %v3663_v15  ;;  %v3749_v15 = vld [vmem:[%s5351_s0 + $0x2d0] ss:$20 sps:$4 sm:$0xff]  }
  0x33   :  { %1428 = vmatprep.subr.bf16.mxu0 %v3912_v0  ;;  %3487 = vmatprep.subr.bf16.mxu1 %v3912_v0 }
  0x36   :  { %1429 = vmatpush1.bf16.msra.mxu0 %v3664_v16  ;;  %3503 = vmatpush1.bf16.msra.mxu1 %v3664_v16  ;;  %v3750_v16 = vld [vmem:[%s5351_s0 + $0x58] ss:$20 sps:$4 sm:$0xff]  }
  0x37   :  { %1430 = vmatprep.subr.bf16.mxu0 %v3912_v0  ;;  %3488 = vmatprep.subr.bf16.mxu1 %v3912_v0 }
  0x3a   :  { %1431 = vmatpush1.bf16.msra.mxu0 %v3665_v17  ;;  %3504 = vmatpush1.bf16.msra.mxu1 %v3665_v17  ;;  %v3751_v17 = vld [vmem:[%s5351_s0 + $0x2fc] ss:$20 sps:$4 sm:$0xff]  }
  0x3b   :  { %1432 = vmatprep.subr.bf16.mxu0 %v3912_v0  ;;  %3489 = vmatprep.subr.bf16.mxu1 %v3912_v0 }
  0x3e   :  { %1433 = vmatpush1.bf16.msra.mxu0 %v3666_v18  ;;  %3505 = vmatpush1.bf16.msra.mxu1 %v3666_v18  ;;  %v3753_v18 = vld [vmem:[%s5351_s0 + $0x84] ss:$20 sps:$4 sm:$0xff]  }
  0x3f   :  { %1691 = vmatprep.subr.bf16.mxu0 %v3912_v0  ;;  %3402 = vmatprep.subr.bf16.mxu1 %v3674_v19 }
  0x41   :  { %1435 = vmatmul.mubr.bf16.vlgmr.msra.gmra.mrb[0].mxu0 %v3667_v20  ;;  %1499 = vmatmul.mubr.bf16.vlgmr.msra.gmra.mrb[0].mxu1 %v3670_v21  ;;  %v3756_v20 = vld [vmem:[%s5351_s0 + $0x80] ss:$20 sps:$4 sm:$0xff]   ;;  %v3757_v21 = vld [vmem:[%s5351_s0 + $0x324] ss:$20 sps:$4 sm:$0xff]  }
  0x42   :  { %1692 = vmatpush1.bf16.msra.mxu0 %v3673_v22  ;;  %3403 = vmatpush3.bf16.msra.mxu1 %v3674_v19  ;;  %v3755_v19 = vld [vmem:[%s5351_s0 + $0x2f8] ss:$20 sps:$4 sm:$0xff]  }
  0x43   :  { %1693 = vmatprep.subr.bf16.mxu0 %v3912_v0  ;;  %1442 = vmatprep.mubr.bf16.mxu0 %v3676_v23  ;;  %v3759_v22 = vld [vmem:[%s5351_s0 + $0xac] ss:$20 sps:$4 sm:$0xff]  }
  0x44   :  { %1506 = vmatprep.mubr.bf16.mxu1 %v3678_v24  ;;  %3404 = vmatprep.subr.bf16.mxu1 %v3723_v25  ;;  %v3761_v23 = vld [vmem:[%s5351_s0 + $0x320] ss:$20 sps:$4 sm:$0xff]   ;;  %v3762_v24 = vld [vmem:[%s5351_s0 + $0xa8] ss:$20 sps:$4 sm:$0xff]  }
  0x46   :  { %1694 = vmatpush1.bf16.msra.mxu0 %v3675_v26  ;;  %3405 = vmatpush3.bf16.msra.mxu1 %v3723_v25  ;;  %v3764_v25 = vld [vmem:[%s5351_s0 + $0x34c] ss:$20 sps:$4 sm:$0xff]   ;;  %v3766_v26 = vld [vmem:[%s5351_s0 + $0xd4] ss:$20 sps:$4 sm:$0xff]  }
  0x47   :  { %1695 = vmatprep.subr.bf16.mxu0 %v3912_v0  ;;  %3406 = vmatprep.subr.bf16.mxu1 %v3763_v30 }
  0x49   :  { %1443 = vmatmul.mubr.bf16.gmra.mrb[4].mxu0 %v3680_v27  ;;  %1507 = vmatmul.mubr.bf16.gmra.mrb[4].mxu1 %v3681_v28  ;;  %v3768_v27 = vld [vmem:[%s5351_s0 + $0x348] ss:$20 sps:$4 sm:$0xff]   ;;  %v3769_v28 = vld [vmem:[%s5351_s0 + $0xd0] ss:$20 sps:$4 sm:$0xff]  }
  0x4a   :  { %1696 = vmatpush1.bf16.msra.mxu0 %v3682_v29  ;;  %1450 = vmatprep.mubr.bf16.mxu0 %v3684_v31  ;;  %v3770_v29 = vld [vmem:[%s5351_s0 + $0x374] ss:$20 sps:$4 sm:$0xff]   ;;  %v3774_v31 = vld [vmem:[%s5351_s0 + $0x370] ss:$20 sps:$4 sm:$0xff]  }
  0x4b   :  { %1697 = vmatprep.subr.bf16.mxu0 %v3912_v0  ;;  %1514 = vmatprep.mubr.bf16.mxu1 %v3686_v32  ;;  %v3775_v32 = vld [vmem:[%s5351_s0 + $0xf8] ss:$20 sps:$4 sm:$0xff]  }
  0x4c   :  { %3407 = vmatpush3.bf16.msra.mxu1 %v3763_v30  ;;  %v3772_v30 = vld [vmem:[%s5351_s0 + $0xfc] ss:$20 sps:$4 sm:$0xff]  }
  0x4d   :  { %3408 = vmatprep.subr.bf16.mxu1 %v3800_v44 }
  0x4e   :  { %1698 = vmatpush1.bf16.msra.mxu0 %v3683_v33  ;;  %v3776_v33 = vld [vmem:[%s5351_s0 + $0x39c] ss:$20 sps:$4 sm:$0xff]  }
  0x4f   :  { %1699 = vmatprep.subr.bf16.mxu0 %v3912_v0 }
  0x50   :  { %3409 = vmatpush3.bf16.msra.mxu1 %v3800_v44  ;;  %v3793_v44 = vld [vmem:[%s5351_s0 + $0x170] ss:$20 sps:$4 sm:$0xff]  }
  0x51   :  { %1451 = vmatmul.mubr.bf16.gmra.mrb[8].mxu0 %v3688_v34  ;;  %1515 = vmatmul.mubr.bf16.gmra.mrb[8].mxu1 %v3689_v35  ;;  %v3778_v34 = vld [vmem:[%s5351_s0 + $0x124] ss:$20 sps:$4 sm:$0xff]  }
  0x52   :  { %1700 = vmatpush1.bf16.msra.mxu0 %v3690_v36  ;;  %1458 = vmatprep.mubr.bf16.mxu0 %v3692_v37  ;;  %v3780_v35 = vld [vmem:[%s5351_s0 + $0x398] ss:$20 sps:$4 sm:$0xff]   ;;  %v3781_v36 = vld [vmem:[%s5351_s0 + $0x120] ss:$20 sps:$4 sm:$0xff]  }
  0x53   :  { %1701 = vmatprep.subr.bf16.mxu0 %v3912_v0  ;;  %1522 = vmatprep.mubr.bf16.mxu1 %v3694_v38  ;;  %v3782_v37 = vld [vmem:[%s5351_s0 + $0x3c4] ss:$20 sps:$4 sm:$0xff]   ;;  %v3784_v38 = vld [vmem:[%s5351_s0 + $0x14c] ss:$20 sps:$4 sm:$0xff]  }
  0x56   :  { %1702 = vmatpush1.bf16.msra.mxu0 %v3691_v39  ;;  %v3786_v39 = vld [vmem:[%s5351_s0 + $0x3c0] ss:$20 sps:$4 sm:$0xff]  }
  0x57   :  { %1703 = vmatprep.subr.bf16.mxu0 %v3912_v0 }
  0x59   :  { %1459 = vmatmul.mubr.bf16.gmra.mrb[12].mxu0 %v3696_v40  ;;  %1523 = vmatmul.mubr.bf16.gmra.mrb[12].mxu1 %v3697_v41  ;;  %v3787_v40 = vld [vmem:[%s5351_s0 + $0x148] ss:$20 sps:$4 sm:$0xff]   ;;  %v3788_v41 = vld [vmem:[%s5351_s0 + $0x3ec] ss:$20 sps:$4 sm:$0xff]  }
  0x5a   :  { %1704 = vmatpush1.bf16.msra.mxu0 %v3698_v42  ;;  %1466 = vmatprep.mubr.bf16.mxu0 %v3700_v43  ;;  %v3790_v42 = vld [vmem:[%s5351_s0 + $0x174] ss:$20 sps:$4 sm:$0xff]  }
  0x5b   :  { %1705 = vmatprep.subr.bf16.mxu0 %v3912_v0  ;;  %1530 = vmatprep.mubr.bf16.mxu1 %v3702_v45  ;;  %v3792_v43 = vld [vmem:[%s5351_s0 + $0x3e8] ss:$20 sps:$4 sm:$0xff]  }
  0x5c   :  { %v3794_v45 = vld [vmem:[%s5351_s0 + $0x414] ss:$20 sps:$4 sm:$0xff]  }
  0x5e   :  { %1706 = vmatpush1.bf16.msra.mxu0 %v3699_v46  ;;  %v3796_v46 = vld [vmem:[%s5351_s0 + $0x19c] ss:$20 sps:$4 sm:$0xff]  }
  0x5f   :  { %1707 = vmatprep.subr.bf16.mxu0 %v3912_v0 }
  0x61   :  { %1467 = vmatmul.mubr.bf16.gmra.mrb[16].mxu0 %v3704_v47  ;;  %1531 = vmatmul.mubr.bf16.gmra.mrb[16].mxu1 %v3705_v48  ;;  %v3798_v47 = vld [vmem:[%s5351_s0 + $0x410] ss:$20 sps:$4 sm:$0xff]   ;;  %v3799_v48 = vld [vmem:[%s5351_s0 + $0x198] ss:$20 sps:$4 sm:$0xff]  }
  0x62   :  { %1708 = vmatpush1.bf16.msra.mxu0 %v3706_v49  ;;  %1474 = vmatprep.mubr.bf16.mxu0 %v3708_v50  ;;  %v3801_v49 = vld [vmem:[%s5351_s0 + $0x43c] ss:$20 sps:$4 sm:$0xff]   ;;  %v3803_v50 = vld [vmem:[%s5351_s0 + $0x1c4] ss:$20 sps:$4 sm:$0xff]  }
  0x63   :  { %1709 = vmatprep.subr.bf16.mxu0 %v3912_v0  ;;  %1538 = vmatprep.mubr.bf16.mxu1 %v3710_v51  ;;  %v3805_v51 = vld [vmem:[%s5351_s0 + $0x438] ss:$20 sps:$4 sm:$0xff]  }
  0x66   :  { %1710 = vmatpush1.bf16.msra.mxu0 %v3707_v52  ;;  %v3806_v52 = vld [vmem:[%s5351_s0 + $0x1c0] ss:$20 sps:$4 sm:$0xff]  }
  0x67   :  { %1711 = vmatprep.subr.bf16.mxu0 %v3912_v0 }
  0x69   :  { %1475 = vmatmul.mubr.bf16.gmra.mrb[20].mxu0 %v3712_v53  ;;  %1539 = vmatmul.mubr.bf16.gmra.mrb[20].mxu1 %v3713_v54  ;;  %v3807_v53 = vld [vmem:[%s5351_s0 + $0x464] ss:$20 sps:$4 sm:$0xff]   ;;  %v3809_v54 = vld [vmem:[%s5351_s0 + $0x1ec] ss:$20 sps:$4 sm:$0xff]  }
  0x6a   :  { %1712 = vmatpush1.bf16.msra.mxu0 %v3714_v55  ;;  %1482 = vmatprep.mubr.bf16.mxu0 %v3716_v56  ;;  %v3811_v55 = vld [vmem:[%s5351_s0 + $0x460] ss:$20 sps:$4 sm:$0xff]   ;;  %v3812_v56 = vld [vmem:[%s5351_s0 + $0x1e8] ss:$20 sps:$4 sm:$0xff]  }
  0x6b   :  { %1713 = vmatprep.subr.bf16.mxu0 %v3912_v0  ;;  %1546 = vmatprep.mubr.bf16.mxu1 %v3718_v57  ;;  %v3813_v57 = vld [vmem:[%s5351_s0 + $0x48c] ss:$20 sps:$4 sm:$0xff]  }
  0x6e   :  { %1714 = vmatpush1.bf16.msra.mxu0 %v3715_v58  ;;  %v3815_v58 = vld [vmem:[%s5351_s0 + $0x214] ss:$20 sps:$4 sm:$0xff]  }
  0x6f   :  { %1715 = vmatprep.subr.bf16.mxu0 %v3912_v0 }
  0x71   :  { %1483 = vmatmul.mubr.bf16.gmra.mrb[24].mxu0 %v3720_v59  ;;  %1547 = vmatmul.mubr.bf16.gmra.mrb[24].mxu1 %v3721_v60  ;;  %v3817_v59 = vld [vmem:[%s5351_s0 + $0x488] ss:$20 sps:$4 sm:$0xff]   ;;  %v3818_v60 = vld [vmem:[%s5351_s0 + $0x210] ss:$20 sps:$4 sm:$0xff]  }
  0x72   :  { %1716 = vmatpush1.bf16.msra.mxu0 %v3722_v61  ;;  %1490 = vmatprep.mubr.bf16.mxu0 %v3725_v62  ;;  %v3819_v61 = vld [vmem:[%s5351_s0 + $0x4b4] ss:$20 sps:$4 sm:$0xff]   ;;  %v3821_v62 = vld [vmem:[%s5351_s0 + $0x23c] ss:$20 sps:$4 sm:$0xff]  }
  0x73   :  { %1717 = vmatprep.subr.bf16.mxu0 %v3912_v0  ;;  %1554 = vmatprep.mubr.bf16.mxu1 %v3727_v63  ;;  %v3823_v63 = vld [vmem:[%s5351_s0 + $0x4b0] ss:$20 sps:$4 sm:$0xff]  }
  0x76   :  { %1718 = vmatpush1.bf16.msra.mxu0 %v3724_v1  ;;  %v3824_v1 = vld [vmem:[%s5351_s0 + $0x238] ss:$20 sps:$4 sm:$0xff]  }
  0x77   :  { %1719 = vmatprep.subr.bf16.mxu0 %v3912_v0 }
  0x79   :  { %1491 = vmatmul.mubr.bf16.gmra.mrb[28].mxu0 %v3729_v2  ;;  %1555 = vmatmul.mubr.bf16.gmra.mrb[28].mxu1 %v3730_v3  ;;  %v3825_v2 = vld [vmem:[%s5351_s0 + $0x4dc] ss:$20 sps:$4 sm:$0xff]   ;;  %v3827_v3 = vld [vmem:[%s5351_s0 + $0x264] ss:$20 sps:$4 sm:$0xff]  }
  0x7a   :  { %1720 = vmatpush1.bf16.msra.mxu0 %v3731_v4  ;;  %1562 = vmatprep.mubr.bf16.mxu1 %v3733_v5  ;;  %v3829_v4 = vld [vmem:[%s5351_s0 + $0x4d8] ss:$20 sps:$4 sm:$0xff]   ;;  %v3830_v5 = vld [vmem:[%s5351_s0 + $0x260] ss:$20 sps:$4 sm:$0xff]  }
  0x7b   :  { %1721 = vmatprep.subr.bf16.mxu0 %v3912_v0  ;;  %1723 = vmatprep.mubr.bf16.mxu0 %v3737_v6  ;;  %v3743_v0 = vld [vmem:[%s5351_s0 + $0x2a8] ss:$20 sps:$4 sm:$0xff]   ;;  %v3831_v6 = vld [vmem:[%s5351_s0 + $0x28c] ss:$20 sps:$4 sm:$0xff]  }
  0x7e   :  { %1722 = vmatpush1.bf16.msra.mxu0 %v3732_v7  ;;  %v3833_v7 = vld [vmem:[%s5351_s0 + $0x10] ss:$20 sps:$4 sm:$0xff]  }
  0x81   :  { %1563 = vmatmul.mubr.bf16.gmra.mrb[32].mxu1 %v3738_v9  ;;  %1724 = vmatmul.mubr.bf16.vlgmr.msra.gmra.mrb[0].mxu0 %v3735_v8  ;;  %v3834_v8 = vld [vmem:[%s5351_s0 + $0x288] ss:$20 sps:$4 sm:$0xff]   ;;  %v3835_v9 = vld [vmem:[%s5351_s0 + $0x38] ss:$20 sps:$4 sm:$0xff]  }
  0x82   :  { %1570 = vmatprep.mubr.bf16.mxu1 %v3739_v10  ;;  %1731 = vmatprep.mubr.bf16.mxu0 %v3741_v11  ;;  %v3836_v10 = vld [vmem:[%s5351_s0 + $0x2b4] ss:$20 sps:$4 sm:$0xff]  }
  0x83   :  { %v3838_v11 = vld [vmem:[%s5351_s0 + $0x60] ss:$20 sps:$4 sm:$0xff]  }
  0x89   :  { %1571 = vmatmul.mubr.bf16.gmra.mrb[36].mxu1 %v3743_v0  ;;  %1732 = vmatmul.mubr.bf16.gmra.mrb[4].mxu0 %v3744_v12  ;;  %v3839_v0 = vld [vmem:[%s5351_s0 + $0x2b0] ss:$20 sps:$4 sm:$0xff]   ;;  %v3840_v12 = vld [vmem:[%s5351_s0 + $0x88] ss:$20 sps:$4 sm:$0xff]  }
  0x8a   :  { %1578 = vmatprep.mubr.bf16.mxu1 %v3745_v13  ;;  %1739 = vmatprep.mubr.bf16.mxu0 %v3747_v14  ;;  %v3841_v13 = vld [vmem:[%s5351_s0 + $0x2dc] ss:$20 sps:$4 sm:$0xff]  }
  0x8b   :  { %v3843_v14 = vld [vmem:[%s5351_s0 + $0xb0] ss:$20 sps:$4 sm:$0xff]  }
  0x91   :  { %1579 = vmatmul.mubr.bf16.gmra.mrb[40].mxu1 %v3749_v15  ;;  %1740 = vmatmul.mubr.bf16.gmra.mrb[8].mxu0 %v3750_v16  ;;  %v3844_v15 = vld [vmem:[%s5351_s0 + $0x2d8] ss:$20 sps:$4 sm:$0xff]  }
  0x92   :  { %1586 = vmatprep.mubr.bf16.mxu1 %v3751_v17  ;;  %1747 = vmatprep.mubr.bf16.mxu0 %v3753_v18  ;;  %v3845_v16 = vld [vmem:[%s5351_s0 + $0xd8] ss:$20 sps:$4 sm:$0xff]   ;;  %v3848_v18 = vld [vmem:[%s5351_s0 + $0x100] ss:$20 sps:$4 sm:$0xff]  }
  0x93   :  { %v3846_v17 = vld [vmem:[%s5351_s0 + $0x304] ss:$20 sps:$4 sm:$0xff]  }
  0x99   :  { %1587 = vmatmul.mubr.bf16.gmra.mrb[44].mxu1 %v3755_v19  ;;  %1748 = vmatmul.mubr.bf16.gmra.mrb[12].mxu0 %v3756_v20 }
  0x9a   :  { %1594 = vmatprep.mubr.bf16.mxu1 %v3757_v21  ;;  %1755 = vmatprep.mubr.bf16.mxu0 %v3759_v22  ;;  %v3849_v21 = vld [vmem:[%s5351_s0 + $0x300] ss:$20 sps:$4 sm:$0xff]   ;;  %v3850_v22 = vld [vmem:[%s5351_s0 + $0x128] ss:$20 sps:$4 sm:$0xff]  }
  0xa1   :  { %1595 = vmatmul.mubr.bf16.gmra.mrb[48].mxu1 %v3761_v23  ;;  %1756 = vmatmul.mubr.bf16.gmra.mrb[16].mxu0 %v3762_v24  ;;  %v3851_v24 = vld [vmem:[%s5351_s0 + $0x32c] ss:$20 sps:$4 sm:$0xff]  }
  0xa2   :  { %1602 = vmatprep.mubr.bf16.mxu1 %v3764_v25  ;;  %1763 = vmatprep.mubr.bf16.mxu0 %v3766_v26  ;;  %v3853_v25 = vld [vmem:[%s5351_s0 + $0x150] ss:$20 sps:$4 sm:$0xff]  }
  0xa9   :  { %1603 = vmatmul.mubr.bf16.gmra.mrb[52].mxu1 %v3768_v27  ;;  %1764 = vmatmul.mubr.bf16.gmra.mrb[20].mxu0 %v3769_v28 }
  0xaa   :  { %1610 = vmatprep.mubr.bf16.mxu1 %v3770_v29  ;;  %1771 = vmatprep.mubr.bf16.mxu0 %v3772_v30  ;;  %v3854_v29 = vld [vmem:[%s5351_s0 + $0x328] ss:$20 sps:$4 sm:$0xff]   ;;  %v3855_v30 = vld [vmem:[%s5351_s0 + $0x178] ss:$20 sps:$4 sm:$0xff]  }
  0xb1   :  { %1611 = vmatmul.mubr.bf16.gmra.mrb[56].mxu1 %v3774_v31  ;;  %1772 = vmatmul.mubr.bf16.gmra.mrb[24].mxu0 %v3775_v32  ;;  %v3856_v32 = vld [vmem:[%s5351_s0 + $0x354] ss:$20 sps:$4 sm:$0xff]  }
  0xb2   :  { %1618 = vmatprep.mubr.bf16.mxu1 %v3776_v33  ;;  %1779 = vmatprep.mubr.bf16.mxu0 %v3778_v34  ;;  %v3858_v33 = vld [vmem:[%s5351_s0 + $0x1a0] ss:$20 sps:$4 sm:$0xff]  }
  0xb9   :  { %1619 = vmatmul.mubr.bf16.gmra.mrb[60].mxu1 %v3780_v35  ;;  %1780 = vmatmul.mubr.bf16.gmra.mrb[28].mxu0 %v3781_v36 }
  0xba   :  { %1626 = vmatprep.mubr.bf16.mxu1 %v3782_v37  ;;  %1787 = vmatprep.mubr.bf16.mxu0 %v3784_v38  ;;  %v3859_v37 = vld [vmem:[%s5351_s0 + $0x350] ss:$20 sps:$4 sm:$0xff]   ;;  %v3860_v38 = vld [vmem:[%s5351_s0 + $0x1c8] ss:$20 sps:$4 sm:$0xff]  }
  0xc1   :  { %1627 = vmatmul.mubr.bf16.gmra.mrb[64].mxu1 %v3786_v39  ;;  %1788 = vmatmul.mubr.bf16.gmra.mrb[32].mxu0 %v3787_v40  ;;  %v3861_v40 = vld [vmem:[%s5351_s0 + $0x37c] ss:$20 sps:$4 sm:$0xff]  }
  0xc2   :  { %1634 = vmatprep.mubr.bf16.mxu1 %v3788_v41  ;;  %1795 = vmatprep.mubr.bf16.mxu0 %v3790_v42  ;;  %v3863_v41 = vld [vmem:[%s5351_s0 + $0x1f0] ss:$20 sps:$4 sm:$0xff]  }
  0xc9   :  { %1635 = vmatmul.mubr.bf16.gmra.mrb[68].mxu1 %v3792_v43  ;;  %1796 = vmatmul.mubr.bf16.gmra.mrb[36].mxu0 %v3793_v44 }
  0xca   :  { %1642 = vmatprep.mubr.bf16.mxu1 %v3794_v45  ;;  %1803 = vmatprep.mubr.bf16.mxu0 %v3796_v46  ;;  %v3864_v45 = vld [vmem:[%s5351_s0 + $0x378] ss:$20 sps:$4 sm:$0xff]  }
  0xcb   :  { %v3865_v46 = vld [vmem:[%s5351_s0 + $0x218] ss:$20 sps:$4 sm:$0xff]  }
  0xd1   :  { %1643 = vmatmul.mubr.bf16.gmra.mrb[72].mxu1 %v3798_v47  ;;  %1804 = vmatmul.mubr.bf16.gmra.mrb[40].mxu0 %v3799_v48  ;;  %v3866_v48 = vld [vmem:[%s5351_s0 + $0x3a4] ss:$20 sps:$4 sm:$0xff]  }
  0xd2   :  { %1650 = vmatprep.mubr.bf16.mxu1 %v3801_v49  ;;  %1811 = vmatprep.mubr.bf16.mxu0 %v3803_v50  ;;  %v3868_v49 = vld [vmem:[%s5351_s0 + $0x240] ss:$20 sps:$4 sm:$0xff]  }
  0xd9   :  { %1651 = vmatmul.mubr.bf16.gmra.mrb[76].mxu1 %v3805_v51  ;;  %1812 = vmatmul.mubr.bf16.gmra.mrb[44].mxu0 %v3806_v52 }
  0xda   :  { %1658 = vmatprep.mubr.bf16.mxu1 %v3807_v53  ;;  %1819 = vmatprep.mubr.bf16.mxu0 %v3809_v54  ;;  %v3869_v53 = vld [vmem:[%s5351_s0 + $0x3a0] ss:$20 sps:$4 sm:$0xff]   ;;  %v3870_v54 = vld [vmem:[%s5351_s0 + $0x268] ss:$20 sps:$4 sm:$0xff]  }
  0xe1   :  { %1659 = vmatmul.mubr.bf16.gmra.mrb[80].mxu1 %v3811_v55  ;;  %1820 = vmatmul.mubr.bf16.gmra.mrb[48].mxu0 %v3812_v56  ;;  %v3871_v56 = vld [vmem:[%s5351_s0 + $0x3cc] ss:$20 sps:$4 sm:$0xff]  }
  0xe2   :  { %1666 = vmatprep.mubr.bf16.mxu1 %v3813_v57  ;;  %1827 = vmatprep.mubr.bf16.mxu0 %v3815_v58  ;;  %v3873_v57 = vld [vmem:[%s5351_s0 + $0x290] ss:$20 sps:$4 sm:$0xff]  }
  0xe9   :  { %1667 = vmatmul.mubr.bf16.gmra.mrb[84].mxu1 %v3817_v59  ;;  %1828 = vmatmul.mubr.bf16.gmra.mrb[52].mxu0 %v3818_v60 }
  0xea   :  { %1674 = vmatprep.mubr.bf16.mxu1 %v3819_v61  ;;  %1835 = vmatprep.mubr.bf16.mxu0 %v3821_v62  ;;  %v3874_v61 = vld [vmem:[%s5351_s0 + $0x3c8] ss:$20 sps:$4 sm:$0xff]   ;;  %v3875_v62 = vld [vmem:[%s5351_s0 + $0x2b8] ss:$20 sps:$4 sm:$0xff]  }
  0xf1   :  { %1675 = vmatmul.mubr.bf16.gmra.mrb[88].mxu1 %v3823_v63  ;;  %1836 = vmatmul.mubr.bf16.gmra.mrb[56].mxu0 %v3824_v1  ;;  %v3876_v1 = vld [vmem:[%s5351_s0 + $0x3f4] ss:$20 sps:$4 sm:$0xff]  }
  0xf2   :  { %1682 = vmatprep.mubr.bf16.mxu1 %v3825_v2  ;;  %1843 = vmatprep.mubr.bf16.mxu0 %v3827_v3  ;;  %v3878_v2 = vld [vmem:[%s5351_s0 + $0x2e0] ss:$20 sps:$4 sm:$0xff]  }
  0xf9   :  { %1683 = vmatmul.mubr.bf16.gmra.mrb[92].mxu1 %v3829_v4  ;;  %1844 = vmatmul.mubr.bf16.gmra.mrb[60].mxu0 %v3830_v5 }
  0xfa   :  { %1851 = vmatprep.mubr.bf16.mxu0 %v3831_v6  ;;  %3410 = vmatprep.mubr.msk.bf16.mxu1 %vm1305_vm0, %v3833_v7  ;;  %v3879_v6 = vld [vmem:[%s5351_s0 + $0x3f0] ss:$20 sps:$4 sm:$0xff]   ;;  %v3880_v7 = vld [vmem:[%s5351_s0 + $0x308] ss:$20 sps:$4 sm:$0xff]  }
 0x101   :  { %1852 = vmatmul.mubr.bf16.gmra.mrb[64].mxu0 %v3834_v8  ;;  %3411 = vmatmul.mubr.msk.bf16.vlgmr.msra.gmra.mrb[96].mxu1 %vm1305_vm0, %v3835_v9  ;;  %v3881_v9 = vld [vmem:[%s5351_s0 + $0x41c] ss:$20 sps:$4 sm:$0xff]  }
 0x102   :  { %1859 = vmatprep.mubr.bf16.mxu0 %v3836_v10  ;;  %3414 = vmatprep.mubr.msk.bf16.mxu1 %vm1305_vm0, %v3838_v11  ;;  %v3883_v10 = vld [vmem:[%s5351_s0 + $0x330] ss:$20 sps:$4 sm:$0xff]  }
 0x109   :  { %1860 = vmatmul.mubr.bf16.gmra.mrb[68].mxu0 %v3839_v0  ;;  %3415 = vmatmul.mubr.msk.bf16.gmra.mrb[100].mxu1 %vm1305_vm0, %v3840_v12 }
 0x10a   :  { %1867 = vmatprep.mubr.bf16.mxu0 %v3841_v13  ;;  %3418 = vmatprep.mubr.msk.bf16.mxu1 %vm1305_vm0, %v3843_v14  ;;  %v3884_v13 = vld [vmem:[%s5351_s0 + $0x418] ss:$20 sps:$4 sm:$0xff]  }
 0x10b   :  { %v3885_v14 = vld [vmem:[%s5351_s0 + $0x358] ss:$20 sps:$4 sm:$0xff]  }
 0x111   :  { %1868 = vmatmul.mubr.bf16.gmra.mrb[72].mxu0 %v3844_v15  ;;  %3419 = vmatmul.mubr.msk.bf16.gmra.mrb[104].mxu1 %vm1305_vm0, %v3845_v16  ;;  %v3886_v16 = vld [vmem:[%s5351_s0 + $0x444] ss:$20 sps:$4 sm:$0xff]  }
 0x112   :  { %1875 = vmatprep.mubr.bf16.mxu0 %v3846_v17  ;;  %3422 = vmatprep.mubr.msk.bf16.mxu1 %vm1305_vm0, %v3848_v18  ;;  %v3888_v17 = vld [vmem:[%s5351_s0 + $0x380] ss:$20 sps:$4 sm:$0xff]  }
 0x114   :  { %v4431_v19 = vpop.f32.mrb[0].mxu1 }
 0x115   :  { %v1502_v20 = vpop.f32.mrb[1].mxu1 }
 0x116   :  { %v4439_v23 = vpop.f32.mrb[2].mxu1 }
 0x117   :  { %v1505_v26 = vpop.f32.mrb[3].mxu1 }
 0x118   :  { %v3890_v26 = vld [vmem:[%s5351_s0 + $0x3a8] ss:$20 sps:$4 sm:$0xff]  }
 0x119   :  { %1876 = vmatmul.mubr.bf16.gmra.mrb[76].mxu0 %v3849_v21  ;;  %3423 = vmatmul.mubr.msk.bf16.gmra.mrb[108].mxu1 %vm1305_vm0, %v3850_v22 }
 0x11a   :  { %1883 = vmatprep.mubr.bf16.mxu0 %v3851_v24  ;;  %3426 = vmatprep.mubr.msk.bf16.mxu1 %vm1305_vm0, %v3853_v25  ;;  %v3889_v25 = vld [vmem:[%s5351_s0 + $0x440] ss:$20 sps:$4 sm:$0xff]  }
 0x11c   :  { %v4449_v27 = vpop.f32.mrb[4].mxu1 }
 0x11d   :  { %v1510_v28 = vpop.f32.mrb[5].mxu1 }
 0x11e   :  { %v4457_v31 = vpop.f32.mrb[6].mxu1 }
 0x11f   :  { %v1513_v34 = vpop.f32.mrb[7].mxu1 }
 0x121   :  { %1884 = vmatmul.mubr.bf16.gmra.mrb[80].mxu0 %v3854_v29  ;;  %3427 = vmatmul.mubr.msk.bf16.gmra.mrb[112].mxu1 %vm1305_vm0, %v3855_v30  ;;  %v3891_v30 = vld [vmem:[%s5351_s0 + $0x46c] ss:$20 sps:$4 sm:$0xff]  }
 0x122   :  { %1891 = vmatprep.mubr.bf16.mxu0 %v3856_v32  ;;  %3430 = vmatprep.mubr.msk.bf16.mxu1 %vm1305_vm0, %v3858_v33  ;;  %v3893_v32 = vld [vmem:[%s5351_s0 + $0x3d0] ss:$20 sps:$4 sm:$0xff]  }
 0x124   :  { %v4467_v35 = vpop.f32.mrb[8].mxu1 }
 0x125   :  { %v1518_v36 = vpop.f32.mrb[9].mxu1 }
 0x126   :  { %v4475_v39 = vpop.f32.mrb[10].mxu1 }
 0x127   :  { %v1521_v42 = vpop.f32.mrb[11].mxu1 }
 0x128   :  { %v3895_v42 = vld [vmem:[%s5351_s0 + $0x3f8] ss:$20 sps:$4 sm:$0xff]  }
 0x129   :  { %1892 = vmatmul.mubr.bf16.gmra.mrb[84].mxu0 %v3859_v37  ;;  %3431 = vmatmul.mubr.msk.bf16.gmra.mrb[116].mxu1 %vm1305_vm0, %v3860_v38 }
 0x12a   :  { %1899 = vmatprep.mubr.bf16.mxu0 %v3861_v40  ;;  %3434 = vmatprep.mubr.msk.bf16.mxu1 %vm1305_vm0, %v3863_v41  ;;  %v3894_v41 = vld [vmem:[%s5351_s0 + $0x468] ss:$20 sps:$4 sm:$0xff]  }
 0x12c   :  { %v4485_v43 = vpop.f32.mrb[12].mxu1 }
 0x12d   :  { %v1526_v44 = vpop.f32.mrb[13].mxu1 }
 0x12e   :  { %v4493_v47 = vpop.f32.mrb[14].mxu1 }
 0x12f   :  { %v1529_v50 = vpop.f32.mrb[15].mxu1 }
 0x131   :  { %1900 = vmatmul.mubr.bf16.gmra.mrb[88].mxu0 %v3864_v45  ;;  %3435 = vmatmul.mubr.msk.bf16.gmra.mrb[120].mxu1 %vm1305_vm0, %v3865_v46  ;;  %v3896_v46 = vld [vmem:[%s5351_s0 + $0x494] ss:$20 sps:$4 sm:$0xff]  }
 0x132   :  { %1907 = vmatprep.mubr.bf16.mxu0 %v3866_v48  ;;  %3438 = vmatprep.mubr.msk.bf16.mxu1 %vm1305_vm0, %v3868_v49  ;;  %v3898_v48 = vld [vmem:[%s5351_s0 + $0x420] ss:$20 sps:$4 sm:$0xff]  }
 0x134   :  { %v4503_v51 = vpop.f32.mrb[16].mxu1 }
 0x135   :  { %v1534_v52 = vpop.f32.mrb[17].mxu1 }
 0x136   :  { %v4511_v55 = vpop.f32.mrb[18].mxu1 }
 0x137   :  { %v1537_v58 = vpop.f32.mrb[19].mxu1 }
 0x138   :  { %v3900_v58 = vld [vmem:[%s5351_s0 + $0x448] ss:$20 sps:$4 sm:$0xff]  }
 0x139   :  { %1908 = vmatmul.mubr.bf16.gmra.mrb[92].mxu0 %v3869_v53  ;;  %3439 = vmatmul.mubr.msk.bf16.gmra.mrb[124].mxu1 %vm1305_vm0, %v3870_v54 }
 0x13a   :  { %1915 = vmatprep.mubr.bf16.mxu0 %v3871_v56  ;;  %3442 = vmatprep.mubr.msk.bf16.mxu1 %vm1305_vm0, %v3873_v57  ;;  %v3899_v57 = vld [vmem:[%s5351_s0 + $0x490] ss:$20 sps:$4 sm:$0xff]  }
 0x13c   :  { %v4521_v59 = vpop.f32.mrb[20].mxu1 }
 0x13d   :  { %v1542_v60 = vpop.f32.mrb[21].mxu1 }
 0x13e   :  { %v4529_v63 = vpop.f32.mrb[22].mxu1 }
 0x13f   :  { %v1545_v3 = vpop.f32.mrb[23].mxu1 }
 0x141   :  { %1916 = vmatmul.mubr.bf16.gmra.mrb[96].mxu0 %v3874_v61  ;;  %3443 = vmatmul.mubr.msk.bf16.gmra.mrb[128].mxu1 %vm1305_vm0, %v3875_v62  ;;  %v3901_v62 = vld [vmem:[%s5351_s0 + $0x4bc] ss:$20 sps:$4 sm:$0xff]  }
 0x142   :  { %1923 = vmatprep.mubr.bf16.mxu0 %v3876_v1  ;;  %3446 = vmatprep.mubr.msk.bf16.mxu1 %vm1305_vm0, %v3878_v2  ;;  %v3903_v1 = vld [vmem:[%s5351_s0 + $0x470] ss:$20 sps:$4 sm:$0xff]  }
 0x144   :  { %v4539_v4 = vpop.f32.mrb[24].mxu1 }
 0x145   :  { %v1550_v5 = vpop.f32.mrb[25].mxu1 }
 0x146   :  { %v4547_v8 = vpop.f32.mrb[26].mxu1 }
 0x147   :  { %v1553_v11 = vpop.f32.mrb[27].mxu1 }
 0x148   :  { %v3905_v11 = vld [vmem:[%s5351_s0 + $0x498] ss:$20 sps:$4 sm:$0xff]  }
 0x149   :  { %1924 = vmatmul.mubr.bf16.gmra.mrb[100].mxu0 %v3879_v6  ;;  %3447 = vmatmul.mubr.msk.bf16.gmra.mrb[132].mxu1 %vm1305_vm0, %v3880_v7 }
 0x14a   :  { %1931 = vmatprep.mubr.bf16.mxu0 %v3881_v9  ;;  %3450 = vmatprep.mubr.msk.bf16.mxu1 %vm1305_vm0, %v3883_v10  ;;  %v3904_v10 = vld [vmem:[%s5351_s0 + $0x4b8] ss:$20 sps:$4 sm:$0xff]  }
 0x14c   :  { %v4557_v0 = vpop.f32.mrb[28].mxu1 }
 0x14d   :  { %v1558_v12 = vpop.f32.mrb[29].mxu1 }
 0x14e   :  { %v4565_v15 = vpop.f32.mrb[30].mxu1 }
 0x14f   :  { %v1561_v18 = vpop.f32.mrb[31].mxu1 }
 0x151   :  { %1932 = vmatmul.mubr.bf16.gmra.mrb[104].mxu0 %v3884_v13  ;;  %3451 = vmatmul.mubr.msk.bf16.gmra.mrb[136].mxu1 %vm1305_vm0, %v3885_v14  ;;  %v3906_v14 = vld [vmem:[%s5351_s0 + $0x4e4] ss:$20 sps:$4 sm:$0xff]  }
 0x152   :  { %1939 = vmatprep.mubr.bf16.mxu0 %v3886_v16  ;;  %3454 = vmatprep.mubr.msk.bf16.mxu1 %vm1305_vm0, %v3888_v17  ;;  %v3908_v16 = vld [vmem:[%s5351_s0 + $0x4c0] ss:$20 sps:$4 sm:$0xff]  }
 0x154   :  { %v4575_v20 = vpop.f32.mrb[32].mxu1  ;;  %v4577_v21 = vpop.f32.mrb[0].mxu0 }
 0x155   :  { %v1566_v22 = vpop.f32.mrb[33].mxu1  ;;  %v1727_v24 = vpop.f32.mrb[1].mxu0 }
 0x156   :  { %v4585_v28 = vpop.f32.mrb[34].mxu1  ;;  %v4587_v29 = vpop.f32.mrb[2].mxu0 }
 0x157   :  { %v1569_v33 = vpop.f32.mrb[35].mxu1  ;;  %v1730_v34 = vpop.f32.mrb[3].mxu0 }
 0x159   :  { %1940 = vmatmul.mubr.bf16.gmra.mrb[108].mxu0 %v3889_v25  ;;  %3455 = vmatmul.mubr.msk.bf16.gmra.mrb[140].mxu1 %vm1305_vm0, %v3890_v26 }
 0x15a   :  { %1947 = vmatprep.mubr.bf16.mxu0 %v3891_v30  ;;  %3458 = vmatprep.mubr.msk.bf16.mxu1 %vm1305_vm0, %v3893_v32  ;;  %v3909_v30 = vld [vmem:[%s5351_s0 + $0x4e0] ss:$20 sps:$4 sm:$0xff]   ;;  %v3910_v32 = vld [vmem:[%s5351_s0 + $0x4e8] ss:$20 sps:$4 sm:$0xff]  }
 0x15c   :  { %v4597_v36 = vpop.f32.mrb[36].mxu1  ;;  %v4599_v37 = vpop.f32.mrb[4].mxu0 }
 0x15d   :  { %v1574_v38 = vpop.f32.mrb[37].mxu1  ;;  %v1735_v40 = vpop.f32.mrb[5].mxu0 }
 0x15e   :  { %v4607_v44 = vpop.f32.mrb[38].mxu1  ;;  %v4609_v45 = vpop.f32.mrb[6].mxu0 }
 0x15f   :  { %v1577_v49 = vpop.f32.mrb[39].mxu1  ;;  %v1738_v50 = vpop.f32.mrb[7].mxu0 }
 0x161   :  { %1948 = vmatmul.mubr.bf16.gmra.mrb[112].mxu0 %v3894_v41  ;;  %3459 = vmatmul.mubr.msk.bf16.gmra.mrb[144].mxu1 %vm1305_vm0, %v3895_v42 }
 0x162   :  { %1955 = vmatprep.mubr.bf16.mxu0 %v3896_v46  ;;  %3462 = vmatprep.mubr.msk.bf16.mxu1 %vm1305_vm0, %v3898_v48 }
 0x164   :  { %v4619_v52 = vpop.f32.mrb[40].mxu1  ;;  %v4621_v53 = vpop.f32.mrb[8].mxu0 }
 0x165   :  { %v1582_v54 = vpop.f32.mrb[41].mxu1  ;;  %v1743_v56 = vpop.f32.mrb[9].mxu0 }
 0x166   :  { %v4629_v60 = vpop.f32.mrb[42].mxu1  ;;  %v4631_v61 = vpop.f32.mrb[10].mxu0 }
 0x167   :  { %v1585_v2 = vpop.f32.mrb[43].mxu1  ;;  %v1746_v3 = vpop.f32.mrb[11].mxu0 }
 0x169   :  { %1956 = vmatmul.mubr.bf16.gmra.mrb[116].mxu0 %v3899_v57  ;;  %3463 = vmatmul.mubr.msk.bf16.gmra.mrb[148].mxu1 %vm1305_vm0, %v3900_v58 }
 0x16a   :  { %1963 = vmatprep.mubr.bf16.mxu0 %v3901_v62  ;;  %3466 = vmatprep.mubr.msk.bf16.mxu1 %vm1305_vm0, %v3903_v1 }
 0x16c   :  { %v4641_v5 = vpop.f32.mrb[44].mxu1  ;;  %v4643_v6 = vpop.f32.mrb[12].mxu0 }
 0x16d   :  { %v1590_v7 = vpop.f32.mrb[45].mxu1  ;;  %v1751_v9 = vpop.f32.mrb[13].mxu0 }
 0x16e   :  { %v4651_v12 = vpop.f32.mrb[46].mxu1  ;;  %v4653_v13 = vpop.f32.mrb[14].mxu0 }
 0x16f   :  { %v1593_v17 = vpop.f32.mrb[47].mxu1  ;;  %v1754_v18 = vpop.f32.mrb[15].mxu0 }
 0x171   :  { %1964 = vmatmul.mubr.bf16.gmra.mrb[120].mxu0 %v3904_v10  ;;  %3467 = vmatmul.mubr.msk.bf16.gmra.mrb[152].mxu1 %vm1305_vm0, %v3905_v11 }
 0x172   :  { %1971 = vmatprep.mubr.bf16.mxu0 %v3906_v14  ;;  %3470 = vmatprep.mubr.msk.bf16.mxu1 %vm1305_vm0, %v3908_v16 }
 0x174   :  { %v4663_v22 = vpop.f32.mrb[48].mxu1  ;;  %v4665_v24 = vpop.f32.mrb[16].mxu0 }
 0x175   :  { %v1598_v25 = vpop.f32.mrb[49].mxu1  ;;  %v1759_v26 = vpop.f32.mrb[17].mxu0 }
 0x176   :  { %v4673_v33 = vpop.f32.mrb[50].mxu1  ;;  %v4675_v34 = vpop.f32.mrb[18].mxu0 }
 0x177   :  { %v1601_v38 = vpop.f32.mrb[51].mxu1  ;;  %v1762_v40 = vpop.f32.mrb[19].mxu0 }
 0x179   :  { %1972 = vmatmul.mubr.bf16.gmra.mrb[124].mxu0 %v3909_v30  ;;  %3471 = vmatmul.mubr.msk.bf16.gmra.mrb[156].mxu1 %vm1305_vm0, %v3910_v32  ;;  %v4705_v30 = vld [vmem:[%s5352_s2] ss:$0 sm:$0xff] }
 0x17a   :  { %v1501_v32 = vadd.f32 %v4705_v30, %v4431_v19  ;;  %v1509_v19 = vadd.f32 %v4705_v30, %v4449_v27  ;;  %v1517_v27 = vadd.f32 %v4705_v30, %v4467_v35  ;;  %v1525_v35 = vadd.f32 %v4705_v30, %v4485_v43 }
 0x17b   :  { %v1533_v43 = vadd.f32 %v4705_v30, %v4503_v51  ;;  %v1541_v51 = vadd.f32 %v4705_v30, %v4521_v59  ;;  %v1549_v59 = vadd.f32 %v4705_v30, %v4539_v4  ;;  %v1557_v4 = vadd.f32 %v4705_v30, %v4557_v0  ;;  %v3335_v0 = vld [vmem:[%s5353_s3 + $0x8] sm:$0xff]  }
 0x17c   :  { %v4678_v41 = vpop.f32.mrb[52].mxu1  ;;  %v4680_v42 = vpop.f32.mrb[20].mxu0 }
 0x17d   :  { %v1606_v46 = vpop.f32.mrb[53].mxu1  ;;  %v1767_v48 = vpop.f32.mrb[21].mxu0 }
 0x17e   :  { %v4682_v49 = vpop.f32.mrb[54].mxu1  ;;  %v4684_v50 = vpop.f32.mrb[22].mxu0  ;;  %v1504_v46 = vadd.f32 %v4705_v30, %v4439_v23  ;;  %v1512_v23 = vadd.f32 %v4705_v30, %v4457_v31  ;;  %v1520_v31 = vadd.f32 %v4705_v30, %v4475_v39  ;;  %v1528_v39 = vadd.f32 %v4705_v30, %v4493_v47 }
 0x17f   :  { %v1609_v54 = vpop.f32.mrb[55].mxu1  ;;  %v1770_v56 = vpop.f32.mrb[23].mxu0  ;;  %v1536_v47 = vadd.f32 %v4705_v30, %v4511_v55  ;;  %v1544_v55 = vadd.f32 %v4705_v30, %v4529_v63  ;;  %v1552_v63 = vadd.f32 %v4705_v30, %v4547_v8  ;;  %v1560_v8 = vadd.f32 %v4705_v30, %v4565_v15 }
 0x180   :  { %v1565_v15 = vadd.f32 %v4705_v30, %v4575_v20 }
 0x184   :  { %v4686_v57 = vpop.f32.mrb[56].mxu1  ;;  %v4688_v58 = vpop.f32.mrb[24].mxu0 }
 0x185   :  { %v1614_v62 = vpop.f32.mrb[57].mxu1  ;;  %v1775_v1 = vpop.f32.mrb[25].mxu0 }
 0x186   :  { %v4690_v2 = vpop.f32.mrb[58].mxu1  ;;  %v4692_v3 = vpop.f32.mrb[26].mxu0 }
 0x187   :  { %v1617_v7 = vpop.f32.mrb[59].mxu1  ;;  %v1778_v9 = vpop.f32.mrb[27].mxu0 }
 0x18c   :  { %v4694_v10 = vpop.f32.mrb[60].mxu1  ;;  %v4696_v11 = vpop.f32.mrb[28].mxu0 }
 0x18d   :  { %5355 = vst [vmem:[#allocation2_spill] sm:$0xff] %v4694_v10  ;;  %v1622_v14 = vpop.f32.mrb[61].mxu1  ;;  %v1783_v16 = vpop.f32.mrb[29].mxu0 }
 0x18e   :  { %v4698_v17 = vpop.f32.mrb[62].mxu1  ;;  %v4700_v18 = vpop.f32.mrb[30].mxu0 }
 0x18f   :  { %5356 = vst [vmem:[#allocation3_spill] sm:$0xff] %v4698_v17  ;;  %v1625_v25 = vpop.f32.mrb[63].mxu1  ;;  %v1786_v26 = vpop.f32.mrb[31].mxu0 }
 0x194   :  { %v4709_v38 = vpop.f32.mrb[64].mxu1  ;;  %v1789_v40 = vpop.f32.mrb[32].mxu0 }
 0x195   :  { %5357 = vst [vmem:[#allocation4_spill] sm:$0xff] %v4709_v38  ;;  %v4713_v48 = vadd.f32 %v1789_v40, %v1501_v32  ;;  %v1630_v54 = vpop.f32.mrb[65].mxu1  ;;  %v1791_v56 = vpop.f32.mrb[33].mxu0  ;;  %v3214_v38 = vunpack.c.h.bf16 %v3335_v0 }
 0x196   :  { %v4715_v62 = vpop.f32.mrb[66].mxu1  ;;  %v1792_v1 = vpop.f32.mrb[34].mxu0 }
 0x197   :  { %5358 = vst [vmem:[#allocation5_spill] sm:$0xff] %v4715_v62  ;;  %v4717_v7 = vadd.f32 %v1792_v1, %v1504_v46  ;;  %v1633_v9 = vpop.f32.mrb[67].mxu1  ;;  %v1794_v14 = vpop.f32.mrb[35].mxu0 }
 0x19c   :  { %v4721_v16 = vpop.f32.mrb[68].mxu1  ;;  %v1797_v25 = vpop.f32.mrb[36].mxu0 }
 0x19d   :  { %5359 = vst [vmem:[#allocation6_spill] sm:$0xff] %v4721_v16  ;;  %v4725_v26 = vadd.f32 %v1797_v25, %v1509_v19  ;;  %v1638_v32 = vpop.f32.mrb[69].mxu1  ;;  %v1799_v40 = vpop.f32.mrb[37].mxu0 }
 0x19e   :  { %v4727_v54 = vpop.f32.mrb[70].mxu1  ;;  %v1800_v56 = vpop.f32.mrb[38].mxu0 }
 0x19f   :  { %5360 = vst [vmem:[#allocation7_spill] sm:$0xff] %v4727_v54  ;;  %v4729_v46 = vadd.f32 %v1800_v56, %v1512_v23  ;;  %v1641_v1 = vpop.f32.mrb[71].mxu1  ;;  %v1802_v9 = vpop.f32.mrb[39].mxu0 }
 0x1a4   :  { %v4733_v14 = vpop.f32.mrb[72].mxu1  ;;  %v1805_v16 = vpop.f32.mrb[40].mxu0 }
 0x1a5   :  { %5361 = vst [vmem:[#allocation8_spill] sm:$0xff] %v4733_v14  ;;  %v4737_v19 = vadd.f32 %v1805_v16, %v1517_v27  ;;  %v1646_v25 = vpop.f32.mrb[73].mxu1  ;;  %v1807_v32 = vpop.f32.mrb[41].mxu0 }
 0x1a6   :  { %v4739_v40 = vpop.f32.mrb[74].mxu1  ;;  %v1808_v54 = vpop.f32.mrb[42].mxu0 }
 0x1a7   :  { %5362 = vst [vmem:[#allocation9_spill] sm:$0xff] %v4739_v40  ;;  %v4741_v23 = vadd.f32 %v1808_v54, %v1520_v31  ;;  %v1649_v56 = vpop.f32.mrb[75].mxu1  ;;  %v1810_v1 = vpop.f32.mrb[43].mxu0 }
 0x1ac   :  { %v4745_v9 = vpop.f32.mrb[76].mxu1  ;;  %v1813_v14 = vpop.f32.mrb[44].mxu0 }
 0x1ad   :  { %5363 = vst [vmem:[#allocation10_spill] sm:$0xff] %v4745_v9  ;;  %v4749_v16 = vadd.f32 %v1813_v14, %v1525_v35  ;;  %v1654_v27 = vpop.f32.mrb[77].mxu1  ;;  %v1815_v25 = vpop.f32.mrb[45].mxu0 }
 0x1ae   :  { %v4751_v32 = vpop.f32.mrb[78].mxu1  ;;  %v1816_v40 = vpop.f32.mrb[46].mxu0 }
 0x1af   :  { %5364 = vst [vmem:[#allocation11_spill] sm:$0xff] %v4751_v32  ;;  %v4753_v54 = vadd.f32 %v1816_v40, %v1528_v39  ;;  %v1657_v31 = vpop.f32.mrb[79].mxu1  ;;  %v1818_v56 = vpop.f32.mrb[47].mxu0 }
 0x1b4   :  { %v4757_v1 = vpop.f32.mrb[80].mxu1  ;;  %v1821_v9 = vpop.f32.mrb[48].mxu0 }
 0x1b5   :  { %5365 = vst [vmem:[#allocation12_spill] sm:$0xff] %v4757_v1  ;;  %v4761_v14 = vadd.f32 %v1821_v9, %v1533_v43  ;;  %v1662_v35 = vpop.f32.mrb[81].mxu1  ;;  %v1823_v27 = vpop.f32.mrb[49].mxu0 }
 0x1b6   :  { %v4763_v25 = vpop.f32.mrb[82].mxu1  ;;  %v1824_v32 = vpop.f32.mrb[50].mxu0 }
 0x1b7   :  { %5366 = vst [vmem:[#allocation13_spill] sm:$0xff] %v4763_v25  ;;  %v4765_v40 = vadd.f32 %v1824_v32, %v1536_v47  ;;  %v1665_v39 = vpop.f32.mrb[83].mxu1  ;;  %v1826_v31 = vpop.f32.mrb[51].mxu0 }
 0x1b9   :  { %5367 = vst [vmem:[#allocation14_spill] sm:$0xff] %v4765_v40 }
 0x1bc   :  { %v4769_v56 = vpop.f32.mrb[84].mxu1  ;;  %v1829_v1 = vpop.f32.mrb[52].mxu0 }
 0x1bd   :  { %5368 = vst [vmem:[#allocation15_spill] sm:$0xff] %v4769_v56  ;;  %v4773_v9 = vadd.f32 %v1829_v1, %v1541_v51  ;;  %v1670_v43 = vpop.f32.mrb[85].mxu1  ;;  %v1831_v35 = vpop.f32.mrb[53].mxu0 }
 0x1be   :  { %v4775_v27 = vpop.f32.mrb[86].mxu1  ;;  %v1832_v25 = vpop.f32.mrb[54].mxu0 }
 0x1bf   :  { %5369 = vst [vmem:[#allocation16_spill] sm:$0xff] %v4775_v27  ;;  %v4777_v32 = vadd.f32 %v1832_v25, %v1544_v55  ;;  %v1673_v47 = vpop.f32.mrb[87].mxu1  ;;  %v1834_v39 = vpop.f32.mrb[55].mxu0 }
 0x1c4   :  { %v4781_v31 = vpop.f32.mrb[88].mxu1  ;;  %v1837_v56 = vpop.f32.mrb[56].mxu0 }
 0x1c5   :  { %5370 = vst [vmem:[#allocation17_spill] sm:$0xff] %v4781_v31  ;;  %v4785_v1 = vadd.f32 %v1837_v56, %v1549_v59  ;;  %v1678_v51 = vpop.f32.mrb[89].mxu1  ;;  %v1839_v43 = vpop.f32.mrb[57].mxu0 }
 0x1c6   :  { %v4787_v35 = vpop.f32.mrb[90].mxu1  ;;  %v1840_v27 = vpop.f32.mrb[58].mxu0 }
 0x1c7   :  { %5371 = vst [vmem:[#allocation18_spill] sm:$0xff] %v4785_v1  ;;  %5372 = vst [vmem:[#allocation19_spill] sm:$0xff] %v4787_v35  ;;  %v4789_v25 = vadd.f32 %v1840_v27, %v1552_v63  ;;  %v1681_v55 = vpop.f32.mrb[91].mxu1  ;;  %v1842_v47 = vpop.f32.mrb[59].mxu0 }
 0x1c8   :  { %v3208_v47 = vld [vmem:[%s5353_s3] sm:$0xff]  }
 0x1c9   :  { %5373 = vst [vmem:[#allocation20_spill] sm:$0xff] %v4789_v25  ;;  %v3210_v1 = vunpack.c.h.bf16 %v3208_v47 }
 0x1cc   :  { %v4793_v39 = vpop.f32.mrb[92].mxu1  ;;  %v1845_v31 = vpop.f32.mrb[60].mxu0 }
 0x1cd   :  { %5374 = vst [vmem:[#allocation21_spill] sm:$0xff] %v4793_v39  ;;  %v4797_v56 = vadd.f32 %v1845_v31, %v1557_v4  ;;  %v1686_v59 = vpop.f32.mrb[93].mxu1  ;;  %v1847_v51 = vpop.f32.mrb[61].mxu0  ;;  %v3508_v31 = vadd.f32 %v4705_v30, %v4599_v37  ;;  %v3213_v4 = vunpack.c.l.bf16 %v3335_v0  ;;  %v3507_v37 = vadd.f32 %v4705_v30, %v4587_v29  ;;  %v3336_v0 = vld [vmem:[%s5353_s3 + $0x10] sm:$0xff]  }
 0x1ce   :  { %v4799_v43 = vpop.f32.mrb[94].mxu1  ;;  %v1848_v35 = vpop.f32.mrb[62].mxu0 }
 0x1cf   :  { %5375 = vst [vmem:[#allocation22_spill] sm:$0xff] %v4797_v56  ;;  %5376 = vst [vmem:[#allocation23_spill] sm:$0xff] %v4799_v43  ;;  %v4801_v27 = vadd.f32 %v1848_v35, %v1560_v8  ;;  %v1689_v63 = vpop.f32.mrb[95].mxu1  ;;  %v1850_v55 = vpop.f32.mrb[63].mxu0  ;;  %v3506_v35 = vadd.f32 %v4705_v30, %v4577_v21  ;;  %v1568_v8 = vadd.f32 %v4705_v30, %v4585_v28 }
 0x1d0   :  { %v3209_v63 = vunpack.c.l.bf16 %v3208_v47  ;;  %v3509_v55 = vadd.f32 %v4705_v30, %v4609_v45  ;;  %v3337_v45 = vld [vmem:[%s5353_s3 + $0x18] sm:$0xff]  }
 0x1d1   :  { %5377 = vst [vmem:[#allocation24_spill] sm:$0xff] %v4801_v27 }
 0x1d4   :  { %v1853_v59 = vpop.f32.mrb[64].mxu0  ;;  %v3412_v51 = vpop.f32.mrb[96].mxu1 }
 0x1d5   :  { %v4819_v43 = vadd.f32 %v1853_v59, %v1565_v15  ;;  %v2023_v39 = vadd.f32 %v3508_v31, %v3412_v51  ;;  %v1855_v20 = vpop.f32.mrb[65].mxu0  ;;  %v2014_v62 = vpop.f32.mrb[97].mxu1 }
 0x1d6   :  { %v2015_v25 = vadd.f32 %v3506_v35, %v2014_v62  ;;  %v1856_v21 = vpop.f32.mrb[66].mxu0  ;;  %v3413_v27 = vpop.f32.mrb[98].mxu1  ;;  %v1573_v62 = vadd.f32 %v4705_v30, %v4597_v36  ;;  %v1576_v35 = vadd.f32 %v4705_v30, %v4607_v44 }
 0x1d7   :  { %v2399_v28 = vadd.f32 %v3213_v4, %v2023_v39  ;;  %v4823_v56 = vadd.f32 %v1856_v21, %v1568_v8  ;;  %v2026_v17 = vadd.f32 %v3509_v55, %v3413_v27  ;;  %v1858_v10 = vpop.f32.mrb[67].mxu0  ;;  %v2017_v40 = vpop.f32.mrb[99].mxu1  ;;  %v3217_v4 = vunpack.c.l.bf16 %v3336_v0 }
 0x1d8   :  { %v2397_v15 = vadd.f32 %v3209_v63, %v2015_v25  ;;  %v2018_v29 = vadd.f32 %v3507_v37, %v2017_v40  ;;  %v3221_v10 = vunpack.c.l.bf16 %v3337_v45  ;;  %v3512_v8 = vadd.f32 %v4705_v30, %v4643_v6 }
 0x1d9   :  { %v2463_v47 = vmax.f32 %v2399_v28, 0.0  ;;  %v2400_v39 = vadd.f32 %v3214_v38, %v2026_v17  ;;  %v3510_v40 = vadd.f32 %v4705_v30, %v4621_v53  ;;  %v3222_v17 = vunpack.c.h.bf16 %v3337_v45 }
 0x1da   :  { %v2461_v31 = vmax.f32 %v2397_v15, 0.0  ;;  %v2398_v27 = vadd.f32 %v3210_v1, %v2018_v29  ;;  %v3513_v38 = vadd.f32 %v4705_v30, %v4653_v13  ;;  %v3511_v53 = vadd.f32 %v4705_v30, %v4631_v61 }
 0x1db   :  { %v3145_v59 = vpack.c.bf16 %v2463_v47, %v2463_v47  ;;  %v2464_v51 = vmax.f32 %v2400_v39, 0.0  ;;  %v3218_v15 = vunpack.c.h.bf16 %v3336_v0 }
 0x1dc   :  { %v3143_v25 = vpack.c.bf16 %v2461_v31, %v2461_v31  ;;  %v2462_v36 = vmax.f32 %v2398_v27, 0.0  ;;  %v1861_v63 = vpop.f32.mrb[68].mxu0  ;;  %v3416_v55 = vpop.f32.mrb[100].mxu1  ;;  %v3339_v31 = vld [vmem:[%s5353_s3 + $0x28] sm:$0xff]   ;;  %v3338_v27 = vld [vmem:[%s5353_s3 + $0x20] sm:$0xff]  }
 0x1dd   :  { %2784 = vst.msk [vmem:[%s5354_s4 + $0x8] sm:$0xf] %vm2781_vm1, %v3145_v59  ;;  %v3146_v44 = vpack.c.bf16 %v2464_v51, %v2464_v51  ;;  %v4845_v6 = vadd.f32 %v1861_v63, %v1573_v62  ;;  %v2039_v1 = vadd.f32 %v3512_v8, %v3416_v55  ;;  %v1863_v20 = vpop.f32.mrb[69].mxu0  ;;  %v2030_v37 = vpop.f32.mrb[101].mxu1  ;;  %v1584_v63 = vadd.f32 %v4705_v30, %v4629_v60 }
 0x1de   :  { %2782 = vst.msk [vmem:[%s5354_s4] sm:$0xf] %vm2781_vm1, %v3143_v25  ;;  %v3144_v13 = vpack.c.bf16 %v2462_v36, %v2462_v36  ;;  %v2031_v21 = vadd.f32 %v3510_v40, %v2030_v37  ;;  %v1864_v28 = vpop.f32.mrb[70].mxu0  ;;  %v3417_v45 = vpop.f32.mrb[102].mxu1  ;;  %v3229_v25 = vunpack.c.l.bf16 %v3339_v31  ;;  %v3225_v36 = vunpack.c.l.bf16 %v3338_v27 }
 0x1df   :  { %2785 = vst.msk [vmem:[%s5354_s4 + $0xc] sm:$0xf] %vm2781_vm1, %v3146_v44  ;;  %v2403_v29 = vadd.f32 %v3221_v10, %v2039_v1  ;;  %v4857_v62 = vadd.f32 %v1864_v28, %v1576_v35  ;;  %v2042_v47 = vadd.f32 %v3513_v38, %v3417_v45  ;;  %v1866_v61 = vpop.f32.mrb[71].mxu0  ;;  %v2033_v39 = vpop.f32.mrb[103].mxu1  ;;  %v1581_v35 = vadd.f32 %v4705_v30, %v4619_v52 }
 0x1e0   :  { %2783 = vst.msk [vmem:[%s5354_s4 + $0x4] sm:$0xf] %vm2781_vm1, %v3144_v13  ;;  %v2401_v0 = vadd.f32 %v3217_v4, %v2031_v21  ;;  %v2034_v10 = vadd.f32 %v3511_v53, %v2033_v39  ;;  %v3516_v55 = vadd.f32 %v4705_v30, %v4680_v42  ;;  %v3514_v4 = vadd.f32 %v4705_v30, %v4665_v24 }
 0x1e1   :  { %v2467_v8 = vmax.f32 %v2403_v29, 0.0  ;;  %v2404_v59 = vadd.f32 %v3222_v17, %v2042_v47  ;;  %v3230_v17 = vunpack.c.h.bf16 %v3339_v31  ;;  %v3517_v53 = vadd.f32 %v4705_v30, %v4684_v50 }
 0x1e2   :  { %v2465_v51 = vmax.f32 %v2401_v0, 0.0  ;;  %v2402_v40 = vadd.f32 %v3218_v15, %v2034_v10  ;;  %v3515_v24 = vadd.f32 %v4705_v30, %v4675_v34  ;;  %v3226_v47 = vunpack.c.h.bf16 %v3338_v27  ;;  %v3341_v10 = vld [vmem:[%s5353_s3 + $0x38] sm:$0xff]  }
 0x1e3   :  { %v3149_v38 = vpack.c.bf16 %v2467_v8, %v2467_v8  ;;  %v2468_v44 = vmax.f32 %v2404_v59, 0.0  ;;  %v1589_v59 = vadd.f32 %v4705_v30, %v4641_v5 }
 0x1e4   :  { %v3147_v1 = vpack.c.bf16 %v2465_v51, %v2465_v51  ;;  %v2466_v20 = vmax.f32 %v2402_v40, 0.0  ;;  %v1869_v52 = vpop.f32.mrb[72].mxu0  ;;  %v3420_v37 = vpop.f32.mrb[104].mxu1 }
 0x1e5   :  { %2788 = vst.msk [vmem:[%s5354_s4 + $0x18] sm:$0xf] %vm2781_vm1, %v3149_v38  ;;  %v3150_v60 = vpack.c.bf16 %v2468_v44, %v2468_v44  ;;  %v4883_v42 = vadd.f32 %v1869_v52, %v1581_v35  ;;  %v2055_v13 = vadd.f32 %v3516_v55, %v3420_v37  ;;  %v1871_v21 = vpop.f32.mrb[73].mxu0  ;;  %v2046_v28 = vpop.f32.mrb[105].mxu1  ;;  %v3340_v35 = vld [vmem:[%s5353_s3 + $0x30] sm:$0xff]   ;;  %v3237_v55 = vunpack.c.l.bf16 %v3341_v10 }
 0x1e6   :  { %2786 = vst.msk [vmem:[%s5354_s4 + $0x10] sm:$0xf] %vm2781_vm1, %v3147_v1  ;;  %v3148_v50 = vpack.c.bf16 %v2466_v20, %v2466_v20  ;;  %v2047_v45 = vadd.f32 %v3514_v4, %v2046_v28  ;;  %v1872_v15 = vpop.f32.mrb[74].mxu0  ;;  %v3421_v29 = vpop.f32.mrb[106].mxu1  ;;  %v3233_v38 = vunpack.c.l.bf16 %v3340_v35  ;;  %v1592_v44 = vadd.f32 %v4705_v30, %v4651_v12 }
 0x1e7   :  { %2789 = vst.msk [vmem:[%s5354_s4 + $0x1c] sm:$0xf] %vm2781_vm1, %v3150_v60  ;;  %v2407_v61 = vadd.f32 %v3229_v25, %v2055_v13  ;;  %v4895_v39 = vadd.f32 %v1872_v15, %v1584_v63  ;;  %v2058_v31 = vadd.f32 %v3517_v53, %v3421_v29  ;;  %v1874_v34 = vpop.f32.mrb[75].mxu0  ;;  %v2049_v0 = vpop.f32.mrb[107].mxu1  ;;  %v3520_v4 = vadd.f32 %v4705_v30, %v4696_v11 }
 0x1e8   :  { %2787 = vst.msk [vmem:[%s5354_s4 + $0x14] sm:$0xf] %vm2781_vm1, %v3148_v50  ;;  %v2405_v27 = vadd.f32 %v3225_v36, %v2047_v45  ;;  %v2050_v8 = vadd.f32 %v3515_v24, %v2049_v0  ;;  %v3518_v36 = vadd.f32 %v4705_v30, %v4688_v58  ;;  %v3521_v60 = vadd.f32 %v4705_v30, %v4700_v18 }
 0x1e9   :  { %v2471_v51 = vmax.f32 %v2407_v61, 0.0  ;;  %v2408_v40 = vadd.f32 %v3230_v17, %v2058_v31  ;;  %v3238_v17 = vunpack.c.h.bf16 %v3341_v10  ;;  %v3519_v58 = vadd.f32 %v4705_v30, %v4692_v3  ;;  %v3343_v10 = vld [vmem:[%s5353_s3 + $0x48] sm:$0xff]  }
 0x1ea   :  { %v2469_v25 = vmax.f32 %v2405_v27, 0.0  ;;  %v2406_v63 = vadd.f32 %v3226_v47, %v2050_v8  ;;  %v3234_v15 = vunpack.c.h.bf16 %v3340_v35  ;;  %v3342_v8 = vld [vmem:[%s5353_s3 + $0x40] sm:$0xff]  }
 0x1eb   :  { %v3153_v1 = vpack.c.bf16 %v2471_v51, %v2471_v51  ;;  %v2472_v20 = vmax.f32 %v2408_v40, 0.0  ;;  %v1597_v40 = vadd.f32 %v4705_v30, %v4663_v22 }
 0x1ec   :  { %v3151_v52 = vpack.c.bf16 %v2469_v25, %v2469_v25  ;;  %v2470_v37 = vmax.f32 %v2406_v63, 0.0  ;;  %v1877_v5 = vpop.f32.mrb[76].mxu0  ;;  %v3424_v53 = vpop.f32.mrb[108].mxu1 }
 0x1ed   :  { %2792 = vst.msk [vmem:[%s5354_s4 + $0x28] sm:$0xf] %vm2781_vm1, %v3153_v1  ;;  %v3154_v12 = vpack.c.bf16 %v2472_v20, %v2472_v20  ;;  %v4921_v11 = vadd.f32 %v1877_v5, %v1589_v59  ;;  %v2071_v13 = vadd.f32 %v3520_v4, %v3424_v53  ;;  %v1879_v21 = vpop.f32.mrb[77].mxu0  ;;  %v2062_v28 = vpop.f32.mrb[109].mxu1 }
 0x1ee   :  { %2790 = vst.msk [vmem:[%s5354_s4 + $0x20] sm:$0xf] %vm2781_vm1, %v3151_v52  ;;  %v3152_v18 = vpack.c.bf16 %v2470_v37, %v2470_v37  ;;  %v2063_v24 = vadd.f32 %v3518_v36, %v2062_v28  ;;  %v1880_v50 = vpop.f32.mrb[78].mxu0  ;;  %v3425_v45 = vpop.f32.mrb[110].mxu1  ;;  %v3241_v36 = vunpack.c.l.bf16 %v3342_v8  ;;  %v3242_v21 = vunpack.c.h.bf16 %v3342_v8 }
 0x1ef   :  { %2793 = vst.msk [vmem:[%s5354_s4 + $0x2c] sm:$0xf] %vm2781_vm1, %v3154_v12  ;;  %v2411_v29 = vadd.f32 %v3237_v55, %v2071_v13  ;;  %v4933_v47 = vadd.f32 %v1880_v50, %v1592_v44  ;;  %v2074_v61 = vadd.f32 %v3521_v60, %v3425_v45  ;;  %v1882_v3 = vpop.f32.mrb[79].mxu0  ;;  %v2065_v31 = vpop.f32.mrb[111].mxu1  ;;  %v3245_v55 = vunpack.c.l.bf16 %v3343_v10  ;;  %v3345_v45 = vld [vmem:[%s5353_s3 + $0x58] sm:$0xff]  }
 0x1f0   :  { %2791 = vst.msk [vmem:[%s5354_s4 + $0x24] sm:$0xf] %vm2781_vm1, %v3152_v18  ;;  %v2409_v34 = vadd.f32 %v3233_v38, %v2063_v24  ;;  %v2066_v0 = vadd.f32 %v3519_v58, %v2065_v31  ;;  %v1600_v38 = vadd.f32 %v4705_v30, %v4673_v33  ;;  %v1605_v31 = vadd.f32 %v4705_v30, %v4678_v41 }
 0x1f1   :  { %v2475_v35 = vmax.f32 %v2411_v29, 0.0  ;;  %v2412_v27 = vadd.f32 %v3238_v17, %v2074_v61  ;;  %v3246_v17 = vunpack.c.h.bf16 %v3343_v10  ;;  %v3253_v10 = vunpack.c.l.bf16 %v3345_v45 }
 0x1f2   :  { %v2473_v59 = vmax.f32 %v2409_v34, 0.0  ;;  %v2410_v51 = vadd.f32 %v3234_v15, %v2066_v0 }
 0x1f3   :  { %v3157_v25 = vpack.c.bf16 %v2475_v35, %v2475_v35  ;;  %v2476_v63 = vmax.f32 %v2412_v27, 0.0 }
 0x1f4   :  { %v3155_v44 = vpack.c.bf16 %v2473_v59, %v2473_v59  ;;  %v2474_v4 = vmax.f32 %v2410_v51, 0.0  ;;  %v1885_v1 = vpop.f32.mrb[80].mxu0  ;;  %v3428_v20 = vpop.f32.mrb[112].mxu1 }
 0x1f5   :  { %2796 = vst.msk [vmem:[%s5354_s4 + $0x38] sm:$0xf] %vm2781_vm1, %v3157_v25  ;;  %v3158_v52 = vpack.c.bf16 %v2476_v63, %v2476_v63  ;;  %v4953_v37 = vadd.f32 %v1885_v1, %v1597_v40  ;;  %v2087_v22 = vadd.f32 %v3428_v20, %v4725_v26  ;;  %v1887_v5 = vpop.f32.mrb[81].mxu0  ;;  %v2078_v53 = vpop.f32.mrb[113].mxu1 }
 0x1f6   :  { %2794 = vst.msk [vmem:[%s5354_s4 + $0x30] sm:$0xf] %vm2781_vm1, %v3155_v44  ;;  %v3156_v33 = vpack.c.bf16 %v2474_v4, %v2474_v4  ;;  %v2079_v60 = vadd.f32 %v2078_v53, %v4713_v48  ;;  %v1888_v12 = vpop.f32.mrb[82].mxu0  ;;  %v3429_v13 = vpop.f32.mrb[114].mxu1 }
 0x1f7   :  { %2797 = vst.msk [vmem:[%s5354_s4 + $0x3c] sm:$0xf] %vm2781_vm1, %v3158_v52  ;;  %v2415_v26 = vadd.f32 %v3245_v55, %v2087_v22  ;;  %v4965_v28 = vadd.f32 %v1888_v12, %v1600_v38  ;;  %v2090_v58 = vadd.f32 %v3429_v13, %v4729_v46  ;;  %v1890_v18 = vpop.f32.mrb[83].mxu0  ;;  %v2081_v24 = vpop.f32.mrb[115].mxu1  ;;  %v3344_v46 = vld [vmem:[%s5353_s3 + $0x50] sm:$0xff]   ;;  %v3254_v38 = vunpack.c.h.bf16 %v3345_v45 }
 0x1f8   :  { %2795 = vst.msk [vmem:[%s5354_s4 + $0x34] sm:$0xf] %vm2781_vm1, %v3156_v33  ;;  %v2413_v48 = vadd.f32 %v3241_v36, %v2079_v60  ;;  %v2082_v50 = vadd.f32 %v2081_v24, %v4717_v7  ;;  %v1608_v7 = vadd.f32 %v4705_v30, %v4682_v49  ;;  %v3249_v51 = vunpack.c.l.bf16 %v3344_v46 }
 0x1f9   :  { %v2479_v15 = vmax.f32 %v2415_v26, 0.0  ;;  %v2416_v29 = vadd.f32 %v3246_v17, %v2090_v58  ;;  %v3250_v20 = vunpack.c.h.bf16 %v3344_v46  ;;  %v3347_v17 = vld [vmem:[%s5353_s3 + $0x68] sm:$0xff]  }
 0x1fa   :  { %v2477_v61 = vmax.f32 %v2413_v48, 0.0  ;;  %v2414_v3 = vadd.f32 %v3242_v21, %v2082_v50  ;;  %v1613_v21 = vadd.f32 %v4705_v30, %v4686_v57  ;;  %v3261_v18 = vunpack.c.l.bf16 %v3347_v17 }
 0x1fb   :  { %v3161_v34 = vpack.c.bf16 %v2479_v15, %v2479_v15  ;;  %v2480_v0 = vmax.f32 %v2416_v29, 0.0 }
 0x1fc   :  { %v3159_v35 = vpack.c.bf16 %v2477_v61, %v2477_v61  ;;  %v2478_v27 = vmax.f32 %v2414_v3, 0.0  ;;  %v1893_v8 = vpop.f32.mrb[84].mxu0  ;;  %v3432_v59 = vpop.f32.mrb[116].mxu1 }
 0x1fd   :  { %2800 = vst.msk [vmem:[%s5354_s4 + $0x48] sm:$0xf] %vm2781_vm1, %v3161_v34  ;;  %v3162_v40 = vpack.c.bf16 %v2480_v0, %v2480_v0  ;;  %v4987_v25 = vadd.f32 %v1893_v8, %v1605_v31  ;;  %v2103_v41 = vadd.f32 %v3432_v59, %v4749_v16  ;;  %v1895_v63 = vpop.f32.mrb[85].mxu0  ;;  %v2094_v55 = vpop.f32.mrb[117].mxu1  ;;  %v3262_v31 = vunpack.c.h.bf16 %v3347_v17 }
 0x1fe   :  { %2798 = vst.msk [vmem:[%s5354_s4 + $0x40] sm:$0xf] %vm2781_vm1, %v3159_v35  ;;  %v3160_v49 = vpack.c.bf16 %v2478_v27, %v2478_v27  ;;  %v2095_v44 = vadd.f32 %v2094_v55, %v4737_v19  ;;  %v1896_v4 = vpop.f32.mrb[86].mxu0  ;;  %v3433_v1 = vpop.f32.mrb[118].mxu1 }
 0x1ff   :  { %2801 = vst.msk [vmem:[%s5354_s4 + $0x4c] sm:$0xf] %vm2781_vm1, %v3162_v40  ;;  %v2419_v16 = vadd.f32 %v3253_v10, %v2103_v41  ;;  %v4999_v36 = vadd.f32 %v1896_v4, %v1608_v7  ;;  %v2106_v52 = vadd.f32 %v3433_v1, %v4753_v54  ;;  %v1898_v22 = vpop.f32.mrb[87].mxu0  ;;  %v2097_v5 = vpop.f32.mrb[119].mxu1  ;;  %v3346_v54 = vld [vmem:[%s5353_s3 + $0x60] sm:$0xff]   ;;  %v3349_v41 = vld [vmem:[%s5353_s3 + $0x78] sm:$0xff]  }
 0x200   :  { %2799 = vst.msk [vmem:[%s5354_s4 + $0x44] sm:$0xf] %vm2781_vm1, %v3160_v49  ;;  %v2417_v19 = vadd.f32 %v3249_v51, %v2095_v44  ;;  %v2098_v53 = vadd.f32 %v2097_v5, %v4741_v23  ;;  %v1616_v23 = vadd.f32 %v4705_v30, %v4690_v2  ;;  %v3257_v15 = vunpack.c.l.bf16 %v3346_v54  ;;  %v5378_v51 = vld [vmem:[#allocation14_spill] sm:$0xff] }
 0x201   :  { %v2483_v33 = vmax.f32 %v2419_v16, 0.0  ;;  %v2420_v60 = vadd.f32 %v3254_v38, %v2106_v52  ;;  %v3258_v7 = vunpack.c.h.bf16 %v3346_v54  ;;  %v5379_v44 = vld [vmem:[#allocation2_spill] sm:$0xff]  ;;  %v3269_v16 = vunpack.c.l.bf16 %v3349_v41  ;;  %v5380_v52 = vld [vmem:[#allocation3_spill] sm:$0xff] }
 0x202   :  { %v2481_v12 = vmax.f32 %v2417_v19, 0.0  ;;  %v2418_v13 = vadd.f32 %v3250_v20, %v2098_v53  ;;  %v1621_v4 = vadd.f32 %v4705_v30, %v5379_v44  ;;  %v1624_v22 = vadd.f32 %v4705_v30, %v5380_v52 }
 0x203   :  { %v3165_v26 = vpack.c.bf16 %v2483_v33, %v2483_v33  ;;  %v2484_v58 = vmax.f32 %v2420_v60, 0.0 }
 0x204   :  { %v3163_v24 = vpack.c.bf16 %v2481_v12, %v2481_v12  ;;  %v2482_v48 = vmax.f32 %v2418_v13, 0.0  ;;  %v1901_v50 = vpop.f32.mrb[88].mxu0  ;;  %v3436_v45 = vpop.f32.mrb[120].mxu1  ;;  %v5381_v12 = vld [vmem:[#allocation22_spill] sm:$0xff] }
 0x205   :  { %2804 = vst.msk [vmem:[%s5354_s4 + $0x58] sm:$0xf] %vm2781_vm1, %v3165_v26  ;;  %v3166_v29 = vpack.c.bf16 %v2484_v58, %v2484_v58  ;;  %v5021_v46 = vadd.f32 %v1901_v50, %v1613_v21  ;;  %v2119_v57 = vadd.f32 %v3436_v45, %v4773_v9  ;;  %v1903_v61 = vpop.f32.mrb[89].mxu0  ;;  %v2110_v3 = vpop.f32.mrb[121].mxu1  ;;  %v3270_v58 = vunpack.c.h.bf16 %v3349_v41 }
 0x206   :  { %2802 = vst.msk [vmem:[%s5354_s4 + $0x50] sm:$0xf] %vm2781_vm1, %v3163_v24  ;;  %v3164_v2 = vpack.c.bf16 %v2482_v48, %v2482_v48  ;;  %v2111_v34 = vadd.f32 %v2110_v3, %v4761_v14  ;;  %v1904_v0 = vpop.f32.mrb[90].mxu0  ;;  %v3437_v10 = vpop.f32.mrb[122].mxu1 }
 0x207   :  { %2805 = vst.msk [vmem:[%s5354_s4 + $0x5c] sm:$0xf] %vm2781_vm1, %v3166_v29  ;;  %v2423_v9 = vadd.f32 %v3261_v18, %v2119_v57  ;;  %v5033_v35 = vadd.f32 %v1904_v0, %v1616_v23  ;;  %v2122_v27 = vadd.f32 %v3437_v10, %v4777_v32  ;;  %v1906_v8 = vpop.f32.mrb[91].mxu0  ;;  %v2113_v59 = vpop.f32.mrb[123].mxu1  ;;  %v3348_v32 = vld [vmem:[%s5353_s3 + $0x70] sm:$0xff]   ;;  %v5382_v23 = vld [vmem:[#allocation18_spill] sm:$0xff] }
 0x208   :  { %2803 = vst.msk [vmem:[%s5354_s4 + $0x54] sm:$0xf] %vm2781_vm1, %v3164_v2  ;;  %v2421_v14 = vadd.f32 %v3257_v15, %v2111_v34  ;;  %v2114_v40 = vadd.f32 %v2113_v59, %v5378_v51  ;;  %v3265_v33 = vunpack.c.l.bf16 %v3348_v32  ;;  %v3266_v45 = vunpack.c.h.bf16 %v3348_v32  ;;  %v5383_v57 = vld [vmem:[#allocation24_spill] sm:$0xff]  ;;  %v3351_v10 = vld [vmem:[%s5353_s3 + $0x88] sm:$0xff]  }
 0x209   :  { %v2487_v63 = vmax.f32 %v2423_v9, 0.0  ;;  %v2424_v55 = vadd.f32 %v3262_v31, %v2122_v27  ;;  %v5384_v34 = vld [vmem:[#allocation20_spill] sm:$0xff]  ;;  %v3350_v27 = vld [vmem:[%s5353_s3 + $0x80] sm:$0xff]  }
 0x20a   :  { %v2485_v38 = vmax.f32 %v2421_v14, 0.0  ;;  %v2422_v49 = vadd.f32 %v3258_v7, %v2114_v40  ;;  %v5385_v14 = vld [vmem:[#allocation4_spill] sm:$0xff] }
 0x20b   :  { %v3169_v1 = vpack.c.bf16 %v2487_v63, %v2487_v63  ;;  %v2488_v20 = vmax.f32 %v2424_v55, 0.0  ;;  %v1629_v51 = vadd.f32 %v4705_v30, %v5385_v14  ;;  %v3277_v63 = vunpack.c.l.bf16 %v3351_v10  ;;  %v5386_v55 = vld [vmem:[#allocation5_spill] sm:$0xff] }
 0x20c   :  { %v3167_v5 = vpack.c.bf16 %v2485_v38, %v2485_v38  ;;  %v2486_v19 = vmax.f32 %v2422_v49, 0.0  ;;  %v1909_v53 = vpop.f32.mrb[92].mxu0  ;;  %v3440_v17 = vpop.f32.mrb[124].mxu1  ;;  %v1632_v32 = vadd.f32 %v4705_v30, %v5386_v55 }
 0x20d   :  { %2808 = vst.msk [vmem:[%s5354_s4 + $0x68] sm:$0xf] %vm2781_vm1, %v3169_v1  ;;  %v3170_v60 = vpack.c.bf16 %v2488_v20, %v2488_v20  ;;  %v5055_v54 = vadd.f32 %v1909_v53, %v1621_v4  ;;  %v2135_v13 = vadd.f32 %v3440_v17, %v5381_v12  ;;  %v1911_v21 = vpop.f32.mrb[93].mxu0  ;;  %v2126_v26 = vpop.f32.mrb[125].mxu1  ;;  %v3273_v1 = vunpack.c.l.bf16 %v3350_v27 }
 0x20e   :  { %2806 = vst.msk [vmem:[%s5354_s4 + $0x60] sm:$0xf] %vm2781_vm1, %v3167_v5  ;;  %v3168_v18 = vpack.c.bf16 %v2486_v19, %v2486_v19  ;;  %v2127_v24 = vadd.f32 %v2126_v26, %v5382_v23  ;;  %v1912_v48 = vpop.f32.mrb[94].mxu0  ;;  %v3441_v50 = vpop.f32.mrb[126].mxu1  ;;  %v3278_v19 = vunpack.c.h.bf16 %v3351_v10  ;;  %v3274_v12 = vunpack.c.h.bf16 %v3350_v27  ;;  %v3353_v23 = vld [vmem:[%s5353_s3 + $0x98] sm:$0xff]  }
 0x20f   :  { %2809 = vst.msk [vmem:[%s5354_s4 + $0x6c] sm:$0xf] %vm2781_vm1, %v3170_v60  ;;  %v2427_v15 = vadd.f32 %v3269_v16, %v2135_v13  ;;  %v5067_v29 = vadd.f32 %v1912_v48, %v1624_v22  ;;  %v2138_v61 = vadd.f32 %v3441_v50, %v5383_v57  ;;  %v1914_v3 = vpop.f32.mrb[95].mxu0  ;;  %v2129_v31 = vpop.f32.mrb[127].mxu1 }
 0x210   :  { %2807 = vst.msk [vmem:[%s5354_s4 + $0x64] sm:$0xf] %vm2781_vm1, %v3168_v18  ;;  %v2425_v2 = vadd.f32 %v3265_v33, %v2127_v24  ;;  %v2130_v0 = vadd.f32 %v2129_v31, %v5384_v34  ;;  %v3285_v31 = vunpack.c.l.bf16 %v3353_v23 }
 0x211   :  { %v2491_v7 = vmax.f32 %v2427_v15, 0.0  ;;  %v2428_v9 = vadd.f32 %v3270_v58, %v2138_v61  ;;  %v5387_v15 = vld [vmem:[#allocation6_spill] sm:$0xff] }
 0x212   :  { %v2489_v8 = vmax.f32 %v2425_v2, 0.0  ;;  %v2426_v59 = vadd.f32 %v3266_v45, %v2130_v0  ;;  %v1637_v57 = vadd.f32 %v4705_v30, %v5387_v15  ;;  %v5388_v2 = vld [vmem:[#allocation7_spill] sm:$0xff] }
 0x213   :  { %v3173_v40 = vpack.c.bf16 %v2491_v7, %v2491_v7  ;;  %v2492_v41 = vmax.f32 %v2428_v9, 0.0 }
 0x214   :  { %v3171_v38 = vpack.c.bf16 %v2489_v8, %v2489_v8  ;;  %v2490_v49 = vmax.f32 %v2426_v59, 0.0  ;;  %v1917_v44 = vpop.f32.mrb[96].mxu0  ;;  %v3444_v4 = vpop.f32.mrb[128].mxu1 }
 0x215   :  { %2812 = vst.msk [vmem:[%s5354_s4 + $0x78] sm:$0xf] %vm2781_vm1, %v3173_v40  ;;  %v3174_v20 = vpack.c.bf16 %v2492_v41, %v2492_v41  ;;  %v5089_v16 = vadd.f32 %v1917_v44, %v1629_v51  ;;  %v2151_v52 = vadd.f32 %v3444_v4, %v4845_v6  ;;  %v1919_v22 = vpop.f32.mrb[97].mxu0  ;;  %v2142_v5 = vpop.f32.mrb[129].mxu1  ;;  %v3286_v40 = vunpack.c.h.bf16 %v3353_v23 }
 0x216   :  { %2810 = vst.msk [vmem:[%s5354_s4 + $0x70] sm:$0xf] %vm2781_vm1, %v3171_v38  ;;  %v3172_v53 = vpack.c.bf16 %v2490_v49, %v2490_v49  ;;  %v2143_v17 = vadd.f32 %v2142_v5, %v4819_v43  ;;  %v1920_v33 = vpop.f32.mrb[98].mxu0  ;;  %v3445_v60 = vpop.f32.mrb[130].mxu1 }
 0x217   :  { %2813 = vst.msk [vmem:[%s5354_s4 + $0x7c] sm:$0xf] %vm2781_vm1, %v3174_v20  ;;  %v2431_v6 = vadd.f32 %v3277_v63, %v2151_v52  ;;  %v5101_v13 = vadd.f32 %v1920_v33, %v1632_v32  ;;  %v2154_v21 = vadd.f32 %v3445_v60, %v4857_v62  ;;  %v1922_v26 = vpop.f32.mrb[99].mxu0  ;;  %v2145_v58 = vpop.f32.mrb[131].mxu1  ;;  %v3352_v62 = vld [vmem:[%s5353_s3 + $0x90] sm:$0xff]   ;;  %v3355_v52 = vld [vmem:[%s5353_s3 + $0xa8] sm:$0xff]  }
 0x218   :  { %2811 = vst.msk [vmem:[%s5354_s4 + $0x74] sm:$0xf] %vm2781_vm1, %v3172_v53  ;;  %v2429_v43 = vadd.f32 %v3273_v1, %v2143_v17  ;;  %v2146_v18 = vadd.f32 %v2145_v58, %v4823_v56  ;;  %v1640_v56 = vadd.f32 %v4705_v30, %v5388_v2  ;;  %v3281_v9 = vunpack.c.l.bf16 %v3352_v62  ;;  %v5389_v17 = vld [vmem:[#allocation8_spill] sm:$0xff] }
 0x219   :  { %v2495_v24 = vmax.f32 %v2431_v6, 0.0  ;;  %v2432_v48 = vadd.f32 %v3278_v19, %v2154_v21  ;;  %v3282_v38 = vunpack.c.h.bf16 %v3352_v62  ;;  %v1645_v33 = vadd.f32 %v4705_v30, %v5389_v17  ;;  %v5390_v21 = vld [vmem:[#allocation9_spill] sm:$0xff] }
 0x21a   :  { %v2493_v50 = vmax.f32 %v2429_v43, 0.0  ;;  %v2430_v45 = vadd.f32 %v3274_v12, %v2146_v18  ;;  %v3293_v6 = vunpack.c.l.bf16 %v3355_v52  ;;  %v3294_v15 = vunpack.c.h.bf16 %v3355_v52 }
 0x21b   :  { %v3177_v61 = vpack.c.bf16 %v2495_v24, %v2495_v24  ;;  %v2496_v3 = vmax.f32 %v2432_v48, 0.0 }
 0x21c   :  { %v3175_v34 = vpack.c.bf16 %v2493_v50, %v2493_v50  ;;  %v2494_v0 = vmax.f32 %v2430_v45, 0.0  ;;  %v1925_v10 = vpop.f32.mrb[100].mxu0  ;;  %v3448_v7 = vpop.f32.mrb[132].mxu1 }
 0x21d   :  { %2816 = vst.msk [vmem:[%s5354_s4 + $0x88] sm:$0xf] %vm2781_vm1, %v3177_v61  ;;  %v3178_v27 = vpack.c.bf16 %v2496_v3, %v2496_v3  ;;  %v5123_v8 = vadd.f32 %v1925_v10, %v1637_v57  ;;  %v2167_v59 = vadd.f32 %v3448_v7, %v4921_v11  ;;  %v1927_v14 = vpop.f32.mrb[101].mxu0  ;;  %v2158_v51 = vpop.f32.mrb[133].mxu1  ;;  %v3357_v7 = vld [vmem:[%s5353_s3 + $0xb8] sm:$0xff]  }
 0x21e   :  { %2814 = vst.msk [vmem:[%s5354_s4 + $0x80] sm:$0xf] %vm2781_vm1, %v3175_v34  ;;  %v3176_v41 = vpack.c.bf16 %v2494_v0, %v2494_v0  ;;  %v2159_v63 = vadd.f32 %v2158_v51, %v4883_v42  ;;  %v1928_v55 = vpop.f32.mrb[102].mxu0  ;;  %v3449_v32 = vpop.f32.mrb[134].mxu1  ;;  %v5186_v51 = vld [vmem:[%s5352_s2] ss:$0 sm:$0xff] }
 0x21f   :  { %2817 = vst.msk [vmem:[%s5354_s4 + $0x8c] sm:$0xf] %vm2781_vm1, %v3178_v27  ;;  %v2435_v11 = vadd.f32 %v3285_v31, %v2167_v59  ;;  %v5135_v49 = vadd.f32 %v1928_v55, %v1640_v56  ;;  %v2170_v44 = vadd.f32 %v3449_v32, %v4933_v47  ;;  %v1930_v4 = vpop.f32.mrb[103].mxu0  ;;  %v2161_v1 = vpop.f32.mrb[135].mxu1  ;;  %v3354_v47 = vld [vmem:[%s5353_s3 + $0xa0] sm:$0xff]   ;;  %v3301_v55 = vunpack.c.l.bf16 %v3357_v7  ;;  %v5392_v32 = vld [vmem:[#allocation11_spill] sm:$0xff] }
 0x220   :  { %2815 = vst.msk [vmem:[%s5354_s4 + $0x84] sm:$0xf] %vm2781_vm1, %v3176_v41  ;;  %v2433_v42 = vadd.f32 %v3281_v9, %v2159_v63  ;;  %v2162_v20 = vadd.f32 %v2161_v1, %v4895_v39  ;;  %v1648_v39 = vadd.f32 %v4705_v30, %v5390_v21  ;;  %v3289_v23 = vunpack.c.l.bf16 %v3354_v47 }
 0x221   :  { %v2499_v22 = vmax.f32 %v2435_v11, 0.0  ;;  %v2436_v5 = vadd.f32 %v3286_v40, %v2170_v44  ;;  %v3290_v31 = vunpack.c.h.bf16 %v3354_v47  ;;  %v5391_v40 = vld [vmem:[#allocation10_spill] sm:$0xff] }
 0x222   :  { %v2497_v19 = vmax.f32 %v2433_v42, 0.0  ;;  %v2434_v53 = vadd.f32 %v3282_v38, %v2162_v20  ;;  %v1656_v38 = vadd.f32 %v5186_v51, %v5392_v32 }
 0x223   :  { %v3181_v60 = vpack.c.bf16 %v2499_v22, %v2499_v22  ;;  %v2500_v12 = vmax.f32 %v2436_v5, 0.0 }
 0x224   :  { %v3179_v26 = vpack.c.bf16 %v2497_v19, %v2497_v19  ;;  %v2498_v58 = vmax.f32 %v2434_v53, 0.0  ;;  %v1933_v43 = vpop.f32.mrb[104].mxu0  ;;  %v3452_v18 = vpop.f32.mrb[136].mxu1  ;;  %v3302_v19 = vunpack.c.h.bf16 %v3357_v7 }
 0x225   :  { %2820 = vst.msk [vmem:[%s5354_s4 + $0x98] sm:$0xf] %vm2781_vm1, %v3181_v60  ;;  %v3182_v24 = vpack.c.bf16 %v2500_v12, %v2500_v12  ;;  %v5157_v48 = vadd.f32 %v1933_v43, %v1645_v33  ;;  %v2183_v62 = vadd.f32 %v3452_v18, %v4987_v25  ;;  %v1935_v50 = vpop.f32.mrb[105].mxu0  ;;  %v2174_v45 = vpop.f32.mrb[137].mxu1  ;;  %v3359_v43 = vld [vmem:[%s5353_s3 + $0xc8] sm:$0xff]  }
 0x226   :  { %2818 = vst.msk [vmem:[%s5354_s4 + $0x90] sm:$0xf] %vm2781_vm1, %v3179_v26  ;;  %v3180_v30 = vpack.c.bf16 %v2498_v58, %v2498_v58  ;;  %v2175_v57 = vadd.f32 %v2174_v45, %v4953_v37  ;;  %v1936_v61 = vpop.f32.mrb[106].mxu0  ;;  %v3453_v3 = vpop.f32.mrb[138].mxu1  ;;  %v5393_v50 = vld [vmem:[#allocation12_spill] sm:$0xff] }
 0x227   :  { %2821 = vst.msk [vmem:[%s5354_s4 + $0x9c] sm:$0xf] %vm2781_vm1, %v3182_v24  ;;  %v2439_v25 = vadd.f32 %v3293_v6, %v2183_v62  ;;  %v5169_v2 = vadd.f32 %v1936_v61, %v1648_v39  ;;  %v2186_v56 = vadd.f32 %v3453_v3, %v4999_v36  ;;  %v1938_v34 = vpop.f32.mrb[107].mxu0  ;;  %v2177_v0 = vpop.f32.mrb[139].mxu1  ;;  %v3356_v36 = vld [vmem:[%s5353_s3 + $0xb0] sm:$0xff]   ;;  %v1661_v45 = vadd.f32 %v5186_v51, %v5393_v50  ;;  %v5394_v61 = vld [vmem:[#allocation13_spill] sm:$0xff] }
 0x228   :  { %2819 = vst.msk [vmem:[%s5354_s4 + $0x94] sm:$0xf] %vm2781_vm1, %v3180_v30  ;;  %v2437_v37 = vadd.f32 %v3289_v23, %v2175_v57  ;;  %v2178_v10 = vadd.f32 %v2177_v0, %v4965_v28  ;;  %v1653_v28 = vadd.f32 %v5186_v51, %v5391_v40  ;;  %v3297_v42 = vunpack.c.l.bf16 %v3356_v36 }
 0x229   :  { %v2503_v9 = vmax.f32 %v2439_v25, 0.0  ;;  %v2440_v27 = vadd.f32 %v3294_v15, %v2186_v56  ;;  %v3298_v12 = vunpack.c.h.bf16 %v3356_v36  ;;  %v3309_v57 = vunpack.c.l.bf16 %v3359_v43 }
 0x22a   :  { %v2501_v59 = vmax.f32 %v2437_v37, 0.0  ;;  %v2438_v14 = vadd.f32 %v3290_v31, %v2178_v10 }
 0x22b   :  { %v3185_v41 = vpack.c.bf16 %v2503_v9, %v2503_v9  ;;  %v2504_v63 = vmax.f32 %v2440_v27, 0.0  ;;  %v3310_v27 = vunpack.c.h.bf16 %v3359_v43 }
 0x22c   :  { %v3183_v11 = vpack.c.bf16 %v2501_v59, %v2501_v59  ;;  %v2502_v44 = vmax.f32 %v2438_v14, 0.0  ;;  %v1941_v4 = vpop.f32.mrb[108].mxu0  ;;  %v3456_v1 = vpop.f32.mrb[140].mxu1 }
 0x22d   :  { %2824 = vst.msk [vmem:[%s5354_s4 + $0xa8] sm:$0xf] %vm2781_vm1, %v3185_v41  ;;  %v3186_v20 = vpack.c.bf16 %v2504_v63, %v2504_v63  ;;  %v5196_v52 = vadd.f32 %v1941_v4, %v1653_v28  ;;  %v2199_v22 = vadd.f32 %v3456_v1, %v5055_v54  ;;  %v1943_v5 = vpop.f32.mrb[109].mxu0  ;;  %v2190_v47 = vpop.f32.mrb[141].mxu1 }
 0x22e   :  { %2822 = vst.msk [vmem:[%s5354_s4 + $0xa0] sm:$0xf] %vm2781_vm1, %v3183_v11  ;;  %v3184_v53 = vpack.c.bf16 %v2502_v44, %v2502_v44  ;;  %v2191_v17 = vadd.f32 %v2190_v47, %v5021_v46  ;;  %v1944_v33 = vpop.f32.mrb[110].mxu0  ;;  %v3457_v60 = vpop.f32.mrb[142].mxu1  ;;  %v3361_v11 = vld [vmem:[%s5353_s3 + $0xd8] sm:$0xff]  }
 0x22f   :  { %2825 = vst.msk [vmem:[%s5354_s4 + $0xac] sm:$0xf] %vm2781_vm1, %v3186_v20  ;;  %v2443_v54 = vadd.f32 %v3301_v55, %v2199_v22  ;;  %v5208_v6 = vadd.f32 %v1944_v33, %v1656_v38  ;;  %v2202_v21 = vadd.f32 %v3457_v60, %v5067_v29  ;;  %v1946_v39 = vpop.f32.mrb[111].mxu0  ;;  %v2193_v26 = vpop.f32.mrb[143].mxu1  ;;  %v3358_v29 = vld [vmem:[%s5353_s3 + $0xc0] sm:$0xff]   ;;  %v5395_v20 = vld [vmem:[#allocation15_spill] sm:$0xff]  ;;  %v3318_v43 = vunpack.c.h.bf16 %v3361_v11 }
 0x230   :  { %2823 = vst.msk [vmem:[%s5354_s4 + $0xa4] sm:$0xf] %vm2781_vm1, %v3184_v53  ;;  %v2441_v46 = vadd.f32 %v3297_v42, %v2191_v17  ;;  %v2194_v58 = vadd.f32 %v2193_v26, %v5033_v35  ;;  %v1664_v35 = vadd.f32 %v5186_v51, %v5394_v61  ;;  %v3305_v34 = vunpack.c.l.bf16 %v3358_v29  ;;  %v5396_v53 = vld [vmem:[#allocation16_spill] sm:$0xff]  ;;  %v3363_v61 = vld [vmem:[%s5353_s3 + $0xe8] sm:$0xff]  }
 0x231   :  { %v2507_v18 = vmax.f32 %v2443_v54, 0.0  ;;  %v2444_v23 = vadd.f32 %v3302_v19, %v2202_v21  ;;  %v3306_v28 = vunpack.c.h.bf16 %v3358_v29  ;;  %v1669_v22 = vadd.f32 %v5186_v51, %v5395_v20 }
 0x232   :  { %v2505_v24 = vmax.f32 %v2441_v46, 0.0  ;;  %v2442_v62 = vadd.f32 %v3298_v12, %v2194_v58  ;;  %v3317_v19 = vunpack.c.l.bf16 %v3361_v11 }
 0x233   :  { %v3189_v15 = vpack.c.bf16 %v2507_v18, %v2507_v18  ;;  %v2508_v30 = vmax.f32 %v2444_v23, 0.0 }
 0x234   :  { %v3187_v3 = vpack.c.bf16 %v2505_v24, %v2505_v24  ;;  %v2506_v31 = vmax.f32 %v2442_v62, 0.0  ;;  %v1949_v25 = vpop.f32.mrb[112].mxu0  ;;  %v3460_v56 = vpop.f32.mrb[144].mxu1 }
 0x235   :  { %2828 = vst.msk [vmem:[%s5354_s4 + $0xb8] sm:$0xf] %vm2781_vm1, %v3189_v15  ;;  %v3190_v0 = vpack.c.bf16 %v2508_v30, %v2508_v30  ;;  %v5230_v37 = vadd.f32 %v1949_v25, %v1661_v45  ;;  %v2215_v10 = vadd.f32 %v3460_v56, %v5123_v8  ;;  %v1951_v7 = vpop.f32.mrb[113].mxu0  ;;  %v2206_v9 = vpop.f32.mrb[145].mxu1  ;;  %v5397_v56 = vld [vmem:[#allocation17_spill] sm:$0xff] }
 0x236   :  { %2826 = vst.msk [vmem:[%s5354_s4 + $0xb0] sm:$0xf] %vm2781_vm1, %v3187_v3  ;;  %v3188_v36 = vpack.c.bf16 %v2506_v31, %v2506_v31  ;;  %v2207_v59 = vadd.f32 %v2206_v9, %v5089_v16  ;;  %v1952_v14 = vpop.f32.mrb[114].mxu0  ;;  %v3461_v40 = vpop.f32.mrb[146].mxu1  ;;  %v3325_v7 = vunpack.c.l.bf16 %v3363_v61  ;;  %v5398_v9 = vld [vmem:[#allocation19_spill] sm:$0xff] }
 0x237   :  { %2829 = vst.msk [vmem:[%s5354_s4 + $0xbc] sm:$0xf] %vm2781_vm1, %v3190_v0  ;;  %v2447_v8 = vadd.f32 %v3309_v57, %v2215_v10  ;;  %v5242_v41 = vadd.f32 %v1952_v14, %v1664_v35  ;;  %v2218_v63 = vadd.f32 %v3461_v40, %v5135_v49  ;;  %v1954_v55 = vpop.f32.mrb[115].mxu0  ;;  %v2209_v32 = vpop.f32.mrb[147].mxu1  ;;  %v3360_v49 = vld [vmem:[%s5353_s3 + $0xd0] sm:$0xff]  }
 0x238   :  { %2827 = vst.msk [vmem:[%s5354_s4 + $0xb4] sm:$0xf] %vm2781_vm1, %v3188_v36  ;;  %v2445_v16 = vadd.f32 %v3305_v34, %v2207_v59  ;;  %v2210_v38 = vadd.f32 %v2209_v32, %v5101_v13  ;;  %v1672_v13 = vadd.f32 %v5186_v51, %v5396_v53  ;;  %v3313_v54 = vunpack.c.l.bf16 %v3360_v49 }
 0x239   :  { %v2511_v44 = vmax.f32 %v2447_v8, 0.0  ;;  %v2448_v4 = vadd.f32 %v3310_v27, %v2218_v63  ;;  %v3314_v62 = vunpack.c.h.bf16 %v3360_v49  ;;  %v1677_v34 = vadd.f32 %v5186_v51, %v5397_v56 }
 0x23a   :  { %v2509_v1 = vmax.f32 %v2445_v16, 0.0  ;;  %v2446_v42 = vadd.f32 %v3306_v28, %v2210_v38  ;;  %v3326_v16 = vunpack.c.h.bf16 %v3363_v61 }
 0x23b   :  { %v3193_v5 = vpack.c.bf16 %v2511_v44, %v2511_v44  ;;  %v2512_v47 = vmax.f32 %v2448_v4, 0.0 }
 0x23c   :  { %v3191_v17 = vpack.c.bf16 %v2509_v1, %v2509_v1  ;;  %v2510_v33 = vmax.f32 %v2446_v42, 0.0  ;;  %v1957_v60 = vpop.f32.mrb[116].mxu0  ;;  %v3464_v12 = vpop.f32.mrb[148].mxu1 }
 0x23d   :  { %2832 = vst.msk [vmem:[%s5354_s4 + $0xc8] sm:$0xf] %vm2781_vm1, %v3193_v5  ;;  %v3194_v21 = vpack.c.bf16 %v2512_v47, %v2512_v47  ;;  %v1958_v39 = vadd.f32 %v1957_v60, %v1669_v22  ;;  %v2231_v26 = vadd.f32 %v3464_v12, %v5196_v52  ;;  %v1959_v46 = vpop.f32.mrb[117].mxu0  ;;  %v2222_v58 = vpop.f32.mrb[149].mxu1  ;;  %v3365_v60 = vld [vmem:[%s5353_s3 + $0xf8] sm:$0xff]  }
 0x23e   :  { %2830 = vst.msk [vmem:[%s5354_s4 + $0xc0] sm:$0xf] %vm2781_vm1, %v3191_v17  ;;  %v3192_v18 = vpack.c.bf16 %v2510_v33, %v2510_v33  ;;  %v2223_v23 = vadd.f32 %v2222_v58, %v5157_v48  ;;  %v1960_v29 = vpop.f32.mrb[118].mxu0  ;;  %v3465_v24 = vpop.f32.mrb[150].mxu1  ;;  %v5399_v12 = vld [vmem:[#allocation21_spill] sm:$0xff] }
 0x23f   :  { %2833 = vst.msk [vmem:[%s5354_s4 + $0xcc] sm:$0xf] %vm2781_vm1, %v3194_v21  ;;  %v2451_v52 = vadd.f32 %v3317_v19, %v2231_v26  ;;  %v1961_v50 = vadd.f32 %v1960_v29, %v1672_v13  ;;  %v2234_v45 = vadd.f32 %v3465_v24, %v5208_v6  ;;  %v1962_v15 = vpop.f32.mrb[119].mxu0  ;;  %v2225_v30 = vpop.f32.mrb[151].mxu1  ;;  %v3362_v6 = vld [vmem:[%s5353_s3 + $0xe0] sm:$0xff]   ;;  %v3364_v13 = vld [vmem:[%s5353_s3 + $0xf0] sm:$0xff]  }
 0x240   :  { %2831 = vst.msk [vmem:[%s5354_s4 + $0xc4] sm:$0xf] %vm2781_vm1, %v3192_v18  ;;  %v2449_v48 = vadd.f32 %v3313_v54, %v2223_v23  ;;  %v2226_v57 = vadd.f32 %v2225_v30, %v5169_v2  ;;  %v1680_v2 = vadd.f32 %v5186_v51, %v5398_v9  ;;  %v3321_v40 = vunpack.c.l.bf16 %v3362_v6  ;;  %v5400_v18 = vld [vmem:[#allocation23_spill] sm:$0xff] }
 0x241   :  { %v2515_v35 = vmax.f32 %v2451_v52, 0.0  ;;  %v2452_v3 = vadd.f32 %v3318_v43, %v2234_v45  ;;  %v3322_v49 = vunpack.c.h.bf16 %v3362_v6  ;;  %v1685_v54 = vadd.f32 %v5186_v51, %v5399_v12 }
 0x242   :  { %v2513_v31 = vmax.f32 %v2449_v48, 0.0  ;;  %v2450_v25 = vadd.f32 %v3314_v62, %v2226_v57  ;;  %v3329_v43 = vunpack.c.l.bf16 %v3364_v13  ;;  %v1688_v23 = vadd.f32 %v5186_v51, %v5400_v18 }
 0x243   :  { %v3197_v0 = vpack.c.bf16 %v2515_v35, %v2515_v35  ;;  %v2516_v10 = vmax.f32 %v2452_v3, 0.0  ;;  %v3333_v62 = vunpack.c.l.bf16 %v3365_v60  ;;  %v3330_v51 = vunpack.c.h.bf16 %v3364_v13 }
 0x244   :  { %v3195_v27 = vpack.c.bf16 %v2513_v31, %v2513_v31  ;;  %v2514_v36 = vmax.f32 %v2450_v25, 0.0  ;;  %v1965_v59 = vpop.f32.mrb[120].mxu0  ;;  %v3468_v14 = vpop.f32.mrb[152].mxu1  ;;  %v3334_v35 = vunpack.c.h.bf16 %v3365_v60 }
 0x245   :  { %2836 = vst.msk [vmem:[%s5354_s4 + $0xd8] sm:$0xf] %vm2781_vm1, %v3197_v0  ;;  %v3198_v28 = vpack.c.bf16 %v2516_v10, %v2516_v10  ;;  %v1966_v8 = vadd.f32 %v1965_v59, %v1677_v34  ;;  %v2247_v63 = vadd.f32 %v3468_v14, %v1958_v39  ;;  %v1967_v55 = vpop.f32.mrb[121].mxu0  ;;  %v2238_v32 = vpop.f32.mrb[153].mxu1 }
 0x246   :  { %2834 = vst.msk [vmem:[%s5354_s4 + $0xd0] sm:$0xf] %vm2781_vm1, %v3195_v27  ;;  %v3196_v38 = vpack.c.bf16 %v2514_v36, %v2514_v36  ;;  %v2239_v11 = vadd.f32 %v2238_v32, %v5230_v37  ;;  %v1968_v44 = vpop.f32.mrb[122].mxu0  ;;  %v3469_v4 = vpop.f32.mrb[154].mxu1 }
 0x247   :  { %2837 = vst.msk [vmem:[%s5354_s4 + $0xdc] sm:$0xf] %vm2781_vm1, %v3198_v28  ;;  %v2455_v1 = vadd.f32 %v3325_v7, %v2247_v63  ;;  %v1969_v42 = vadd.f32 %v1968_v44, %v1680_v2  ;;  %v2250_v20 = vadd.f32 %v3469_v4, %v1961_v50  ;;  %v1970_v22 = vpop.f32.mrb[123].mxu0  ;;  %v2241_v5 = vpop.f32.mrb[155].mxu1 }
 0x248   :  { %2835 = vst.msk [vmem:[%s5354_s4 + $0xd4] sm:$0xf] %vm2781_vm1, %v3196_v38  ;;  %v2453_v47 = vadd.f32 %v3321_v40, %v2239_v11  ;;  %v2242_v37 = vadd.f32 %v2241_v5, %v5242_v41 }
 0x249   :  { %v2519_v19 = vmax.f32 %v2455_v1, 0.0  ;;  %v2456_v53 = vadd.f32 %v3326_v16, %v2250_v20 }
 0x24a   :  { %v2517_v17 = vmax.f32 %v2453_v47, 0.0  ;;  %v2454_v33 = vadd.f32 %v3322_v49, %v2242_v37 }
 0x24b   :  { %v3201_v21 = vpack.c.bf16 %v2519_v19, %v2519_v19  ;;  %v2520_v39 = vmax.f32 %v2456_v53, 0.0 }
 0x24c   :  { %v3199_v26 = vpack.c.bf16 %v2517_v17, %v2517_v17  ;;  %v2518_v46 = vmax.f32 %v2454_v33, 0.0  ;;  %v1973_v41 = vpop.f32.mrb[124].mxu0  ;;  %v3472_v58 = vpop.f32.mrb[156].mxu1 }
 0x24d   :  { %2840 = vst.msk [vmem:[%s5354_s4 + $0xe8] sm:$0xf] %vm2781_vm1, %v3201_v21  ;;  %v3202_v29 = vpack.c.bf16 %v2520_v39, %v2520_v39  ;;  %v1974_v24 = vadd.f32 %v1973_v41, %v1685_v54  ;;  %v1975_v52 = vpop.f32.mrb[125].mxu0  ;;  %v2254_v50 = vpop.f32.mrb[157].mxu1 }
 0x24e   :  { %2838 = vst.msk [vmem:[%s5354_s4 + $0xe0] sm:$0xf] %vm2781_vm1, %v3199_v26  ;;  %v3200_v45 = vpack.c.bf16 %v2518_v46, %v2518_v46  ;;  %v2255_v15 = vadd.f32 %v2254_v50, %v1966_v8  ;;  %v1976_v30 = vpop.f32.mrb[126].mxu0  ;;  %v3473_v48 = vpop.f32.mrb[158].mxu1 }
 0x24f   :  { %2841 = vst.msk [vmem:[%s5354_s4 + $0xec] sm:$0xf] %vm2781_vm1, %v3202_v29  ;;  %v2263_v57 = vadd.f32 %v3472_v58, %v1974_v24  ;;  %v1977_v61 = vadd.f32 %v1976_v30, %v1688_v23  ;;  %v1978_v3 = vpop.f32.mrb[127].mxu0  ;;  %v2257_v6 = vpop.f32.mrb[159].mxu1 }
 0x250   :  { %2839 = vst.msk [vmem:[%s5354_s4 + $0xe4] sm:$0xf] %vm2781_vm1, %v3200_v45  ;;  %v2457_v31 = vadd.f32 %v3329_v43, %v2255_v15  ;;  %v2258_v25 = vadd.f32 %v2257_v6, %v1969_v42 }
 0x251   :  { %v2459_v56 = vadd.f32 %v3333_v62, %v2263_v57  ;;  %v2266_v34 = vadd.f32 %v3473_v48, %v1977_v61 }
 0x252   :  { %v2521_v0 = vmax.f32 %v2457_v31, 0.0  ;;  %v2458_v10 = vadd.f32 %v3330_v51, %v2258_v25 }
 0x253   :  { %v2523_v7 = vmax.f32 %v2459_v56, 0.0  ;;  %v2460_v9 = vadd.f32 %v3334_v35, %v2266_v34 }
 0x254   :  { %v3203_v2 = vpack.c.bf16 %v2521_v0, %v2521_v0  ;;  %v2522_v27 = vmax.f32 %v2458_v10, 0.0 }
 0x255   :  { %v3205_v36 = vpack.c.bf16 %v2523_v7, %v2523_v7  ;;  %v2524_v59 = vmax.f32 %v2460_v9, 0.0 }
 0x256   :  { %2842 = vst.msk [vmem:[%s5354_s4 + $0xf0] sm:$0xf] %vm2781_vm1, %v3203_v2  ;;  %v3204_v14 = vpack.c.bf16 %v2522_v27, %v2522_v27 }
 0x257   :  { %2844 = vst.msk [vmem:[%s5354_s4 + $0xf8] sm:$0xf] %vm2781_vm1, %v3205_v36  ;;  %v3206_v40 = vpack.c.bf16 %v2524_v59, %v2524_v59 }
 0x258   :  { %2843 = vst.msk [vmem:[%s5354_s4 + $0xf4] sm:$0xf] %vm2781_vm1, %v3204_v14 }
 0x259   :  { %2845 = vst.msk [vmem:[%s5354_s4 + $0xfc] sm:$0xf] %vm2781_vm1, %v3206_v40 }

// kernel: fcn_forward.27
= control target key start
LH: loop header
LB: loop body
LE: loop exit
PB: predicated region body
PF: predicated region fallthrough
CT: control target
= control target key end

     0   :  { %vm558_vm0 = vcmask 523264   ;;  %s1733_s1 = inlined_call_operand.vmem [shape: bf16[576,128], index: 1, kind: input, shape index: {}]   ;;  %s1734_s0 = inlined_call_operand.vmem [shape: bf16[128,576], index: 0, kind: input, shape index: {}]   ;;  %s1735_s2 = inlined_call_operand.vmem [shape: f32[1,128], index: 2, kind: input, shape index: {}]   ;;  %s1736_s3 = inlined_call_operand.vmem [shape: bf16[128,128], index: 3, kind: output, shape index: {}]  }
   0x1   :  { %v1310_v0 = vld [vmem:[%s1733_s1 + $0x40] sm:$0xff]   ;;  %v1314_v4 = vld [vmem:[%s1733_s1 + $0x48] sm:$0xff]   ;;  %v1318_v8 = vld [vmem:[%s1733_s1 + $0x50] sm:$0xff]  }
   0x2   :  { %v1311_v1 = vld [vmem:[%s1733_s1 + $0xc0] sm:$0xff]   ;;  %1138 = vmatprep.subr.bf16.mxu0 %v1310_v0  ;;  %v1315_v5 = vld [vmem:[%s1733_s1 + $0xc8] sm:$0xff]   ;;  %v1319_v9 = vld [vmem:[%s1733_s1 + $0xd0] sm:$0xff]  }
   0x3   :  { %v1312_v2 = vld [vmem:[%s1733_s1] sm:$0xff]   ;;  %1202 = vmatprep.subr.bf16.mxu1 %v1311_v1  ;;  %v1316_v6 = vld [vmem:[%s1733_s1 + $0x8] sm:$0xff]   ;;  %v1320_v10 = vld [vmem:[%s1733_s1 + $0x10] sm:$0xff]  }
   0x4   :  { %v1313_v3 = vld [vmem:[%s1733_s1 + $0x80] sm:$0xff]   ;;  %1139 = vmatpush3.bf16.msra.mxu0 %v1312_v2  ;;  %v1317_v7 = vld [vmem:[%s1733_s1 + $0x88] sm:$0xff]   ;;  %v1321_v11 = vld [vmem:[%s1733_s1 + $0x90] sm:$0xff]  }
   0x5   :  { %1203 = vmatpush3.bf16.msra.mxu1 %v1313_v3  ;;  %1140 = vmatprep.subr.bf16.mxu0 %v1314_v4  ;;  %v1322_v12 = vld [vmem:[%s1733_s1 + $0x58] sm:$0xff]   ;;  %v1326_v16 = vld [vmem:[%s1733_s1 + $0x60] sm:$0xff]   ;;  %v1330_v20 = vld [vmem:[%s1733_s1 + $0x68] sm:$0xff]  }
   0x6   :  { %1204 = vmatprep.subr.bf16.mxu1 %v1315_v5  ;;  %v1323_v13 = vld [vmem:[%s1733_s1 + $0xd8] sm:$0xff]   ;;  %v1327_v17 = vld [vmem:[%s1733_s1 + $0xe0] sm:$0xff]   ;;  %v1331_v21 = vld [vmem:[%s1733_s1 + $0xe8] sm:$0xff]  }
   0x7   :  { %v1324_v14 = vld [vmem:[%s1733_s1 + $0x18] sm:$0xff]   ;;  %v1328_v18 = vld [vmem:[%s1733_s1 + $0x20] sm:$0xff]   ;;  %v1332_v22 = vld [vmem:[%s1733_s1 + $0x28] sm:$0xff]  }
   0x8   :  { %1141 = vmatpush3.bf16.msra.mxu0 %v1316_v6  ;;  %v1325_v15 = vld [vmem:[%s1733_s1 + $0x98] sm:$0xff]   ;;  %v1329_v19 = vld [vmem:[%s1733_s1 + $0xa0] sm:$0xff]   ;;  %v1333_v23 = vld [vmem:[%s1733_s1 + $0xa8] sm:$0xff]  }
   0x9   :  { %1205 = vmatpush3.bf16.msra.mxu1 %v1317_v7  ;;  %1142 = vmatprep.subr.bf16.mxu0 %v1318_v8  ;;  %v1334_v24 = vld [vmem:[%s1733_s1 + $0x70] sm:$0xff]   ;;  %v1338_v28 = vld [vmem:[%s1733_s1 + $0x78] sm:$0xff]   ;;  %v1347_v35 = vld [vmem:[%s1734_s0 + $0xc] ss:$20 sps:$4 sm:$0xff]  }
   0xa   :  { %1206 = vmatprep.subr.bf16.mxu1 %v1319_v9  ;;  %v1335_v25 = vld [vmem:[%s1733_s1 + $0xf0] sm:$0xff]   ;;  %v1339_v29 = vld [vmem:[%s1733_s1 + $0xf8] sm:$0xff]   ;;  %v1348_v36 = vld [vmem:[%s1733_s1 + $0x100] sm:$0xff]   ;;  %712 = vmatprep.mubr.bf16.mxu1 %v1347_v35 }
   0xb   :  { %v1336_v26 = vld [vmem:[%s1733_s1 + $0x30] sm:$0xff]   ;;  %v1340_v30 = vld [vmem:[%s1733_s1 + $0x38] sm:$0xff]   ;;  %v1349_v37 = vld [vmem:[%s1734_s0 + $0x2c] ss:$20 sps:$4 sm:$0xff]  }
   0xc   :  { %1143 = vmatpush3.bf16.msra.mxu0 %v1320_v10  ;;  %v1337_v27 = vld [vmem:[%s1733_s1 + $0xb0] sm:$0xff]   ;;  %v1341_v31 = vld [vmem:[%s1733_s1 + $0xb8] sm:$0xff]   ;;  %v1361_v42 = vld [vmem:[%s1733_s1 + $0x108] sm:$0xff]  }
   0xd   :  { %1207 = vmatpush3.bf16.msra.mxu1 %v1321_v11  ;;  %1144 = vmatprep.subr.bf16.mxu0 %v1322_v12  ;;  %v1342_v32 = vld [vmem:[%s1734_s0] ss:$20 sps:$4 sm:$0xff]   ;;  %v1344_v33 = vld [vmem:[%s1734_s0 + $0x4] ss:$20 sps:$4 sm:$0xff]   ;;  %v1345_v34 = vld [vmem:[%s1734_s0 + $0x8] ss:$20 sps:$4 sm:$0xff]  }
   0xe   :  { %1208 = vmatprep.subr.bf16.mxu1 %v1323_v13  ;;  %615 = vmatprep.mubr.bf16.mxu0 %v1344_v33  ;;  %v1351_v38 = vld [vmem:[%s1734_s0 + $0x34] ss:$20 sps:$4 sm:$0xff]   ;;  %v1354_v40 = vld [vmem:[%s1734_s0 + $0x30] ss:$20 sps:$4 sm:$0xff]   ;;  %v1360_v45 = vld [vmem:[%s1734_s0 + $0x58] ss:$20 sps:$4 sm:$0xff]  }
   0xf   :  { %v1353_v39 = vld [vmem:[%s1734_s0 + $0x28] ss:$20 sps:$4 sm:$0xff]   ;;  %v1359_v44 = vld [vmem:[%s1734_s0 + $0x50] ss:$20 sps:$4 sm:$0xff]   ;;  %v1366_v50 = vld [vmem:[%s1734_s0 + $0x78] ss:$20 sps:$4 sm:$0xff]  }
  0x10   :  { %1145 = vmatpush3.bf16.msra.mxu0 %v1324_v14  ;;  %v1355_v41 = vld [vmem:[%s1734_s0 + $0x54] ss:$20 sps:$4 sm:$0xff]   ;;  %v1357_v43 = vld [vmem:[%s1734_s0 + $0x5c] ss:$20 sps:$4 sm:$0xff]   ;;  %v1364_v48 = vld [vmem:[%s1734_s0 + $0x84] ss:$20 sps:$4 sm:$0xff]  }
  0x11   :  { %1209 = vmatpush3.bf16.msra.mxu1 %v1325_v15  ;;  %1146 = vmatprep.subr.bf16.mxu0 %v1326_v16  ;;  %v1374_v46 = vld [vmem:[%s1733_s1 + $0x110] sm:$0xff]   ;;  %v1387_v49 = vld [vmem:[%s1733_s1 + $0x118] sm:$0xff]   ;;  %v1370_v53 = vld [vmem:[%s1734_s0 + $0xac] ss:$20 sps:$4 sm:$0xff]  }
  0x12   :  { %1210 = vmatprep.subr.bf16.mxu1 %v1327_v17  ;;  %v1362_v47 = vld [vmem:[%s1734_s0 + $0x7c] ss:$20 sps:$4 sm:$0xff]   ;;  %v1367_v51 = vld [vmem:[%s1734_s0 + $0x80] ss:$20 sps:$4 sm:$0xff]   ;;  %v1368_v52 = vld [vmem:[%s1734_s0 + $0xa4] ss:$20 sps:$4 sm:$0xff]  }
  0x13   :  { %v1372_v54 = vld [vmem:[%s1734_s0 + $0xa0] ss:$20 sps:$4 sm:$0xff]   ;;  %v1373_v55 = vld [vmem:[%s1734_s0 + $0xa8] ss:$20 sps:$4 sm:$0xff]   ;;  %v1380_v59 = vld [vmem:[%s1734_s0 + $0xd0] ss:$20 sps:$4 sm:$0xff]  }
  0x14   :  { %1147 = vmatpush3.bf16.msra.mxu0 %v1328_v18  ;;  %v1375_v56 = vld [vmem:[%s1734_s0 + $0xcc] ss:$20 sps:$4 sm:$0xff]   ;;  %v1377_v57 = vld [vmem:[%s1734_s0 + $0xd4] ss:$20 sps:$4 sm:$0xff]   ;;  %v1383_v61 = vld [vmem:[%s1734_s0 + $0xfc] ss:$20 sps:$4 sm:$0xff]  }
  0x15   :  { %1211 = vmatpush3.bf16.msra.mxu1 %v1329_v19  ;;  %1148 = vmatprep.subr.bf16.mxu0 %v1330_v20  ;;  %v1379_v58 = vld [vmem:[%s1734_s0 + $0xc8] ss:$20 sps:$4 sm:$0xff]   ;;  %v1385_v62 = vld [vmem:[%s1734_s0 + $0xf0] ss:$20 sps:$4 sm:$0xff]   ;;  %v1386_v63 = vld [vmem:[%s1734_s0 + $0xf8] ss:$20 sps:$4 sm:$0xff]  }
  0x16   :  { %1212 = vmatprep.subr.bf16.mxu1 %v1331_v21  ;;  %v1381_v60 = vld [vmem:[%s1734_s0 + $0xf4] ss:$20 sps:$4 sm:$0xff]   ;;  %v1388_v0 = vld [vmem:[%s1734_s0 + $0x11c] ss:$20 sps:$4 sm:$0xff]   ;;  %v1390_v1 = vld [vmem:[%s1734_s0 + $0x124] ss:$20 sps:$4 sm:$0xff]  }
  0x17   :  { %v1392_v2 = vld [vmem:[%s1734_s0 + $0x118] ss:$20 sps:$4 sm:$0xff]   ;;  %v1393_v3 = vld [vmem:[%s1734_s0 + $0x120] ss:$20 sps:$4 sm:$0xff]   ;;  %v1394_v4 = vld [vmem:[%s1734_s0 + $0x10] ss:$20 sps:$4 sm:$0xff]  }
  0x18   :  { %1149 = vmatpush3.bf16.msra.mxu0 %v1332_v22  ;;  %v1395_v5 = vld [vmem:[%s1734_s0 + $0xb0] ss:$20 sps:$4 sm:$0xff]   ;;  %v1396_v6 = vld [vmem:[%s1734_s0 + $0x38] ss:$20 sps:$4 sm:$0xff]   ;;  %v1398_v8 = vld [vmem:[%s1734_s0 + $0x60] ss:$20 sps:$4 sm:$0xff]  }
  0x19   :  { %1213 = vmatpush3.bf16.msra.mxu1 %v1333_v23  ;;  %1150 = vmatprep.subr.bf16.mxu0 %v1334_v24  ;;  %v1397_v7 = vld [vmem:[%s1734_s0 + $0xd8] ss:$20 sps:$4 sm:$0xff]   ;;  %v1399_v9 = vld [vmem:[%s1734_s0 + $0x100] ss:$20 sps:$4 sm:$0xff]   ;;  %v1400_v10 = vld [vmem:[%s1734_s0 + $0x88] ss:$20 sps:$4 sm:$0xff]  }
  0x1a   :  { %1214 = vmatprep.subr.bf16.mxu1 %v1335_v25  ;;  %v1401_v11 = vld [vmem:[%s1734_s0 + $0x128] ss:$20 sps:$4 sm:$0xff]   ;;  %v1661_v14 = vld [vmem:[%s1735_s2] ss:$0 sm:$0xff] }
  0x1c   :  { %1151 = vmatpush3.bf16.msra.mxu0 %v1336_v26 }
  0x1d   :  { %1215 = vmatpush3.bf16.msra.mxu1 %v1337_v27  ;;  %1152 = vmatprep.subr.bf16.mxu0 %v1338_v28 }
  0x1e   :  { %1216 = vmatprep.subr.bf16.mxu1 %v1339_v29 }
  0x20   :  { %1153 = vmatpush3.bf16.msra.mxu0 %v1340_v30 }
  0x21   :  { %1217 = vmatpush3.bf16.msra.mxu1 %v1341_v31  ;;  %1278 = vmatprep.subr.bf16.mxu0 %v1348_v36 }
  0x22   :  { %1302 = vmatprep.subr.bf16.mxu1 %v1348_v36 }
  0x23   :  { %616 = vmatmul.mubr.bf16.vlgmr.msra.gmra.mrb[0].mxu0 %v1342_v32 }
  0x24   :  { %713 = vmatmul.mubr.bf16.vlgmr.msra.gmra.mrb[0].mxu1 %v1345_v34  ;;  %1279 = vmatpush3.bf16.msra.mxu0 %v1348_v36 }
  0x25   :  { %1306 = vmatpush3.bf16.msra.mxu1 %v1348_v36  ;;  %623 = vmatprep.mubr.bf16.mxu0 %v1349_v37 }
  0x26   :  { %720 = vmatprep.mubr.bf16.mxu1 %v1351_v38  ;;  %1280 = vmatprep.subr.bf16.mxu0 %v1361_v42 }
  0x27   :  { %1303 = vmatprep.subr.bf16.mxu1 %v1361_v42 }
  0x28   :  { %1281 = vmatpush3.bf16.msra.mxu0 %v1361_v42 }
  0x29   :  { %1307 = vmatpush3.bf16.msra.mxu1 %v1361_v42  ;;  %1282 = vmatprep.subr.bf16.mxu0 %v1374_v46 }
  0x2a   :  { %1304 = vmatprep.subr.bf16.mxu1 %v1374_v46 }
  0x2b   :  { %624 = vmatmul.mubr.bf16.gmra.mrb[4].mxu0 %v1353_v39 }
  0x2c   :  { %721 = vmatmul.mubr.bf16.gmra.mrb[4].mxu1 %v1354_v40  ;;  %631 = vmatprep.mubr.bf16.mxu0 %v1355_v41 }
  0x2d   :  { %728 = vmatprep.mubr.bf16.mxu1 %v1357_v43  ;;  %1283 = vmatpush3.bf16.msra.mxu0 %v1374_v46 }
  0x2e   :  { %1308 = vmatpush3.bf16.msra.mxu1 %v1374_v46  ;;  %1284 = vmatprep.subr.bf16.mxu0 %v1387_v49 }
  0x2f   :  { %1305 = vmatprep.subr.bf16.mxu1 %v1387_v49 }
  0x31   :  { %1285 = vmatpush3.bf16.msra.mxu0 %v1387_v49 }
  0x32   :  { %1309 = vmatpush3.bf16.msra.mxu1 %v1387_v49 }
  0x33   :  { %632 = vmatmul.mubr.bf16.gmra.mrb[8].mxu0 %v1359_v44 }
  0x34   :  { %729 = vmatmul.mubr.bf16.gmra.mrb[8].mxu1 %v1360_v45  ;;  %639 = vmatprep.mubr.bf16.mxu0 %v1362_v47 }
  0x35   :  { %736 = vmatprep.mubr.bf16.mxu1 %v1364_v48 }
  0x3b   :  { %640 = vmatmul.mubr.bf16.gmra.mrb[12].mxu0 %v1366_v50 }
  0x3c   :  { %737 = vmatmul.mubr.bf16.gmra.mrb[12].mxu1 %v1367_v51  ;;  %647 = vmatprep.mubr.bf16.mxu0 %v1368_v52 }
  0x3d   :  { %744 = vmatprep.mubr.bf16.mxu1 %v1370_v53 }
  0x43   :  { %648 = vmatmul.mubr.bf16.gmra.mrb[16].mxu0 %v1372_v54 }
  0x44   :  { %745 = vmatmul.mubr.bf16.gmra.mrb[16].mxu1 %v1373_v55  ;;  %655 = vmatprep.mubr.bf16.mxu0 %v1375_v56 }
  0x45   :  { %752 = vmatprep.mubr.bf16.mxu1 %v1377_v57 }
  0x4b   :  { %656 = vmatmul.mubr.bf16.gmra.mrb[20].mxu0 %v1379_v58 }
  0x4c   :  { %753 = vmatmul.mubr.bf16.gmra.mrb[20].mxu1 %v1380_v59  ;;  %663 = vmatprep.mubr.bf16.mxu0 %v1381_v60 }
  0x4d   :  { %760 = vmatprep.mubr.bf16.mxu1 %v1383_v61 }
  0x53   :  { %664 = vmatmul.mubr.bf16.gmra.mrb[24].mxu0 %v1385_v62 }
  0x54   :  { %761 = vmatmul.mubr.bf16.gmra.mrb[24].mxu1 %v1386_v63  ;;  %671 = vmatprep.mubr.bf16.mxu0 %v1388_v0 }
  0x55   :  { %768 = vmatprep.mubr.bf16.mxu1 %v1390_v1 }
  0x5b   :  { %672 = vmatmul.mubr.bf16.gmra.mrb[28].mxu0 %v1392_v2 }
  0x5c   :  { %769 = vmatmul.mubr.bf16.gmra.mrb[28].mxu1 %v1393_v3  ;;  %1286 = vmatprep.mubr.msk.bf16.mxu0 %vm558_vm0, %v1394_v4 }
  0x5d   :  { %1294 = vmatprep.mubr.msk.bf16.mxu1 %vm558_vm0, %v1395_v5 }
  0x63   :  { %1287 = vmatmul.mubr.msk.bf16.vlgmr.msra.gmra.mrb[32].mxu0 %vm558_vm0, %v1396_v6 }
  0x64   :  { %1295 = vmatmul.mubr.msk.bf16.vlgmr.msra.gmra.mrb[32].mxu1 %vm558_vm0, %v1397_v7  ;;  %1290 = vmatprep.mubr.msk.bf16.mxu0 %vm558_vm0, %v1398_v8 }
  0x65   :  { %1298 = vmatprep.mubr.msk.bf16.mxu1 %vm558_vm0, %v1399_v9 }
  0x6b   :  { %1291 = vmatmul.mubr.msk.bf16.gmra.mrb[36].mxu0 %vm558_vm0, %v1400_v10 }
  0x6c   :  { %1299 = vmatmul.mubr.msk.bf16.gmra.mrb[36].mxu1 %vm558_vm0, %v1401_v11 }
  0xf6   :  { %v1154_v12 = vpop.f32.mrb[0].mxu0 }
  0xf7   :  { %v1218_v13 = vpop.f32.mrb[0].mxu1  ;;  %v1155_v15 = vpop.f32.mrb[1].mxu0 }
  0xf8   :  { %v1156_v16 = vadd.f32 %v1155_v15, %v1154_v12  ;;  %v1219_v17 = vpop.f32.mrb[1].mxu1  ;;  %v1157_v18 = vpop.f32.mrb[2].mxu0 }
  0xf9   :  { %v1220_v19 = vadd.f32 %v1219_v17, %v1218_v13  ;;  %v1221_v20 = vpop.f32.mrb[2].mxu1  ;;  %v1158_v21 = vpop.f32.mrb[3].mxu0 }
  0xfa   :  { %v618_v22 = vadd.f32 %v1156_v16, %v1661_v14  ;;  %v1159_v23 = vadd.f32 %v1158_v21, %v1157_v18  ;;  %v1222_v24 = vpop.f32.mrb[3].mxu1 }
  0xfb   :  { %v1223_v25 = vadd.f32 %v1222_v24, %v1221_v20 }
  0xfc   :  { %v621_v26 = vadd.f32 %v1159_v23, %v1661_v14  ;;  %v1665_v27 = vadd.f32 %v1220_v19, %v618_v22 }
  0xfe   :  { %v1160_v28 = vpop.f32.mrb[4].mxu0  ;;  %v1667_v29 = vadd.f32 %v1223_v25, %v621_v26 }
  0xff   :  { %v1224_v30 = vpop.f32.mrb[4].mxu1  ;;  %v1161_v31 = vpop.f32.mrb[5].mxu0 }
 0x100   :  { %v1162_v32 = vadd.f32 %v1161_v31, %v1160_v28  ;;  %v1225_v33 = vpop.f32.mrb[5].mxu1  ;;  %v1163_v34 = vpop.f32.mrb[6].mxu0 }
 0x101   :  { %v1226_v35 = vadd.f32 %v1225_v33, %v1224_v30  ;;  %v1227_v36 = vpop.f32.mrb[6].mxu1  ;;  %v1164_v37 = vpop.f32.mrb[7].mxu0 }
 0x102   :  { %v626_v38 = vadd.f32 %v1162_v32, %v1661_v14  ;;  %v1165_v39 = vadd.f32 %v1164_v37, %v1163_v34  ;;  %v1228_v40 = vpop.f32.mrb[7].mxu1 }
 0x103   :  { %v1229_v41 = vadd.f32 %v1228_v40, %v1227_v36 }
 0x104   :  { %v629_v42 = vadd.f32 %v1165_v39, %v1661_v14  ;;  %v1671_v43 = vadd.f32 %v1226_v35, %v626_v38 }
 0x106   :  { %v1166_v44 = vpop.f32.mrb[8].mxu0  ;;  %v1673_v45 = vadd.f32 %v1229_v41, %v629_v42 }
 0x107   :  { %v1230_v46 = vpop.f32.mrb[8].mxu1  ;;  %v1167_v47 = vpop.f32.mrb[9].mxu0 }
 0x108   :  { %v1168_v48 = vadd.f32 %v1167_v47, %v1166_v44  ;;  %v1231_v49 = vpop.f32.mrb[9].mxu1  ;;  %v1169_v50 = vpop.f32.mrb[10].mxu0 }
 0x109   :  { %v1232_v51 = vadd.f32 %v1231_v49, %v1230_v46  ;;  %v1233_v52 = vpop.f32.mrb[10].mxu1  ;;  %v1170_v53 = vpop.f32.mrb[11].mxu0 }
 0x10a   :  { %v634_v54 = vadd.f32 %v1168_v48, %v1661_v14  ;;  %v1171_v55 = vadd.f32 %v1170_v53, %v1169_v50  ;;  %v1234_v56 = vpop.f32.mrb[11].mxu1 }
 0x10b   :  { %v1235_v57 = vadd.f32 %v1234_v56, %v1233_v52 }
 0x10c   :  { %v637_v58 = vadd.f32 %v1171_v55, %v1661_v14  ;;  %v1677_v59 = vadd.f32 %v1232_v51, %v634_v54 }
 0x10e   :  { %v1172_v60 = vpop.f32.mrb[12].mxu0  ;;  %v1679_v61 = vadd.f32 %v1235_v57, %v637_v58 }
 0x10f   :  { %v1236_v62 = vpop.f32.mrb[12].mxu1  ;;  %v1173_v63 = vpop.f32.mrb[13].mxu0 }
 0x110   :  { %v1174_v0 = vadd.f32 %v1173_v63, %v1172_v60  ;;  %v1237_v1 = vpop.f32.mrb[13].mxu1  ;;  %v1175_v2 = vpop.f32.mrb[14].mxu0 }
 0x111   :  { %v1238_v3 = vadd.f32 %v1237_v1, %v1236_v62  ;;  %v1239_v4 = vpop.f32.mrb[14].mxu1  ;;  %v1176_v5 = vpop.f32.mrb[15].mxu0 }
 0x112   :  { %v642_v6 = vadd.f32 %v1174_v0, %v1661_v14  ;;  %v1177_v7 = vadd.f32 %v1176_v5, %v1175_v2  ;;  %v1240_v8 = vpop.f32.mrb[15].mxu1 }
 0x113   :  { %v1241_v9 = vadd.f32 %v1240_v8, %v1239_v4 }
 0x114   :  { %v645_v10 = vadd.f32 %v1177_v7, %v1661_v14  ;;  %v1683_v11 = vadd.f32 %v1238_v3, %v642_v6 }
 0x116   :  { %v1178_v12 = vpop.f32.mrb[16].mxu0  ;;  %v1685_v13 = vadd.f32 %v1241_v9, %v645_v10 }
 0x117   :  { %v1242_v15 = vpop.f32.mrb[16].mxu1  ;;  %v1179_v16 = vpop.f32.mrb[17].mxu0 }
 0x118   :  { %v1180_v17 = vadd.f32 %v1179_v16, %v1178_v12  ;;  %v1243_v18 = vpop.f32.mrb[17].mxu1  ;;  %v1181_v19 = vpop.f32.mrb[18].mxu0 }
 0x119   :  { %v1244_v20 = vadd.f32 %v1243_v18, %v1242_v15  ;;  %v1245_v21 = vpop.f32.mrb[18].mxu1  ;;  %v1182_v22 = vpop.f32.mrb[19].mxu0 }
 0x11a   :  { %v650_v23 = vadd.f32 %v1180_v17, %v1661_v14  ;;  %v1183_v24 = vadd.f32 %v1182_v22, %v1181_v19  ;;  %v1246_v25 = vpop.f32.mrb[19].mxu1 }
 0x11b   :  { %v1247_v26 = vadd.f32 %v1246_v25, %v1245_v21 }
 0x11c   :  { %v653_v28 = vadd.f32 %v1183_v24, %v1661_v14  ;;  %v747_v30 = vadd.f32 %v1244_v20, %v650_v23 }
 0x11e   :  { %v1184_v31 = vpop.f32.mrb[20].mxu0  ;;  %v1689_v32 = vadd.f32 %v1247_v26, %v653_v28 }
 0x11f   :  { %v1248_v33 = vpop.f32.mrb[20].mxu1  ;;  %v1185_v34 = vpop.f32.mrb[21].mxu0 }
 0x120   :  { %v1186_v35 = vadd.f32 %v1185_v34, %v1184_v31  ;;  %v1249_v36 = vpop.f32.mrb[21].mxu1  ;;  %v1187_v37 = vpop.f32.mrb[22].mxu0 }
 0x121   :  { %v1250_v38 = vadd.f32 %v1249_v36, %v1248_v33  ;;  %v1251_v39 = vpop.f32.mrb[22].mxu1  ;;  %v1188_v40 = vpop.f32.mrb[23].mxu0 }
 0x122   :  { %v658_v41 = vadd.f32 %v1186_v35, %v1661_v14  ;;  %v1189_v42 = vadd.f32 %v1188_v40, %v1187_v37  ;;  %v1252_v44 = vpop.f32.mrb[23].mxu1 }
 0x123   :  { %v1253_v46 = vadd.f32 %v1252_v44, %v1251_v39 }
 0x124   :  { %v661_v47 = vadd.f32 %v1189_v42, %v1661_v14  ;;  %v755_v48 = vadd.f32 %v1250_v38, %v658_v41 }
 0x126   :  { %v1190_v49 = vpop.f32.mrb[24].mxu0  ;;  %v758_v50 = vadd.f32 %v1253_v46, %v661_v47 }
 0x127   :  { %v1254_v51 = vpop.f32.mrb[24].mxu1  ;;  %v1191_v52 = vpop.f32.mrb[25].mxu0 }
 0x128   :  { %v1192_v53 = vadd.f32 %v1191_v52, %v1190_v49  ;;  %v1255_v54 = vpop.f32.mrb[25].mxu1  ;;  %v1193_v55 = vpop.f32.mrb[26].mxu0 }
 0x129   :  { %v1256_v56 = vadd.f32 %v1255_v54, %v1254_v51  ;;  %v1257_v57 = vpop.f32.mrb[26].mxu1  ;;  %v1194_v58 = vpop.f32.mrb[27].mxu0 }
 0x12a   :  { %v666_v60 = vadd.f32 %v1192_v53, %v1661_v14  ;;  %v1195_v62 = vadd.f32 %v1194_v58, %v1193_v55  ;;  %v1258_v63 = vpop.f32.mrb[27].mxu1 }
 0x12b   :  { %v1259_v0 = vadd.f32 %v1258_v63, %v1257_v57 }
 0x12c   :  { %v669_v1 = vadd.f32 %v1195_v62, %v1661_v14  ;;  %v763_v2 = vadd.f32 %v1256_v56, %v666_v60 }
 0x12e   :  { %v1196_v3 = vpop.f32.mrb[28].mxu0  ;;  %v1695_v4 = vadd.f32 %v1259_v0, %v669_v1 }
 0x12f   :  { %v1260_v5 = vpop.f32.mrb[28].mxu1  ;;  %v1197_v6 = vpop.f32.mrb[29].mxu0 }
 0x130   :  { %v1198_v7 = vadd.f32 %v1197_v6, %v1196_v3  ;;  %v1261_v8 = vpop.f32.mrb[29].mxu1  ;;  %v1199_v9 = vpop.f32.mrb[30].mxu0 }
 0x131   :  { %v1262_v10 = vadd.f32 %v1261_v8, %v1260_v5  ;;  %v1263_v12 = vpop.f32.mrb[30].mxu1  ;;  %v1200_v15 = vpop.f32.mrb[31].mxu0 }
 0x132   :  { %v674_v16 = vadd.f32 %v1198_v7, %v1661_v14  ;;  %v1201_v17 = vadd.f32 %v1200_v15, %v1199_v9  ;;  %v1264_v18 = vpop.f32.mrb[31].mxu1 }
 0x133   :  { %v1265_v19 = vadd.f32 %v1264_v18, %v1263_v12 }
 0x134   :  { %v677_v20 = vadd.f32 %v1201_v17, %v1661_v14  ;;  %v771_v21 = vadd.f32 %v1262_v10, %v674_v16 }
 0x136   :  { %v1288_v22 = vpop.f32.mrb[32].mxu0  ;;  %v774_v23 = vadd.f32 %v1265_v19, %v677_v20 }
 0x137   :  { %v820_v24 = vadd.f32 %v1288_v22, %v1671_v43  ;;  %v1296_v25 = vpop.f32.mrb[32].mxu1  ;;  %v811_v26 = vpop.f32.mrb[33].mxu0 }
 0x138   :  { %v852_v28 = vadd.f32 %v1296_v25, %v755_v48  ;;  %v812_v31 = vadd.f32 %v811_v26, %v1665_v27  ;;  %v843_v33 = vpop.f32.mrb[33].mxu1  ;;  %v1289_v34 = vpop.f32.mrb[34].mxu0 }
 0x139   :  { %v844_v35 = vadd.f32 %v843_v33, %v747_v30  ;;  %v823_v36 = vadd.f32 %v1289_v34, %v1673_v45  ;;  %v1297_v37 = vpop.f32.mrb[34].mxu1  ;;  %v814_v38 = vpop.f32.mrb[35].mxu0  ;;  %v876_v41 = vmax.f32 %v820_v24, 0.0 }
 0x13a   :  { %v855_v39 = vadd.f32 %v1297_v37, %v758_v50  ;;  %v815_v14 = vadd.f32 %v814_v38, %v1667_v29  ;;  %v846_v40 = vpop.f32.mrb[35].mxu1  ;;  %v884_v44 = vmax.f32 %v852_v28, 0.0  ;;  %v874_v46 = vmax.f32 %v812_v31, 0.0 }
 0x13b   :  { %v877_v42 = vmax.f32 %v823_v36, 0.0  ;;  %v847_v43 = vadd.f32 %v846_v40, %v1689_v32  ;;  %v882_v27 = vmax.f32 %v844_v35, 0.0 }
 0x13c   :  { %v885_v47 = vmax.f32 %v855_v39, 0.0  ;;  %v875_v48 = vmax.f32 %v815_v14, 0.0 }
 0x13d   :  { %v1099_v49 = vpack.c.bf16 %v877_v42, %v876_v41  ;;  %v883_v51 = vmax.f32 %v847_v43, 0.0 }
 0x13e   :  { %v1119_v30 = vpack.c.bf16 %v885_v47, %v884_v44  ;;  %v1094_v52 = vpack.c.bf16 %v875_v48, %v874_v46  ;;  %v1292_v45 = vpop.f32.mrb[36].mxu0 }
 0x13f   :  { %1131 = vst [vmem:[%s1736_s3 + $0x8] sm:$0xff] %v1099_v49   ;;  %v1114_v29 = vpack.c.bf16 %v883_v51, %v882_v27  ;;  %v836_v50 = vadd.f32 %v1292_v45, %v1683_v11  ;;  %v1300_v53 = vpop.f32.mrb[36].mxu1  ;;  %v827_v54 = vpop.f32.mrb[37].mxu0 }
 0x140   :  { %1135 = vst [vmem:[%s1736_s3 + $0x28] sm:$0xff] %v1119_v30   ;;  %1095 = vst [vmem:[%s1736_s3] sm:$0xff] %v1094_v52   ;;  %v868_v32 = vadd.f32 %v1300_v53, %v771_v21  ;;  %v828_v55 = vadd.f32 %v827_v54, %v1677_v59  ;;  %v859_v56 = vpop.f32.mrb[37].mxu1  ;;  %v1293_v57 = vpop.f32.mrb[38].mxu0 }
 0x141   :  { %1134 = vst [vmem:[%s1736_s3 + $0x20] sm:$0xff] %v1114_v29   ;;  %v860_v11 = vadd.f32 %v859_v56, %v763_v2  ;;  %v839_v58 = vadd.f32 %v1293_v57, %v1685_v13  ;;  %v1301_v60 = vpop.f32.mrb[38].mxu1  ;;  %v830_v62 = vpop.f32.mrb[39].mxu0  ;;  %v880_v3 = vmax.f32 %v836_v50, 0.0 }
 0x142   :  { %v871_v63 = vadd.f32 %v1301_v60, %v774_v23  ;;  %v831_v0 = vadd.f32 %v830_v62, %v1679_v61  ;;  %v862_v1 = vpop.f32.mrb[39].mxu1  ;;  %v888_v59 = vmax.f32 %v868_v32, 0.0  ;;  %v878_v7 = vmax.f32 %v828_v55, 0.0 }
 0x143   :  { %v881_v5 = vmax.f32 %v839_v58, 0.0  ;;  %v863_v6 = vadd.f32 %v862_v1, %v1695_v4  ;;  %v886_v10 = vmax.f32 %v860_v11, 0.0 }
 0x144   :  { %v889_v8 = vmax.f32 %v871_v63, 0.0  ;;  %v879_v9 = vmax.f32 %v831_v0, 0.0 }
 0x145   :  { %v1109_v12 = vpack.c.bf16 %v881_v5, %v880_v3  ;;  %v887_v15 = vmax.f32 %v863_v6, 0.0 }
 0x146   :  { %v1129_v2 = vpack.c.bf16 %v889_v8, %v888_v59  ;;  %v1104_v16 = vpack.c.bf16 %v879_v9, %v878_v7 }
 0x147   :  { %1133 = vst [vmem:[%s1736_s3 + $0x18] sm:$0xff] %v1109_v12   ;;  %v1124_v13 = vpack.c.bf16 %v887_v15, %v886_v10 }
 0x148   :  { %1137 = vst [vmem:[%s1736_s3 + $0x38] sm:$0xff] %v1129_v2   ;;  %1132 = vst [vmem:[%s1736_s3 + $0x10] sm:$0xff] %v1104_v16  }
 0x149   :  { %1136 = vst [vmem:[%s1736_s3 + $0x30] sm:$0xff] %v1124_v13  }

// kernel: fcn_forward.28
= control target key start
LH: loop header
LB: loop body
LE: loop exit
PB: predicated region body
PF: predicated region fallthrough
CT: control target
= control target key end

     0   :  { %vm110_vm0 = vcmask 523264   ;;  %s563_s1 = inlined_call_operand.vmem [shape: bf16[64,128], index: 1, kind: input, shape index: {}]   ;;  %s564_s0 = inlined_call_operand.vmem [shape: bf16[128,64], index: 0, kind: input, shape index: {}]   ;;  %s565_s2 = inlined_call_operand.vmem [shape: f32[1,128], index: 2, kind: input, shape index: {}]   ;;  %s566_s3 = inlined_call_operand.vmem [shape: bf16[128,128], index: 3, kind: output, shape index: {}]  }
   0x1   :  { %v460_v0 = vld [vmem:[%s563_s1] sm:$0xff]   ;;  %v461_v1 = vld [vmem:[%s563_s1 + $0x8] sm:$0xff]   ;;  %v462_v2 = vld [vmem:[%s563_s1 + $0x10] sm:$0xff]  }
   0x2   :  { %428 = vmatprep.subr.bf16.mxu0 %v460_v0  ;;  %452 = vmatprep.subr.bf16.mxu1 %v460_v0  ;;  %v464_v3 = vld [vmem:[%s564_s0] sm:$0xff]   ;;  %v463_v5 = vld [vmem:[%s563_s1 + $0x18] sm:$0xff]   ;;  %v466_v6 = vld [vmem:[%s564_s0 + $0x8] sm:$0xff]  }
   0x3   :  { %429 = vmatpush3.bf16.msra.mxu0 %v460_v0  ;;  %456 = vmatpush3.bf16.msra.mxu1 %v460_v0  ;;  %v465_v4 = vld [vmem:[%s564_s0 + $0x20] sm:$0xff]   ;;  %v467_v7 = vld [vmem:[%s564_s0 + $0x28] sm:$0xff]   ;;  %v468_v8 = vld [vmem:[%s564_s0 + $0x10] sm:$0xff]  }
   0x4   :  { %430 = vmatprep.subr.bf16.mxu0 %v461_v1  ;;  %453 = vmatprep.subr.bf16.mxu1 %v461_v1  ;;  %v469_v9 = vld [vmem:[%s564_s0 + $0x30] sm:$0xff]   ;;  %v470_v10 = vld [vmem:[%s564_s0 + $0x18] sm:$0xff]   ;;  %v316_v13 = vld [vmem:[%s565_s2] ss:$0 sm:$0xff] }
   0x5   :  { %436 = vmatprep.mubr.msk.bf16.mxu0 %vm110_vm0, %v464_v3  ;;  %444 = vmatprep.mubr.msk.bf16.mxu1 %vm110_vm0, %v465_v4  ;;  %v471_v11 = vld [vmem:[%s564_s0 + $0x38] sm:$0xff]  }
   0x7   :  { %431 = vmatpush3.bf16.msra.mxu0 %v461_v1  ;;  %457 = vmatpush3.bf16.msra.mxu1 %v461_v1 }
   0x8   :  { %432 = vmatprep.subr.bf16.mxu0 %v462_v2  ;;  %454 = vmatprep.subr.bf16.mxu1 %v462_v2 }
   0xb   :  { %433 = vmatpush3.bf16.msra.mxu0 %v462_v2  ;;  %458 = vmatpush3.bf16.msra.mxu1 %v462_v2 }
   0xc   :  { %434 = vmatprep.subr.bf16.mxu0 %v463_v5  ;;  %455 = vmatprep.subr.bf16.mxu1 %v463_v5 }
   0xf   :  { %435 = vmatpush3.bf16.msra.mxu0 %v463_v5  ;;  %459 = vmatpush3.bf16.msra.mxu1 %v463_v5 }
  0x12   :  { %437 = vmatmul.mubr.msk.bf16.vlgmr.msra.gmra.mrb[0].mxu0 %vm110_vm0, %v466_v6  ;;  %445 = vmatmul.mubr.msk.bf16.vlgmr.msra.gmra.mrb[0].mxu1 %vm110_vm0, %v467_v7 }
  0x13   :  { %440 = vmatprep.mubr.msk.bf16.mxu0 %vm110_vm0, %v468_v8  ;;  %448 = vmatprep.mubr.msk.bf16.mxu1 %vm110_vm0, %v469_v9 }
  0x1a   :  { %441 = vmatmul.mubr.msk.bf16.gmra.mrb[4].mxu0 %vm110_vm0, %v470_v10  ;;  %449 = vmatmul.mubr.msk.bf16.gmra.mrb[4].mxu1 %vm110_vm0, %v471_v11 }
  0xe5   :  { %v438_v12 = vpop.f32.mrb[0].mxu0  ;;  %v446_v14 = vpop.f32.mrb[0].mxu1 }
  0xe6   :  { %v169_v15 = vpop.f32.mrb[1].mxu0  ;;  %v201_v16 = vpop.f32.mrb[1].mxu1  ;;  %v178_v19 = vadd.f32 %v438_v12, %v316_v13  ;;  %v210_v20 = vadd.f32 %v446_v14, %v316_v13 }
  0xe7   :  { %v439_v17 = vpop.f32.mrb[2].mxu0  ;;  %v447_v18 = vpop.f32.mrb[2].mxu1  ;;  %v170_v25 = vadd.f32 %v316_v13, %v169_v15  ;;  %v202_v26 = vadd.f32 %v316_v13, %v201_v16 }
  0xe8   :  { %v181_v21 = vadd.f32 %v439_v17, %v316_v13  ;;  %v213_v22 = vadd.f32 %v447_v18, %v316_v13  ;;  %v172_v23 = vpop.f32.mrb[3].mxu0  ;;  %v204_v24 = vpop.f32.mrb[3].mxu1 }
  0xe9   :  { %v173_v27 = vadd.f32 %v316_v13, %v172_v23  ;;  %v205_v28 = vadd.f32 %v316_v13, %v204_v24 }
  0xea   :  { %v377_v29 = vpack.c.bf16 %v181_v21, %v178_v19  ;;  %v397_v30 = vpack.c.bf16 %v213_v22, %v210_v20 }
  0xeb   :  { %v372_v31 = vpack.c.bf16 %v173_v27, %v170_v25  ;;  %v392_v32 = vpack.c.bf16 %v205_v28, %v202_v26 }
  0xec   :  { %409 = vst [vmem:[%s566_s3 + $0x8] sm:$0xff] %v377_v29   ;;  %413 = vst [vmem:[%s566_s3 + $0x28] sm:$0xff] %v397_v30  }
  0xed   :  { %373 = vst [vmem:[%s566_s3] sm:$0xff] %v372_v31   ;;  %412 = vst [vmem:[%s566_s3 + $0x20] sm:$0xff] %v392_v32   ;;  %v442_v33 = vpop.f32.mrb[4].mxu0  ;;  %v450_v34 = vpop.f32.mrb[4].mxu1 }
  0xee   :  { %v185_v35 = vpop.f32.mrb[5].mxu0  ;;  %v217_v36 = vpop.f32.mrb[5].mxu1  ;;  %v194_v39 = vadd.f32 %v442_v33, %v316_v13  ;;  %v226_v40 = vadd.f32 %v450_v34, %v316_v13 }
  0xef   :  { %v443_v37 = vpop.f32.mrb[6].mxu0  ;;  %v451_v38 = vpop.f32.mrb[6].mxu1  ;;  %v186_v45 = vadd.f32 %v316_v13, %v185_v35  ;;  %v218_v46 = vadd.f32 %v316_v13, %v217_v36 }
  0xf0   :  { %v197_v41 = vadd.f32 %v443_v37, %v316_v13  ;;  %v229_v42 = vadd.f32 %v451_v38, %v316_v13  ;;  %v188_v43 = vpop.f32.mrb[7].mxu0  ;;  %v220_v44 = vpop.f32.mrb[7].mxu1 }
  0xf1   :  { %v189_v47 = vadd.f32 %v316_v13, %v188_v43  ;;  %v221_v48 = vadd.f32 %v316_v13, %v220_v44 }
  0xf2   :  { %v387_v49 = vpack.c.bf16 %v197_v41, %v194_v39  ;;  %v407_v50 = vpack.c.bf16 %v229_v42, %v226_v40 }
  0xf3   :  { %v382_v51 = vpack.c.bf16 %v189_v47, %v186_v45  ;;  %v402_v52 = vpack.c.bf16 %v221_v48, %v218_v46 }
  0xf4   :  { %411 = vst [vmem:[%s566_s3 + $0x18] sm:$0xff] %v387_v49   ;;  %415 = vst [vmem:[%s566_s3 + $0x38] sm:$0xff] %v407_v50  }
  0xf5   :  { %410 = vst [vmem:[%s566_s3 + $0x10] sm:$0xff] %v382_v51   ;;  %414 = vst [vmem:[%s566_s3 + $0x30] sm:$0xff] %v402_v52  }

// kernel: fcn_forward.29
= control target key start
LH: loop header
LB: loop body
LE: loop exit
PB: predicated region body
PF: predicated region fallthrough
CT: control target
= control target key end

     0   :  { %s3073_s1 = inlined_call_operand.vmem [shape: bf16[1152,128], index: 1, kind: input, shape index: {}]   ;;  %s3074_s0 = inlined_call_operand.vmem [shape: bf16[128,1152], index: 0, kind: input, shape index: {}]   ;;  %s3075_s2 = inlined_call_operand.vmem [shape: f32[1,128], index: 2, kind: input, shape index: {}]   ;;  %s3076_s3 = inlined_call_operand.vmem [shape: bf16[128,128], index: 3, kind: input, shape index: {}]   ;;  %s3077_s4 = inlined_call_operand.vmem [shape: bf16[128,128], index: 4, kind: output, shape index: {}]  }
   0x1   :  { %v2265_v0 = vld [vmem:[%s3073_s1 + $0x40] sm:$0xff]   ;;  %v2269_v4 = vld [vmem:[%s3073_s1 + $0x48] sm:$0xff]   ;;  %v2273_v8 = vld [vmem:[%s3073_s1 + $0x50] sm:$0xff]  }
   0x2   :  { %v2266_v1 = vld [vmem:[%s3073_s1 + $0xc0] sm:$0xff]   ;;  %1945 = vmatprep.subr.bf16.mxu0 %v2265_v0  ;;  %v2270_v5 = vld [vmem:[%s3073_s1 + $0xc8] sm:$0xff]   ;;  %v2274_v9 = vld [vmem:[%s3073_s1 + $0xd0] sm:$0xff]  }
   0x3   :  { %v2267_v2 = vld [vmem:[%s3073_s1] sm:$0xff]   ;;  %2009 = vmatprep.subr.bf16.mxu1 %v2266_v1  ;;  %v2271_v6 = vld [vmem:[%s3073_s1 + $0x8] sm:$0xff]   ;;  %v2275_v10 = vld [vmem:[%s3073_s1 + $0x10] sm:$0xff]  }
   0x4   :  { %v2268_v3 = vld [vmem:[%s3073_s1 + $0x80] sm:$0xff]   ;;  %1946 = vmatpush3.bf16.msra.mxu0 %v2267_v2  ;;  %v2272_v7 = vld [vmem:[%s3073_s1 + $0x88] sm:$0xff]   ;;  %v2276_v11 = vld [vmem:[%s3073_s1 + $0x90] sm:$0xff]  }
   0x5   :  { %2010 = vmatpush3.bf16.msra.mxu1 %v2268_v3  ;;  %1947 = vmatprep.subr.bf16.mxu0 %v2269_v4  ;;  %v2277_v12 = vld [vmem:[%s3073_s1 + $0x58] sm:$0xff]   ;;  %v2281_v16 = vld [vmem:[%s3073_s1 + $0x60] sm:$0xff]   ;;  %v2285_v20 = vld [vmem:[%s3073_s1 + $0x68] sm:$0xff]  }
   0x6   :  { %2011 = vmatprep.subr.bf16.mxu1 %v2270_v5  ;;  %v2278_v13 = vld [vmem:[%s3073_s1 + $0xd8] sm:$0xff]   ;;  %v2282_v17 = vld [vmem:[%s3073_s1 + $0xe0] sm:$0xff]   ;;  %v2286_v21 = vld [vmem:[%s3073_s1 + $0xe8] sm:$0xff]  }
   0x7   :  { %v2279_v14 = vld [vmem:[%s3073_s1 + $0x18] sm:$0xff]   ;;  %v2283_v18 = vld [vmem:[%s3073_s1 + $0x20] sm:$0xff]   ;;  %v2287_v22 = vld [vmem:[%s3073_s1 + $0x28] sm:$0xff]  }
   0x8   :  { %1948 = vmatpush3.bf16.msra.mxu0 %v2271_v6  ;;  %v2280_v15 = vld [vmem:[%s3073_s1 + $0x98] sm:$0xff]   ;;  %v2284_v19 = vld [vmem:[%s3073_s1 + $0xa0] sm:$0xff]   ;;  %v2288_v23 = vld [vmem:[%s3073_s1 + $0xa8] sm:$0xff]  }
   0x9   :  { %2012 = vmatpush3.bf16.msra.mxu1 %v2272_v7  ;;  %1949 = vmatprep.subr.bf16.mxu0 %v2273_v8  ;;  %v2289_v24 = vld [vmem:[%s3073_s1 + $0x70] sm:$0xff]   ;;  %v2293_v28 = vld [vmem:[%s3073_s1 + $0x78] sm:$0xff]   ;;  %v2297_v32 = vld [vmem:[%s3074_s0] ss:$36 sps:$4 sm:$0xff]  }
   0xa   :  { %2013 = vmatprep.subr.bf16.mxu1 %v2274_v9  ;;  %v2290_v25 = vld [vmem:[%s3073_s1 + $0xf0] sm:$0xff]   ;;  %v2294_v29 = vld [vmem:[%s3073_s1 + $0xf8] sm:$0xff]   ;;  %v2299_v33 = vld [vmem:[%s3074_s0 + $0x4] ss:$36 sps:$4 sm:$0xff]  }
   0xb   :  { %v2291_v26 = vld [vmem:[%s3073_s1 + $0x30] sm:$0xff]   ;;  %v2295_v30 = vld [vmem:[%s3073_s1 + $0x38] sm:$0xff]   ;;  %v2300_v34 = vld [vmem:[%s3074_s0 + $0x8] ss:$36 sps:$4 sm:$0xff]   ;;  %1081 = vmatprep.mubr.bf16.mxu0 %v2299_v33 }
   0xc   :  { %1950 = vmatpush3.bf16.msra.mxu0 %v2275_v10  ;;  %v2292_v27 = vld [vmem:[%s3073_s1 + $0xb0] sm:$0xff]   ;;  %v2296_v31 = vld [vmem:[%s3073_s1 + $0xb8] sm:$0xff]   ;;  %v2303_v36 = vld [vmem:[%s3073_s1 + $0x140] sm:$0xff]  }
   0xd   :  { %2014 = vmatpush3.bf16.msra.mxu1 %v2276_v11  ;;  %1951 = vmatprep.subr.bf16.mxu0 %v2277_v12  ;;  %v2302_v35 = vld [vmem:[%s3074_s0 + $0xc] ss:$36 sps:$4 sm:$0xff]   ;;  %v2304_v37 = vld [vmem:[%s3073_s1 + $0x1c0] sm:$0xff]   ;;  %v2309_v41 = vld [vmem:[%s3074_s0 + $0x54] ss:$36 sps:$4 sm:$0xff]  }
   0xe   :  { %2015 = vmatprep.subr.bf16.mxu1 %v2278_v13  ;;  %1178 = vmatprep.mubr.bf16.mxu1 %v2302_v35  ;;  %v2305_v38 = vld [vmem:[%s3073_s1 + $0x100] sm:$0xff]   ;;  %v2307_v40 = vld [vmem:[%s3074_s0 + $0x4c] ss:$36 sps:$4 sm:$0xff]   ;;  %v2317_v48 = vld [vmem:[%s3074_s0 + $0x94] ss:$36 sps:$4 sm:$0xff]  }
   0xf   :  { %v2306_v39 = vld [vmem:[%s3073_s1 + $0x180] sm:$0xff]   ;;  %v2311_v42 = vld [vmem:[%s3074_s0 + $0x48] ss:$36 sps:$4 sm:$0xff]   ;;  %v2312_v43 = vld [vmem:[%s3074_s0 + $0x50] ss:$36 sps:$4 sm:$0xff]  }
  0x10   :  { %1952 = vmatpush3.bf16.msra.mxu0 %v2279_v14  ;;  %v2313_v44 = vld [vmem:[%s3073_s1 + $0x148] sm:$0xff]   ;;  %v2319_v49 = vld [vmem:[%s3074_s0 + $0x9c] ss:$36 sps:$4 sm:$0xff]   ;;  %v2321_v50 = vld [vmem:[%s3074_s0 + $0x90] ss:$36 sps:$4 sm:$0xff]  }
  0x11   :  { %2016 = vmatpush3.bf16.msra.mxu1 %v2280_v15  ;;  %1953 = vmatprep.subr.bf16.mxu0 %v2281_v16  ;;  %v2314_v45 = vld [vmem:[%s3073_s1 + $0x1c8] sm:$0xff]   ;;  %v2322_v51 = vld [vmem:[%s3074_s0 + $0x98] ss:$36 sps:$4 sm:$0xff]   ;;  %v2323_v52 = vld [vmem:[%s3073_s1 + $0x150] sm:$0xff]  }
  0x12   :  { %2017 = vmatprep.subr.bf16.mxu1 %v2282_v17  ;;  %v2315_v46 = vld [vmem:[%s3073_s1 + $0x108] sm:$0xff]   ;;  %v2324_v53 = vld [vmem:[%s3073_s1 + $0x1d0] sm:$0xff]   ;;  %v2327_v56 = vld [vmem:[%s3074_s0 + $0xdc] ss:$36 sps:$4 sm:$0xff]  }
  0x13   :  { %v2316_v47 = vld [vmem:[%s3073_s1 + $0x188] sm:$0xff]   ;;  %v2325_v54 = vld [vmem:[%s3073_s1 + $0x110] sm:$0xff]   ;;  %v2331_v58 = vld [vmem:[%s3074_s0 + $0xd8] ss:$36 sps:$4 sm:$0xff]  }
  0x14   :  { %1954 = vmatpush3.bf16.msra.mxu0 %v2283_v18  ;;  %v2326_v55 = vld [vmem:[%s3073_s1 + $0x190] sm:$0xff]   ;;  %v2329_v57 = vld [vmem:[%s3074_s0 + $0xe4] ss:$36 sps:$4 sm:$0xff]   ;;  %v2333_v60 = vld [vmem:[%s3073_s1 + $0x158] sm:$0xff]  }
  0x15   :  { %2018 = vmatpush3.bf16.msra.mxu1 %v2284_v19  ;;  %1955 = vmatprep.subr.bf16.mxu0 %v2285_v20  ;;  %v2332_v59 = vld [vmem:[%s3074_s0 + $0xe0] ss:$36 sps:$4 sm:$0xff]   ;;  %v2334_v61 = vld [vmem:[%s3073_s1 + $0x1d8] sm:$0xff]   ;;  %v2339_v1 = vld [vmem:[%s3074_s0 + $0x12c] ss:$36 sps:$4 sm:$0xff]  }
  0x16   :  { %2019 = vmatprep.subr.bf16.mxu1 %v2286_v21  ;;  %v2335_v62 = vld [vmem:[%s3073_s1 + $0x118] sm:$0xff]   ;;  %v2337_v0 = vld [vmem:[%s3074_s0 + $0x124] ss:$36 sps:$4 sm:$0xff]   ;;  %v2347_v8 = vld [vmem:[%s3074_s0 + $0x16c] ss:$36 sps:$4 sm:$0xff]  }
  0x17   :  { %v2336_v63 = vld [vmem:[%s3073_s1 + $0x198] sm:$0xff]   ;;  %v2341_v2 = vld [vmem:[%s3074_s0 + $0x120] ss:$36 sps:$4 sm:$0xff]   ;;  %v2342_v4 = vld [vmem:[%s3074_s0 + $0x128] ss:$36 sps:$4 sm:$0xff]  }
  0x18   :  { %1956 = vmatpush3.bf16.msra.mxu0 %v2287_v22  ;;  %v2343_v3 = vld [vmem:[%s3073_s1 + $0x160] sm:$0xff]   ;;  %v2349_v9 = vld [vmem:[%s3074_s0 + $0x174] ss:$36 sps:$4 sm:$0xff]   ;;  %v2353_v10 = vld [vmem:[%s3073_s1 + $0x168] sm:$0xff]  }
  0x19   :  { %2020 = vmatpush3.bf16.msra.mxu1 %v2288_v23  ;;  %1957 = vmatprep.subr.bf16.mxu0 %v2289_v24  ;;  %v2344_v5 = vld [vmem:[%s3073_s1 + $0x1e0] sm:$0xff]   ;;  %v2354_v11 = vld [vmem:[%s3073_s1 + $0x1e8] sm:$0xff]   ;;  %v2352_v15 = vld [vmem:[%s3074_s0 + $0x170] ss:$36 sps:$4 sm:$0xff]  }
  0x1a   :  { %2021 = vmatprep.subr.bf16.mxu1 %v2290_v25  ;;  %v2345_v6 = vld [vmem:[%s3073_s1 + $0x120] sm:$0xff]   ;;  %v2351_v12 = vld [vmem:[%s3074_s0 + $0x168] ss:$36 sps:$4 sm:$0xff]   ;;  %v2357_v16 = vld [vmem:[%s3074_s0 + $0x1b4] ss:$36 sps:$4 sm:$0xff]  }
  0x1b   :  { %v2346_v7 = vld [vmem:[%s3073_s1 + $0x1a0] sm:$0xff]   ;;  %v2355_v13 = vld [vmem:[%s3073_s1 + $0x128] sm:$0xff]   ;;  %v2363_v18 = vld [vmem:[%s3073_s1 + $0x170] sm:$0xff]  }
  0x1c   :  { %1958 = vmatpush3.bf16.msra.mxu0 %v2291_v26  ;;  %v2356_v14 = vld [vmem:[%s3073_s1 + $0x1a8] sm:$0xff]   ;;  %v2359_v17 = vld [vmem:[%s3074_s0 + $0x1bc] ss:$36 sps:$4 sm:$0xff]   ;;  %v2364_v19 = vld [vmem:[%s3073_s1 + $0x1f0] sm:$0xff]  }
  0x1d   :  { %2022 = vmatpush3.bf16.msra.mxu1 %v2292_v27  ;;  %1959 = vmatprep.subr.bf16.mxu0 %v2293_v28  ;;  %v2365_v20 = vld [vmem:[%s3073_s1 + $0x130] sm:$0xff]   ;;  %v2362_v23 = vld [vmem:[%s3074_s0 + $0x1b8] ss:$36 sps:$4 sm:$0xff]   ;;  %v2369_v25 = vld [vmem:[%s3074_s0 + $0x204] ss:$36 sps:$4 sm:$0xff]  }
  0x1e   :  { %2023 = vmatprep.subr.bf16.mxu1 %v2294_v29  ;;  %v2366_v21 = vld [vmem:[%s3073_s1 + $0x1b0] sm:$0xff]   ;;  %v2367_v24 = vld [vmem:[%s3074_s0 + $0x1fc] ss:$36 sps:$4 sm:$0xff]  }
  0x1f   :  { %v2361_v22 = vld [vmem:[%s3074_s0 + $0x1b0] ss:$36 sps:$4 sm:$0xff]   ;;  %v2373_v26 = vld [vmem:[%s3073_s1 + $0x178] sm:$0xff]  }
  0x20   :  { %1960 = vmatpush3.bf16.msra.mxu0 %v2295_v30  ;;  %v2374_v27 = vld [vmem:[%s3073_s1 + $0x1f8] sm:$0xff]   ;;  %v2377_v35 = vld [vmem:[%s3074_s0 + $0x10] ss:$36 sps:$4 sm:$0xff]  }
  0x21   :  { %2024 = vmatpush3.bf16.msra.mxu1 %v2296_v31  ;;  %2073 = vmatprep.subr.bf16.mxu0 %v2303_v36  ;;  %v2375_v28 = vld [vmem:[%s3073_s1 + $0x138] sm:$0xff]   ;;  %v2372_v31 = vld [vmem:[%s3074_s0 + $0x200] ss:$36 sps:$4 sm:$0xff]  }
  0x22   :  { %2137 = vmatprep.subr.bf16.mxu1 %v2304_v37  ;;  %v2376_v29 = vld [vmem:[%s3073_s1 + $0x1b8] sm:$0xff]  }
  0x23   :  { %1082 = vmatmul.mubr.bf16.vlgmr.msra.gmra.mrb[0].mxu0 %v2297_v32  ;;  %v2371_v30 = vld [vmem:[%s3074_s0 + $0x1f8] ss:$36 sps:$4 sm:$0xff]   ;;  %v2383_v32 = vld [vmem:[%s3073_s1 + $0x200] sm:$0xff]  }
  0x24   :  { %1179 = vmatmul.mubr.bf16.vlgmr.msra.gmra.mrb[0].mxu1 %v2300_v34  ;;  %2074 = vmatpush3.bf16.msra.mxu0 %v2305_v38  ;;  %v2379_v33 = vld [vmem:[%s3074_s0 + $0x14] ss:$36 sps:$4 sm:$0xff]   ;;  %v2382_v34 = vld [vmem:[%s3074_s0 + $0x1c] ss:$36 sps:$4 sm:$0xff]   ;;  %v2386_v38 = vld [vmem:[%s3074_s0 + $0x64] ss:$36 sps:$4 sm:$0xff]  }
  0x25   :  { %2138 = vmatpush3.bf16.msra.mxu1 %v2306_v39  ;;  %1089 = vmatprep.mubr.bf16.mxu0 %v2307_v40  ;;  %v2380_v36 = vld [vmem:[%s3074_s0 + $0x18] ss:$36 sps:$4 sm:$0xff]   ;;  %v2390_v39 = vld [vmem:[%s3073_s1 + $0x208] sm:$0xff]   ;;  %v2397_v40 = vld [vmem:[%s3073_s1 + $0x210] sm:$0xff]  }
  0x26   :  { %1186 = vmatprep.mubr.bf16.mxu1 %v2309_v41  ;;  %2075 = vmatprep.subr.bf16.mxu0 %v2313_v44  ;;  %v2384_v37 = vld [vmem:[%s3074_s0 + $0x5c] ss:$36 sps:$4 sm:$0xff]   ;;  %v2393_v44 = vld [vmem:[%s3074_s0 + $0xac] ss:$36 sps:$4 sm:$0xff]  }
  0x27   :  { %2139 = vmatprep.subr.bf16.mxu1 %v2314_v45  ;;  %v2388_v41 = vld [vmem:[%s3074_s0 + $0x58] ss:$36 sps:$4 sm:$0xff]  }
  0x28   :  { %2076 = vmatpush3.bf16.msra.mxu0 %v2315_v46  ;;  %v2404_v45 = vld [vmem:[%s3073_s1 + $0x218] sm:$0xff]   ;;  %v2411_v46 = vld [vmem:[%s3073_s1 + $0x220] sm:$0xff]  }
  0x29   :  { %2140 = vmatpush3.bf16.msra.mxu1 %v2316_v47  ;;  %2077 = vmatprep.subr.bf16.mxu0 %v2323_v52  ;;  %v2395_v47 = vld [vmem:[%s3074_s0 + $0xa0] ss:$36 sps:$4 sm:$0xff]   ;;  %v2402_v52 = vld [vmem:[%s3074_s0 + $0xe8] ss:$36 sps:$4 sm:$0xff]  }
  0x2a   :  { %2141 = vmatprep.subr.bf16.mxu1 %v2324_v53  ;;  %v2425_v53 = vld [vmem:[%s3073_s1 + $0x230] sm:$0xff]  }
  0x2b   :  { %1090 = vmatmul.mubr.bf16.gmra.mrb[4].mxu0 %v2311_v42  ;;  %v2389_v42 = vld [vmem:[%s3074_s0 + $0x60] ss:$36 sps:$4 sm:$0xff]  }
  0x2c   :  { %1187 = vmatmul.mubr.bf16.gmra.mrb[4].mxu1 %v2312_v43  ;;  %1097 = vmatprep.mubr.bf16.mxu0 %v2317_v48  ;;  %v2391_v43 = vld [vmem:[%s3074_s0 + $0xa4] ss:$36 sps:$4 sm:$0xff]  }
  0x2d   :  { %1194 = vmatprep.mubr.bf16.mxu1 %v2319_v49  ;;  %2078 = vmatpush3.bf16.msra.mxu0 %v2325_v54  ;;  %v2396_v48 = vld [vmem:[%s3074_s0 + $0xa8] ss:$36 sps:$4 sm:$0xff]   ;;  %v2403_v54 = vld [vmem:[%s3074_s0 + $0xf0] ss:$36 sps:$4 sm:$0xff]  }
  0x2e   :  { %2142 = vmatpush3.bf16.msra.mxu1 %v2326_v55  ;;  %2079 = vmatprep.subr.bf16.mxu0 %v2333_v60  ;;  %v2398_v49 = vld [vmem:[%s3074_s0 + $0xec] ss:$36 sps:$4 sm:$0xff]   ;;  %v2405_v55 = vld [vmem:[%s3074_s0 + $0x134] ss:$36 sps:$4 sm:$0xff]   ;;  %v2412_v60 = vld [vmem:[%s3074_s0 + $0x17c] ss:$36 sps:$4 sm:$0xff]  }
  0x2f   :  { %2143 = vmatprep.subr.bf16.mxu1 %v2334_v61  ;;  %v2414_v61 = vld [vmem:[%s3074_s0 + $0x184] ss:$36 sps:$4 sm:$0xff]  }
  0x31   :  { %2080 = vmatpush3.bf16.msra.mxu0 %v2335_v62  ;;  %v2416_v62 = vld [vmem:[%s3074_s0 + $0x178] ss:$36 sps:$4 sm:$0xff]  }
  0x32   :  { %2144 = vmatpush3.bf16.msra.mxu1 %v2336_v63  ;;  %2081 = vmatprep.subr.bf16.mxu0 %v2343_v3  ;;  %v2417_v63 = vld [vmem:[%s3074_s0 + $0x180] ss:$36 sps:$4 sm:$0xff]   ;;  %v2424_v3 = vld [vmem:[%s3074_s0 + $0x1c8] ss:$36 sps:$4 sm:$0xff]  }
  0x33   :  { %1098 = vmatmul.mubr.bf16.gmra.mrb[8].mxu0 %v2321_v50  ;;  %2145 = vmatprep.subr.bf16.mxu1 %v2344_v5  ;;  %v2400_v50 = vld [vmem:[%s3074_s0 + $0xf4] ss:$36 sps:$4 sm:$0xff]  }
  0x34   :  { %1195 = vmatmul.mubr.bf16.gmra.mrb[8].mxu1 %v2322_v51  ;;  %1105 = vmatprep.mubr.bf16.mxu0 %v2327_v56  ;;  %v2418_v51 = vld [vmem:[%s3073_s1 + $0x228] sm:$0xff]   ;;  %v2407_v56 = vld [vmem:[%s3074_s0 + $0x13c] ss:$36 sps:$4 sm:$0xff]   ;;  %v2428_v5 = vld [vmem:[%s3074_s0 + $0x214] ss:$36 sps:$4 sm:$0xff]  }
  0x35   :  { %1202 = vmatprep.mubr.bf16.mxu1 %v2329_v57  ;;  %2082 = vmatpush3.bf16.msra.mxu0 %v2345_v6  ;;  %v2432_v57 = vld [vmem:[%s3073_s1 + $0x238] sm:$0xff]   ;;  %v2430_v6 = vld [vmem:[%s3074_s0 + $0x208] ss:$36 sps:$4 sm:$0xff]  }
  0x36   :  { %2146 = vmatpush3.bf16.msra.mxu1 %v2346_v7  ;;  %2083 = vmatprep.subr.bf16.mxu0 %v2353_v10  ;;  %v2431_v7 = vld [vmem:[%s3074_s0 + $0x210] ss:$36 sps:$4 sm:$0xff]   ;;  %v2435_v10 = vld [vmem:[%s3074_s0 + $0x68] ss:$36 sps:$4 sm:$0xff]  }
  0x37   :  { %2147 = vmatprep.subr.bf16.mxu1 %v2354_v11  ;;  %v2436_v11 = vld [vmem:[%s3074_s0 + $0x188] ss:$36 sps:$4 sm:$0xff]  }
  0x39   :  { %2084 = vmatpush3.bf16.msra.mxu0 %v2355_v13  ;;  %v2438_v13 = vld [vmem:[%s3074_s0 + $0x1d0] ss:$36 sps:$4 sm:$0xff]  }
  0x3a   :  { %2148 = vmatpush3.bf16.msra.mxu1 %v2356_v14  ;;  %2085 = vmatprep.subr.bf16.mxu0 %v2363_v18  ;;  %v2439_v14 = vld [vmem:[%s3074_s0 + $0xf8] ss:$36 sps:$4 sm:$0xff]   ;;  %v2901_v18 = vld [vmem:[%s3075_s2] ss:$0 sm:$0xff] }
  0x3b   :  { %1106 = vmatmul.mubr.bf16.gmra.mrb[12].mxu0 %v2331_v58  ;;  %2149 = vmatprep.subr.bf16.mxu1 %v2364_v19  ;;  %v2409_v58 = vld [vmem:[%s3074_s0 + $0x130] ss:$36 sps:$4 sm:$0xff]  }
  0x3c   :  { %1203 = vmatmul.mubr.bf16.gmra.mrb[12].mxu1 %v2332_v59  ;;  %1113 = vmatprep.mubr.bf16.mxu0 %v2337_v0  ;;  %v2410_v59 = vld [vmem:[%s3074_s0 + $0x138] ss:$36 sps:$4 sm:$0xff]   ;;  %v2419_v0 = vld [vmem:[%s3074_s0 + $0x1c4] ss:$36 sps:$4 sm:$0xff]  }
  0x3d   :  { %1210 = vmatprep.mubr.bf16.mxu1 %v2339_v1  ;;  %2086 = vmatpush3.bf16.msra.mxu0 %v2365_v20  ;;  %v2421_v1 = vld [vmem:[%s3074_s0 + $0x1cc] ss:$36 sps:$4 sm:$0xff]  }
  0x3e   :  { %2150 = vmatpush3.bf16.msra.mxu1 %v2366_v21  ;;  %2087 = vmatprep.subr.bf16.mxu0 %v2373_v26 }
  0x3f   :  { %2151 = vmatprep.subr.bf16.mxu1 %v2374_v27 }
  0x41   :  { %2088 = vmatpush3.bf16.msra.mxu0 %v2375_v28 }
  0x42   :  { %2152 = vmatpush3.bf16.msra.mxu1 %v2376_v29  ;;  %2217 = vmatprep.subr.bf16.mxu0 %v2383_v32 }
  0x43   :  { %1114 = vmatmul.mubr.bf16.gmra.mrb[16].mxu0 %v2341_v2  ;;  %2249 = vmatprep.subr.bf16.mxu1 %v2383_v32  ;;  %v2423_v2 = vld [vmem:[%s3074_s0 + $0x1c0] ss:$36 sps:$4 sm:$0xff]  }
  0x44   :  { %1211 = vmatmul.mubr.bf16.gmra.mrb[16].mxu1 %v2342_v4  ;;  %1121 = vmatprep.mubr.bf16.mxu0 %v2347_v8  ;;  %v2426_v4 = vld [vmem:[%s3074_s0 + $0x20c] ss:$36 sps:$4 sm:$0xff]   ;;  %v2433_v8 = vld [vmem:[%s3074_s0 + $0x20] ss:$36 sps:$4 sm:$0xff]  }
  0x45   :  { %1218 = vmatprep.mubr.bf16.mxu1 %v2349_v9  ;;  %v2434_v9 = vld [vmem:[%s3074_s0 + $0x140] ss:$36 sps:$4 sm:$0xff]  }
  0x4b   :  { %1122 = vmatmul.mubr.bf16.gmra.mrb[20].mxu0 %v2351_v12  ;;  %v2437_v12 = vld [vmem:[%s3074_s0 + $0xb0] ss:$36 sps:$4 sm:$0xff]  }
  0x4c   :  { %1219 = vmatmul.mubr.bf16.gmra.mrb[20].mxu1 %v2352_v15  ;;  %1129 = vmatprep.mubr.bf16.mxu0 %v2357_v16  ;;  %v2440_v15 = vld [vmem:[%s3074_s0 + $0x218] ss:$36 sps:$4 sm:$0xff]  }
  0x4d   :  { %1226 = vmatprep.mubr.bf16.mxu1 %v2359_v17 }
  0x53   :  { %1130 = vmatmul.mubr.bf16.gmra.mrb[24].mxu0 %v2361_v22 }
  0x54   :  { %1227 = vmatmul.mubr.bf16.gmra.mrb[24].mxu1 %v2362_v23  ;;  %1137 = vmatprep.mubr.bf16.mxu0 %v2367_v24 }
  0x55   :  { %1234 = vmatprep.mubr.bf16.mxu1 %v2369_v25 }
  0x5b   :  { %1138 = vmatmul.mubr.bf16.gmra.mrb[28].mxu0 %v2371_v30 }
  0x5c   :  { %1235 = vmatmul.mubr.bf16.gmra.mrb[28].mxu1 %v2372_v31  ;;  %1275 = vmatprep.mubr.bf16.mxu0 %v2379_v33 }
  0x5d   :  { %1372 = vmatprep.mubr.bf16.mxu1 %v2382_v34 }
  0x63   :  { %1276 = vmatmul.mubr.bf16.vlgmr.msra.gmra.mrb[32].mxu0 %v2377_v35 }
  0x64   :  { %1373 = vmatmul.mubr.bf16.vlgmr.msra.gmra.mrb[32].mxu1 %v2380_v36  ;;  %2218 = vmatpush3.bf16.msra.mxu0 %v2383_v32 }
  0x65   :  { %2257 = vmatpush3.bf16.msra.mxu1 %v2383_v32  ;;  %1283 = vmatprep.mubr.bf16.mxu0 %v2384_v37 }
  0x66   :  { %1380 = vmatprep.mubr.bf16.mxu1 %v2386_v38  ;;  %2219 = vmatprep.subr.bf16.mxu0 %v2390_v39 }
  0x67   :  { %2250 = vmatprep.subr.bf16.mxu1 %v2390_v39 }
  0x68   :  { %2220 = vmatpush3.bf16.msra.mxu0 %v2390_v39 }
  0x69   :  { %2258 = vmatpush3.bf16.msra.mxu1 %v2390_v39  ;;  %2221 = vmatprep.subr.bf16.mxu0 %v2397_v40 }
  0x6a   :  { %2251 = vmatprep.subr.bf16.mxu1 %v2397_v40 }
  0x6b   :  { %1284 = vmatmul.mubr.bf16.gmra.mrb[36].mxu0 %v2388_v41 }
  0x6c   :  { %1381 = vmatmul.mubr.bf16.gmra.mrb[36].mxu1 %v2389_v42  ;;  %1291 = vmatprep.mubr.bf16.mxu0 %v2391_v43 }
  0x6d   :  { %1388 = vmatprep.mubr.bf16.mxu1 %v2393_v44  ;;  %2222 = vmatpush3.bf16.msra.mxu0 %v2397_v40 }
  0x6e   :  { %2259 = vmatpush3.bf16.msra.mxu1 %v2397_v40  ;;  %2223 = vmatprep.subr.bf16.mxu0 %v2404_v45 }
  0x6f   :  { %2252 = vmatprep.subr.bf16.mxu1 %v2404_v45 }
  0x71   :  { %2224 = vmatpush3.bf16.msra.mxu0 %v2404_v45 }
  0x72   :  { %2260 = vmatpush3.bf16.msra.mxu1 %v2404_v45  ;;  %2225 = vmatprep.subr.bf16.mxu0 %v2411_v46 }
  0x73   :  { %1292 = vmatmul.mubr.bf16.gmra.mrb[40].mxu0 %v2395_v47  ;;  %2253 = vmatprep.subr.bf16.mxu1 %v2411_v46 }
  0x74   :  { %1389 = vmatmul.mubr.bf16.gmra.mrb[40].mxu1 %v2396_v48  ;;  %1299 = vmatprep.mubr.bf16.mxu0 %v2398_v49 }
  0x75   :  { %1396 = vmatprep.mubr.bf16.mxu1 %v2400_v50  ;;  %2226 = vmatpush3.bf16.msra.mxu0 %v2411_v46 }
  0x76   :  { %2261 = vmatpush3.bf16.msra.mxu1 %v2411_v46  ;;  %2227 = vmatprep.subr.bf16.mxu0 %v2418_v51 }
  0x77   :  { %2254 = vmatprep.subr.bf16.mxu1 %v2418_v51 }
  0x79   :  { %2228 = vmatpush3.bf16.msra.mxu0 %v2418_v51 }
  0x7a   :  { %2262 = vmatpush3.bf16.msra.mxu1 %v2418_v51  ;;  %2229 = vmatprep.subr.bf16.mxu0 %v2425_v53 }
  0x7b   :  { %1300 = vmatmul.mubr.bf16.gmra.mrb[44].mxu0 %v2402_v52  ;;  %2255 = vmatprep.subr.bf16.mxu1 %v2425_v53 }
  0x7c   :  { %1397 = vmatmul.mubr.bf16.gmra.mrb[44].mxu1 %v2403_v54  ;;  %1307 = vmatprep.mubr.bf16.mxu0 %v2405_v55 }
  0x7d   :  { %1404 = vmatprep.mubr.bf16.mxu1 %v2407_v56  ;;  %2230 = vmatpush3.bf16.msra.mxu0 %v2425_v53 }
  0x7e   :  { %2263 = vmatpush3.bf16.msra.mxu1 %v2425_v53  ;;  %2231 = vmatprep.subr.bf16.mxu0 %v2432_v57 }
  0x7f   :  { %2256 = vmatprep.subr.bf16.mxu1 %v2432_v57 }
  0x81   :  { %2232 = vmatpush3.bf16.msra.mxu0 %v2432_v57 }
  0x82   :  { %2264 = vmatpush3.bf16.msra.mxu1 %v2432_v57 }
  0x83   :  { %1308 = vmatmul.mubr.bf16.gmra.mrb[48].mxu0 %v2409_v58 }
  0x84   :  { %1405 = vmatmul.mubr.bf16.gmra.mrb[48].mxu1 %v2410_v59  ;;  %1315 = vmatprep.mubr.bf16.mxu0 %v2412_v60 }
  0x85   :  { %1412 = vmatprep.mubr.bf16.mxu1 %v2414_v61 }
  0x8b   :  { %1316 = vmatmul.mubr.bf16.gmra.mrb[52].mxu0 %v2416_v62 }
  0x8c   :  { %1413 = vmatmul.mubr.bf16.gmra.mrb[52].mxu1 %v2417_v63  ;;  %1323 = vmatprep.mubr.bf16.mxu0 %v2419_v0 }
  0x8d   :  { %1420 = vmatprep.mubr.bf16.mxu1 %v2421_v1 }
  0x93   :  { %1324 = vmatmul.mubr.bf16.gmra.mrb[56].mxu0 %v2423_v2 }
  0x94   :  { %1421 = vmatmul.mubr.bf16.gmra.mrb[56].mxu1 %v2424_v3  ;;  %1331 = vmatprep.mubr.bf16.mxu0 %v2426_v4 }
  0x95   :  { %1428 = vmatprep.mubr.bf16.mxu1 %v2428_v5 }
  0x9b   :  { %1332 = vmatmul.mubr.bf16.gmra.mrb[60].mxu0 %v2430_v6 }
  0x9c   :  { %1429 = vmatmul.mubr.bf16.gmra.mrb[60].mxu1 %v2431_v7  ;;  %2233 = vmatprep.mubr.bf16.mxu0 %v2433_v8 }
  0x9d   :  { %2241 = vmatprep.mubr.bf16.mxu1 %v2434_v9 }
  0xa3   :  { %2234 = vmatmul.mubr.bf16.vlgmr.msra.gmra.mrb[64].mxu0 %v2435_v10 }
  0xa4   :  { %2242 = vmatmul.mubr.bf16.vlgmr.msra.gmra.mrb[64].mxu1 %v2436_v11  ;;  %2237 = vmatprep.mubr.bf16.mxu0 %v2437_v12 }
  0xa5   :  { %2245 = vmatprep.mubr.bf16.mxu1 %v2438_v13 }
  0xab   :  { %2238 = vmatmul.mubr.bf16.gmra.mrb[68].mxu0 %v2439_v14 }
  0xac   :  { %2246 = vmatmul.mubr.bf16.gmra.mrb[68].mxu1 %v2440_v15 }
  0xf6   :  { %v1961_v16 = vpop.f32.mrb[0].mxu0 }
  0xf7   :  { %v2025_v17 = vpop.f32.mrb[0].mxu1  ;;  %v1962_v19 = vpop.f32.mrb[1].mxu0 }
  0xf8   :  { %v1963_v20 = vadd.f32 %v1962_v19, %v1961_v16  ;;  %v2026_v21 = vpop.f32.mrb[1].mxu1  ;;  %v1964_v22 = vpop.f32.mrb[2].mxu0 }
  0xf9   :  { %v2027_v23 = vadd.f32 %v2026_v21, %v2025_v17  ;;  %v2028_v24 = vpop.f32.mrb[2].mxu1  ;;  %v1965_v25 = vpop.f32.mrb[3].mxu0 }
  0xfa   :  { %v1084_v26 = vadd.f32 %v1963_v20, %v2901_v18  ;;  %v1966_v27 = vadd.f32 %v1965_v25, %v1964_v22  ;;  %v2029_v28 = vpop.f32.mrb[3].mxu1 }
  0xfb   :  { %v2030_v29 = vadd.f32 %v2029_v28, %v2028_v24 }
  0xfc   :  { %v2904_v30 = vadd.f32 %v2027_v23, %v1084_v26  ;;  %v1087_v31 = vadd.f32 %v1966_v27, %v2901_v18 }
  0xfe   :  { %v2907_v32 = vadd.f32 %v2030_v29, %v1087_v31  ;;  %v1967_v33 = vpop.f32.mrb[4].mxu0 }
  0xff   :  { %v2031_v34 = vpop.f32.mrb[4].mxu1  ;;  %v1968_v35 = vpop.f32.mrb[5].mxu0 }
 0x100   :  { %v1969_v36 = vadd.f32 %v1968_v35, %v1967_v33  ;;  %v2032_v37 = vpop.f32.mrb[5].mxu1  ;;  %v1970_v38 = vpop.f32.mrb[6].mxu0 }
 0x101   :  { %v2033_v39 = vadd.f32 %v2032_v37, %v2031_v34  ;;  %v2034_v40 = vpop.f32.mrb[6].mxu1  ;;  %v1971_v41 = vpop.f32.mrb[7].mxu0 }
 0x102   :  { %v1092_v42 = vadd.f32 %v1969_v36, %v2901_v18  ;;  %v1972_v43 = vadd.f32 %v1971_v41, %v1970_v38  ;;  %v2035_v44 = vpop.f32.mrb[7].mxu1 }
 0x103   :  { %v2036_v45 = vadd.f32 %v2035_v44, %v2034_v40 }
 0x104   :  { %v2910_v46 = vadd.f32 %v2033_v39, %v1092_v42  ;;  %v1095_v47 = vadd.f32 %v1972_v43, %v2901_v18 }
 0x106   :  { %v2913_v48 = vadd.f32 %v2036_v45, %v1095_v47  ;;  %v1973_v49 = vpop.f32.mrb[8].mxu0 }
 0x107   :  { %v2037_v50 = vpop.f32.mrb[8].mxu1  ;;  %v1974_v51 = vpop.f32.mrb[9].mxu0 }
 0x108   :  { %v1975_v52 = vadd.f32 %v1974_v51, %v1973_v49  ;;  %v2038_v53 = vpop.f32.mrb[9].mxu1  ;;  %v1976_v54 = vpop.f32.mrb[10].mxu0 }
 0x109   :  { %v2039_v55 = vadd.f32 %v2038_v53, %v2037_v50  ;;  %v2040_v56 = vpop.f32.mrb[10].mxu1  ;;  %v1977_v57 = vpop.f32.mrb[11].mxu0 }
 0x10a   :  { %v1100_v58 = vadd.f32 %v1975_v52, %v2901_v18  ;;  %v1978_v59 = vadd.f32 %v1977_v57, %v1976_v54  ;;  %v2041_v60 = vpop.f32.mrb[11].mxu1 }
 0x10b   :  { %v2042_v61 = vadd.f32 %v2041_v60, %v2040_v56 }
 0x10c   :  { %v2916_v62 = vadd.f32 %v2039_v55, %v1100_v58  ;;  %v1103_v63 = vadd.f32 %v1978_v59, %v2901_v18 }
 0x10e   :  { %v2919_v0 = vadd.f32 %v2042_v61, %v1103_v63  ;;  %v1979_v1 = vpop.f32.mrb[12].mxu0 }
 0x10f   :  { %v2043_v2 = vpop.f32.mrb[12].mxu1  ;;  %v1980_v3 = vpop.f32.mrb[13].mxu0 }
 0x110   :  { %v1981_v4 = vadd.f32 %v1980_v3, %v1979_v1  ;;  %v2044_v5 = vpop.f32.mrb[13].mxu1  ;;  %v1982_v6 = vpop.f32.mrb[14].mxu0 }
 0x111   :  { %v2045_v7 = vadd.f32 %v2044_v5, %v2043_v2  ;;  %v2046_v8 = vpop.f32.mrb[14].mxu1  ;;  %v1983_v9 = vpop.f32.mrb[15].mxu0 }
 0x112   :  { %v1108_v10 = vadd.f32 %v1981_v4, %v2901_v18  ;;  %v1984_v11 = vadd.f32 %v1983_v9, %v1982_v6  ;;  %v2047_v12 = vpop.f32.mrb[15].mxu1 }
 0x113   :  { %v2048_v13 = vadd.f32 %v2047_v12, %v2046_v8 }
 0x114   :  { %v2922_v14 = vadd.f32 %v2045_v7, %v1108_v10  ;;  %v1111_v15 = vadd.f32 %v1984_v11, %v2901_v18 }
 0x116   :  { %v2925_v16 = vadd.f32 %v2048_v13, %v1111_v15  ;;  %v1985_v17 = vpop.f32.mrb[16].mxu0 }
 0x117   :  { %v2049_v19 = vpop.f32.mrb[16].mxu1  ;;  %v1986_v20 = vpop.f32.mrb[17].mxu0 }
 0x118   :  { %v1987_v21 = vadd.f32 %v1986_v20, %v1985_v17  ;;  %v2050_v22 = vpop.f32.mrb[17].mxu1  ;;  %v1988_v23 = vpop.f32.mrb[18].mxu0 }
 0x119   :  { %v2051_v24 = vadd.f32 %v2050_v22, %v2049_v19  ;;  %v2052_v25 = vpop.f32.mrb[18].mxu1  ;;  %v1989_v26 = vpop.f32.mrb[19].mxu0 }
 0x11a   :  { %v1116_v27 = vadd.f32 %v1987_v21, %v2901_v18  ;;  %v1990_v28 = vadd.f32 %v1989_v26, %v1988_v23  ;;  %v2053_v29 = vpop.f32.mrb[19].mxu1 }
 0x11b   :  { %v2054_v31 = vadd.f32 %v2053_v29, %v2052_v25 }
 0x11c   :  { %v2928_v33 = vadd.f32 %v2051_v24, %v1116_v27  ;;  %v1119_v34 = vadd.f32 %v1990_v28, %v2901_v18 }
 0x11e   :  { %v2931_v35 = vadd.f32 %v2054_v31, %v1119_v34  ;;  %v1991_v36 = vpop.f32.mrb[20].mxu0 }
 0x11f   :  { %v2055_v37 = vpop.f32.mrb[20].mxu1  ;;  %v1992_v38 = vpop.f32.mrb[21].mxu0 }
 0x120   :  { %v1993_v39 = vadd.f32 %v1992_v38, %v1991_v36  ;;  %v2056_v40 = vpop.f32.mrb[21].mxu1  ;;  %v1994_v41 = vpop.f32.mrb[22].mxu0 }
 0x121   :  { %v2057_v42 = vadd.f32 %v2056_v40, %v2055_v37  ;;  %v2058_v43 = vpop.f32.mrb[22].mxu1  ;;  %v1995_v44 = vpop.f32.mrb[23].mxu0 }
 0x122   :  { %v1124_v45 = vadd.f32 %v1993_v39, %v2901_v18  ;;  %v1996_v47 = vadd.f32 %v1995_v44, %v1994_v41  ;;  %v2059_v49 = vpop.f32.mrb[23].mxu1 }
 0x123   :  { %v2060_v50 = vadd.f32 %v2059_v49, %v2058_v43 }
 0x124   :  { %v2934_v51 = vadd.f32 %v2057_v42, %v1124_v45  ;;  %v1127_v52 = vadd.f32 %v1996_v47, %v2901_v18 }
 0x126   :  { %v2937_v53 = vadd.f32 %v2060_v50, %v1127_v52  ;;  %v1997_v54 = vpop.f32.mrb[24].mxu0 }
 0x127   :  { %v2061_v55 = vpop.f32.mrb[24].mxu1  ;;  %v1998_v56 = vpop.f32.mrb[25].mxu0 }
 0x128   :  { %v1999_v57 = vadd.f32 %v1998_v56, %v1997_v54  ;;  %v2062_v58 = vpop.f32.mrb[25].mxu1  ;;  %v2000_v59 = vpop.f32.mrb[26].mxu0 }
 0x129   :  { %v2063_v60 = vadd.f32 %v2062_v58, %v2061_v55  ;;  %v2064_v61 = vpop.f32.mrb[26].mxu1  ;;  %v2001_v63 = vpop.f32.mrb[27].mxu0 }
 0x12a   :  { %v1132_v1 = vadd.f32 %v1999_v57, %v2901_v18  ;;  %v2002_v2 = vadd.f32 %v2001_v63, %v2000_v59  ;;  %v2065_v3 = vpop.f32.mrb[27].mxu1 }
 0x12b   :  { %v2066_v4 = vadd.f32 %v2065_v3, %v2064_v61 }
 0x12c   :  { %v2940_v5 = vadd.f32 %v2063_v60, %v1132_v1  ;;  %v1135_v6 = vadd.f32 %v2002_v2, %v2901_v18 }
 0x12e   :  { %v2943_v7 = vadd.f32 %v2066_v4, %v1135_v6  ;;  %v2003_v8 = vpop.f32.mrb[28].mxu0 }
 0x12f   :  { %v2067_v9 = vpop.f32.mrb[28].mxu1  ;;  %v2004_v10 = vpop.f32.mrb[29].mxu0 }
 0x130   :  { %v2005_v11 = vadd.f32 %v2004_v10, %v2003_v8  ;;  %v2068_v12 = vpop.f32.mrb[29].mxu1  ;;  %v2006_v13 = vpop.f32.mrb[30].mxu0 }
 0x131   :  { %v2069_v15 = vadd.f32 %v2068_v12, %v2067_v9  ;;  %v2070_v17 = vpop.f32.mrb[30].mxu1  ;;  %v2007_v19 = vpop.f32.mrb[31].mxu0 }
 0x132   :  { %v1140_v20 = vadd.f32 %v2005_v11, %v2901_v18  ;;  %v2008_v21 = vadd.f32 %v2007_v19, %v2006_v13  ;;  %v2071_v22 = vpop.f32.mrb[31].mxu1 }
 0x133   :  { %v2072_v23 = vadd.f32 %v2071_v22, %v2070_v17 }
 0x134   :  { %v2946_v24 = vadd.f32 %v2069_v15, %v1140_v20  ;;  %v1143_v25 = vadd.f32 %v2008_v21, %v2901_v18 }
 0x136   :  { %v2949_v26 = vadd.f32 %v2072_v23, %v1143_v25  ;;  %v2089_v27 = vpop.f32.mrb[32].mxu0 }
 0x137   :  { %v2153_v28 = vpop.f32.mrb[32].mxu1  ;;  %v2090_v29 = vpop.f32.mrb[33].mxu0 }
 0x138   :  { %v2091_v31 = vadd.f32 %v2090_v29, %v2089_v27  ;;  %v2154_v34 = vpop.f32.mrb[33].mxu1  ;;  %v2092_v36 = vpop.f32.mrb[34].mxu0 }
 0x139   :  { %v2155_v37 = vadd.f32 %v2154_v34, %v2153_v28  ;;  %v2156_v38 = vpop.f32.mrb[34].mxu1  ;;  %v2093_v39 = vpop.f32.mrb[35].mxu0 }
 0x13a   :  { %v1278_v40 = vadd.f32 %v2091_v31, %v2904_v30  ;;  %v2094_v41 = vadd.f32 %v2093_v39, %v2092_v36  ;;  %v2157_v42 = vpop.f32.mrb[35].mxu1 }
 0x13b   :  { %v2158_v43 = vadd.f32 %v2157_v42, %v2156_v38 }
 0x13c   :  { %v1281_v44 = vadd.f32 %v2094_v41, %v2907_v32  ;;  %v2953_v45 = vadd.f32 %v2155_v37, %v1278_v40 }
 0x13e   :  { %v2095_v18 = vpop.f32.mrb[36].mxu0  ;;  %v2955_v47 = vadd.f32 %v2158_v43, %v1281_v44 }
 0x13f   :  { %v2159_v49 = vpop.f32.mrb[36].mxu1  ;;  %v2096_v50 = vpop.f32.mrb[37].mxu0 }
 0x140   :  { %v2097_v52 = vadd.f32 %v2096_v50, %v2095_v18  ;;  %v2160_v54 = vpop.f32.mrb[37].mxu1  ;;  %v2098_v55 = vpop.f32.mrb[38].mxu0 }
 0x141   :  { %v2161_v56 = vadd.f32 %v2160_v54, %v2159_v49  ;;  %v2162_v57 = vpop.f32.mrb[38].mxu1  ;;  %v2099_v58 = vpop.f32.mrb[39].mxu0 }
 0x142   :  { %v1286_v30 = vadd.f32 %v2097_v52, %v2910_v46  ;;  %v2100_v59 = vadd.f32 %v2099_v58, %v2098_v55  ;;  %v2163_v60 = vpop.f32.mrb[39].mxu1 }
 0x143   :  { %v2164_v61 = vadd.f32 %v2163_v60, %v2162_v57 }
 0x144   :  { %v1289_v32 = vadd.f32 %v2100_v59, %v2913_v48  ;;  %v2959_v63 = vadd.f32 %v2161_v56, %v1286_v30 }
 0x146   :  { %v2101_v1 = vpop.f32.mrb[40].mxu0  ;;  %v2961_v2 = vadd.f32 %v2164_v61, %v1289_v32 }
 0x147   :  { %v2165_v3 = vpop.f32.mrb[40].mxu1  ;;  %v2102_v4 = vpop.f32.mrb[41].mxu0 }
 0x148   :  { %v2103_v6 = vadd.f32 %v2102_v4, %v2101_v1  ;;  %v2166_v8 = vpop.f32.mrb[41].mxu1  ;;  %v2104_v9 = vpop.f32.mrb[42].mxu0 }
 0x149   :  { %v2167_v10 = vadd.f32 %v2166_v8, %v2165_v3  ;;  %v2168_v11 = vpop.f32.mrb[42].mxu1  ;;  %v2105_v12 = vpop.f32.mrb[43].mxu0 }
 0x14a   :  { %v1294_v46 = vadd.f32 %v2103_v6, %v2916_v62  ;;  %v2106_v13 = vadd.f32 %v2105_v12, %v2104_v9  ;;  %v2169_v15 = vpop.f32.mrb[43].mxu1 }
 0x14b   :  { %v2170_v17 = vadd.f32 %v2169_v15, %v2168_v11 }
 0x14c   :  { %v1297_v48 = vadd.f32 %v2106_v13, %v2919_v0  ;;  %v2965_v19 = vadd.f32 %v2167_v10, %v1294_v46 }
 0x14e   :  { %v2107_v20 = vpop.f32.mrb[44].mxu0  ;;  %v2967_v21 = vadd.f32 %v2170_v17, %v1297_v48 }
 0x14f   :  { %v2171_v22 = vpop.f32.mrb[44].mxu1  ;;  %v2108_v23 = vpop.f32.mrb[45].mxu0 }
 0x150   :  { %v2109_v25 = vadd.f32 %v2108_v23, %v2107_v20  ;;  %v2172_v27 = vpop.f32.mrb[45].mxu1  ;;  %v2110_v28 = vpop.f32.mrb[46].mxu0 }
 0x151   :  { %v2173_v29 = vadd.f32 %v2172_v27, %v2171_v22  ;;  %v2174_v31 = vpop.f32.mrb[46].mxu1  ;;  %v2111_v34 = vpop.f32.mrb[47].mxu0 }
 0x152   :  { %v1302_v62 = vadd.f32 %v2109_v25, %v2922_v14  ;;  %v2112_v36 = vadd.f32 %v2111_v34, %v2110_v28  ;;  %v2175_v37 = vpop.f32.mrb[47].mxu1 }
 0x153   :  { %v2176_v38 = vadd.f32 %v2175_v37, %v2174_v31 }
 0x154   :  { %v1305_v0 = vadd.f32 %v2112_v36, %v2925_v16  ;;  %v2971_v39 = vadd.f32 %v2173_v29, %v1302_v62 }
 0x156   :  { %v2113_v40 = vpop.f32.mrb[48].mxu0  ;;  %v2973_v41 = vadd.f32 %v2176_v38, %v1305_v0 }
 0x157   :  { %v2177_v42 = vpop.f32.mrb[48].mxu1  ;;  %v2114_v43 = vpop.f32.mrb[49].mxu0 }
 0x158   :  { %v2115_v44 = vadd.f32 %v2114_v43, %v2113_v40  ;;  %v2178_v18 = vpop.f32.mrb[49].mxu1  ;;  %v2116_v49 = vpop.f32.mrb[50].mxu0 }
 0x159   :  { %v2179_v50 = vadd.f32 %v2178_v18, %v2177_v42  ;;  %v2180_v52 = vpop.f32.mrb[50].mxu1  ;;  %v2117_v54 = vpop.f32.mrb[51].mxu0 }
 0x15a   :  { %v1310_v14 = vadd.f32 %v2115_v44, %v2928_v33  ;;  %v2118_v55 = vadd.f32 %v2117_v54, %v2116_v49  ;;  %v2181_v56 = vpop.f32.mrb[51].mxu1  ;;  %v1860_v54 = vld [vmem:[%s3076_s3] sm:$0xff]  }
 0x15b   :  { %v2182_v57 = vadd.f32 %v2181_v56, %v2180_v52  ;;  %v1935_v52 = vld [vmem:[%s3076_s3 + $0x28] sm:$0xff]   ;;  %v3008_v56 = vld [vmem:[%s3076_s3 + $0x18] sm:$0xff]  }
 0x15c   :  { %v1313_v16 = vadd.f32 %v2118_v55, %v2931_v35  ;;  %v2977_v58 = vadd.f32 %v2179_v50, %v1310_v14  ;;  %v1934_v55 = vld [vmem:[%s3076_s3 + $0x20] sm:$0xff]  }
 0x15e   :  { %v2119_v30 = vpop.f32.mrb[52].mxu0  ;;  %v2979_v59 = vadd.f32 %v2182_v57, %v1313_v16 }
 0x15f   :  { %v2183_v60 = vpop.f32.mrb[52].mxu1  ;;  %v2120_v61 = vpop.f32.mrb[53].mxu0 }
 0x160   :  { %v2121_v32 = vadd.f32 %v2120_v61, %v2119_v30  ;;  %v2184_v1 = vpop.f32.mrb[53].mxu1  ;;  %v2122_v3 = vpop.f32.mrb[54].mxu0  ;;  %v1881_v30 = vunpack.c.l.bf16 %v1935_v52  ;;  %v3013_v61 = vld [vmem:[%s3076_s3 + $0x38] sm:$0xff]  }
 0x161   :  { %v2185_v4 = vadd.f32 %v2184_v1, %v2183_v60  ;;  %v2186_v6 = vpop.f32.mrb[54].mxu1  ;;  %v2123_v8 = vpop.f32.mrb[55].mxu0  ;;  %v1861_v60 = vunpack.c.l.bf16 %v1860_v54  ;;  %v1877_v1 = vunpack.c.l.bf16 %v1934_v55 }
 0x162   :  { %v1318_v33 = vadd.f32 %v2121_v32, %v2934_v51  ;;  %v2124_v9 = vadd.f32 %v2123_v8, %v2122_v3  ;;  %v2187_v10 = vpop.f32.mrb[55].mxu1  ;;  %v3018_v32 = vld [vmem:[%s3076_s3 + $0x10] sm:$0xff]  }
 0x163   :  { %v2188_v11 = vadd.f32 %v2187_v10, %v2186_v6  ;;  %v3023_v6 = vld [vmem:[%s3076_s3 + $0x30] sm:$0xff]  }
 0x164   :  { %v1321_v35 = vadd.f32 %v2124_v9, %v2937_v53  ;;  %v1415_v12 = vadd.f32 %v2185_v4, %v1318_v33  ;;  %v1882_v4 = vunpack.c.h.bf16 %v1935_v52 }
 0x166   :  { %v2125_v46 = vpop.f32.mrb[56].mxu0  ;;  %v2983_v13 = vadd.f32 %v2188_v11, %v1321_v35  ;;  %v1862_v11 = vunpack.c.h.bf16 %v1860_v54  ;;  %v1878_v35 = vunpack.c.h.bf16 %v1934_v55 }
 0x167   :  { %v2189_v15 = vpop.f32.mrb[56].mxu1  ;;  %v2126_v17 = vpop.f32.mrb[57].mxu0 }
 0x168   :  { %v2127_v48 = vadd.f32 %v2126_v17, %v2125_v46  ;;  %v2190_v20 = vpop.f32.mrb[57].mxu1  ;;  %v2128_v22 = vpop.f32.mrb[58].mxu0  ;;  %v1873_v46 = vunpack.c.l.bf16 %v3008_v56 }
 0x169   :  { %v2191_v23 = vadd.f32 %v2190_v20, %v2189_v15  ;;  %v2192_v25 = vpop.f32.mrb[58].mxu1  ;;  %v2129_v27 = vpop.f32.mrb[59].mxu0 }
 0x16a   :  { %v1326_v28 = vadd.f32 %v2127_v48, %v2940_v5  ;;  %v2130_v51 = vadd.f32 %v2129_v27, %v2128_v22  ;;  %v2193_v29 = vpop.f32.mrb[59].mxu1  ;;  %v1889_v22 = vunpack.c.l.bf16 %v3013_v61 }
 0x16b   :  { %v2194_v31 = vadd.f32 %v2193_v29, %v2192_v25  ;;  %v1885_v29 = vunpack.c.l.bf16 %v3023_v6 }
 0x16c   :  { %v1329_v34 = vadd.f32 %v2130_v51, %v2943_v7  ;;  %v2987_v53 = vadd.f32 %v2191_v23, %v1326_v28  ;;  %v1931_v7 = vld [vmem:[%s3076_s3 + $0x8] sm:$0xff]   ;;  %v1869_v23 = vunpack.c.l.bf16 %v3018_v32 }
 0x16d   :  { %v1865_v16 = vunpack.c.l.bf16 %v1931_v7  ;;  %v1866_v3 = vunpack.c.h.bf16 %v1931_v7 }
 0x16e   :  { %v2131_v62 = vpop.f32.mrb[60].mxu0  ;;  %v2989_v36 = vadd.f32 %v2194_v31, %v1329_v34 }
 0x16f   :  { %v2195_v37 = vpop.f32.mrb[60].mxu1  ;;  %v2132_v38 = vpop.f32.mrb[61].mxu0 }
 0x170   :  { %v2133_v0 = vadd.f32 %v2132_v38, %v2131_v62  ;;  %v2196_v40 = vpop.f32.mrb[61].mxu1  ;;  %v2134_v42 = vpop.f32.mrb[62].mxu0 }
 0x171   :  { %v2197_v43 = vadd.f32 %v2196_v40, %v2195_v37  ;;  %v2198_v44 = vpop.f32.mrb[62].mxu1  ;;  %v2135_v18 = vpop.f32.mrb[63].mxu0  ;;  %v1874_v40 = vunpack.c.h.bf16 %v3008_v56 }
 0x172   :  { %v1334_v5 = vadd.f32 %v2133_v0, %v2946_v24  ;;  %v2136_v49 = vadd.f32 %v2135_v18, %v2134_v42  ;;  %v2199_v50 = vpop.f32.mrb[63].mxu1 }
 0x173   :  { %v2200_v14 = vadd.f32 %v2199_v50, %v2198_v44 }
 0x174   :  { %v1337_v24 = vadd.f32 %v2136_v49, %v2949_v26  ;;  %v1431_v57 = vadd.f32 %v2197_v43, %v1334_v5  ;;  %v1870_v43 = vunpack.c.h.bf16 %v3018_v32 }
 0x176   :  { %v2235_v26 = vpop.f32.mrb[64].mxu0  ;;  %v3025_v8 = vadd.f32 %v2200_v14, %v1337_v24 }
 0x177   :  { %v1480_v33 = vadd.f32 %v2235_v26, %v2959_v63  ;;  %v2243_v9 = vpop.f32.mrb[64].mxu1  ;;  %v1471_v10 = vpop.f32.mrb[65].mxu0 }
 0x178   :  { %v1512_v15 = vadd.f32 %v2243_v9, %v1415_v12  ;;  %v1472_v17 = vadd.f32 %v1471_v10, %v2953_v45  ;;  %v1503_v48 = vpop.f32.mrb[65].mxu1  ;;  %v2236_v20 = vpop.f32.mrb[66].mxu0 }
 0x179   :  { %v1568_v25 = vadd.f32 %v1865_v16, %v1480_v33  ;;  %v1504_v27 = vadd.f32 %v1503_v48, %v2977_v58  ;;  %v1483_v63 = vadd.f32 %v2236_v20, %v2961_v2  ;;  %v2244_v28 = vpop.f32.mrb[66].mxu1  ;;  %v1474_v51 = vpop.f32.mrb[67].mxu0  ;;  %v1890_v2 = vunpack.c.h.bf16 %v3013_v61 }
 0x17a   :  { %v1576_v31 = vadd.f32 %v1881_v30, %v1512_v15  ;;  %v1566_v34 = vadd.f32 %v1861_v60, %v1472_v17  ;;  %v1515_v12 = vadd.f32 %v2244_v28, %v2983_v13  ;;  %v1475_v45 = vadd.f32 %v1474_v51, %v2955_v47  ;;  %v1506_v62 = vpop.f32.mrb[67].mxu1 }
 0x17b   :  { %v1574_v37 = vadd.f32 %v1877_v1, %v1504_v27  ;;  %v1569_v38 = vadd.f32 %v1866_v3, %v1483_v63  ;;  %v1507_v0 = vadd.f32 %v1506_v62, %v2979_v59  ;;  %v1584_v44 = vmax.f32 %v1568_v25, 0.0 }
 0x17c   :  { %v1577_v58 = vadd.f32 %v1882_v4, %v1515_v12  ;;  %v1567_v42 = vadd.f32 %v1862_v11, %v1475_v45  ;;  %v1886_v13 = vunpack.c.h.bf16 %v3023_v6  ;;  %v1592_v49 = vmax.f32 %v1576_v31, 0.0 }
 0x17d   :  { %v1585_v18 = vmax.f32 %v1569_v38, 0.0  ;;  %v1575_v5 = vadd.f32 %v1878_v35, %v1507_v0  ;;  %v1582_v47 = vmax.f32 %v1566_v34, 0.0  ;;  %v1590_v54 = vmax.f32 %v1574_v37, 0.0 }
 0x17e   :  { %v1593_v50 = vmax.f32 %v1577_v58, 0.0  ;;  %v1583_v7 = vmax.f32 %v1567_v42, 0.0  ;;  %v2239_v52 = vpop.f32.mrb[68].mxu0 }
 0x17f   :  { %v1899_v59 = vpack.c.bf16 %v1585_v18, %v1584_v44  ;;  %v1591_v14 = vmax.f32 %v1575_v5, 0.0  ;;  %v1496_v55 = vadd.f32 %v2239_v52, %v2971_v39  ;;  %v2247_v24 = vpop.f32.mrb[68].mxu1  ;;  %v1487_v56 = vpop.f32.mrb[69].mxu0 }
 0x180   :  { %v1919_v16 = vpack.c.bf16 %v1593_v50, %v1592_v49  ;;  %v1894_v30 = vpack.c.bf16 %v1583_v7, %v1582_v47  ;;  %v1528_v60 = vadd.f32 %v2247_v24, %v1431_v57  ;;  %v1488_v61 = vadd.f32 %v1487_v56, %v2965_v19  ;;  %v1519_v32 = vpop.f32.mrb[69].mxu1  ;;  %v2240_v26 = vpop.f32.mrb[70].mxu0 }
 0x181   :  { %1938 = vst [vmem:[%s3077_s4 + $0x8] sm:$0xff] %v1899_v59   ;;  %v1914_v1 = vpack.c.bf16 %v1591_v14, %v1590_v54  ;;  %v1572_v3 = vadd.f32 %v1873_v46, %v1496_v55  ;;  %v1520_v4 = vadd.f32 %v1519_v32, %v2987_v53  ;;  %v1499_v6 = vadd.f32 %v2240_v26, %v2973_v41  ;;  %v2248_v39 = vpop.f32.mrb[70].mxu1  ;;  %v1490_v33 = vpop.f32.mrb[71].mxu0 }
 0x182   :  { %1942 = vst [vmem:[%s3077_s4 + $0x28] sm:$0xff] %v1919_v16   ;;  %1895 = vst [vmem:[%s3077_s4] sm:$0xff] %v1894_v30   ;;  %v1580_v19 = vadd.f32 %v1889_v22, %v1528_v60  ;;  %v1570_v57 = vadd.f32 %v1869_v23, %v1488_v61  ;;  %v1531_v9 = vadd.f32 %v2248_v39, %v3025_v8  ;;  %v1522_v11 = vpop.f32.mrb[71].mxu1 }
 0x183   :  { %v1491_v10 = vadd.f32 %v1490_v33, %v2967_v21  ;;  %1941 = vst [vmem:[%s3077_s4 + $0x20] sm:$0xff] %v1914_v1   ;;  %v1578_v41 = vadd.f32 %v1885_v29, %v1520_v4  ;;  %v1573_v53 = vadd.f32 %v1874_v40, %v1499_v6  ;;  %v1523_v35 = vadd.f32 %v1522_v11, %v2989_v36 }
 0x184   :  { %v1581_v46 = vadd.f32 %v1890_v2, %v1531_v9  ;;  %v1588_v17 = vmax.f32 %v1572_v3, 0.0  ;;  %v1596_v22 = vmax.f32 %v1580_v19, 0.0  ;;  %v1586_v23 = vmax.f32 %v1570_v57, 0.0 }
 0x185   :  { %v1571_v15 = vadd.f32 %v1870_v43, %v1491_v10  ;;  %v1589_v48 = vmax.f32 %v1573_v53, 0.0  ;;  %v1579_v20 = vadd.f32 %v1886_v13, %v1523_v35  ;;  %v1594_v27 = vmax.f32 %v1578_v41, 0.0 }
 0x186   :  { %v1597_v25 = vmax.f32 %v1581_v46, 0.0 }
 0x187   :  { %v1587_v8 = vmax.f32 %v1571_v15, 0.0  ;;  %v1909_v21 = vpack.c.bf16 %v1589_v48, %v1588_v17  ;;  %v1595_v63 = vmax.f32 %v1579_v20, 0.0 }
 0x188   :  { %v1929_v28 = vpack.c.bf16 %v1597_v25, %v1596_v22 }
 0x189   :  { %v1904_v51 = vpack.c.bf16 %v1587_v8, %v1586_v23  ;;  %1940 = vst [vmem:[%s3077_s4 + $0x18] sm:$0xff] %v1909_v21   ;;  %v1924_v29 = vpack.c.bf16 %v1595_v63, %v1594_v27 }
 0x18a   :  { %1944 = vst [vmem:[%s3077_s4 + $0x38] sm:$0xff] %v1929_v28  }
 0x18b   :  { %1939 = vst [vmem:[%s3077_s4 + $0x10] sm:$0xff] %v1904_v51   ;;  %1943 = vst [vmem:[%s3077_s4 + $0x30] sm:$0xff] %v1924_v29  }

// kernel: fcn_forward.30
= control target key start
LH: loop header
LB: loop body
LE: loop exit
PB: predicated region body
PF: predicated region fallthrough
CT: control target
= control target key end

     0   :  { %s2926_s1 = inlined_call_operand.vmem [shape: bf16[1152,128], index: 1, kind: input, shape index: {}]   ;;  %s2927_s0 = inlined_call_operand.vmem [shape: bf16[128,1152], index: 0, kind: input, shape index: {}]   ;;  %s2928_s2 = inlined_call_operand.vmem [shape: f32[1,128], index: 2, kind: input, shape index: {}]   ;;  %s2929_s3 = inlined_call_operand.vmem [shape: bf16[128,128], index: 3, kind: output, shape index: {}]  }
   0x1   :  { %v2175_v0 = vld [vmem:[%s2926_s1 + $0x40] sm:$0xff]   ;;  %v2179_v4 = vld [vmem:[%s2926_s1 + $0x48] sm:$0xff]   ;;  %v2183_v8 = vld [vmem:[%s2926_s1 + $0x50] sm:$0xff]  }
   0x2   :  { %v2176_v1 = vld [vmem:[%s2926_s1 + $0xc0] sm:$0xff]   ;;  %1855 = vmatprep.subr.bf16.mxu0 %v2175_v0  ;;  %v2180_v5 = vld [vmem:[%s2926_s1 + $0xc8] sm:$0xff]   ;;  %v2184_v9 = vld [vmem:[%s2926_s1 + $0xd0] sm:$0xff]  }
   0x3   :  { %v2177_v2 = vld [vmem:[%s2926_s1] sm:$0xff]   ;;  %1919 = vmatprep.subr.bf16.mxu1 %v2176_v1  ;;  %v2181_v6 = vld [vmem:[%s2926_s1 + $0x8] sm:$0xff]   ;;  %v2185_v10 = vld [vmem:[%s2926_s1 + $0x10] sm:$0xff]  }
   0x4   :  { %v2178_v3 = vld [vmem:[%s2926_s1 + $0x80] sm:$0xff]   ;;  %1856 = vmatpush3.bf16.msra.mxu0 %v2177_v2  ;;  %v2182_v7 = vld [vmem:[%s2926_s1 + $0x88] sm:$0xff]   ;;  %v2186_v11 = vld [vmem:[%s2926_s1 + $0x90] sm:$0xff]  }
   0x5   :  { %1920 = vmatpush3.bf16.msra.mxu1 %v2178_v3  ;;  %1857 = vmatprep.subr.bf16.mxu0 %v2179_v4  ;;  %v2187_v12 = vld [vmem:[%s2926_s1 + $0x58] sm:$0xff]   ;;  %v2191_v16 = vld [vmem:[%s2926_s1 + $0x60] sm:$0xff]   ;;  %v2195_v20 = vld [vmem:[%s2926_s1 + $0x68] sm:$0xff]  }
   0x6   :  { %1921 = vmatprep.subr.bf16.mxu1 %v2180_v5  ;;  %v2188_v13 = vld [vmem:[%s2926_s1 + $0xd8] sm:$0xff]   ;;  %v2192_v17 = vld [vmem:[%s2926_s1 + $0xe0] sm:$0xff]   ;;  %v2196_v21 = vld [vmem:[%s2926_s1 + $0xe8] sm:$0xff]  }
   0x7   :  { %v2189_v14 = vld [vmem:[%s2926_s1 + $0x18] sm:$0xff]   ;;  %v2193_v18 = vld [vmem:[%s2926_s1 + $0x20] sm:$0xff]   ;;  %v2197_v22 = vld [vmem:[%s2926_s1 + $0x28] sm:$0xff]  }
   0x8   :  { %1858 = vmatpush3.bf16.msra.mxu0 %v2181_v6  ;;  %v2190_v15 = vld [vmem:[%s2926_s1 + $0x98] sm:$0xff]   ;;  %v2194_v19 = vld [vmem:[%s2926_s1 + $0xa0] sm:$0xff]   ;;  %v2198_v23 = vld [vmem:[%s2926_s1 + $0xa8] sm:$0xff]  }
   0x9   :  { %1922 = vmatpush3.bf16.msra.mxu1 %v2182_v7  ;;  %1859 = vmatprep.subr.bf16.mxu0 %v2183_v8  ;;  %v2199_v24 = vld [vmem:[%s2926_s1 + $0x70] sm:$0xff]   ;;  %v2203_v28 = vld [vmem:[%s2926_s1 + $0x78] sm:$0xff]   ;;  %v2207_v32 = vld [vmem:[%s2927_s0] ss:$36 sps:$4 sm:$0xff]  }
   0xa   :  { %1923 = vmatprep.subr.bf16.mxu1 %v2184_v9  ;;  %v2200_v25 = vld [vmem:[%s2926_s1 + $0xf0] sm:$0xff]   ;;  %v2204_v29 = vld [vmem:[%s2926_s1 + $0xf8] sm:$0xff]   ;;  %v2209_v33 = vld [vmem:[%s2927_s0 + $0x4] ss:$36 sps:$4 sm:$0xff]  }
   0xb   :  { %v2201_v26 = vld [vmem:[%s2926_s1 + $0x30] sm:$0xff]   ;;  %v2205_v30 = vld [vmem:[%s2926_s1 + $0x38] sm:$0xff]   ;;  %v2210_v34 = vld [vmem:[%s2927_s0 + $0x8] ss:$36 sps:$4 sm:$0xff]   ;;  %1078 = vmatprep.mubr.bf16.mxu0 %v2209_v33 }
   0xc   :  { %1860 = vmatpush3.bf16.msra.mxu0 %v2185_v10  ;;  %v2202_v27 = vld [vmem:[%s2926_s1 + $0xb0] sm:$0xff]   ;;  %v2206_v31 = vld [vmem:[%s2926_s1 + $0xb8] sm:$0xff]   ;;  %v2213_v36 = vld [vmem:[%s2926_s1 + $0x140] sm:$0xff]  }
   0xd   :  { %1924 = vmatpush3.bf16.msra.mxu1 %v2186_v11  ;;  %1861 = vmatprep.subr.bf16.mxu0 %v2187_v12  ;;  %v2212_v35 = vld [vmem:[%s2927_s0 + $0xc] ss:$36 sps:$4 sm:$0xff]   ;;  %v2214_v37 = vld [vmem:[%s2926_s1 + $0x1c0] sm:$0xff]   ;;  %v2219_v41 = vld [vmem:[%s2927_s0 + $0x54] ss:$36 sps:$4 sm:$0xff]  }
   0xe   :  { %1925 = vmatprep.subr.bf16.mxu1 %v2188_v13  ;;  %1175 = vmatprep.mubr.bf16.mxu1 %v2212_v35  ;;  %v2215_v38 = vld [vmem:[%s2926_s1 + $0x100] sm:$0xff]   ;;  %v2217_v40 = vld [vmem:[%s2927_s0 + $0x4c] ss:$36 sps:$4 sm:$0xff]   ;;  %v2227_v48 = vld [vmem:[%s2927_s0 + $0x94] ss:$36 sps:$4 sm:$0xff]  }
   0xf   :  { %v2216_v39 = vld [vmem:[%s2926_s1 + $0x180] sm:$0xff]   ;;  %v2221_v42 = vld [vmem:[%s2927_s0 + $0x48] ss:$36 sps:$4 sm:$0xff]   ;;  %v2222_v43 = vld [vmem:[%s2927_s0 + $0x50] ss:$36 sps:$4 sm:$0xff]  }
  0x10   :  { %1862 = vmatpush3.bf16.msra.mxu0 %v2189_v14  ;;  %v2223_v44 = vld [vmem:[%s2926_s1 + $0x148] sm:$0xff]   ;;  %v2229_v49 = vld [vmem:[%s2927_s0 + $0x9c] ss:$36 sps:$4 sm:$0xff]   ;;  %v2231_v50 = vld [vmem:[%s2927_s0 + $0x90] ss:$36 sps:$4 sm:$0xff]  }
  0x11   :  { %1926 = vmatpush3.bf16.msra.mxu1 %v2190_v15  ;;  %1863 = vmatprep.subr.bf16.mxu0 %v2191_v16  ;;  %v2224_v45 = vld [vmem:[%s2926_s1 + $0x1c8] sm:$0xff]   ;;  %v2232_v51 = vld [vmem:[%s2927_s0 + $0x98] ss:$36 sps:$4 sm:$0xff]   ;;  %v2233_v52 = vld [vmem:[%s2926_s1 + $0x150] sm:$0xff]  }
  0x12   :  { %1927 = vmatprep.subr.bf16.mxu1 %v2192_v17  ;;  %v2225_v46 = vld [vmem:[%s2926_s1 + $0x108] sm:$0xff]   ;;  %v2234_v53 = vld [vmem:[%s2926_s1 + $0x1d0] sm:$0xff]   ;;  %v2237_v56 = vld [vmem:[%s2927_s0 + $0xdc] ss:$36 sps:$4 sm:$0xff]  }
  0x13   :  { %v2226_v47 = vld [vmem:[%s2926_s1 + $0x188] sm:$0xff]   ;;  %v2235_v54 = vld [vmem:[%s2926_s1 + $0x110] sm:$0xff]   ;;  %v2241_v58 = vld [vmem:[%s2927_s0 + $0xd8] ss:$36 sps:$4 sm:$0xff]  }
  0x14   :  { %1864 = vmatpush3.bf16.msra.mxu0 %v2193_v18  ;;  %v2236_v55 = vld [vmem:[%s2926_s1 + $0x190] sm:$0xff]   ;;  %v2239_v57 = vld [vmem:[%s2927_s0 + $0xe4] ss:$36 sps:$4 sm:$0xff]   ;;  %v2243_v60 = vld [vmem:[%s2926_s1 + $0x158] sm:$0xff]  }
  0x15   :  { %1928 = vmatpush3.bf16.msra.mxu1 %v2194_v19  ;;  %1865 = vmatprep.subr.bf16.mxu0 %v2195_v20  ;;  %v2242_v59 = vld [vmem:[%s2927_s0 + $0xe0] ss:$36 sps:$4 sm:$0xff]   ;;  %v2244_v61 = vld [vmem:[%s2926_s1 + $0x1d8] sm:$0xff]   ;;  %v2249_v1 = vld [vmem:[%s2927_s0 + $0x12c] ss:$36 sps:$4 sm:$0xff]  }
  0x16   :  { %1929 = vmatprep.subr.bf16.mxu1 %v2196_v21  ;;  %v2245_v62 = vld [vmem:[%s2926_s1 + $0x118] sm:$0xff]   ;;  %v2247_v0 = vld [vmem:[%s2927_s0 + $0x124] ss:$36 sps:$4 sm:$0xff]   ;;  %v2257_v8 = vld [vmem:[%s2927_s0 + $0x16c] ss:$36 sps:$4 sm:$0xff]  }
  0x17   :  { %v2246_v63 = vld [vmem:[%s2926_s1 + $0x198] sm:$0xff]   ;;  %v2251_v2 = vld [vmem:[%s2927_s0 + $0x120] ss:$36 sps:$4 sm:$0xff]   ;;  %v2252_v4 = vld [vmem:[%s2927_s0 + $0x128] ss:$36 sps:$4 sm:$0xff]  }
  0x18   :  { %1866 = vmatpush3.bf16.msra.mxu0 %v2197_v22  ;;  %v2253_v3 = vld [vmem:[%s2926_s1 + $0x160] sm:$0xff]   ;;  %v2259_v9 = vld [vmem:[%s2927_s0 + $0x174] ss:$36 sps:$4 sm:$0xff]   ;;  %v2263_v10 = vld [vmem:[%s2926_s1 + $0x168] sm:$0xff]  }
  0x19   :  { %1930 = vmatpush3.bf16.msra.mxu1 %v2198_v23  ;;  %1867 = vmatprep.subr.bf16.mxu0 %v2199_v24  ;;  %v2254_v5 = vld [vmem:[%s2926_s1 + $0x1e0] sm:$0xff]   ;;  %v2264_v11 = vld [vmem:[%s2926_s1 + $0x1e8] sm:$0xff]   ;;  %v2262_v15 = vld [vmem:[%s2927_s0 + $0x170] ss:$36 sps:$4 sm:$0xff]  }
  0x1a   :  { %1931 = vmatprep.subr.bf16.mxu1 %v2200_v25  ;;  %v2255_v6 = vld [vmem:[%s2926_s1 + $0x120] sm:$0xff]   ;;  %v2261_v12 = vld [vmem:[%s2927_s0 + $0x168] ss:$36 sps:$4 sm:$0xff]   ;;  %v2267_v16 = vld [vmem:[%s2927_s0 + $0x1b4] ss:$36 sps:$4 sm:$0xff]  }
  0x1b   :  { %v2256_v7 = vld [vmem:[%s2926_s1 + $0x1a0] sm:$0xff]   ;;  %v2265_v13 = vld [vmem:[%s2926_s1 + $0x128] sm:$0xff]   ;;  %v2273_v18 = vld [vmem:[%s2926_s1 + $0x170] sm:$0xff]  }
  0x1c   :  { %1868 = vmatpush3.bf16.msra.mxu0 %v2201_v26  ;;  %v2266_v14 = vld [vmem:[%s2926_s1 + $0x1a8] sm:$0xff]   ;;  %v2269_v17 = vld [vmem:[%s2927_s0 + $0x1bc] ss:$36 sps:$4 sm:$0xff]   ;;  %v2274_v19 = vld [vmem:[%s2926_s1 + $0x1f0] sm:$0xff]  }
  0x1d   :  { %1932 = vmatpush3.bf16.msra.mxu1 %v2202_v27  ;;  %1869 = vmatprep.subr.bf16.mxu0 %v2203_v28  ;;  %v2275_v20 = vld [vmem:[%s2926_s1 + $0x130] sm:$0xff]   ;;  %v2272_v23 = vld [vmem:[%s2927_s0 + $0x1b8] ss:$36 sps:$4 sm:$0xff]   ;;  %v2279_v25 = vld [vmem:[%s2927_s0 + $0x204] ss:$36 sps:$4 sm:$0xff]  }
  0x1e   :  { %1933 = vmatprep.subr.bf16.mxu1 %v2204_v29  ;;  %v2276_v21 = vld [vmem:[%s2926_s1 + $0x1b0] sm:$0xff]   ;;  %v2277_v24 = vld [vmem:[%s2927_s0 + $0x1fc] ss:$36 sps:$4 sm:$0xff]  }
  0x1f   :  { %v2271_v22 = vld [vmem:[%s2927_s0 + $0x1b0] ss:$36 sps:$4 sm:$0xff]   ;;  %v2283_v26 = vld [vmem:[%s2926_s1 + $0x178] sm:$0xff]  }
  0x20   :  { %1870 = vmatpush3.bf16.msra.mxu0 %v2205_v30  ;;  %v2284_v27 = vld [vmem:[%s2926_s1 + $0x1f8] sm:$0xff]   ;;  %v2287_v35 = vld [vmem:[%s2927_s0 + $0x10] ss:$36 sps:$4 sm:$0xff]  }
  0x21   :  { %1934 = vmatpush3.bf16.msra.mxu1 %v2206_v31  ;;  %1983 = vmatprep.subr.bf16.mxu0 %v2213_v36  ;;  %v2285_v28 = vld [vmem:[%s2926_s1 + $0x138] sm:$0xff]   ;;  %v2282_v31 = vld [vmem:[%s2927_s0 + $0x200] ss:$36 sps:$4 sm:$0xff]  }
  0x22   :  { %2047 = vmatprep.subr.bf16.mxu1 %v2214_v37  ;;  %v2286_v29 = vld [vmem:[%s2926_s1 + $0x1b8] sm:$0xff]  }
  0x23   :  { %1079 = vmatmul.mubr.bf16.vlgmr.msra.gmra.mrb[0].mxu0 %v2207_v32  ;;  %v2281_v30 = vld [vmem:[%s2927_s0 + $0x1f8] ss:$36 sps:$4 sm:$0xff]   ;;  %v2293_v32 = vld [vmem:[%s2926_s1 + $0x200] sm:$0xff]  }
  0x24   :  { %1176 = vmatmul.mubr.bf16.vlgmr.msra.gmra.mrb[0].mxu1 %v2210_v34  ;;  %1984 = vmatpush3.bf16.msra.mxu0 %v2215_v38  ;;  %v2289_v33 = vld [vmem:[%s2927_s0 + $0x14] ss:$36 sps:$4 sm:$0xff]   ;;  %v2292_v34 = vld [vmem:[%s2927_s0 + $0x1c] ss:$36 sps:$4 sm:$0xff]   ;;  %v2296_v38 = vld [vmem:[%s2927_s0 + $0x64] ss:$36 sps:$4 sm:$0xff]  }
  0x25   :  { %2048 = vmatpush3.bf16.msra.mxu1 %v2216_v39  ;;  %1086 = vmatprep.mubr.bf16.mxu0 %v2217_v40  ;;  %v2290_v36 = vld [vmem:[%s2927_s0 + $0x18] ss:$36 sps:$4 sm:$0xff]   ;;  %v2300_v39 = vld [vmem:[%s2926_s1 + $0x208] sm:$0xff]   ;;  %v2307_v40 = vld [vmem:[%s2926_s1 + $0x210] sm:$0xff]  }
  0x26   :  { %1183 = vmatprep.mubr.bf16.mxu1 %v2219_v41  ;;  %1985 = vmatprep.subr.bf16.mxu0 %v2223_v44  ;;  %v2294_v37 = vld [vmem:[%s2927_s0 + $0x5c] ss:$36 sps:$4 sm:$0xff]   ;;  %v2303_v44 = vld [vmem:[%s2927_s0 + $0xac] ss:$36 sps:$4 sm:$0xff]  }
  0x27   :  { %2049 = vmatprep.subr.bf16.mxu1 %v2224_v45  ;;  %v2298_v41 = vld [vmem:[%s2927_s0 + $0x58] ss:$36 sps:$4 sm:$0xff]  }
  0x28   :  { %1986 = vmatpush3.bf16.msra.mxu0 %v2225_v46  ;;  %v2314_v45 = vld [vmem:[%s2926_s1 + $0x218] sm:$0xff]   ;;  %v2321_v46 = vld [vmem:[%s2926_s1 + $0x220] sm:$0xff]  }
  0x29   :  { %2050 = vmatpush3.bf16.msra.mxu1 %v2226_v47  ;;  %1987 = vmatprep.subr.bf16.mxu0 %v2233_v52  ;;  %v2305_v47 = vld [vmem:[%s2927_s0 + $0xa0] ss:$36 sps:$4 sm:$0xff]   ;;  %v2312_v52 = vld [vmem:[%s2927_s0 + $0xe8] ss:$36 sps:$4 sm:$0xff]  }
  0x2a   :  { %2051 = vmatprep.subr.bf16.mxu1 %v2234_v53  ;;  %v2335_v53 = vld [vmem:[%s2926_s1 + $0x230] sm:$0xff]  }
  0x2b   :  { %1087 = vmatmul.mubr.bf16.gmra.mrb[4].mxu0 %v2221_v42  ;;  %v2299_v42 = vld [vmem:[%s2927_s0 + $0x60] ss:$36 sps:$4 sm:$0xff]  }
  0x2c   :  { %1184 = vmatmul.mubr.bf16.gmra.mrb[4].mxu1 %v2222_v43  ;;  %1094 = vmatprep.mubr.bf16.mxu0 %v2227_v48  ;;  %v2301_v43 = vld [vmem:[%s2927_s0 + $0xa4] ss:$36 sps:$4 sm:$0xff]  }
  0x2d   :  { %1191 = vmatprep.mubr.bf16.mxu1 %v2229_v49  ;;  %1988 = vmatpush3.bf16.msra.mxu0 %v2235_v54  ;;  %v2306_v48 = vld [vmem:[%s2927_s0 + $0xa8] ss:$36 sps:$4 sm:$0xff]   ;;  %v2313_v54 = vld [vmem:[%s2927_s0 + $0xf0] ss:$36 sps:$4 sm:$0xff]  }
  0x2e   :  { %2052 = vmatpush3.bf16.msra.mxu1 %v2236_v55  ;;  %1989 = vmatprep.subr.bf16.mxu0 %v2243_v60  ;;  %v2308_v49 = vld [vmem:[%s2927_s0 + $0xec] ss:$36 sps:$4 sm:$0xff]   ;;  %v2315_v55 = vld [vmem:[%s2927_s0 + $0x134] ss:$36 sps:$4 sm:$0xff]   ;;  %v2322_v60 = vld [vmem:[%s2927_s0 + $0x17c] ss:$36 sps:$4 sm:$0xff]  }
  0x2f   :  { %2053 = vmatprep.subr.bf16.mxu1 %v2244_v61  ;;  %v2324_v61 = vld [vmem:[%s2927_s0 + $0x184] ss:$36 sps:$4 sm:$0xff]  }
  0x31   :  { %1990 = vmatpush3.bf16.msra.mxu0 %v2245_v62  ;;  %v2326_v62 = vld [vmem:[%s2927_s0 + $0x178] ss:$36 sps:$4 sm:$0xff]  }
  0x32   :  { %2054 = vmatpush3.bf16.msra.mxu1 %v2246_v63  ;;  %1991 = vmatprep.subr.bf16.mxu0 %v2253_v3  ;;  %v2327_v63 = vld [vmem:[%s2927_s0 + $0x180] ss:$36 sps:$4 sm:$0xff]   ;;  %v2334_v3 = vld [vmem:[%s2927_s0 + $0x1c8] ss:$36 sps:$4 sm:$0xff]  }
  0x33   :  { %1095 = vmatmul.mubr.bf16.gmra.mrb[8].mxu0 %v2231_v50  ;;  %2055 = vmatprep.subr.bf16.mxu1 %v2254_v5  ;;  %v2310_v50 = vld [vmem:[%s2927_s0 + $0xf4] ss:$36 sps:$4 sm:$0xff]  }
  0x34   :  { %1192 = vmatmul.mubr.bf16.gmra.mrb[8].mxu1 %v2232_v51  ;;  %1102 = vmatprep.mubr.bf16.mxu0 %v2237_v56  ;;  %v2328_v51 = vld [vmem:[%s2926_s1 + $0x228] sm:$0xff]   ;;  %v2317_v56 = vld [vmem:[%s2927_s0 + $0x13c] ss:$36 sps:$4 sm:$0xff]   ;;  %v2338_v5 = vld [vmem:[%s2927_s0 + $0x214] ss:$36 sps:$4 sm:$0xff]  }
  0x35   :  { %1199 = vmatprep.mubr.bf16.mxu1 %v2239_v57  ;;  %1992 = vmatpush3.bf16.msra.mxu0 %v2255_v6  ;;  %v2342_v57 = vld [vmem:[%s2926_s1 + $0x238] sm:$0xff]   ;;  %v2340_v6 = vld [vmem:[%s2927_s0 + $0x208] ss:$36 sps:$4 sm:$0xff]  }
  0x36   :  { %2056 = vmatpush3.bf16.msra.mxu1 %v2256_v7  ;;  %1993 = vmatprep.subr.bf16.mxu0 %v2263_v10  ;;  %v2341_v7 = vld [vmem:[%s2927_s0 + $0x210] ss:$36 sps:$4 sm:$0xff]   ;;  %v2345_v10 = vld [vmem:[%s2927_s0 + $0x68] ss:$36 sps:$4 sm:$0xff]  }
  0x37   :  { %2057 = vmatprep.subr.bf16.mxu1 %v2264_v11  ;;  %v2346_v11 = vld [vmem:[%s2927_s0 + $0x188] ss:$36 sps:$4 sm:$0xff]  }
  0x39   :  { %1994 = vmatpush3.bf16.msra.mxu0 %v2265_v13  ;;  %v2348_v13 = vld [vmem:[%s2927_s0 + $0x1d0] ss:$36 sps:$4 sm:$0xff]  }
  0x3a   :  { %2058 = vmatpush3.bf16.msra.mxu1 %v2266_v14  ;;  %1995 = vmatprep.subr.bf16.mxu0 %v2273_v18  ;;  %v2349_v14 = vld [vmem:[%s2927_s0 + $0xf8] ss:$36 sps:$4 sm:$0xff]   ;;  %v2806_v18 = vld [vmem:[%s2928_s2] ss:$0 sm:$0xff] }
  0x3b   :  { %1103 = vmatmul.mubr.bf16.gmra.mrb[12].mxu0 %v2241_v58  ;;  %2059 = vmatprep.subr.bf16.mxu1 %v2274_v19  ;;  %v2319_v58 = vld [vmem:[%s2927_s0 + $0x130] ss:$36 sps:$4 sm:$0xff]  }
  0x3c   :  { %1200 = vmatmul.mubr.bf16.gmra.mrb[12].mxu1 %v2242_v59  ;;  %1110 = vmatprep.mubr.bf16.mxu0 %v2247_v0  ;;  %v2320_v59 = vld [vmem:[%s2927_s0 + $0x138] ss:$36 sps:$4 sm:$0xff]   ;;  %v2329_v0 = vld [vmem:[%s2927_s0 + $0x1c4] ss:$36 sps:$4 sm:$0xff]  }
  0x3d   :  { %1207 = vmatprep.mubr.bf16.mxu1 %v2249_v1  ;;  %1996 = vmatpush3.bf16.msra.mxu0 %v2275_v20  ;;  %v2331_v1 = vld [vmem:[%s2927_s0 + $0x1cc] ss:$36 sps:$4 sm:$0xff]  }
  0x3e   :  { %2060 = vmatpush3.bf16.msra.mxu1 %v2276_v21  ;;  %1997 = vmatprep.subr.bf16.mxu0 %v2283_v26 }
  0x3f   :  { %2061 = vmatprep.subr.bf16.mxu1 %v2284_v27 }
  0x41   :  { %1998 = vmatpush3.bf16.msra.mxu0 %v2285_v28 }
  0x42   :  { %2062 = vmatpush3.bf16.msra.mxu1 %v2286_v29  ;;  %2127 = vmatprep.subr.bf16.mxu0 %v2293_v32 }
  0x43   :  { %1111 = vmatmul.mubr.bf16.gmra.mrb[16].mxu0 %v2251_v2  ;;  %2159 = vmatprep.subr.bf16.mxu1 %v2293_v32  ;;  %v2333_v2 = vld [vmem:[%s2927_s0 + $0x1c0] ss:$36 sps:$4 sm:$0xff]  }
  0x44   :  { %1208 = vmatmul.mubr.bf16.gmra.mrb[16].mxu1 %v2252_v4  ;;  %1118 = vmatprep.mubr.bf16.mxu0 %v2257_v8  ;;  %v2336_v4 = vld [vmem:[%s2927_s0 + $0x20c] ss:$36 sps:$4 sm:$0xff]   ;;  %v2343_v8 = vld [vmem:[%s2927_s0 + $0x20] ss:$36 sps:$4 sm:$0xff]  }
  0x45   :  { %1215 = vmatprep.mubr.bf16.mxu1 %v2259_v9  ;;  %v2344_v9 = vld [vmem:[%s2927_s0 + $0x140] ss:$36 sps:$4 sm:$0xff]  }
  0x4b   :  { %1119 = vmatmul.mubr.bf16.gmra.mrb[20].mxu0 %v2261_v12  ;;  %v2347_v12 = vld [vmem:[%s2927_s0 + $0xb0] ss:$36 sps:$4 sm:$0xff]  }
  0x4c   :  { %1216 = vmatmul.mubr.bf16.gmra.mrb[20].mxu1 %v2262_v15  ;;  %1126 = vmatprep.mubr.bf16.mxu0 %v2267_v16  ;;  %v2350_v15 = vld [vmem:[%s2927_s0 + $0x218] ss:$36 sps:$4 sm:$0xff]  }
  0x4d   :  { %1223 = vmatprep.mubr.bf16.mxu1 %v2269_v17 }
  0x53   :  { %1127 = vmatmul.mubr.bf16.gmra.mrb[24].mxu0 %v2271_v22 }
  0x54   :  { %1224 = vmatmul.mubr.bf16.gmra.mrb[24].mxu1 %v2272_v23  ;;  %1134 = vmatprep.mubr.bf16.mxu0 %v2277_v24 }
  0x55   :  { %1231 = vmatprep.mubr.bf16.mxu1 %v2279_v25 }
  0x5b   :  { %1135 = vmatmul.mubr.bf16.gmra.mrb[28].mxu0 %v2281_v30 }
  0x5c   :  { %1232 = vmatmul.mubr.bf16.gmra.mrb[28].mxu1 %v2282_v31  ;;  %1272 = vmatprep.mubr.bf16.mxu0 %v2289_v33 }
  0x5d   :  { %1369 = vmatprep.mubr.bf16.mxu1 %v2292_v34 }
  0x63   :  { %1273 = vmatmul.mubr.bf16.vlgmr.msra.gmra.mrb[32].mxu0 %v2287_v35 }
  0x64   :  { %1370 = vmatmul.mubr.bf16.vlgmr.msra.gmra.mrb[32].mxu1 %v2290_v36  ;;  %2128 = vmatpush3.bf16.msra.mxu0 %v2293_v32 }
  0x65   :  { %2167 = vmatpush3.bf16.msra.mxu1 %v2293_v32  ;;  %1280 = vmatprep.mubr.bf16.mxu0 %v2294_v37 }
  0x66   :  { %1377 = vmatprep.mubr.bf16.mxu1 %v2296_v38  ;;  %2129 = vmatprep.subr.bf16.mxu0 %v2300_v39 }
  0x67   :  { %2160 = vmatprep.subr.bf16.mxu1 %v2300_v39 }
  0x68   :  { %2130 = vmatpush3.bf16.msra.mxu0 %v2300_v39 }
  0x69   :  { %2168 = vmatpush3.bf16.msra.mxu1 %v2300_v39  ;;  %2131 = vmatprep.subr.bf16.mxu0 %v2307_v40 }
  0x6a   :  { %2161 = vmatprep.subr.bf16.mxu1 %v2307_v40 }
  0x6b   :  { %1281 = vmatmul.mubr.bf16.gmra.mrb[36].mxu0 %v2298_v41 }
  0x6c   :  { %1378 = vmatmul.mubr.bf16.gmra.mrb[36].mxu1 %v2299_v42  ;;  %1288 = vmatprep.mubr.bf16.mxu0 %v2301_v43 }
  0x6d   :  { %1385 = vmatprep.mubr.bf16.mxu1 %v2303_v44  ;;  %2132 = vmatpush3.bf16.msra.mxu0 %v2307_v40 }
  0x6e   :  { %2169 = vmatpush3.bf16.msra.mxu1 %v2307_v40  ;;  %2133 = vmatprep.subr.bf16.mxu0 %v2314_v45 }
  0x6f   :  { %2162 = vmatprep.subr.bf16.mxu1 %v2314_v45 }
  0x71   :  { %2134 = vmatpush3.bf16.msra.mxu0 %v2314_v45 }
  0x72   :  { %2170 = vmatpush3.bf16.msra.mxu1 %v2314_v45  ;;  %2135 = vmatprep.subr.bf16.mxu0 %v2321_v46 }
  0x73   :  { %1289 = vmatmul.mubr.bf16.gmra.mrb[40].mxu0 %v2305_v47  ;;  %2163 = vmatprep.subr.bf16.mxu1 %v2321_v46 }
  0x74   :  { %1386 = vmatmul.mubr.bf16.gmra.mrb[40].mxu1 %v2306_v48  ;;  %1296 = vmatprep.mubr.bf16.mxu0 %v2308_v49 }
  0x75   :  { %1393 = vmatprep.mubr.bf16.mxu1 %v2310_v50  ;;  %2136 = vmatpush3.bf16.msra.mxu0 %v2321_v46 }
  0x76   :  { %2171 = vmatpush3.bf16.msra.mxu1 %v2321_v46  ;;  %2137 = vmatprep.subr.bf16.mxu0 %v2328_v51 }
  0x77   :  { %2164 = vmatprep.subr.bf16.mxu1 %v2328_v51 }
  0x79   :  { %2138 = vmatpush3.bf16.msra.mxu0 %v2328_v51 }
  0x7a   :  { %2172 = vmatpush3.bf16.msra.mxu1 %v2328_v51  ;;  %2139 = vmatprep.subr.bf16.mxu0 %v2335_v53 }
  0x7b   :  { %1297 = vmatmul.mubr.bf16.gmra.mrb[44].mxu0 %v2312_v52  ;;  %2165 = vmatprep.subr.bf16.mxu1 %v2335_v53 }
  0x7c   :  { %1394 = vmatmul.mubr.bf16.gmra.mrb[44].mxu1 %v2313_v54  ;;  %1304 = vmatprep.mubr.bf16.mxu0 %v2315_v55 }
  0x7d   :  { %1401 = vmatprep.mubr.bf16.mxu1 %v2317_v56  ;;  %2140 = vmatpush3.bf16.msra.mxu0 %v2335_v53 }
  0x7e   :  { %2173 = vmatpush3.bf16.msra.mxu1 %v2335_v53  ;;  %2141 = vmatprep.subr.bf16.mxu0 %v2342_v57 }
  0x7f   :  { %2166 = vmatprep.subr.bf16.mxu1 %v2342_v57 }
  0x81   :  { %2142 = vmatpush3.bf16.msra.mxu0 %v2342_v57 }
  0x82   :  { %2174 = vmatpush3.bf16.msra.mxu1 %v2342_v57 }
  0x83   :  { %1305 = vmatmul.mubr.bf16.gmra.mrb[48].mxu0 %v2319_v58 }
  0x84   :  { %1402 = vmatmul.mubr.bf16.gmra.mrb[48].mxu1 %v2320_v59  ;;  %1312 = vmatprep.mubr.bf16.mxu0 %v2322_v60 }
  0x85   :  { %1409 = vmatprep.mubr.bf16.mxu1 %v2324_v61 }
  0x8b   :  { %1313 = vmatmul.mubr.bf16.gmra.mrb[52].mxu0 %v2326_v62 }
  0x8c   :  { %1410 = vmatmul.mubr.bf16.gmra.mrb[52].mxu1 %v2327_v63  ;;  %1320 = vmatprep.mubr.bf16.mxu0 %v2329_v0 }
  0x8d   :  { %1417 = vmatprep.mubr.bf16.mxu1 %v2331_v1 }
  0x93   :  { %1321 = vmatmul.mubr.bf16.gmra.mrb[56].mxu0 %v2333_v2 }
  0x94   :  { %1418 = vmatmul.mubr.bf16.gmra.mrb[56].mxu1 %v2334_v3  ;;  %1328 = vmatprep.mubr.bf16.mxu0 %v2336_v4 }
  0x95   :  { %1425 = vmatprep.mubr.bf16.mxu1 %v2338_v5 }
  0x9b   :  { %1329 = vmatmul.mubr.bf16.gmra.mrb[60].mxu0 %v2340_v6 }
  0x9c   :  { %1426 = vmatmul.mubr.bf16.gmra.mrb[60].mxu1 %v2341_v7  ;;  %2143 = vmatprep.mubr.bf16.mxu0 %v2343_v8 }
  0x9d   :  { %2151 = vmatprep.mubr.bf16.mxu1 %v2344_v9 }
  0xa3   :  { %2144 = vmatmul.mubr.bf16.vlgmr.msra.gmra.mrb[64].mxu0 %v2345_v10 }
  0xa4   :  { %2152 = vmatmul.mubr.bf16.vlgmr.msra.gmra.mrb[64].mxu1 %v2346_v11  ;;  %2147 = vmatprep.mubr.bf16.mxu0 %v2347_v12 }
  0xa5   :  { %2155 = vmatprep.mubr.bf16.mxu1 %v2348_v13 }
  0xab   :  { %2148 = vmatmul.mubr.bf16.gmra.mrb[68].mxu0 %v2349_v14 }
  0xac   :  { %2156 = vmatmul.mubr.bf16.gmra.mrb[68].mxu1 %v2350_v15 }
  0xf6   :  { %v1871_v16 = vpop.f32.mrb[0].mxu0 }
  0xf7   :  { %v1935_v17 = vpop.f32.mrb[0].mxu1  ;;  %v1872_v19 = vpop.f32.mrb[1].mxu0 }
  0xf8   :  { %v1873_v20 = vadd.f32 %v1872_v19, %v1871_v16  ;;  %v1936_v21 = vpop.f32.mrb[1].mxu1  ;;  %v1874_v22 = vpop.f32.mrb[2].mxu0 }
  0xf9   :  { %v1937_v23 = vadd.f32 %v1936_v21, %v1935_v17  ;;  %v1938_v24 = vpop.f32.mrb[2].mxu1  ;;  %v1875_v25 = vpop.f32.mrb[3].mxu0 }
  0xfa   :  { %v1081_v26 = vadd.f32 %v1873_v20, %v2806_v18  ;;  %v1876_v27 = vadd.f32 %v1875_v25, %v1874_v22  ;;  %v1939_v28 = vpop.f32.mrb[3].mxu1 }
  0xfb   :  { %v1940_v29 = vadd.f32 %v1939_v28, %v1938_v24 }
  0xfc   :  { %v2809_v30 = vadd.f32 %v1937_v23, %v1081_v26  ;;  %v1084_v31 = vadd.f32 %v1876_v27, %v2806_v18 }
  0xfe   :  { %v2812_v32 = vadd.f32 %v1940_v29, %v1084_v31  ;;  %v1877_v33 = vpop.f32.mrb[4].mxu0 }
  0xff   :  { %v1941_v34 = vpop.f32.mrb[4].mxu1  ;;  %v1878_v35 = vpop.f32.mrb[5].mxu0 }
 0x100   :  { %v1879_v36 = vadd.f32 %v1878_v35, %v1877_v33  ;;  %v1942_v37 = vpop.f32.mrb[5].mxu1  ;;  %v1880_v38 = vpop.f32.mrb[6].mxu0 }
 0x101   :  { %v1943_v39 = vadd.f32 %v1942_v37, %v1941_v34  ;;  %v1944_v40 = vpop.f32.mrb[6].mxu1  ;;  %v1881_v41 = vpop.f32.mrb[7].mxu0 }
 0x102   :  { %v1089_v42 = vadd.f32 %v1879_v36, %v2806_v18  ;;  %v1882_v43 = vadd.f32 %v1881_v41, %v1880_v38  ;;  %v1945_v44 = vpop.f32.mrb[7].mxu1 }
 0x103   :  { %v1946_v45 = vadd.f32 %v1945_v44, %v1944_v40 }
 0x104   :  { %v2815_v46 = vadd.f32 %v1943_v39, %v1089_v42  ;;  %v1092_v47 = vadd.f32 %v1882_v43, %v2806_v18 }
 0x106   :  { %v2818_v48 = vadd.f32 %v1946_v45, %v1092_v47  ;;  %v1883_v49 = vpop.f32.mrb[8].mxu0 }
 0x107   :  { %v1947_v50 = vpop.f32.mrb[8].mxu1  ;;  %v1884_v51 = vpop.f32.mrb[9].mxu0 }
 0x108   :  { %v1885_v52 = vadd.f32 %v1884_v51, %v1883_v49  ;;  %v1948_v53 = vpop.f32.mrb[9].mxu1  ;;  %v1886_v54 = vpop.f32.mrb[10].mxu0 }
 0x109   :  { %v1949_v55 = vadd.f32 %v1948_v53, %v1947_v50  ;;  %v1950_v56 = vpop.f32.mrb[10].mxu1  ;;  %v1887_v57 = vpop.f32.mrb[11].mxu0 }
 0x10a   :  { %v1097_v58 = vadd.f32 %v1885_v52, %v2806_v18  ;;  %v1888_v59 = vadd.f32 %v1887_v57, %v1886_v54  ;;  %v1951_v60 = vpop.f32.mrb[11].mxu1 }
 0x10b   :  { %v1952_v61 = vadd.f32 %v1951_v60, %v1950_v56 }
 0x10c   :  { %v2821_v62 = vadd.f32 %v1949_v55, %v1097_v58  ;;  %v1100_v63 = vadd.f32 %v1888_v59, %v2806_v18 }
 0x10e   :  { %v2824_v0 = vadd.f32 %v1952_v61, %v1100_v63  ;;  %v1889_v1 = vpop.f32.mrb[12].mxu0 }
 0x10f   :  { %v1953_v2 = vpop.f32.mrb[12].mxu1  ;;  %v1890_v3 = vpop.f32.mrb[13].mxu0 }
 0x110   :  { %v1891_v4 = vadd.f32 %v1890_v3, %v1889_v1  ;;  %v1954_v5 = vpop.f32.mrb[13].mxu1  ;;  %v1892_v6 = vpop.f32.mrb[14].mxu0 }
 0x111   :  { %v1955_v7 = vadd.f32 %v1954_v5, %v1953_v2  ;;  %v1956_v8 = vpop.f32.mrb[14].mxu1  ;;  %v1893_v9 = vpop.f32.mrb[15].mxu0 }
 0x112   :  { %v1105_v10 = vadd.f32 %v1891_v4, %v2806_v18  ;;  %v1894_v11 = vadd.f32 %v1893_v9, %v1892_v6  ;;  %v1957_v12 = vpop.f32.mrb[15].mxu1 }
 0x113   :  { %v1958_v13 = vadd.f32 %v1957_v12, %v1956_v8 }
 0x114   :  { %v2827_v14 = vadd.f32 %v1955_v7, %v1105_v10  ;;  %v1108_v15 = vadd.f32 %v1894_v11, %v2806_v18 }
 0x116   :  { %v2830_v16 = vadd.f32 %v1958_v13, %v1108_v15  ;;  %v1895_v17 = vpop.f32.mrb[16].mxu0 }
 0x117   :  { %v1959_v19 = vpop.f32.mrb[16].mxu1  ;;  %v1896_v20 = vpop.f32.mrb[17].mxu0 }
 0x118   :  { %v1897_v21 = vadd.f32 %v1896_v20, %v1895_v17  ;;  %v1960_v22 = vpop.f32.mrb[17].mxu1  ;;  %v1898_v23 = vpop.f32.mrb[18].mxu0 }
 0x119   :  { %v1961_v24 = vadd.f32 %v1960_v22, %v1959_v19  ;;  %v1962_v25 = vpop.f32.mrb[18].mxu1  ;;  %v1899_v26 = vpop.f32.mrb[19].mxu0 }
 0x11a   :  { %v1113_v27 = vadd.f32 %v1897_v21, %v2806_v18  ;;  %v1900_v28 = vadd.f32 %v1899_v26, %v1898_v23  ;;  %v1963_v29 = vpop.f32.mrb[19].mxu1 }
 0x11b   :  { %v1964_v31 = vadd.f32 %v1963_v29, %v1962_v25 }
 0x11c   :  { %v2833_v33 = vadd.f32 %v1961_v24, %v1113_v27  ;;  %v1116_v34 = vadd.f32 %v1900_v28, %v2806_v18 }
 0x11e   :  { %v2836_v35 = vadd.f32 %v1964_v31, %v1116_v34  ;;  %v1901_v36 = vpop.f32.mrb[20].mxu0 }
 0x11f   :  { %v1965_v37 = vpop.f32.mrb[20].mxu1  ;;  %v1902_v38 = vpop.f32.mrb[21].mxu0 }
 0x120   :  { %v1903_v39 = vadd.f32 %v1902_v38, %v1901_v36  ;;  %v1966_v40 = vpop.f32.mrb[21].mxu1  ;;  %v1904_v41 = vpop.f32.mrb[22].mxu0 }
 0x121   :  { %v1967_v42 = vadd.f32 %v1966_v40, %v1965_v37  ;;  %v1968_v43 = vpop.f32.mrb[22].mxu1  ;;  %v1905_v44 = vpop.f32.mrb[23].mxu0 }
 0x122   :  { %v1121_v45 = vadd.f32 %v1903_v39, %v2806_v18  ;;  %v1906_v47 = vadd.f32 %v1905_v44, %v1904_v41  ;;  %v1969_v49 = vpop.f32.mrb[23].mxu1 }
 0x123   :  { %v1970_v50 = vadd.f32 %v1969_v49, %v1968_v43 }
 0x124   :  { %v2839_v51 = vadd.f32 %v1967_v42, %v1121_v45  ;;  %v1124_v52 = vadd.f32 %v1906_v47, %v2806_v18 }
 0x126   :  { %v2842_v53 = vadd.f32 %v1970_v50, %v1124_v52  ;;  %v1907_v54 = vpop.f32.mrb[24].mxu0 }
 0x127   :  { %v1971_v55 = vpop.f32.mrb[24].mxu1  ;;  %v1908_v56 = vpop.f32.mrb[25].mxu0 }
 0x128   :  { %v1909_v57 = vadd.f32 %v1908_v56, %v1907_v54  ;;  %v1972_v58 = vpop.f32.mrb[25].mxu1  ;;  %v1910_v59 = vpop.f32.mrb[26].mxu0 }
 0x129   :  { %v1973_v60 = vadd.f32 %v1972_v58, %v1971_v55  ;;  %v1974_v61 = vpop.f32.mrb[26].mxu1  ;;  %v1911_v63 = vpop.f32.mrb[27].mxu0 }
 0x12a   :  { %v1129_v1 = vadd.f32 %v1909_v57, %v2806_v18  ;;  %v1912_v2 = vadd.f32 %v1911_v63, %v1910_v59  ;;  %v1975_v3 = vpop.f32.mrb[27].mxu1 }
 0x12b   :  { %v1976_v4 = vadd.f32 %v1975_v3, %v1974_v61 }
 0x12c   :  { %v2845_v5 = vadd.f32 %v1973_v60, %v1129_v1  ;;  %v1132_v6 = vadd.f32 %v1912_v2, %v2806_v18 }
 0x12e   :  { %v2848_v7 = vadd.f32 %v1976_v4, %v1132_v6  ;;  %v1913_v8 = vpop.f32.mrb[28].mxu0 }
 0x12f   :  { %v1977_v9 = vpop.f32.mrb[28].mxu1  ;;  %v1914_v10 = vpop.f32.mrb[29].mxu0 }
 0x130   :  { %v1915_v11 = vadd.f32 %v1914_v10, %v1913_v8  ;;  %v1978_v12 = vpop.f32.mrb[29].mxu1  ;;  %v1916_v13 = vpop.f32.mrb[30].mxu0 }
 0x131   :  { %v1979_v15 = vadd.f32 %v1978_v12, %v1977_v9  ;;  %v1980_v17 = vpop.f32.mrb[30].mxu1  ;;  %v1917_v19 = vpop.f32.mrb[31].mxu0 }
 0x132   :  { %v1137_v20 = vadd.f32 %v1915_v11, %v2806_v18  ;;  %v1918_v21 = vadd.f32 %v1917_v19, %v1916_v13  ;;  %v1981_v22 = vpop.f32.mrb[31].mxu1 }
 0x133   :  { %v1982_v23 = vadd.f32 %v1981_v22, %v1980_v17 }
 0x134   :  { %v2851_v24 = vadd.f32 %v1979_v15, %v1137_v20  ;;  %v1140_v25 = vadd.f32 %v1918_v21, %v2806_v18 }
 0x136   :  { %v2854_v26 = vadd.f32 %v1982_v23, %v1140_v25  ;;  %v1999_v27 = vpop.f32.mrb[32].mxu0 }
 0x137   :  { %v2063_v28 = vpop.f32.mrb[32].mxu1  ;;  %v2000_v29 = vpop.f32.mrb[33].mxu0 }
 0x138   :  { %v2001_v31 = vadd.f32 %v2000_v29, %v1999_v27  ;;  %v2064_v34 = vpop.f32.mrb[33].mxu1  ;;  %v2002_v36 = vpop.f32.mrb[34].mxu0 }
 0x139   :  { %v2065_v37 = vadd.f32 %v2064_v34, %v2063_v28  ;;  %v2066_v38 = vpop.f32.mrb[34].mxu1  ;;  %v2003_v39 = vpop.f32.mrb[35].mxu0 }
 0x13a   :  { %v1275_v40 = vadd.f32 %v2001_v31, %v2809_v30  ;;  %v2004_v41 = vadd.f32 %v2003_v39, %v2002_v36  ;;  %v2067_v42 = vpop.f32.mrb[35].mxu1 }
 0x13b   :  { %v2068_v43 = vadd.f32 %v2067_v42, %v2066_v38 }
 0x13c   :  { %v1278_v44 = vadd.f32 %v2004_v41, %v2812_v32  ;;  %v2858_v45 = vadd.f32 %v2065_v37, %v1275_v40 }
 0x13e   :  { %v2005_v18 = vpop.f32.mrb[36].mxu0  ;;  %v2860_v47 = vadd.f32 %v2068_v43, %v1278_v44 }
 0x13f   :  { %v2069_v49 = vpop.f32.mrb[36].mxu1  ;;  %v2006_v50 = vpop.f32.mrb[37].mxu0 }
 0x140   :  { %v2007_v52 = vadd.f32 %v2006_v50, %v2005_v18  ;;  %v2070_v54 = vpop.f32.mrb[37].mxu1  ;;  %v2008_v55 = vpop.f32.mrb[38].mxu0 }
 0x141   :  { %v2071_v56 = vadd.f32 %v2070_v54, %v2069_v49  ;;  %v2072_v57 = vpop.f32.mrb[38].mxu1  ;;  %v2009_v58 = vpop.f32.mrb[39].mxu0 }
 0x142   :  { %v1283_v30 = vadd.f32 %v2007_v52, %v2815_v46  ;;  %v2010_v59 = vadd.f32 %v2009_v58, %v2008_v55  ;;  %v2073_v60 = vpop.f32.mrb[39].mxu1 }
 0x143   :  { %v2074_v61 = vadd.f32 %v2073_v60, %v2072_v57 }
 0x144   :  { %v1286_v32 = vadd.f32 %v2010_v59, %v2818_v48  ;;  %v2864_v63 = vadd.f32 %v2071_v56, %v1283_v30 }
 0x146   :  { %v2011_v1 = vpop.f32.mrb[40].mxu0  ;;  %v2866_v2 = vadd.f32 %v2074_v61, %v1286_v32 }
 0x147   :  { %v2075_v3 = vpop.f32.mrb[40].mxu1  ;;  %v2012_v4 = vpop.f32.mrb[41].mxu0 }
 0x148   :  { %v2013_v6 = vadd.f32 %v2012_v4, %v2011_v1  ;;  %v2076_v8 = vpop.f32.mrb[41].mxu1  ;;  %v2014_v9 = vpop.f32.mrb[42].mxu0 }
 0x149   :  { %v2077_v10 = vadd.f32 %v2076_v8, %v2075_v3  ;;  %v2078_v11 = vpop.f32.mrb[42].mxu1  ;;  %v2015_v12 = vpop.f32.mrb[43].mxu0 }
 0x14a   :  { %v1291_v46 = vadd.f32 %v2013_v6, %v2821_v62  ;;  %v2016_v13 = vadd.f32 %v2015_v12, %v2014_v9  ;;  %v2079_v15 = vpop.f32.mrb[43].mxu1 }
 0x14b   :  { %v2080_v17 = vadd.f32 %v2079_v15, %v2078_v11 }
 0x14c   :  { %v1294_v48 = vadd.f32 %v2016_v13, %v2824_v0  ;;  %v2870_v19 = vadd.f32 %v2077_v10, %v1291_v46 }
 0x14e   :  { %v2017_v20 = vpop.f32.mrb[44].mxu0  ;;  %v2872_v21 = vadd.f32 %v2080_v17, %v1294_v48 }
 0x14f   :  { %v2081_v22 = vpop.f32.mrb[44].mxu1  ;;  %v2018_v23 = vpop.f32.mrb[45].mxu0 }
 0x150   :  { %v2019_v25 = vadd.f32 %v2018_v23, %v2017_v20  ;;  %v2082_v27 = vpop.f32.mrb[45].mxu1  ;;  %v2020_v28 = vpop.f32.mrb[46].mxu0 }
 0x151   :  { %v2083_v29 = vadd.f32 %v2082_v27, %v2081_v22  ;;  %v2084_v31 = vpop.f32.mrb[46].mxu1  ;;  %v2021_v34 = vpop.f32.mrb[47].mxu0 }
 0x152   :  { %v1299_v62 = vadd.f32 %v2019_v25, %v2827_v14  ;;  %v2022_v36 = vadd.f32 %v2021_v34, %v2020_v28  ;;  %v2085_v37 = vpop.f32.mrb[47].mxu1 }
 0x153   :  { %v2086_v38 = vadd.f32 %v2085_v37, %v2084_v31 }
 0x154   :  { %v1302_v0 = vadd.f32 %v2022_v36, %v2830_v16  ;;  %v2876_v39 = vadd.f32 %v2083_v29, %v1299_v62 }
 0x156   :  { %v2023_v40 = vpop.f32.mrb[48].mxu0  ;;  %v2878_v41 = vadd.f32 %v2086_v38, %v1302_v0 }
 0x157   :  { %v2087_v42 = vpop.f32.mrb[48].mxu1  ;;  %v2024_v43 = vpop.f32.mrb[49].mxu0 }
 0x158   :  { %v2025_v44 = vadd.f32 %v2024_v43, %v2023_v40  ;;  %v2088_v18 = vpop.f32.mrb[49].mxu1  ;;  %v2026_v49 = vpop.f32.mrb[50].mxu0 }
 0x159   :  { %v2089_v50 = vadd.f32 %v2088_v18, %v2087_v42  ;;  %v2090_v52 = vpop.f32.mrb[50].mxu1  ;;  %v2027_v54 = vpop.f32.mrb[51].mxu0 }
 0x15a   :  { %v1307_v14 = vadd.f32 %v2025_v44, %v2833_v33  ;;  %v2028_v55 = vadd.f32 %v2027_v54, %v2026_v49  ;;  %v2091_v56 = vpop.f32.mrb[51].mxu1 }
 0x15b   :  { %v2092_v57 = vadd.f32 %v2091_v56, %v2090_v52 }
 0x15c   :  { %v1310_v16 = vadd.f32 %v2028_v55, %v2836_v35  ;;  %v1404_v58 = vadd.f32 %v2089_v50, %v1307_v14 }
 0x15e   :  { %v2029_v30 = vpop.f32.mrb[52].mxu0  ;;  %v2882_v59 = vadd.f32 %v2092_v57, %v1310_v16 }
 0x15f   :  { %v2093_v60 = vpop.f32.mrb[52].mxu1  ;;  %v2030_v61 = vpop.f32.mrb[53].mxu0 }
 0x160   :  { %v2031_v32 = vadd.f32 %v2030_v61, %v2029_v30  ;;  %v2094_v1 = vpop.f32.mrb[53].mxu1  ;;  %v2032_v3 = vpop.f32.mrb[54].mxu0 }
 0x161   :  { %v2095_v4 = vadd.f32 %v2094_v1, %v2093_v60  ;;  %v2096_v6 = vpop.f32.mrb[54].mxu1  ;;  %v2033_v8 = vpop.f32.mrb[55].mxu0 }
 0x162   :  { %v1315_v9 = vadd.f32 %v2031_v32, %v2839_v51  ;;  %v2034_v33 = vadd.f32 %v2033_v8, %v2032_v3  ;;  %v2097_v10 = vpop.f32.mrb[55].mxu1 }
 0x163   :  { %v2098_v11 = vadd.f32 %v2097_v10, %v2096_v6 }
 0x164   :  { %v1318_v12 = vadd.f32 %v2034_v33, %v2842_v53  ;;  %v1412_v35 = vadd.f32 %v2095_v4, %v1315_v9 }
 0x166   :  { %v2035_v46 = vpop.f32.mrb[56].mxu0  ;;  %v1415_v13 = vadd.f32 %v2098_v11, %v1318_v12 }
 0x167   :  { %v2099_v15 = vpop.f32.mrb[56].mxu1  ;;  %v2036_v17 = vpop.f32.mrb[57].mxu0 }
 0x168   :  { %v2037_v48 = vadd.f32 %v2036_v17, %v2035_v46  ;;  %v2100_v20 = vpop.f32.mrb[57].mxu1  ;;  %v2038_v22 = vpop.f32.mrb[58].mxu0 }
 0x169   :  { %v2101_v23 = vadd.f32 %v2100_v20, %v2099_v15  ;;  %v2102_v25 = vpop.f32.mrb[58].mxu1  ;;  %v2039_v27 = vpop.f32.mrb[59].mxu0 }
 0x16a   :  { %v1323_v28 = vadd.f32 %v2037_v48, %v2845_v5  ;;  %v2040_v29 = vadd.f32 %v2039_v27, %v2038_v22  ;;  %v2103_v51 = vpop.f32.mrb[59].mxu1 }
 0x16b   :  { %v2104_v31 = vadd.f32 %v2103_v51, %v2102_v25 }
 0x16c   :  { %v1326_v34 = vadd.f32 %v2040_v29, %v2848_v7  ;;  %v1420_v62 = vadd.f32 %v2101_v23, %v1323_v28 }
 0x16e   :  { %v2041_v53 = vpop.f32.mrb[60].mxu0  ;;  %v2888_v36 = vadd.f32 %v2104_v31, %v1326_v34 }
 0x16f   :  { %v2105_v37 = vpop.f32.mrb[60].mxu1  ;;  %v2042_v38 = vpop.f32.mrb[61].mxu0 }
 0x170   :  { %v2043_v0 = vadd.f32 %v2042_v38, %v2041_v53  ;;  %v2106_v40 = vpop.f32.mrb[61].mxu1  ;;  %v2044_v42 = vpop.f32.mrb[62].mxu0 }
 0x171   :  { %v2107_v43 = vadd.f32 %v2106_v40, %v2105_v37  ;;  %v2108_v44 = vpop.f32.mrb[62].mxu1  ;;  %v2045_v18 = vpop.f32.mrb[63].mxu0 }
 0x172   :  { %v1331_v49 = vadd.f32 %v2043_v0, %v2851_v24  ;;  %v2046_v5 = vadd.f32 %v2045_v18, %v2044_v42  ;;  %v2109_v50 = vpop.f32.mrb[63].mxu1 }
 0x173   :  { %v2110_v52 = vadd.f32 %v2109_v50, %v2108_v44 }
 0x174   :  { %v1334_v54 = vadd.f32 %v2046_v5, %v2854_v26  ;;  %v1428_v7 = vadd.f32 %v2107_v43, %v1331_v49 }
 0x176   :  { %v2145_v14 = vpop.f32.mrb[64].mxu0  ;;  %v1431_v55 = vadd.f32 %v2110_v52, %v1334_v54 }
 0x177   :  { %v1477_v56 = vadd.f32 %v2145_v14, %v2864_v63  ;;  %v2153_v57 = vpop.f32.mrb[64].mxu1  ;;  %v1468_v16 = vpop.f32.mrb[65].mxu0 }
 0x178   :  { %v1509_v30 = vadd.f32 %v2153_v57, %v1412_v35  ;;  %v1469_v60 = vadd.f32 %v1468_v16, %v2858_v45  ;;  %v1500_v61 = vpop.f32.mrb[65].mxu1  ;;  %v2146_v32 = vpop.f32.mrb[66].mxu0 }
 0x179   :  { %v1501_v1 = vadd.f32 %v1500_v61, %v1404_v58  ;;  %v1480_v24 = vadd.f32 %v2146_v32, %v2866_v2  ;;  %v2154_v3 = vpop.f32.mrb[66].mxu1  ;;  %v1471_v4 = vpop.f32.mrb[67].mxu0  ;;  %v1533_v9 = vmax.f32 %v1477_v56, 0.0 }
 0x17a   :  { %v1512_v6 = vadd.f32 %v2154_v3, %v1415_v13  ;;  %v1472_v26 = vadd.f32 %v1471_v4, %v2860_v47  ;;  %v1503_v8 = vpop.f32.mrb[67].mxu1  ;;  %v1541_v10 = vmax.f32 %v1509_v30, 0.0  ;;  %v1531_v11 = vmax.f32 %v1469_v60, 0.0 }
 0x17b   :  { %v1534_v33 = vmax.f32 %v1480_v24, 0.0  ;;  %v1504_v63 = vadd.f32 %v1503_v8, %v2882_v59  ;;  %v1539_v45 = vmax.f32 %v1501_v1, 0.0 }
 0x17c   :  { %v1542_v12 = vmax.f32 %v1512_v6, 0.0  ;;  %v1532_v35 = vmax.f32 %v1472_v26, 0.0 }
 0x17d   :  { %v1816_v46 = vpack.c.bf16 %v1534_v33, %v1533_v9  ;;  %v1540_v15 = vmax.f32 %v1504_v63, 0.0 }
 0x17e   :  { %v1836_v58 = vpack.c.bf16 %v1542_v12, %v1541_v10  ;;  %v1811_v17 = vpack.c.bf16 %v1532_v35, %v1531_v11  ;;  %v2149_v2 = vpop.f32.mrb[68].mxu0 }
 0x17f   :  { %1848 = vst [vmem:[%s2929_s3 + $0x8] sm:$0xff] %v1816_v46   ;;  %v1831_v47 = vpack.c.bf16 %v1540_v15, %v1539_v45  ;;  %v1493_v13 = vadd.f32 %v2149_v2, %v2876_v39  ;;  %v2157_v48 = vpop.f32.mrb[68].mxu1  ;;  %v1484_v20 = vpop.f32.mrb[69].mxu0 }
 0x180   :  { %1852 = vst [vmem:[%s2929_s3 + $0x28] sm:$0xff] %v1836_v58   ;;  %1812 = vst [vmem:[%s2929_s3] sm:$0xff] %v1811_v17   ;;  %v1525_v59 = vadd.f32 %v2157_v48, %v1428_v7  ;;  %v1485_v22 = vadd.f32 %v1484_v20, %v2870_v19  ;;  %v1516_v23 = vpop.f32.mrb[69].mxu1  ;;  %v2150_v25 = vpop.f32.mrb[70].mxu0 }
 0x181   :  { %1851 = vst [vmem:[%s2929_s3 + $0x20] sm:$0xff] %v1831_v47   ;;  %v1517_v39 = vadd.f32 %v1516_v23, %v1420_v62  ;;  %v1496_v27 = vadd.f32 %v2150_v25, %v2878_v41  ;;  %v2158_v28 = vpop.f32.mrb[70].mxu1  ;;  %v1487_v29 = vpop.f32.mrb[71].mxu0  ;;  %v1537_v53 = vmax.f32 %v1493_v13, 0.0 }
 0x182   :  { %v1528_v51 = vadd.f32 %v2158_v28, %v1431_v55  ;;  %v1488_v31 = vadd.f32 %v1487_v29, %v2872_v21  ;;  %v1519_v34 = vpop.f32.mrb[71].mxu1  ;;  %v1545_v19 = vmax.f32 %v1525_v59, 0.0  ;;  %v1535_v0 = vmax.f32 %v1485_v22, 0.0 }
 0x183   :  { %v1538_v37 = vmax.f32 %v1496_v27, 0.0  ;;  %v1520_v38 = vadd.f32 %v1519_v34, %v2888_v36  ;;  %v1543_v43 = vmax.f32 %v1517_v39, 0.0 }
 0x184   :  { %v1546_v40 = vmax.f32 %v1528_v51, 0.0  ;;  %v1536_v42 = vmax.f32 %v1488_v31, 0.0 }
 0x185   :  { %v1826_v44 = vpack.c.bf16 %v1538_v37, %v1537_v53  ;;  %v1544_v18 = vmax.f32 %v1520_v38, 0.0 }
 0x186   :  { %v1846_v62 = vpack.c.bf16 %v1546_v40, %v1545_v19  ;;  %v1821_v49 = vpack.c.bf16 %v1536_v42, %v1535_v0 }
 0x187   :  { %1850 = vst [vmem:[%s2929_s3 + $0x18] sm:$0xff] %v1826_v44   ;;  %v1841_v41 = vpack.c.bf16 %v1544_v18, %v1543_v43 }
 0x188   :  { %1854 = vst [vmem:[%s2929_s3 + $0x38] sm:$0xff] %v1846_v62   ;;  %1849 = vst [vmem:[%s2929_s3 + $0x10] sm:$0xff] %v1821_v49  }
 0x189   :  { %1853 = vst [vmem:[%s2929_s3 + $0x30] sm:$0xff] %v1841_v41  }

// kernel: fcn_forward.36
= control target key start
LH: loop header
LB: loop body
LE: loop exit
PB: predicated region body
PF: predicated region fallthrough
CT: control target
= control target key end

     0   :  { %v180_v0 = vmov 0.0   ;;  %vm181_vm0 = vmmov 0   ;;  %v182_v2 = vmov 0   ;;  %s236_s1 = inlined_call_operand.vmem [shape: bf16[128,128], index: 1, kind: input, shape index: {}]   ;;  %s237_s2 = inlined_call_operand.vmem [shape: f32[4,1], index: 2, kind: input, shape index: {}]   ;;  %s238_s0 = inlined_call_operand.vmem [shape: bf16[4,128], index: 0, kind: input, shape index: {}]   ;;  %s239_s3 = inlined_call_operand.vmem [shape: f32[4,128], index: 3, kind: output, shape index: {}]  }
   0x1   :  { %148 = vmatprep.subr.bf16.mxu0 %v180_v0  ;;  %v172_v1 = vld [vmem:[%s236_s1] sm:$0xff]   ;;  %164 = vmatprep.mubr.msk.bf16.mxu0 %vm181_vm0, %v180_v0  ;;  %v173_v3 = vld [vmem:[%s236_s1 + $0x8] sm:$0xff]   ;;  %v174_v4 = vld [vmem:[%s236_s1 + $0x10] sm:$0xff]  }
   0x2   :  { %171 = vset.pattern.permute.xlu0 %v182_v2  ;;  %149 = vmatpush3.bf16.msra.mxu0 %v172_v1  ;;  %v32_v5 = vld [vmem:[%s237_s2] sm:$0xf]  ;;  %v175_v6 = vld [vmem:[%s236_s1 + $0x18] sm:$0xff]   ;;  %v177_v8 = vld [vmem:[%s236_s1 + $0x28] sm:$0xff]  }
   0x3   :  { %150 = vmatprep.subr.bf16.mxu0 %v180_v0  ;;  %35 = vperm.xlu0 %171, %v32_v5   ;;  %v176_v7 = vld [vmem:[%s236_s1 + $0x20] sm:$0xff]   ;;  %v178_v9 = vld [vmem:[%s236_s1 + $0x30] sm:$0xff]   ;;  %v179_v10 = vld [vmem:[%s236_s1 + $0x38] sm:$0xff]  }
   0x4   :  { %v15_v11 = vld [vmem:[%s238_s0] sm:$0x3] }
   0x6   :  { %151 = vmatpush3.bf16.msra.mxu0 %v173_v3 }
   0x7   :  { %152 = vmatprep.subr.bf16.mxu0 %v180_v0 }
   0xa   :  { %153 = vmatpush3.bf16.msra.mxu0 %v174_v4 }
   0xb   :  { %154 = vmatprep.subr.bf16.mxu0 %v180_v0 }
   0xe   :  { %155 = vmatpush3.bf16.msra.mxu0 %v175_v6 }
   0xf   :  { %156 = vmatprep.subr.bf16.mxu0 %v180_v0 }
  0x12   :  { %157 = vmatpush3.bf16.msra.mxu0 %v176_v7 }
  0x13   :  { %158 = vmatprep.subr.bf16.mxu0 %v180_v0 }
  0x16   :  { %159 = vmatpush3.bf16.msra.mxu0 %v177_v8 }
  0x17   :  { %160 = vmatprep.subr.bf16.mxu0 %v180_v0 }
  0x1a   :  { %161 = vmatpush3.bf16.msra.mxu0 %v178_v9 }
  0x1b   :  { %162 = vmatprep.subr.bf16.mxu0 %v180_v0 }
  0x1e   :  { %163 = vmatpush3.bf16.msra.mxu0 %v179_v10 }
  0x21   :  { %165 = vmatmul.mubr.bf16.vlgmr.msra.gmra.mrb[0].mxu0 %v15_v11 }
  0x82   :  { %v36_v12 = vpop.permute.xlu0 %35 }
  0xf4   :  { %v120_v13 = vpop.f32.mrb[0].mxu0 }
  0xf5   :  { %v121_v14 = vadd.f32 %v120_v13, %v36_v12  ;;  %v166_v15 = vpop.f32.mrb[1].mxu0 }
  0xf6   :  { %v123_v16 = vpop.f32.mrb[2].mxu0 }
  0xf7   :  { %126 = vst [vmem:[%s239_s3] sm:$0xf] %v121_v14  ;;  %v167_v17 = vpop.f32.mrb[3].mxu0 }

// kernel: fcn_forward.37
= control target key start
LH: loop header
LB: loop body
LE: loop exit
PB: predicated region body
PF: predicated region fallthrough
CT: control target
= control target key end

     0   :  { %s610_s12 = smov 0   ;;  %s682_s0 = inlined_call_operand.vmem [shape: f32[8,8,8], index: 0, kind: input, shape index: {}]   ;;  %s683_s1 = inlined_call_operand.vmem [shape: f32[64,8], index: 1, kind: input, shape index: {}]   ;;  %s684_s2 = inlined_call_operand.vmem [shape: f32[8,64], index: 2, kind: input, shape index: {}]   ;;  %s685_s3 = inlined_call_operand.vmem [shape: f32[8,64,64], index: 3, kind: output, shape index: {}]  }
   0x1 LB: > { %s501_s13 = sadd.s32 4294967295, %s588_s12   ;;  %p505_p0 = scmp.ge.s32.totalorder %s588_s12, 1  ;;  %s588_s12 = sphi %s610_s12, %s13_s12  }
   0x2   : > { %p136_p1 = scmp.lt.s32.totalorder %s588_s12, 9 }
   0x4   : > { %p137_p2 = pnand %p505_p0, %p136_p1 }
   0x5   : > { %p159_p3 = scmp.lt.s32.totalorder (!%p137_p2), %s501_s13, 7  ;;  %v169_v0 = vld [vmem:[%s683_s1] sm:$0xff] (!%p137_p2)  ;;  %vm177_vm0 = vcmask (!%p137_p2), 64512   ;;  %v170_v2 = vld [vmem:[%s683_s1 + $0x8] sm:$0xff] (!%p137_p2)  ;;  %v171_v3 = vld [vmem:[%s683_s1 + $0x10] sm:$0xff] (!%p137_p2)  ;;  %vm437_vm1 = vcmask (!%p137_p2), 523264  }
   0x6   : > { %140 = sbr.rel (%p137_p2) target bundleno = 459 (0x1cb), region = 32  ;;  %548 = vmatprep.mubr.msk.f32.mxu0 (!%p137_p2), %vm177_vm0, %v169_v0  ;;  %v172_v4 = vld [vmem:[%s683_s1 + $0x18] sm:$0xff] (!%p137_p2)  ;;  %v173_v5 = vld [vmem:[%s683_s1 + $0x20] sm:$0xff] (!%p137_p2)  ;;  %v174_v6 = vld [vmem:[%s683_s1 + $0x28] sm:$0xff] (!%p137_p2) }
   0x7   : > { %v175_v7 = vld [vmem:[%s683_s1 + $0x30] sm:$0xff] (!%p137_p2)  ;;  %v176_v8 = vld [vmem:[%s683_s1 + $0x38] sm:$0xff] (!%p137_p2)  ;;  %v307_v9 = vld [vmem:[%s684_s2] sm:$0xff] (!%p137_p2) }
   0x8   : > { %560 = vmatprep.subr.mxu1 (!%p137_p2), %v307_v9 }
   0x9   : > { %561 = vmatpush3.msra.mxu1 (!%p137_p2), %v307_v9 }
   0xd   : > { %s687_s13 = smov (!%p159_p3, %s501_s13), 7 }
   0xe   : > { %s506_s16 = sshll.u32 %s687_s13, 3  ;;  %s527_s9 = sshll.u32 %s687_s13, 6 }
   0xf   : > { %s162_s19 = scalar_lea.vmem %s682_s0, %s506_s16  ;;  %s167_s14 = scalar_lea.vmem %s685_s3, %s527_s9 }
  0x10   : > { %v168_v1 = vld [vmem:[%s162_s19] sm:$0xff] }
  0x11   : > { %546 = vmatprep.subr.mxu0 %v168_v1 }
  0x12   : > { %547 = vmatpush3.msra.mxu0 %v168_v1 }
  0x13   : > { %549 = vmatmul.mubr.msk.f32.vlgmr.msra.gmra.mrb[0].mxu0 %vm177_vm0, %v170_v2 }
  0x14   : > { %551 = vmatprep.mubr.msk.f32.mxu0 %vm177_vm0, %v171_v3 }
  0x17   : > { %552 = vmatmul.mubr.msk.f32.gmra.mrb[2].mxu0 %vm177_vm0, %v172_v4 }
  0x18   : > { %554 = vmatprep.mubr.msk.f32.mxu0 %vm177_vm0, %v173_v5 }
  0x1b   : > { %555 = vmatmul.mubr.msk.f32.gmra.mrb[4].mxu0 %vm177_vm0, %v174_v6 }
  0x1c   : > { %557 = vmatprep.mubr.msk.f32.mxu0 %vm177_vm0, %v175_v7 }
  0x1f   : > { %558 = vmatmul.mubr.msk.f32.gmra.mrb[6].mxu0 %vm177_vm0, %v176_v8 }
  0xe6   : > { %v550_v10 = vpop.f32.mrb[0].mxu0 }
  0xe7   : > { %v268_v11 = vpop.f32.mrb[1].mxu0 }
  0xe8   : > { %562 = vmatprep.mubr.msk.f32.mxu1 %vm177_vm0, %v268_v11 }
  0xe9   : > { %563 = vmatmul.mubr.msk.f32.vlgmr.msra.gmra.mrb[0].mxu1 %vm177_vm0, %v550_v10 }
  0xea   : > { %v553_v12 = vpop.f32.mrb[2].mxu0 }
  0xeb   : > { %v278_v13 = vpop.f32.mrb[3].mxu0 }
  0xec   : > { %565 = vmatprep.mubr.msk.f32.mxu1 %vm177_vm0, %v278_v13 }
  0xed   : > { %566 = vmatmul.mubr.msk.f32.gmra.mrb[2].mxu1 %vm177_vm0, %v553_v12 }
  0xee   : > { %v556_v14 = vpop.f32.mrb[4].mxu0 }
  0xef   : > { %v288_v15 = vpop.f32.mrb[5].mxu0 }
  0xf0   : > { %568 = vmatprep.mubr.msk.f32.mxu1 %vm177_vm0, %v288_v15 }
  0xf1   : > { %569 = vmatmul.mubr.msk.f32.gmra.mrb[4].mxu1 %vm177_vm0, %v556_v14 }
  0xf2   : > { %v559_v16 = vpop.f32.mrb[6].mxu0 }
  0xf3   : > { %v298_v17 = vpop.f32.mrb[7].mxu0 }
  0xf4   : > { %571 = vmatprep.mubr.msk.f32.mxu1 %vm177_vm0, %v298_v17 }
  0xf5   : > { %572 = vmatmul.mubr.msk.f32.gmra.mrb[6].mxu1 %vm177_vm0, %v559_v16 }
 0x1bc   : > { %v564_v18 = vpop.f32.mrb[0].mxu1 }
 0x1bd   : > { %439 = vst.msk [vmem:[%s167_s14 + $0x8] sm:$0xff] %vm437_vm1, %v564_v18  ;;  %v398_v19 = vpop.f32.mrb[1].mxu1 }
 0x1be   : > { %438 = vst.msk [vmem:[%s167_s14] sm:$0xff] %vm437_vm1, %v398_v19 }
 0x1c0   : > { %v567_v20 = vpop.f32.mrb[2].mxu1 }
 0x1c1   : > { %441 = vst.msk [vmem:[%s167_s14 + $0x18] sm:$0xff] %vm437_vm1, %v567_v20  ;;  %v408_v21 = vpop.f32.mrb[3].mxu1 }
 0x1c2   : > { %440 = vst.msk [vmem:[%s167_s14 + $0x10] sm:$0xff] %vm437_vm1, %v408_v21 }
 0x1c4   : > { %v570_v22 = vpop.f32.mrb[4].mxu1 }
 0x1c5   : > { %443 = vst.msk [vmem:[%s167_s14 + $0x28] sm:$0xff] %vm437_vm1, %v570_v22  ;;  %v418_v23 = vpop.f32.mrb[5].mxu1 }
 0x1c6   : > { %442 = vst.msk [vmem:[%s167_s14 + $0x20] sm:$0xff] %vm437_vm1, %v418_v23 }
 0x1c8   : > { %v573_v24 = vpop.f32.mrb[6].mxu1 }
 0x1c9   : > { %445 = vst.msk [vmem:[%s167_s14 + $0x38] sm:$0xff] %vm437_vm1, %v573_v24  ;;  %v428_v25 = vpop.f32.mrb[7].mxu1 }
 0x1ca   : > { %444 = vst.msk [vmem:[%s167_s14 + $0x30] sm:$0xff] %vm437_vm1, %v428_v25 }
 0x1cb PF: > { %s13_s12 = sadd.s32 1, %s588_s12  }
 0x1cc   : > { %p10_p4 = scmp.ge.s32.totalorder %s13_s12, 10  }
 0x1ce   :  { %12 = sbr.rel (!%p10_p4) target bundleno = 1 (0x1), region = 62 }

</bundles_post_ra>
